<compile_context>
chip_gen: v7x
topology: tpu7x:2x2x1
jax: 0.10.0
libtpu: 0.0.40
codegen_flags: <defaults>
</compile_context>

<pallas_src>
import jax
import jax.numpy as jnp
from jax.experimental import pallas as pl
from jax.experimental.pallas import tpu as pltpu

H1 = 256
H2 = 128


def _round_up(v, m):
    return ((v + m - 1) // m) * m


def _vmem_capacity_bytes():
    # Per-TensorCore VMEM (v5e/v6e: 128 MiB, v7x: 64 MiB). Fall back to the
    # smallest generation so tiling is always safe.
    try:
        return int(pltpu.get_tpu_info().vmem_capacity_bytes)
    except Exception:
        return 64 << 20


def tcga_mlp_kernel(x_ref, w1_ref, b1_ref, w2_ref, b2_ref, w3_ref, b3_ref, o_ref):
    # Layer 1: Linear(D, 256) + ReLU. bf16 operands on the MXU, f32 accumulate.
    h1 = jnp.dot(x_ref[...], w1_ref[...], preferred_element_type=jnp.float32)
    h1 = jnp.maximum(h1 + b1_ref[...], 0.0)

    # Layer 2: Linear(256, 128) + ReLU (Dropout = identity in eval mode).
    h2 = jnp.dot(h1.astype(jnp.bfloat16), w2_ref[...],
                 preferred_element_type=jnp.float32)
    h2 = jnp.maximum(h2 + b2_ref[...], 0.0)

    # Layer 3: Linear(128, 1) as a VPU multiply against the (1, 128) weight row
    # plus an XLU lane reduction (an N=1 MXU pass would waste the systolic array).
    out = jnp.sum(h2 * w3_ref[...], axis=-1)                  # (tile_b,)

    # Lane-dense store: batch lives on lanes of the (1, 1, tile_b) output slab.
    # (The sublane->lane relayout of `out` sits on the XLU slot under MXU slack.)
    o_ref[...] = (out[None, None, :] + b3_ref[0]).astype(o_ref.dtype)


def _build_call(nb, tile_b, d_pad, vmem_limit, single_buffer_weights):
    if single_buffer_weights:
        # Constant index map -> block never changes; one resident buffer is
        # enough (saves ~sizeof(W1) of VMEM, which matters on v7x at large D).
        const_kw = dict(pipeline_mode=pl.Buffered(1))
    else:
        const_kw = {}
    return pl.pallas_call(
        tcga_mlp_kernel,
        out_shape=jax.ShapeDtypeStruct((nb, 1, tile_b), jnp.float32),
        grid_spec=pltpu.PrefetchScalarGridSpec(
            num_scalar_prefetch=0,
            grid=(nb,),
            in_specs=[
                pl.BlockSpec((tile_b, d_pad), lambda i: (i, 0)),          # x tile (bf16, streamed)
                pl.BlockSpec((d_pad, H1), lambda i: (0, 0), **const_kw),  # W1 (in, out) bf16
                pl.BlockSpec((1, H1), lambda i: (0, 0)),                  # b1 f32
                pl.BlockSpec((H1, H2), lambda i: (0, 0), **const_kw),     # W2 (in, out) bf16
                pl.BlockSpec((1, H2), lambda i: (0, 0)),                  # b2 f32
                pl.BlockSpec((1, H2), lambda i: (0, 0), **const_kw),      # W3 row (1, 128) f32
                pl.BlockSpec(memory_space=pltpu.MemorySpace.SMEM),        # b3 scalar in SMEM
            ],
            out_specs=pl.BlockSpec((1, 1, tile_b), lambda i: (i, 0, 0)),
        ),
        compiler_params=pltpu.CompilerParams(
            dimension_semantics=("parallel",),    # batch grid shards across TCs on v7x
            vmem_limit_bytes=vmem_limit,
        ),
    )


def tcga_model_forward(x, params, *, tile_b=1024):
    """Eval-mode forward of TCGAModel.

    x: (B, D) float32.  Returns (B, 1) float32.
    params: w1/w2 pre-transposed to (in, out); w3 kept in PyTorch (1, 128) row layout.
    """
    B, D = x.shape
    w1, b1, w2, b2, w3, b3 = (params["w1"], params["b1"], params["w2"],
                              params["b2"], params["w3"], params["b3"])

    # --- VMEM plan, sized per generation (v7x: 64 MiB/TC, v5e/v6e: 128 MiB). ---
    vmem_cap = _vmem_capacity_bytes()
    vmem_limit = min(112 << 20, max(32 << 20, vmem_cap - (16 << 20)))
    data_budget = vmem_limit - (8 << 20)   # headroom for compiler scratch / DMA bookkeeping

    # --- Pad D (contraction dim of the dominant matmul) to a lane multiple. ---
    d_pad = _round_up(D, 128)

    # --- Pick the batch tile: adapt to small batches, clamp to the VMEM budget. ---
    bp = _round_up(max(B, 1), 128)
    tile_b = max(128, min(tile_b, bp))
    weight_bytes = d_pad * H1 * 2 + H1 * H2 * 2 + (64 << 10)   # bf16 W1 + W2 + small stuff
    per_row_bytes = 2 * d_pad * 2 + 8                          # double-buffered bf16 x row + out
    max_tile_b = (data_budget - weight_bytes) // per_row_bytes
    # TODO(synk): if input_dim grows so large that max_tile_b < 128 (W1 alone near the
    # budget), add a K grid axis over D with an f32 accumulator scratch instead.
    max_tile_b = max(128, (max_tile_b // 128) * 128)
    tile_b = min(tile_b, max_tile_b)
    # v7x has 2 TensorCores: prefer >= 2 grid steps when it costs no extra padding.
    if pl.cdiv(bp, tile_b) == 1 and bp >= 256:
        half = _round_up(bp // 2, 128)
        if 2 * half == bp:
            tile_b = min(tile_b, half)

    nb = pl.cdiv(B, tile_b)
    b_pad = nb * tile_b

    # --- One-time wrapper-side layout/dtype prep: bf16 MXU operands, bf16 x stream.
    #     Padded rows/cols are zero -> numerically inert (row-wise MLP). ---
    x_p = x
    if b_pad != B or d_pad != D:
        x_p = jnp.pad(x_p, ((0, b_pad - B), (0, d_pad - D)))
    x_p = x_p.astype(jnp.bfloat16)
    w1_p = w1
    if d_pad != D:
        w1_p = jnp.pad(w1_p, ((0, d_pad - D), (0, 0)))
    w1_p = w1_p.astype(jnp.bfloat16)
    w2_p = w2.astype(jnp.bfloat16)
    b1_p = b1.reshape(1, H1).astype(jnp.float32)
    b2_p = b2.reshape(1, H2).astype(jnp.float32)
    w3_p = w3.reshape(1, H2).astype(jnp.float32)
    b3_p = b3.reshape(1).astype(jnp.float32)

    args = (x_p, w1_p, b1_p, w2_p, b2_p, w3_p, b3_p)
    try:
        out = _build_call(nb, tile_b, d_pad, vmem_limit, True)(*args)
    except Exception:
        # Fallback if this JAX build rejects pl.Buffered(1) on the top-level grid.
        out = _build_call(nb, tile_b, d_pad, vmem_limit, False)(*args)

    # (nb, 1, tile_b) lane-dense slab  ->  (B, 1)
    return out.reshape(-1)[:B].reshape(B, 1)


def init_params(key, input_dim):
    """Deterministic init matching nn.Linear shapes (w1/w2 stored transposed)."""
    ks = jax.random.split(key, 6)

    def uniform(k, shape, fan_in):
        bound = 1.0 / jnp.sqrt(fan_in)
        return jax.random.uniform(k, shape, jnp.float32, -bound, bound)

    return {
        "w1": uniform(ks[0], (input_dim, H1), input_dim),   # (in, out)
        "b1": uniform(ks[1], (1, H1), input_dim),
        "w2": uniform(ks[2], (H1, H2), H1),                 # (in, out)
        "b2": uniform(ks[3], (1, H2), H1),
        "w3": uniform(ks[4], (1, H2), H2),                  # PyTorch (out=1, in=128) row
        "b3": uniform(ks[5], (1,), H2),
    }


def reference_forward_bf16(x, p):
    """Pure-JAX reference with the same bf16-operand / f32-accumulate numerics."""
    bf = jnp.bfloat16
    h1 = jnp.dot(x.astype(bf), p["w1"].astype(bf),
                 preferred_element_type=jnp.float32) + p["b1"]
    h1 = jnp.maximum(h1, 0.0)
    h2 = jnp.dot(h1.astype(bf), p["w2"].astype(bf),
                 preferred_element_type=jnp.float32) + p["b2"]
    h2 = jnp.maximum(h2, 0.0)
    return (jnp.dot(h2, p["w3"].T, precision=jax.lax.Precision.HIGHEST)
            + p["b3"].reshape(1, 1))


def reference_forward_f32(x, p):
    """Full-f32 reference matching the PyTorch module semantics."""
    hi = jax.lax.Precision.HIGHEST
    h1 = jnp.maximum(jnp.dot(x, p["w1"], precision=hi) + p["b1"], 0.0)
    h2 = jnp.maximum(jnp.dot(h1, p["w2"], precision=hi) + p["b2"], 0.0)
    return jnp.dot(h2, p["w3"].T, precision=hi) + p["b3"].reshape(1, 1)


if __name__ == "__main__":
    key = jax.random.PRNGKey(0)
    k_x, k_p = jax.random.split(key)

    # B=300 exercises batch padding (-> 384); D=500 exercises lane-alignment
    # padding of input_dim (-> 512).
    B, INPUT_DIM = 300, 500
    x = jax.random.normal(k_x, (B, INPUT_DIM), dtype=jnp.float32)
    params = init_params(k_p, INPUT_DIM)

    # Default tiling: one adaptive 384-row tile.
    out = jax.block_until_ready(tcga_model_forward(x, params))
    # Explicit small tile: 3 grid steps including a partial last tile.
    out_small = jax.block_until_ready(tcga_model_forward(x, params, tile_b=128))

    ref_bf16 = reference_forward_bf16(x, params)
    ref_f32 = reference_forward_f32(x, params)

    assert out.shape == (B, 1)
    assert jnp.allclose(out, ref_bf16, atol=2e-3, rtol=2e-3), \
        float(jnp.max(jnp.abs(out - ref_bf16)))
    assert jnp.allclose(out_small, ref_bf16, atol=2e-3, rtol=2e-3), \
        float(jnp.max(jnp.abs(out_small - ref_bf16)))
    # Loose check against the exact f32 PyTorch semantics (bf16 MXU rounding).
    assert jnp.allclose(out, ref_f32, atol=5e-2), \
        float(jnp.max(jnp.abs(out - ref_f32)))
    print("KERNEL_OK")
</pallas_src>

<mosaic_0001>
module attributes {stable_mosaic.version = 11 : i64} {
  func.func @tcga_mlp_kernel(%arg0: i32, %arg1: memref<384x512xbf16, #tpu.memory_space<vmem>>, %arg2: memref<512x256xbf16, #tpu.memory_space<vmem>>, %arg3: memref<1x256xf32, #tpu.memory_space<vmem>>, %arg4: memref<256x128xbf16, #tpu.memory_space<vmem>>, %arg5: memref<1x128xf32, #tpu.memory_space<vmem>>, %arg6: memref<1x128xf32, #tpu.memory_space<vmem>>, %arg7: memref<1xf32, #tpu.memory_space<smem>>, %arg8: memref<1x1x384xf32, #tpu.memory_space<vmem>>) attributes {dimension_semantics = [#tpu.dimension_semantics<parallel>], iteration_bounds = array<i64: 1>, scalar_prefetch = 0 : i64, scratch_operands = 0 : i64, tpu.core_type = #tpu.core_type<tc>, window_params = [{transform_indices = @transform_0, window_bounds = array<i64: 384, 512>}, {pipeline_mode = #tpu.pipeline_mode<synchronous>, transform_indices = @transform_1, window_bounds = array<i64: 512, 256>}, {pipeline_mode = #tpu.pipeline_mode<synchronous>, transform_indices = @transform_2, window_bounds = array<i64: 1, 256>}, {pipeline_mode = #tpu.pipeline_mode<synchronous>, transform_indices = @transform_3, window_bounds = array<i64: 256, 128>}, {pipeline_mode = #tpu.pipeline_mode<synchronous>, transform_indices = @transform_4, window_bounds = array<i64: 1, 128>}, {pipeline_mode = #tpu.pipeline_mode<synchronous>, transform_indices = @transform_5, window_bounds = array<i64: 1, 128>}, {transform_indices = @transform_6, window_bounds = array<i64: 1>}, {transform_indices = @transform_7, window_bounds = array<i64: 1, 1, 384>}]} {
    %c0 = arith.constant 0 : index
    %c0_0 = arith.constant 0 : index
    %0 = vector.load %arg1[%c0, %c0_0] : memref<384x512xbf16, #tpu.memory_space<vmem>>, vector<384x512xbf16>
    %c0_1 = arith.constant 0 : index
    %c0_2 = arith.constant 0 : index
    %1 = vector.load %arg2[%c0_1, %c0_2] : memref<512x256xbf16, #tpu.memory_space<vmem>>, vector<512x256xbf16>
    %cst = arith.constant dense<0.000000e+00> : vector<384x256xf32>
    %2 = tpu.matmul %0, %1, %cst {dimension_numbers = #tpu.dot_dimension_numbers<[1], [0], [0], [1], [0, 0, 1, 1], [], []>} : vector<384x512xbf16>, vector<512x256xbf16>, vector<384x256xf32> -> vector<384x256xf32>
    %c0_3 = arith.constant 0 : index
    %c0_4 = arith.constant 0 : index
    %3 = vector.load %arg3[%c0_3, %c0_4] : memref<1x256xf32, #tpu.memory_space<vmem>>, vector<1x256xf32>
    %4 = vector.broadcast %3 : vector<1x256xf32> to vector<384x256xf32>
    %5 = arith.addf %2, %4 : vector<384x256xf32>
    %cst_5 = arith.constant 0.000000e+00 : f32
    %6 = vector.broadcast %cst_5 : f32 to vector<384x256xf32>
    %7 = arith.maximumf %5, %6 : vector<384x256xf32>
    %8 = arith.truncf %7 : vector<384x256xf32> to vector<384x256xbf16>
    %c0_6 = arith.constant 0 : index
    %c0_7 = arith.constant 0 : index
    %9 = vector.load %arg4[%c0_6, %c0_7] : memref<256x128xbf16, #tpu.memory_space<vmem>>, vector<256x128xbf16>
    %cst_8 = arith.constant dense<0.000000e+00> : vector<384x128xf32>
    %10 = tpu.matmul %8, %9, %cst_8 {dimension_numbers = #tpu.dot_dimension_numbers<[1], [0], [0], [1], [0, 0, 1, 1], [], []>} : vector<384x256xbf16>, vector<256x128xbf16>, vector<384x128xf32> -> vector<384x128xf32>
    %c0_9 = arith.constant 0 : index
    %c0_10 = arith.constant 0 : index
    %11 = vector.load %arg5[%c0_9, %c0_10] : memref<1x128xf32, #tpu.memory_space<vmem>>, vector<1x128xf32>
    %12 = vector.broadcast %11 : vector<1x128xf32> to vector<384x128xf32>
    %13 = arith.addf %10, %12 : vector<384x128xf32>
    %cst_11 = arith.constant 0.000000e+00 : f32
    %14 = vector.broadcast %cst_11 : f32 to vector<384x128xf32>
    %15 = arith.maximumf %13, %14 : vector<384x128xf32>
    %c0_12 = arith.constant 0 : index
    %c0_13 = arith.constant 0 : index
    %16 = vector.load %arg6[%c0_12, %c0_13] : memref<1x128xf32, #tpu.memory_space<vmem>>, vector<1x128xf32>
    %17 = vector.broadcast %16 : vector<1x128xf32> to vector<384x128xf32>
    %18 = arith.mulf %15, %17 : vector<384x128xf32>
    %cst_14 = arith.constant dense<0.000000e+00> : vector<384xf32>
    %19 = vector.multi_reduction <add>, %18, %cst_14 [1] : vector<384x128xf32> to vector<384xf32>
    %20 = vector.shape_cast %19 : vector<384xf32> to vector<1x1x384xf32>
    %c0_15 = arith.constant 0 : index
    %21 = memref.load %arg7[%c0_15] : memref<1xf32, #tpu.memory_space<smem>>
    %22 = vector.broadcast %21 : f32 to vector<1x1x384xf32>
    %23 = arith.addf %20, %22 : vector<1x1x384xf32>
    %c0_16 = arith.constant 0 : index
    %c0_17 = arith.constant 0 : index
    %c0_18 = arith.constant 0 : index
    %24 = vector.load %arg8[%c0_16, %c0_17, %c0_18] : memref<1x1x384xf32, #tpu.memory_space<vmem>>, vector<1x1x384xf32>
    tpu.vector_store %arg8[%c0_16, %c0_17, %c0_18], %23 {strides = array<i32>} : memref<1x1x384xf32, #tpu.memory_space<vmem>>, vector<1x1x384xf32>,
    return
  }
  func.func @transform_0(%arg0: i32) -> (i32, i32) {
    %c0_i32 = arith.constant 0 : i32
    %c0_i32_0 = arith.constant 0 : i32
    return %arg0, %c0_i32 : i32, i32
  }
  func.func @transform_1(%arg0: i32) -> (i32, i32) {
    %c0_i32 = arith.constant 0 : i32
    %c0_i32_0 = arith.constant 0 : i32
    %c0_i32_1 = arith.constant 0 : i32
    return %c0_i32, %c0_i32_0 : i32, i32
  }
  func.func @transform_2(%arg0: i32) -> (i32, i32) {
    %c0_i32 = arith.constant 0 : i32
    %c0_i32_0 = arith.constant 0 : i32
    %c0_i32_1 = arith.constant 0 : i32
    return %c0_i32, %c0_i32_0 : i32, i32
  }
  func.func @transform_3(%arg0: i32) -> (i32, i32) {
    %c0_i32 = arith.constant 0 : i32
    %c0_i32_0 = arith.constant 0 : i32
    %c0_i32_1 = arith.constant 0 : i32
    return %c0_i32, %c0_i32_0 : i32, i32
  }
  func.func @transform_4(%arg0: i32) -> (i32, i32) {
    %c0_i32 = arith.constant 0 : i32
    %c0_i32_0 = arith.constant 0 : i32
    %c0_i32_1 = arith.constant 0 : i32
    return %c0_i32, %c0_i32_0 : i32, i32
  }
  func.func @transform_5(%arg0: i32) -> (i32, i32) {
    %c0_i32 = arith.constant 0 : i32
    %c0_i32_0 = arith.constant 0 : i32
    %c0_i32_1 = arith.constant 0 : i32
    return %c0_i32, %c0_i32_0 : i32, i32
  }
  func.func @transform_6(%arg0: i32) -> i32 {
    %c0_i32 = arith.constant 0 : i32
    %c0_i32_0 = arith.constant 0 : i32
    return %c0_i32 : i32
  }
  func.func @transform_7(%arg0: i32) -> (i32, i32, i32) {
    %c0_i32 = arith.constant 0 : i32
    %c0_i32_0 = arith.constant 0 : i32
    %c0_i32_1 = arith.constant 0 : i32
    return %arg0, %c0_i32, %c0_i32_0 : i32, i32, i32
  }
}

module attributes {stable_mosaic.version = 11 : i64} {
  func.func @tcga_mlp_kernel(%arg0: i32, %arg1: memref<384x512xbf16, #tpu.memory_space<vmem>>, %arg2: memref<512x256xbf16, #tpu.memory_space<vmem>>, %arg3: memref<1x256xf32, #tpu.memory_space<vmem>>, %arg4: memref<256x128xbf16, #tpu.memory_space<vmem>>, %arg5: memref<1x128xf32, #tpu.memory_space<vmem>>, %arg6: memref<1x128xf32, #tpu.memory_space<vmem>>, %arg7: memref<1xf32, #tpu.memory_space<smem>>, %arg8: memref<1x1x384xf32, #tpu.memory_space<vmem>>) attributes {dimension_semantics = [#tpu.dimension_semantics<parallel>], iteration_bounds = array<i64: 1>, scalar_prefetch = 0 : i64, scratch_operands = 0 : i64, tpu.core_type = #tpu.core_type<tc>, window_params = [{transform_indices = @transform_0, window_bounds = array<i64: 384, 512>}, {pipeline_mode = #tpu.pipeline_mode<synchronous>, transform_indices = @transform_1, window_bounds = array<i64: 512, 256>}, {pipeline_mode = #tpu.pipeline_mode<synchronous>, transform_indices = @transform_2, window_bounds = array<i64: 1, 256>}, {pipeline_mode = #tpu.pipeline_mode<synchronous>, transform_indices = @transform_3, window_bounds = array<i64: 256, 128>}, {pipeline_mode = #tpu.pipeline_mode<synchronous>, transform_indices = @transform_4, window_bounds = array<i64: 1, 128>}, {pipeline_mode = #tpu.pipeline_mode<synchronous>, transform_indices = @transform_5, window_bounds = array<i64: 1, 128>}, {transform_indices = @transform_6, window_bounds = array<i64: 1>}, {transform_indices = @transform_7, window_bounds = array<i64: 1, 1, 384>}]} {
    %c0 = arith.constant 0 : index
    %c0_0 = arith.constant 0 : index
    %0 = vector.load %arg1[%c0, %c0_0] : memref<384x512xbf16, #tpu.memory_space<vmem>>, vector<384x512xbf16>
    %c0_1 = arith.constant 0 : index
    %c0_2 = arith.constant 0 : index
    %1 = vector.load %arg2[%c0_1, %c0_2] : memref<512x256xbf16, #tpu.memory_space<vmem>>, vector<512x256xbf16>
    %cst = arith.constant dense<0.000000e+00> : vector<384x256xf32>
    %2 = tpu.matmul %0, %1, %cst {dimension_numbers = #tpu.dot_dimension_numbers<[1], [0], [0], [1], [0, 0, 1, 1], [], []>} : vector<384x512xbf16>, vector<512x256xbf16>, vector<384x256xf32> -> vector<384x256xf32>
    %c0_3 = arith.constant 0 : index
    %c0_4 = arith.constant 0 : index
    %3 = vector.load %arg3[%c0_3, %c0_4] : memref<1x256xf32, #tpu.memory_space<vmem>>, vector<1x256xf32>
    %4 = vector.broadcast %3 : vector<1x256xf32> to vector<384x256xf32>
    %5 = arith.addf %2, %4 : vector<384x256xf32>
    %cst_5 = arith.constant 0.000000e+00 : f32
    %6 = vector.broadcast %cst_5 : f32 to vector<384x256xf32>
    %7 = arith.maximumf %5, %6 : vector<384x256xf32>
    %8 = arith.truncf %7 : vector<384x256xf32> to vector<384x256xbf16>
    %c0_6 = arith.constant 0 : index
    %c0_7 = arith.constant 0 : index
    %9 = vector.load %arg4[%c0_6, %c0_7] : memref<256x128xbf16, #tpu.memory_space<vmem>>, vector<256x128xbf16>
    %cst_8 = arith.constant dense<0.000000e+00> : vector<384x128xf32>
    %10 = tpu.matmul %8, %9, %cst_8 {dimension_numbers = #tpu.dot_dimension_numbers<[1], [0], [0], [1], [0, 0, 1, 1], [], []>} : vector<384x256xbf16>, vector<256x128xbf16>, vector<384x128xf32> -> vector<384x128xf32>
    %c0_9 = arith.constant 0 : index
    %c0_10 = arith.constant 0 : index
    %11 = vector.load %arg5[%c0_9, %c0_10] : memref<1x128xf32, #tpu.memory_space<vmem>>, vector<1x128xf32>
    %12 = vector.broadcast %11 : vector<1x128xf32> to vector<384x128xf32>
    %13 = arith.addf %10, %12 : vector<384x128xf32>
    %cst_11 = arith.constant 0.000000e+00 : f32
    %14 = vector.broadcast %cst_11 : f32 to vector<384x128xf32>
    %15 = arith.maximumf %13, %14 : vector<384x128xf32>
    %c0_12 = arith.constant 0 : index
    %c0_13 = arith.constant 0 : index
    %16 = vector.load %arg6[%c0_12, %c0_13] : memref<1x128xf32, #tpu.memory_space<vmem>>, vector<1x128xf32>
    %17 = vector.broadcast %16 : vector<1x128xf32> to vector<384x128xf32>
    %18 = arith.mulf %15, %17 : vector<384x128xf32>
    %cst_14 = arith.constant dense<0.000000e+00> : vector<384xf32>
    %19 = vector.multi_reduction <add>, %18, %cst_14 [1] : vector<384x128xf32> to vector<384xf32>
    %20 = vector.shape_cast %19 : vector<384xf32> to vector<1x1x384xf32>
    %c0_15 = arith.constant 0 : index
    %21 = memref.load %arg7[%c0_15] : memref<1xf32, #tpu.memory_space<smem>>
    %22 = vector.broadcast %21 : f32 to vector<1x1x384xf32>
    %23 = arith.addf %20, %22 : vector<1x1x384xf32>
    %c0_16 = arith.constant 0 : index
    %c0_17 = arith.constant 0 : index
    %c0_18 = arith.constant 0 : index
    %24 = vector.load %arg8[%c0_16, %c0_17, %c0_18] : memref<1x1x384xf32, #tpu.memory_space<vmem>>, vector<1x1x384xf32>
    tpu.vector_store %arg8[%c0_16, %c0_17, %c0_18], %23 {strides = array<i32>} : memref<1x1x384xf32, #tpu.memory_space<vmem>>, vector<1x1x384xf32>,
    return
  }
  func.func @transform_0(%arg0: i32) -> (i32, i32) {
    %c0_i32 = arith.constant 0 : i32
    %c0_i32_0 = arith.constant 0 : i32
    return %arg0, %c0_i32 : i32, i32
  }
  func.func @transform_1(%arg0: i32) -> (i32, i32) {
    %c0_i32 = arith.constant 0 : i32
    %c0_i32_0 = arith.constant 0 : i32
    %c0_i32_1 = arith.constant 0 : i32
    return %c0_i32, %c0_i32_0 : i32, i32
  }
  func.func @transform_2(%arg0: i32) -> (i32, i32) {
    %c0_i32 = arith.constant 0 : i32
    %c0_i32_0 = arith.constant 0 : i32
    %c0_i32_1 = arith.constant 0 : i32
    return %c0_i32, %c0_i32_0 : i32, i32
  }
  func.func @transform_3(%arg0: i32) -> (i32, i32) {
    %c0_i32 = arith.constant 0 : i32
    %c0_i32_0 = arith.constant 0 : i32
    %c0_i32_1 = arith.constant 0 : i32
    return %c0_i32, %c0_i32_0 : i32, i32
  }
  func.func @transform_4(%arg0: i32) -> (i32, i32) {
    %c0_i32 = arith.constant 0 : i32
    %c0_i32_0 = arith.constant 0 : i32
    %c0_i32_1 = arith.constant 0 : i32
    return %c0_i32, %c0_i32_0 : i32, i32
  }
  func.func @transform_5(%arg0: i32) -> (i32, i32) {
    %c0_i32 = arith.constant 0 : i32
    %c0_i32_0 = arith.constant 0 : i32
    %c0_i32_1 = arith.constant 0 : i32
    return %c0_i32, %c0_i32_0 : i32, i32
  }
  func.func @transform_6(%arg0: i32) -> i32 {
    %c0_i32 = arith.constant 0 : i32
    %c0_i32_0 = arith.constant 0 : i32
    return %c0_i32 : i32
  }
  func.func @transform_7(%arg0: i32) -> (i32, i32, i32) {
    %c0_i32 = arith.constant 0 : i32
    %c0_i32_0 = arith.constant 0 : i32
    %c0_i32_1 = arith.constant 0 : i32
    return %arg0, %c0_i32, %c0_i32_0 : i32, i32, i32
  }
}

</mosaic_0001>

<bundles_post_ra>
// kernel: tpu_custom_call.1
= control target key start
LH: loop header
LB: loop body
LE: loop exit
PB: predicated region body
PF: predicated region fallthrough
CT: control target
= control target key end

     0   :  { %13 = vsyncpa [#allocation4], 0  ;;  %s9346_s0 = inlined_call_operand.hbm [shape: bf16[384,512], index: 0, kind: input, shape index: {}]   ;;  %s9347_s1 = inlined_call_operand.hbm [shape: bf16[512,256], index: 1, kind: input, shape index: {}]   ;;  %s9348_s2 = inlined_call_operand.vmem [shape: f32[1,256], index: 2, kind: input, shape index: {}]   ;;  %s9349_s3 = inlined_call_operand.hbm [shape: bf16[256,128], index: 3, kind: input, shape index: {}]   ;;  %s9350_s4 = inlined_call_operand.vmem [shape: f32[1,128], index: 4, kind: input, shape index: {}]   ;;  %s9351_s5 = inlined_call_operand.vmem [shape: f32[1,128], index: 5, kind: input, shape index: {}]   ;;  %s9352_s6 = inlined_call_operand.<no memory space> [shape: f32[1], index: 6, kind: input, shape index: {}]   ;;  %s9353_s7 = inlined_call_operand.hbm [shape: f32[1,1,384], index: 7, kind: output, shape index: {}]  }
   0x1   :  { %14 = vsyncpa [#allocation7], 0 }
   0x2   :  { %15 = vsyncpa [#allocation5], 0  ;;  %s7503_s24 = smov [#allocation6]   ;;  %s7409_s28 = scalar_lea.hbm %s9347_s1, 8192 }
   0x3   :  { %s33_s25 = sshll.u32 %s7503_s24, 4  ;;  %p7410_p0 = scmp.ne.s32.totalorder %s9347_s1, %s7409_s28  ;;  %s34_s25 = int_to_ptr.vmem [resolvable:$true] %s33_s25 }
   0x4   :  { %p7413_p1 = scmp.lt.u32.totalorder %s7409_s28, %s9347_s1 }
   0x6   :  { %p7415_p2 = pnand %p7413_p1, %p7410_p0 }
   0x8   :  { %7418 = shalt.err (!%p7415_p2)
}
   0x9   :  { %s7419_s10 = scalar_lea.vmem %s34_s25, 8192  ;;  %p7424_p4 = scmp.lt.s32.totalorder %s34_s25, %s34_s25 }
   0xa   :  { %p7420_p3 = scmp.ne.s32.totalorder %s34_s25, %s7419_s10  ;;  %p7425_p5 = scmp.lt.s32.totalorder %s7419_s10, %s7419_s10 }
   0xc   :  { %p7426_p6 = por %p7425_p5, %p7424_p4 }
   0xe   :  { %p7427_p7 = pnand %p7426_p6, %p7420_p3 }
  0x10   :  { %7430 = shalt.err (!%p7427_p7)
}
  0x11   :  { %s7504_s11 = smov 128   ;;  %s7505_s12 = smov 8  }
  0x12   :  { %39 = dma.hbm_to_vmem [thread:$0]  %s9347_s1, 8192, %s34_s25, [#allocation7], %s7504_s11, %s7504_s11, %s7505_s12  }
  0x13   :  { %s7506_s15 = smov [#allocation3]   ;;  %s7431_s19 = scalar_lea.hbm %s9346_s0, 12288 }
  0x14   :  { %s21_s16 = sshll.u32 %s7506_s15, 4  ;;  %p7432_p8 = scmp.ne.s32.totalorder %s9346_s0, %s7431_s19  ;;  %s22_s16 = int_to_ptr.vmem [resolvable:$true] %s21_s16 }
  0x15   :  { %p7435_p9 = scmp.lt.u32.totalorder %s7431_s19, %s9346_s0 }
  0x17   :  { %p7437_p10 = pnand %p7435_p9, %p7432_p8 }
  0x19   :  { %7440 = shalt.err (!%p7437_p10)
}
  0x1a   :  { %s7441_s24 = scalar_lea.vmem %s22_s16, 12288  ;;  %p7446_p12 = scmp.lt.s32.totalorder %s22_s16, %s22_s16 }
  0x1b   :  { %p7442_p11 = scmp.ne.s32.totalorder %s22_s16, %s7441_s24  ;;  %p7447_p13 = scmp.lt.s32.totalorder %s7441_s24, %s7441_s24 }
  0x1d   :  { %p7448_p0 = por %p7447_p13, %p7446_p12 }
  0x1f   :  { %p7449_p1 = pnand %p7448_p0, %p7442_p11 }
  0x21   :  { %7452 = shalt.err (!%p7449_p1)
}
  0x22   :  { %s7507_s1 = smov 256   ;;  %s7508_s25 = smov 16  }
  0x23   :  { %27 = dma.hbm_to_vmem [thread:$0]  %s9346_s0, 12288, %s22_s16, [#allocation4], %s7507_s1, %s7507_s1, %s7508_s25  }
  0x24   :  { %s7509_s28 = smov [#allocation8]   ;;  %s7453_s9 = scalar_lea.hbm %s9349_s3, 2048 }
  0x25   :  { %s47_s29 = sshll.u32 %s7509_s28, 4  ;;  %p7454_p2 = scmp.ne.s32.totalorder %s9349_s3, %s7453_s9  ;;  %s48_s29 = int_to_ptr.vmem [resolvable:$true] %s47_s29 }
  0x26   :  { %p7457_p3 = scmp.lt.u32.totalorder %s7453_s9, %s9349_s3 }
  0x28   :  { %p7459_p4 = pnand %p7457_p3, %p7454_p2 }
  0x2a   :  { %7462 = shalt.err (!%p7459_p4)
}
  0x2b   :  { %s7463_s14 = scalar_lea.vmem %s48_s29, 2048  ;;  %p7468_p6 = scmp.lt.s32.totalorder %s48_s29, %s48_s29 }
  0x2c   :  { %p7464_p5 = scmp.ne.s32.totalorder %s48_s29, %s7463_s14  ;;  %p7469_p7 = scmp.lt.s32.totalorder %s7463_s14, %s7463_s14 }
  0x2e   :  { %p7470_p8 = por %p7469_p7, %p7468_p6 }
  0x30   :  { %p7471_p9 = pnand %p7470_p8, %p7464_p5 }
  0x32   :  { %7474 = shalt.err (!%p7471_p9)
}
  0x33   :  { %s7510_s0 = smov 64   ;;  %s7511_s15 = smov 4  }
  0x34   :  { %53 = dma.hbm_to_vmem [thread:$0]  %s9349_s3, 2048, %s48_s29, [#allocation7], %s7510_s0, %s7510_s0, %s7511_s15  }
  0x35   :  { %7497 = dma.done.wait [#allocation4], 12288  }
  0x36   :  { %7498 = vsyncadd [#allocation4], 4294955008 }
  0x37   :  { %7499 = dma.done.wait [#allocation7], 10240  }
  0x38   :  { %7500 = vsyncadd [#allocation7], 4294957056  ;;  %v7151_v0 = vld [vmem:[#allocation6 + $0x4] ss:$8 sps:$4 sm:$0xff]   ;;  %v7153_v1 = vld [vmem:[#allocation6] ss:$8 sps:$4 sm:$0xff]  }
  0x39   :  { %1042 = vmatprep.subr.bf16.mxu0 %v7151_v0  ;;  %v7154_v2 = vld [vmem:[#allocation6 + $0x14] ss:$8 sps:$4 sm:$0xff]   ;;  %6913 = vmatprep.subr.bf16.mxu1 %v7151_v0  ;;  %v7156_v3 = vld [vmem:[#allocation6 + $0x10] ss:$8 sps:$4 sm:$0xff]   ;;  %v7157_v4 = vld [vmem:[#allocation6 + $0x24] ss:$8 sps:$4 sm:$0xff]  }
  0x3a   :  { %1043 = vmatpush1.bf16.msra.mxu0 %v7153_v1  ;;  %6929 = vmatpush1.bf16.msra.mxu1 %v7153_v1  ;;  %v7159_v5 = vld [vmem:[#allocation6 + $0x20] ss:$8 sps:$4 sm:$0xff]   ;;  %v7160_v6 = vld [vmem:[#allocation6 + $0x34] ss:$8 sps:$4 sm:$0xff]   ;;  %v7162_v7 = vld [vmem:[#allocation6 + $0x30] ss:$8 sps:$4 sm:$0xff]  }
  0x3b   :  { %1044 = vmatprep.subr.bf16.mxu0 %v7154_v2  ;;  %6914 = vmatprep.subr.bf16.mxu1 %v7154_v2  ;;  %v7163_v8 = vld [vmem:[#allocation6 + $0x44] ss:$8 sps:$4 sm:$0xff]   ;;  %v7165_v9 = vld [vmem:[#allocation6 + $0x40] ss:$8 sps:$4 sm:$0xff]   ;;  %v7166_v10 = vld [vmem:[#allocation6 + $0x54] ss:$8 sps:$4 sm:$0xff]  }
  0x3c   :  { %v7168_v11 = vld [vmem:[#allocation6 + $0x50] ss:$8 sps:$4 sm:$0xff]   ;;  %v7169_v12 = vld [vmem:[#allocation6 + $0x64] ss:$8 sps:$4 sm:$0xff]   ;;  %v7171_v14 = vld [vmem:[#allocation6 + $0x60] ss:$8 sps:$4 sm:$0xff]  }
  0x3d   :  { %v7201_v13 = vld [vmem:[#allocation3 + $0x4] ss:$16 sps:$4 sm:$0xff]   ;;  %v7174_v16 = vld [vmem:[#allocation6 + $0x70] ss:$8 sps:$4 sm:$0xff]   ;;  %v7177_v18 = vld [vmem:[#allocation6 + $0x80] ss:$8 sps:$4 sm:$0xff]  }
  0x3e   :  { %1045 = vmatpush1.bf16.msra.mxu0 %v7156_v3  ;;  %6930 = vmatpush1.bf16.msra.mxu1 %v7156_v3  ;;  %v7172_v15 = vld [vmem:[#allocation6 + $0x74] ss:$8 sps:$4 sm:$0xff]   ;;  %v7175_v17 = vld [vmem:[#allocation6 + $0x84] ss:$8 sps:$4 sm:$0xff]   ;;  %v7180_v20 = vld [vmem:[#allocation6 + $0x90] ss:$8 sps:$4 sm:$0xff]  }
  0x3f   :  { %1046 = vmatprep.subr.bf16.mxu0 %v7157_v4  ;;  %6915 = vmatprep.subr.bf16.mxu1 %v7157_v4  ;;  %v7178_v19 = vld [vmem:[#allocation6 + $0x94] ss:$8 sps:$4 sm:$0xff]   ;;  %v7181_v21 = vld [vmem:[#allocation6 + $0xa4] ss:$8 sps:$4 sm:$0xff]   ;;  %v7183_v22 = vld [vmem:[#allocation6 + $0xa0] ss:$8 sps:$4 sm:$0xff]  }
  0x40   :  { %1074 = vmatprep.mubr.bf16.mxu0 %v7201_v13  ;;  %v7184_v23 = vld [vmem:[#allocation6 + $0xb4] ss:$8 sps:$4 sm:$0xff]   ;;  %v7186_v24 = vld [vmem:[#allocation6 + $0xb0] ss:$8 sps:$4 sm:$0xff]   ;;  %v7187_v25 = vld [vmem:[#allocation6 + $0xc4] ss:$8 sps:$4 sm:$0xff]  }
  0x41   :  { %v7189_v26 = vld [vmem:[#allocation6 + $0xc0] ss:$8 sps:$4 sm:$0xff]   ;;  %v7190_v27 = vld [vmem:[#allocation6 + $0xd4] ss:$8 sps:$4 sm:$0xff]   ;;  %v7192_v28 = vld [vmem:[#allocation6 + $0xd0] ss:$8 sps:$4 sm:$0xff]  }
  0x42   :  { %1047 = vmatpush1.bf16.msra.mxu0 %v7159_v5  ;;  %6931 = vmatpush1.bf16.msra.mxu1 %v7159_v5  ;;  %v7193_v29 = vld [vmem:[#allocation6 + $0xe4] ss:$8 sps:$4 sm:$0xff]   ;;  %v7195_v30 = vld [vmem:[#allocation6 + $0xe0] ss:$8 sps:$4 sm:$0xff]   ;;  %v7196_v31 = vld [vmem:[#allocation6 + $0xf4] ss:$8 sps:$4 sm:$0xff]  }
  0x43   :  { %1048 = vmatprep.subr.bf16.mxu0 %v7160_v6  ;;  %6916 = vmatprep.subr.bf16.mxu1 %v7160_v6  ;;  %v7198_v32 = vld [vmem:[#allocation6 + $0xf0] ss:$8 sps:$4 sm:$0xff]   ;;  %v7204_v33 = vld [vmem:[#allocation6 + $0x104] ss:$8 sps:$4 sm:$0xff]   ;;  %v7202_v35 = vld [vmem:[#allocation6 + $0x100] ss:$8 sps:$4 sm:$0xff]  }
  0x44   :  { %v7199_v34 = vld [vmem:[#allocation3] ss:$16 sps:$4 sm:$0xff]   ;;  %v7208_v36 = vld [vmem:[#allocation3 + $0x24] ss:$16 sps:$4 sm:$0xff]   ;;  %vm6432_vm0 = vcmask 130112   ;;  %vm6439_vm1 = vcmask 195712  }
  0x45   :  { %v7207_v37 = vld [vmem:[#allocation6 + $0x114] ss:$8 sps:$4 sm:$0xff]   ;;  %v7205_v38 = vld [vmem:[#allocation6 + $0x110] ss:$8 sps:$4 sm:$0xff]   ;;  %v7213_v39 = vld [vmem:[#allocation6 + $0x124] ss:$8 sps:$4 sm:$0xff]  }
  0x46   :  { %1049 = vmatpush1.bf16.msra.mxu0 %v7162_v7  ;;  %6932 = vmatpush1.bf16.msra.mxu1 %v7162_v7  ;;  %v7210_v40 = vld [vmem:[#allocation3 + $0x20] ss:$16 sps:$4 sm:$0xff]   ;;  %v7214_v42 = vld [vmem:[#allocation3 + $0x44] ss:$16 sps:$4 sm:$0xff]   ;;  %vm6446_vm2 = vcmask 261312   ;;  %vm6453_vm3 = vcmask 326912  }
  0x47   :  { %1050 = vmatprep.subr.bf16.mxu0 %v7163_v8  ;;  %6917 = vmatprep.subr.bf16.mxu1 %v7163_v8  ;;  %v7211_v41 = vld [vmem:[#allocation6 + $0x120] ss:$8 sps:$4 sm:$0xff]   ;;  %v7219_v43 = vld [vmem:[#allocation6 + $0x134] ss:$8 sps:$4 sm:$0xff]   ;;  %v7217_v44 = vld [vmem:[#allocation6 + $0x130] ss:$8 sps:$4 sm:$0xff]  }
  0x48   :  { %v7225_v45 = vld [vmem:[#allocation6 + $0x144] ss:$8 sps:$4 sm:$0xff]   ;;  %v7216_v46 = vld [vmem:[#allocation3 + $0x40] ss:$16 sps:$4 sm:$0xff]   ;;  %v7228_v49 = vld [vmem:[#allocation6 + $0x154] ss:$8 sps:$4 sm:$0xff]  }
  0x49   :  { %v7220_v47 = vld [vmem:[#allocation3 + $0x64] ss:$16 sps:$4 sm:$0xff]   ;;  %v7223_v48 = vld [vmem:[#allocation6 + $0x140] ss:$8 sps:$4 sm:$0xff]   ;;  %v7226_v50 = vld [vmem:[#allocation6 + $0x150] ss:$8 sps:$4 sm:$0xff]  }
  0x4a   :  { %1051 = vmatpush1.bf16.msra.mxu0 %v7165_v9  ;;  %6933 = vmatpush1.bf16.msra.mxu1 %v7165_v9  ;;  %v7234_v51 = vld [vmem:[#allocation6 + $0x164] ss:$8 sps:$4 sm:$0xff]   ;;  %v7222_v52 = vld [vmem:[#allocation3 + $0x60] ss:$16 sps:$4 sm:$0xff]   ;;  %v7240_v55 = vld [vmem:[#allocation6 + $0x174] ss:$8 sps:$4 sm:$0xff]  }
  0x4b   :  { %1052 = vmatprep.subr.bf16.mxu0 %v7166_v10  ;;  %6918 = vmatprep.subr.bf16.mxu1 %v7166_v10  ;;  %v7229_v53 = vld [vmem:[#allocation3 + $0x84] ss:$16 sps:$4 sm:$0xff]   ;;  %v7232_v54 = vld [vmem:[#allocation6 + $0x160] ss:$8 sps:$4 sm:$0xff]   ;;  %v7238_v56 = vld [vmem:[#allocation6 + $0x170] ss:$8 sps:$4 sm:$0xff]  }
  0x4c   :  { %v7246_v57 = vld [vmem:[#allocation6 + $0x184] ss:$8 sps:$4 sm:$0xff]   ;;  %v7231_v58 = vld [vmem:[#allocation3 + $0x80] ss:$16 sps:$4 sm:$0xff]   ;;  %v7249_v61 = vld [vmem:[#allocation6 + $0x194] ss:$8 sps:$4 sm:$0xff]  }
  0x4d   :  { %v7235_v59 = vld [vmem:[#allocation3 + $0xa4] ss:$16 sps:$4 sm:$0xff]   ;;  %v7244_v60 = vld [vmem:[#allocation6 + $0x180] ss:$8 sps:$4 sm:$0xff]   ;;  %v7247_v62 = vld [vmem:[#allocation6 + $0x190] ss:$8 sps:$4 sm:$0xff]  }
  0x4e   :  { %1053 = vmatpush1.bf16.msra.mxu0 %v7168_v11  ;;  %6934 = vmatpush1.bf16.msra.mxu1 %v7168_v11  ;;  %v7255_v63 = vld [vmem:[#allocation6 + $0x1a4] ss:$8 sps:$4 sm:$0xff]   ;;  %v7237_v0 = vld [vmem:[#allocation3 + $0xa0] ss:$16 sps:$4 sm:$0xff]   ;;  %v7261_v3 = vld [vmem:[#allocation6 + $0x1b4] ss:$8 sps:$4 sm:$0xff]  }
  0x4f   :  { %1054 = vmatprep.subr.bf16.mxu0 %v7169_v12  ;;  %6919 = vmatprep.subr.bf16.mxu1 %v7169_v12  ;;  %v7241_v1 = vld [vmem:[#allocation3 + $0xc4] ss:$16 sps:$4 sm:$0xff]   ;;  %v7253_v2 = vld [vmem:[#allocation6 + $0x1a0] ss:$8 sps:$4 sm:$0xff]   ;;  %v7259_v4 = vld [vmem:[#allocation6 + $0x1b0] ss:$8 sps:$4 sm:$0xff]  }
  0x50   :  { %v7267_v5 = vld [vmem:[#allocation6 + $0x1c4] ss:$8 sps:$4 sm:$0xff]   ;;  %v7243_v6 = vld [vmem:[#allocation3 + $0xc0] ss:$16 sps:$4 sm:$0xff]   ;;  %v7270_v9 = vld [vmem:[#allocation6 + $0x1d4] ss:$8 sps:$4 sm:$0xff]  }
  0x51   :  { %v7250_v7 = vld [vmem:[#allocation3 + $0xe4] ss:$16 sps:$4 sm:$0xff]   ;;  %v7265_v8 = vld [vmem:[#allocation6 + $0x1c0] ss:$8 sps:$4 sm:$0xff]   ;;  %v7268_v10 = vld [vmem:[#allocation6 + $0x1d0] ss:$8 sps:$4 sm:$0xff]  }
  0x52   :  { %1055 = vmatpush1.bf16.msra.mxu0 %v7171_v14  ;;  %6935 = vmatpush1.bf16.msra.mxu1 %v7171_v14  ;;  %v7276_v11 = vld [vmem:[#allocation6 + $0x1e4] ss:$8 sps:$4 sm:$0xff]   ;;  %v7252_v12 = vld [vmem:[#allocation3 + $0xe0] ss:$16 sps:$4 sm:$0xff]   ;;  %vm6460_vm4 = vcmask 392512   ;;  %vm6467_vm5 = vcmask 458112  }
  0x53   :  { %1056 = vmatprep.subr.bf16.mxu0 %v7172_v15  ;;  %6920 = vmatprep.subr.bf16.mxu1 %v7172_v15  ;;  %v7256_v13 = vld [vmem:[#allocation3 + $0x104] ss:$16 sps:$4 sm:$0xff]   ;;  %v7274_v14 = vld [vmem:[#allocation6 + $0x1e0] ss:$8 sps:$4 sm:$0xff]   ;;  %vm6474_vm6 = vcmask 523712   ;;  %vm6481_vm7 = vcmask 589312  }
  0x54   :  { %v7282_v15 = vld [vmem:[#allocation6 + $0x1f4] ss:$8 sps:$4 sm:$0xff]   ;;  %vm6488_vm8 = vcmask 654912   ;;  %vm6495_vm9 = vcmask 720512   ;;  %vm6502_vm10 = vcmask 786112   ;;  %vm6509_vm11 = vcmask 851712  }
  0x55   :  { %vm6516_vm12 = vcmask 917312   ;;  %vm6523_vm13 = vcmask 982912   ;;  %vm6530_vm14 = vcmask 1048512  }
  0x56   :  { %1057 = vmatpush1.bf16.msra.mxu0 %v7174_v16  ;;  %6936 = vmatpush1.bf16.msra.mxu1 %v7174_v16  ;;  %v7319_v16 = vld [vmem:[#allocation3 + $0x180] ss:$16 sps:$4 sm:$0xff]  }
  0x57   :  { %1058 = vmatprep.subr.bf16.mxu0 %v7175_v17  ;;  %6921 = vmatprep.subr.bf16.mxu1 %v7175_v17  ;;  %v7321_v17 = vld [vmem:[#allocation3 + $0x184] ss:$16 sps:$4 sm:$0xff]  }
  0x58   :  { %1194 = vmatprep.mubr.bf16.mxu1 %v7321_v17  ;;  %v7310_v17 = vld [vmem:[#allocation3 + $0x12c] ss:$16 sps:$4 sm:$0xff]  }
  0x5a   :  { %1059 = vmatpush1.bf16.msra.mxu0 %v7177_v18  ;;  %6937 = vmatpush1.bf16.msra.mxu1 %v7177_v18  ;;  %v7280_v18 = vld [vmem:[#allocation6 + $0x1f0] ss:$8 sps:$4 sm:$0xff]  }
  0x5b   :  { %1060 = vmatprep.subr.bf16.mxu0 %v7178_v19  ;;  %6922 = vmatprep.subr.bf16.mxu1 %v7178_v19  ;;  %v7258_v19 = vld [vmem:[#allocation3 + $0x100] ss:$16 sps:$4 sm:$0xff]  }
  0x5e   :  { %1061 = vmatpush1.bf16.msra.mxu0 %v7180_v20  ;;  %6938 = vmatpush1.bf16.msra.mxu1 %v7180_v20  ;;  %v7262_v20 = vld [vmem:[#allocation3 + $0x124] ss:$16 sps:$4 sm:$0xff]  }
  0x5f   :  { %1062 = vmatprep.subr.bf16.mxu0 %v7181_v21  ;;  %6923 = vmatprep.subr.bf16.mxu1 %v7181_v21  ;;  %v7325_v21 = vld [vmem:[#allocation3 + $0x1a4] ss:$16 sps:$4 sm:$0xff]  }
  0x62   :  { %1063 = vmatpush1.bf16.msra.mxu0 %v7183_v22  ;;  %6939 = vmatpush1.bf16.msra.mxu1 %v7183_v22  ;;  %v7327_v22 = vld [vmem:[#allocation3 + $0x1a0] ss:$16 sps:$4 sm:$0xff]  }
  0x63   :  { %1064 = vmatprep.subr.bf16.mxu0 %v7184_v23  ;;  %6924 = vmatprep.subr.bf16.mxu1 %v7184_v23  ;;  %v7264_v23 = vld [vmem:[#allocation3 + $0x120] ss:$16 sps:$4 sm:$0xff]  }
  0x66   :  { %1065 = vmatpush1.bf16.msra.mxu0 %v7186_v24  ;;  %6940 = vmatpush1.bf16.msra.mxu1 %v7186_v24  ;;  %v7271_v24 = vld [vmem:[#allocation3 + $0x144] ss:$16 sps:$4 sm:$0xff]  }
  0x67   :  { %1066 = vmatprep.subr.bf16.mxu0 %v7187_v25  ;;  %6925 = vmatprep.subr.bf16.mxu1 %v7187_v25  ;;  %v7331_v25 = vld [vmem:[#allocation3 + $0x1c4] ss:$16 sps:$4 sm:$0xff]  }
  0x6a   :  { %1067 = vmatpush1.bf16.msra.mxu0 %v7189_v26  ;;  %6941 = vmatpush1.bf16.msra.mxu1 %v7189_v26  ;;  %v7333_v26 = vld [vmem:[#allocation3 + $0x1c0] ss:$16 sps:$4 sm:$0xff]  }
  0x6b   :  { %1068 = vmatprep.subr.bf16.mxu0 %v7190_v27  ;;  %6926 = vmatprep.subr.bf16.mxu1 %v7190_v27  ;;  %v7273_v27 = vld [vmem:[#allocation3 + $0x140] ss:$16 sps:$4 sm:$0xff]  }
  0x6e   :  { %1069 = vmatpush1.bf16.msra.mxu0 %v7192_v28  ;;  %6942 = vmatpush1.bf16.msra.mxu1 %v7192_v28  ;;  %v7277_v28 = vld [vmem:[#allocation3 + $0x164] ss:$16 sps:$4 sm:$0xff]  }
  0x6f   :  { %1070 = vmatprep.subr.bf16.mxu0 %v7193_v29  ;;  %6927 = vmatprep.subr.bf16.mxu1 %v7193_v29  ;;  %v7337_v29 = vld [vmem:[#allocation3 + $0x1e4] ss:$16 sps:$4 sm:$0xff]  }
  0x72   :  { %1071 = vmatpush1.bf16.msra.mxu0 %v7195_v30  ;;  %6943 = vmatpush1.bf16.msra.mxu1 %v7195_v30  ;;  %v7339_v30 = vld [vmem:[#allocation3 + $0x1e0] ss:$16 sps:$4 sm:$0xff]  }
  0x73   :  { %1072 = vmatprep.subr.bf16.mxu0 %v7196_v31  ;;  %6928 = vmatprep.subr.bf16.mxu1 %v7196_v31  ;;  %v7279_v31 = vld [vmem:[#allocation3 + $0x160] ss:$16 sps:$4 sm:$0xff]  }
  0x76   :  { %1073 = vmatpush1.bf16.msra.mxu0 %v7198_v32  ;;  %6944 = vmatpush1.bf16.msra.mxu1 %v7198_v32  ;;  %v7285_v32 = vld [vmem:[#allocation3 + $0xc] ss:$16 sps:$4 sm:$0xff]  }
  0x77   :  { %1315 = vmatprep.subr.bf16.mxu0 %v7204_v33  ;;  %v7343_v33 = vld [vmem:[#allocation3 + $0x204] ss:$16 sps:$4 sm:$0xff]  }
  0x79   :  { %1075 = vmatmul.mubr.bf16.vlgmr.msra.gmra.mrb[0].mxu0 %v7199_v34  ;;  %1195 = vmatmul.mubr.bf16.vlgmr.msra.gmra.mrb[0].mxu1 %v7319_v16  ;;  %v7345_v34 = vld [vmem:[#allocation3 + $0x200] ss:$16 sps:$4 sm:$0xff]   ;;  %v7309_v16 = vld [vmem:[#allocation3 + $0x108] ss:$16 sps:$4 sm:$0xff]  }
  0x7a   :  { %1316 = vmatpush1.bf16.msra.mxu0 %v7202_v35  ;;  %1084 = vmatprep.mubr.bf16.mxu0 %v7208_v36  ;;  %v7512_v35 = vmov 0   ;;  %v7348_v36 = vld [vmem:[#allocation8] sm:$0xff]  }
  0x7b   :  { %1317 = vmatprep.subr.bf16.mxu0 %v7207_v37  ;;  %1204 = vmatprep.mubr.bf16.mxu1 %v7325_v21  ;;  %v7283_v37 = vld [vmem:[#allocation3 + $0x8] ss:$16 sps:$4 sm:$0xff]   ;;  %v7316_v21 = vld [vmem:[#allocation3 + $0x16c] ss:$16 sps:$4 sm:$0xff]  }
  0x7c   :  { %1867 = vmatprep.subr.bf16.mxu1 %v7512_v35  ;;  %7150 = vset.pattern.permute.xlu1 %v7512_v35 }
  0x7d   :  { %7149 = vset.pattern.permute.xlu0 %v7512_v35  ;;  %1868 = vmatpush1.bf16.msra.mxu1 %v7348_v36  ;;  %v7356_v36 = vld [vmem:[#allocation3 + $0x228] ss:$16 sps:$4 sm:$0xff]  }
  0x7e   :  { %1318 = vmatpush1.bf16.msra.mxu0 %v7205_v38  ;;  %v7286_v38 = vld [vmem:[#allocation3 + $0x2c] ss:$16 sps:$4 sm:$0xff]   ;;  %1869 = vmatprep.subr.bf16.mxu1 %v7512_v35 }
  0x7f   :  { %1319 = vmatprep.subr.bf16.mxu0 %v7213_v39  ;;  %v7350_v39 = vld [vmem:[#allocation3 + $0x224] ss:$16 sps:$4 sm:$0xff]  }
  0x81   :  { %1085 = vmatmul.mubr.bf16.gmra.mrb[4].mxu0 %v7210_v40  ;;  %1205 = vmatmul.mubr.bf16.gmra.mrb[4].mxu1 %v7327_v22  ;;  %v7352_v40 = vld [vmem:[#allocation3 + $0x220] ss:$16 sps:$4 sm:$0xff]   ;;  %v7318_v22 = vld [vmem:[#allocation3 + $0x168] ss:$16 sps:$4 sm:$0xff]  }
  0x82   :  { %1320 = vmatpush1.bf16.msra.mxu0 %v7211_v41  ;;  %1094 = vmatprep.mubr.bf16.mxu0 %v7214_v42  ;;  %v7353_v41 = vld [vmem:[#allocation8 + $0x8] sm:$0xff]  }
  0x83   :  { %1321 = vmatprep.subr.bf16.mxu0 %v7219_v43  ;;  %1214 = vmatprep.mubr.bf16.mxu1 %v7331_v25  ;;  %v7288_v42 = vld [vmem:[#allocation3 + $0x28] ss:$16 sps:$4 sm:$0xff]   ;;  %v7289_v43 = vld [vmem:[#allocation3 + $0x4c] ss:$16 sps:$4 sm:$0xff]  }
  0x84   :  { %1870 = vmatpush1.bf16.msra.mxu1 %v7353_v41  ;;  %v7406_v25 = vld [vmem:[#allocation8 + $0x78] sm:$0xff]  }
  0x85   :  { %1871 = vmatprep.subr.bf16.mxu1 %v7512_v35  ;;  %v7380_v41 = vld [vmem:[#allocation3 + $0x28c] ss:$16 sps:$4 sm:$0xff]  }
  0x86   :  { %1322 = vmatpush1.bf16.msra.mxu0 %v7217_v44  ;;  %v7357_v44 = vld [vmem:[#allocation3 + $0x244] ss:$16 sps:$4 sm:$0xff]  }
  0x87   :  { %1323 = vmatprep.subr.bf16.mxu0 %v7225_v45  ;;  %v7359_v45 = vld [vmem:[#allocation8 + $0x10] sm:$0xff]  }
  0x88   :  { %1872 = vmatpush1.bf16.msra.mxu1 %v7359_v45  ;;  %v7395_v45 = vld [vmem:[#allocation3 + $0x2cc] ss:$16 sps:$4 sm:$0xff]  }
  0x89   :  { %1095 = vmatmul.mubr.bf16.gmra.mrb[8].mxu0 %v7216_v46  ;;  %1215 = vmatmul.mubr.bf16.gmra.mrb[8].mxu1 %v7333_v26  ;;  %v7360_v46 = vld [vmem:[#allocation3 + $0x240] ss:$16 sps:$4 sm:$0xff]   ;;  %v7324_v26 = vld [vmem:[#allocation3 + $0x188] ss:$16 sps:$4 sm:$0xff]  }
  0x8a   :  { %1104 = vmatprep.mubr.bf16.mxu0 %v7220_v47  ;;  %1324 = vmatpush1.bf16.msra.mxu0 %v7223_v48  ;;  %v7291_v47 = vld [vmem:[#allocation3 + $0x48] ss:$16 sps:$4 sm:$0xff]   ;;  %v7292_v48 = vld [vmem:[#allocation3 + $0x6c] ss:$16 sps:$4 sm:$0xff]  }
  0x8b   :  { %1325 = vmatprep.subr.bf16.mxu0 %v7228_v49  ;;  %1224 = vmatprep.mubr.bf16.mxu1 %v7337_v29  ;;  %v7364_v49 = vld [vmem:[#allocation8 + $0x18] sm:$0xff]  }
  0x8c   :  { %1873 = vmatprep.subr.bf16.mxu1 %v7512_v35  ;;  %v7334_v29 = vld [vmem:[#allocation3 + $0x1cc] ss:$16 sps:$4 sm:$0xff]  }
  0x8d   :  { %1874 = vmatpush1.bf16.msra.mxu1 %v7364_v49 }
  0x8e   :  { %1326 = vmatpush1.bf16.msra.mxu0 %v7226_v50  ;;  %v7365_v50 = vld [vmem:[#allocation3 + $0x264] ss:$16 sps:$4 sm:$0xff]   ;;  %1875 = vmatprep.subr.bf16.mxu1 %v7512_v35 }
  0x8f   :  { %1327 = vmatprep.subr.bf16.mxu0 %v7234_v51  ;;  %v7367_v51 = vld [vmem:[#allocation3 + $0x260] ss:$16 sps:$4 sm:$0xff]  }
  0x91   :  { %1105 = vmatmul.mubr.bf16.gmra.mrb[12].mxu0 %v7222_v52  ;;  %1225 = vmatmul.mubr.bf16.gmra.mrb[12].mxu1 %v7339_v30  ;;  %v7370_v52 = vld [vmem:[#allocation8 + $0x20] sm:$0xff]   ;;  %v7336_v30 = vld [vmem:[#allocation3 + $0x1c8] ss:$16 sps:$4 sm:$0xff]  }
  0x92   :  { %1114 = vmatprep.mubr.bf16.mxu0 %v7229_v53  ;;  %1328 = vmatpush1.bf16.msra.mxu0 %v7232_v54  ;;  %v7294_v53 = vld [vmem:[#allocation3 + $0x68] ss:$16 sps:$4 sm:$0xff]   ;;  %v7295_v54 = vld [vmem:[#allocation3 + $0x8c] ss:$16 sps:$4 sm:$0xff]  }
  0x93   :  { %1329 = vmatprep.subr.bf16.mxu0 %v7240_v55  ;;  %1234 = vmatprep.mubr.bf16.mxu1 %v7343_v33  ;;  %v7372_v55 = vld [vmem:[#allocation8 + $0x28] sm:$0xff]  }
  0x94   :  { %1876 = vmatpush1.bf16.msra.mxu1 %v7370_v52  ;;  %v7346_v33 = vld [vmem:[#allocation3 + $0x20c] ss:$16 sps:$4 sm:$0xff]   ;;  %v7404_v52 = vld [vmem:[#allocation3 + $0x2e8] ss:$16 sps:$4 sm:$0xff]  }
  0x95   :  { %1877 = vmatprep.subr.bf16.mxu1 %v7512_v35 }
  0x96   :  { %1330 = vmatpush1.bf16.msra.mxu0 %v7238_v56  ;;  %v7377_v56 = vld [vmem:[#allocation3 + $0x284] ss:$16 sps:$4 sm:$0xff]  }
  0x97   :  { %1331 = vmatprep.subr.bf16.mxu0 %v7246_v57  ;;  %v7373_v57 = vld [vmem:[#allocation8 + $0x30] sm:$0xff]  }
  0x98   :  { %1878 = vmatpush1.bf16.msra.mxu1 %v7372_v55 }
  0x99   :  { %1115 = vmatmul.mubr.bf16.gmra.mrb[16].mxu0 %v7231_v58  ;;  %1235 = vmatmul.mubr.bf16.gmra.mrb[16].mxu1 %v7345_v34  ;;  %v7379_v58 = vld [vmem:[#allocation3 + $0x280] ss:$16 sps:$4 sm:$0xff]   ;;  %v7349_v34 = vld [vmem:[#allocation3 + $0x208] ss:$16 sps:$4 sm:$0xff]  }
  0x9a   :  { %1124 = vmatprep.mubr.bf16.mxu0 %v7235_v59  ;;  %1332 = vmatpush1.bf16.msra.mxu0 %v7244_v60  ;;  %v7297_v59 = vld [vmem:[#allocation3 + $0x88] ss:$16 sps:$4 sm:$0xff]   ;;  %v7298_v60 = vld [vmem:[#allocation3 + $0xac] ss:$16 sps:$4 sm:$0xff]  }
  0x9b   :  { %1333 = vmatprep.subr.bf16.mxu0 %v7249_v61  ;;  %1244 = vmatprep.mubr.bf16.mxu1 %v7350_v39  ;;  %v7374_v61 = vld [vmem:[#allocation8 + $0x38] sm:$0xff]  }
  0x9c   :  { %1879 = vmatprep.subr.bf16.mxu1 %v7512_v35  ;;  %v7368_v39 = vld [vmem:[#allocation3 + $0x26c] ss:$16 sps:$4 sm:$0xff]  }
  0x9d   :  { %1880 = vmatpush1.bf16.msra.mxu1 %v7373_v57 }
  0x9e   :  { %1334 = vmatpush1.bf16.msra.mxu0 %v7247_v62  ;;  %1881 = vmatprep.subr.bf16.mxu1 %v7512_v35  ;;  %v7384_v62 = vld [vmem:[#allocation3 + $0x2a4] ss:$16 sps:$4 sm:$0xff]  }
  0x9f   :  { %1335 = vmatprep.subr.bf16.mxu0 %v7255_v63  ;;  %v7386_v63 = vld [vmem:[#allocation3 + $0x2a0] ss:$16 sps:$4 sm:$0xff]  }
  0xa1   :  { %1125 = vmatmul.mubr.bf16.gmra.mrb[20].mxu0 %v7237_v0  ;;  %1245 = vmatmul.mubr.bf16.gmra.mrb[20].mxu1 %v7352_v40  ;;  %v7375_v0 = vld [vmem:[#allocation8 + $0x40] sm:$0xff]   ;;  %v7371_v40 = vld [vmem:[#allocation3 + $0x268] ss:$16 sps:$4 sm:$0xff]  }
  0xa2   :  { %1134 = vmatprep.mubr.bf16.mxu0 %v7241_v1  ;;  %1336 = vmatpush1.bf16.msra.mxu0 %v7253_v2  ;;  %v7300_v1 = vld [vmem:[#allocation3 + $0xa8] ss:$16 sps:$4 sm:$0xff]   ;;  %v7301_v2 = vld [vmem:[#allocation3 + $0xcc] ss:$16 sps:$4 sm:$0xff]  }
  0xa3   :  { %1337 = vmatprep.subr.bf16.mxu0 %v7261_v3  ;;  %1254 = vmatprep.mubr.bf16.mxu1 %v7357_v44  ;;  %v7376_v3 = vld [vmem:[#allocation8 + $0x48] sm:$0xff]  }
  0xa4   :  { %1882 = vmatpush1.bf16.msra.mxu1 %v7374_v61  ;;  %v7390_v44 = vld [vmem:[#allocation3 + $0x2a8] ss:$16 sps:$4 sm:$0xff]   ;;  %v9354_v61 = vlaneseq }
  0xa5   :  { %1883 = vmatprep.subr.bf16.mxu1 %v7512_v35 }
  0xa6   :  { %1338 = vmatpush1.bf16.msra.mxu0 %v7259_v4  ;;  %v7391_v4 = vld [vmem:[#allocation3 + $0x2c4] ss:$16 sps:$4 sm:$0xff]  }
  0xa7   :  { %1339 = vmatprep.subr.bf16.mxu0 %v7267_v5  ;;  %v7394_v5 = vld [vmem:[#allocation3 + $0x2c0] ss:$16 sps:$4 sm:$0xff]  }
  0xa8   :  { %1884 = vmatpush1.bf16.msra.mxu1 %v7375_v0  ;;  %v7638_v0 = vshrl.u32 %v9354_v61, 7 }
  0xa9   :  { %1135 = vmatmul.mubr.bf16.gmra.mrb[24].mxu0 %v7243_v6  ;;  %1255 = vmatmul.mubr.bf16.gmra.mrb[24].mxu1 %v7360_v46  ;;  %v7383_v6 = vld [vmem:[#allocation8 + $0x50] sm:$0xff]   ;;  %v7397_v46 = vld [vmem:[#allocation3 + $0x2c8] ss:$16 sps:$4 sm:$0xff]  }
  0xaa   :  { %1144 = vmatprep.mubr.bf16.mxu0 %v7250_v7  ;;  %1340 = vmatpush1.bf16.msra.mxu0 %v7265_v8  ;;  %v7303_v7 = vld [vmem:[#allocation3 + $0xc8] ss:$16 sps:$4 sm:$0xff]   ;;  %v7304_v8 = vld [vmem:[#allocation3 + $0xec] ss:$16 sps:$4 sm:$0xff]   ;;  %9382 = vst [vmem:[#allocation13_spill] sm:$0xff] %v7638_v0 }
  0xab   :  { %1341 = vmatprep.subr.bf16.mxu0 %v7270_v9  ;;  %1264 = vmatprep.mubr.bf16.mxu1 %v7365_v50  ;;  %v7389_v9 = vld [vmem:[#allocation8 + $0x58] sm:$0xff]  }
  0xac   :  { %1885 = vmatprep.subr.bf16.mxu1 %v7512_v35 }
  0xad   :  { %1886 = vmatpush1.bf16.msra.mxu1 %v7376_v3  ;;  %v7645_v3 = vsub.s32 0, %v7638_v0 }
  0xae   :  { %1342 = vmatpush1.bf16.msra.mxu0 %v7268_v10  ;;  %1887 = vmatprep.subr.bf16.mxu1 %v7512_v35  ;;  %v7399_v10 = vld [vmem:[#allocation3 + $0x2e4] ss:$16 sps:$4 sm:$0xff]  }
  0xaf   :  { %1343 = vmatprep.subr.bf16.mxu0 %v7276_v11  ;;  %v7401_v11 = vld [vmem:[#allocation3 + $0x2e0] ss:$16 sps:$4 sm:$0xff]   ;;  %9383 = vst [vmem:[#allocation14_spill] sm:$0xff] %v7645_v3 }
  0xb1   :  { %1145 = vmatmul.mubr.bf16.gmra.mrb[28].mxu0 %v7252_v12  ;;  %1265 = vmatmul.mubr.bf16.gmra.mrb[28].mxu1 %v7367_v51  ;;  %v7393_v12 = vld [vmem:[#allocation8 + $0x60] sm:$0xff]  }
  0xb2   :  { %1154 = vmatprep.mubr.bf16.mxu0 %v7256_v13  ;;  %1344 = vmatpush1.bf16.msra.mxu0 %v7274_v14  ;;  %v7306_v13 = vld [vmem:[#allocation3 + $0xe8] ss:$16 sps:$4 sm:$0xff]   ;;  %v7307_v14 = vld [vmem:[#allocation3 + $0x10c] ss:$16 sps:$4 sm:$0xff]  }
  0xb3   :  { %1345 = vmatprep.subr.bf16.mxu0 %v7282_v15  ;;  %1274 = vmatprep.mubr.bf16.mxu1 %v7377_v56  ;;  %v7398_v15 = vld [vmem:[#allocation8 + $0x68] sm:$0xff]  }
  0xb4   :  { %1888 = vmatpush1.bf16.msra.mxu1 %v7383_v6 }
  0xb5   :  { %1889 = vmatprep.subr.bf16.mxu1 %v7512_v35 }
  0xb6   :  { %1346 = vmatpush1.bf16.msra.mxu0 %v7280_v18  ;;  %v7312_v18 = vld [vmem:[#allocation3 + $0x128] ss:$16 sps:$4 sm:$0xff]  }
  0xb8   :  { %1890 = vmatpush1.bf16.msra.mxu1 %v7389_v9 }
  0xb9   :  { %1155 = vmatmul.mubr.bf16.gmra.mrb[32].mxu0 %v7258_v19  ;;  %1275 = vmatmul.mubr.bf16.gmra.mrb[32].mxu1 %v7379_v58  ;;  %v7313_v19 = vld [vmem:[#allocation3 + $0x14c] ss:$16 sps:$4 sm:$0xff]  }
  0xba   :  { %1164 = vmatprep.mubr.bf16.mxu0 %v7262_v20  ;;  %1284 = vmatprep.mubr.bf16.mxu1 %v7384_v62  ;;  %v7315_v20 = vld [vmem:[#allocation3 + $0x148] ss:$16 sps:$4 sm:$0xff]  }
  0xbb   :  { %1891 = vmatprep.subr.bf16.mxu1 %v7512_v35 }
  0xbc   :  { %1892 = vmatpush1.bf16.msra.mxu1 %v7393_v12 }
  0xbd   :  { %1893 = vmatprep.subr.bf16.mxu1 %v7512_v35 }
  0xc0   :  { %1894 = vmatpush1.bf16.msra.mxu1 %v7398_v15 }
  0xc1   :  { %1165 = vmatmul.mubr.bf16.gmra.mrb[36].mxu0 %v7264_v23  ;;  %1285 = vmatmul.mubr.bf16.gmra.mrb[36].mxu1 %v7386_v63  ;;  %v7322_v23 = vld [vmem:[#allocation3 + $0x18c] ss:$16 sps:$4 sm:$0xff]  }
  0xc2   :  { %1174 = vmatprep.mubr.bf16.mxu0 %v7271_v24  ;;  %1294 = vmatprep.mubr.bf16.mxu1 %v7391_v4  ;;  %v7405_v24 = vld [vmem:[#allocation8 + $0x70] sm:$0xff]   ;;  %v230_v4 = vld [vmem:[%s9348_s2] sm:$0x3] }
  0xc3   :  { %1895 = vmatprep.subr.bf16.mxu1 %v7512_v35 }
  0xc4   :  { %1896 = vmatpush1.bf16.msra.mxu1 %v7405_v24 }
  0xc5   :  { %1897 = vmatprep.subr.bf16.mxu1 %v7512_v35  ;;  %v7354_v35 = vld [vmem:[#allocation3 + $0x22c] ss:$16 sps:$4 sm:$0xff]  }
  0xc8   :  { %1898 = vmatpush1.bf16.msra.mxu1 %v7406_v25 }
  0xc9   :  { %1175 = vmatmul.mubr.bf16.gmra.mrb[40].mxu0 %v7273_v27  ;;  %1295 = vmatmul.mubr.bf16.gmra.mrb[40].mxu1 %v7394_v5  ;;  %v7328_v27 = vld [vmem:[#allocation3 + $0x1ac] ss:$16 sps:$4 sm:$0xff]   ;;  %v7651_v5 = vsub.s32 1, %v7638_v0 }
  0xca   :  { %1184 = vmatprep.mubr.bf16.mxu0 %v7277_v28  ;;  %1304 = vmatprep.mubr.bf16.mxu1 %v7399_v10  ;;  %v7330_v28 = vld [vmem:[#allocation3 + $0x1a8] ss:$16 sps:$4 sm:$0xff]  }
  0xcb   :  { %9384 = vst [vmem:[#allocation15_spill] sm:$0xff] %v7651_v5  ;;  %v7663_v10 = vrot.slane %v230_v4, %v7651_v5 }
  0xd1   :  { %1185 = vmatmul.mubr.bf16.gmra.mrb[44].mxu0 %v7279_v31  ;;  %1305 = vmatmul.mubr.bf16.gmra.mrb[44].mxu1 %v7401_v11  ;;  %v7340_v31 = vld [vmem:[#allocation3 + $0x1ec] ss:$16 sps:$4 sm:$0xff]  }
  0xd2   :  { %1347 = vmatprep.mubr.bf16.mxu0 %v7285_v32  ;;  %v7342_v32 = vld [vmem:[#allocation3 + $0x1e8] ss:$16 sps:$4 sm:$0xff]  }
  0xd9   :  { %1348 = vmatmul.mubr.bf16.vlgmr.msra.gmra.mrb[0].mxu0 %v7283_v37  ;;  %v7361_v37 = vld [vmem:[#allocation3 + $0x24c] ss:$16 sps:$4 sm:$0xff]  }
  0xda   :  { %1357 = vmatprep.mubr.bf16.mxu0 %v7286_v38  ;;  %v7363_v38 = vld [vmem:[#allocation3 + $0x248] ss:$16 sps:$4 sm:$0xff]  }
  0xe1   :  { %1358 = vmatmul.mubr.bf16.gmra.mrb[4].mxu0 %v7288_v42  ;;  %v7382_v42 = vld [vmem:[#allocation3 + $0x288] ss:$16 sps:$4 sm:$0xff]  }
  0xe2   :  { %1367 = vmatprep.mubr.bf16.mxu0 %v7289_v43  ;;  %v7387_v43 = vld [vmem:[#allocation3 + $0x2ac] ss:$16 sps:$4 sm:$0xff]  }
  0xe9   :  { %1368 = vmatmul.mubr.bf16.gmra.mrb[8].mxu0 %v7291_v47  ;;  %v7402_v47 = vld [vmem:[#allocation3 + $0x2ec] ss:$16 sps:$4 sm:$0xff]  }
  0xea   :  { %1377 = vmatprep.mubr.bf16.mxu0 %v7292_v48 }
  0xf1   :  { %1378 = vmatmul.mubr.bf16.gmra.mrb[12].mxu0 %v7294_v53 }
  0xf2   :  { %1387 = vmatprep.mubr.bf16.mxu0 %v7295_v54 }
  0xf9   :  { %1388 = vmatmul.mubr.bf16.gmra.mrb[16].mxu0 %v7297_v59 }
  0xfa   :  { %1397 = vmatprep.mubr.bf16.mxu0 %v7298_v60 }
 0x101   :  { %1398 = vmatmul.mubr.bf16.gmra.mrb[20].mxu0 %v7300_v1 }
 0x102   :  { %1407 = vmatprep.mubr.bf16.mxu0 %v7301_v2 }
 0x109   :  { %1408 = vmatmul.mubr.bf16.gmra.mrb[24].mxu0 %v7303_v7 }
 0x10a   :  { %1417 = vmatprep.mubr.bf16.mxu0 %v7304_v8  ;;  %v7658_v8 = vrot.slane %v230_v4, %v7645_v3 }
 0x111   :  { %1418 = vmatmul.mubr.bf16.gmra.mrb[28].mxu0 %v7306_v13 }
 0x112   :  { %1427 = vmatprep.mubr.bf16.mxu0 %v7307_v14 }
 0x119   :  { %1428 = vmatmul.mubr.bf16.gmra.mrb[32].mxu0 %v7309_v16 }
 0x11a   :  { %1437 = vmatprep.mubr.bf16.mxu0 %v7310_v17 }
 0x121   :  { %1438 = vmatmul.mubr.bf16.gmra.mrb[36].mxu0 %v7312_v18 }
 0x122   :  { %1447 = vmatprep.mubr.bf16.mxu0 %v7313_v19 }
 0x129   :  { %1448 = vmatmul.mubr.bf16.gmra.mrb[40].mxu0 %v7315_v20 }
 0x12a   :  { %1457 = vmatprep.mubr.bf16.mxu0 %v7316_v21 }
 0x131   :  { %1458 = vmatmul.mubr.bf16.gmra.mrb[44].mxu0 %v7318_v22 }
 0x132   :  { %1467 = vmatprep.mubr.bf16.mxu0 %v7322_v23 }
 0x139   :  { %1468 = vmatmul.mubr.bf16.gmra.mrb[48].mxu0 %v7324_v26 }
 0x13a   :  { %1477 = vmatprep.mubr.bf16.mxu0 %v7328_v27 }
 0x141   :  { %1478 = vmatmul.mubr.bf16.gmra.mrb[52].mxu0 %v7330_v28 }
 0x142   :  { %1487 = vmatprep.mubr.bf16.mxu0 %v7334_v29 }
 0x149   :  { %1488 = vmatmul.mubr.bf16.gmra.mrb[56].mxu0 %v7336_v30 }
 0x14a   :  { %1497 = vmatprep.mubr.bf16.mxu0 %v7340_v31 }
 0x14c   :  { %v7609_v48 = vpop.f32.mrb[0].mxu1 }
 0x14d   :  { %v7611_v49 = vpop.f32.mrb[1].mxu1 }
 0x14e   :  { %v7613_v50 = vpop.f32.mrb[2].mxu1 }
 0x14f   :  { %v7615_v51 = vpop.f32.mrb[3].mxu1 }
 0x151   :  { %1498 = vmatmul.mubr.bf16.gmra.mrb[60].mxu0 %v7342_v32 }
 0x152   :  { %1507 = vmatprep.mubr.bf16.mxu0 %v7346_v33 }
 0x154   :  { %v7617_v53 = vpop.f32.mrb[4].mxu1 }
 0x155   :  { %v7619_v54 = vpop.f32.mrb[5].mxu1 }
 0x156   :  { %v7621_v55 = vpop.f32.mrb[6].mxu1 }
 0x157   :  { %v7623_v56 = vpop.f32.mrb[7].mxu1 }
 0x159   :  { %1508 = vmatmul.mubr.bf16.gmra.mrb[64].mxu0 %v7349_v34 }
 0x15a   :  { %1517 = vmatprep.mubr.bf16.mxu0 %v7354_v35 }
 0x15c   :  { %v7625_v57 = vpop.f32.mrb[8].mxu1 }
 0x15d   :  { %v7627_v58 = vpop.f32.mrb[9].mxu1 }
 0x15e   :  { %v7629_v59 = vpop.f32.mrb[10].mxu1 }
 0x15f   :  { %v7631_v60 = vpop.f32.mrb[11].mxu1 }
 0x161   :  { %1518 = vmatmul.mubr.bf16.gmra.mrb[68].mxu0 %v7356_v36 }
 0x162   :  { %1527 = vmatprep.mubr.bf16.mxu0 %v7361_v37 }
 0x164   :  { %v7633_v62 = vpop.f32.mrb[12].mxu1 }
 0x165   :  { %v7635_v63 = vpop.f32.mrb[13].mxu1 }
 0x166   :  { %v7640_v1 = vpop.f32.mrb[14].mxu1 }
 0x167   :  { %v7642_v2 = vpop.f32.mrb[15].mxu1 }
 0x169   :  { %1528 = vmatmul.mubr.bf16.gmra.mrb[72].mxu0 %v7363_v38 }
 0x16a   :  { %1537 = vmatprep.mubr.bf16.mxu0 %v7368_v39 }
 0x16c   :  { %v7653_v6 = vpop.f32.mrb[16].mxu1 }
 0x16d   :  { %v7655_v7 = vpop.f32.mrb[17].mxu1 }
 0x16e   :  { %v7660_v9 = vpop.f32.mrb[18].mxu1 }
 0x16f   :  { %v7665_v11 = vpop.f32.mrb[19].mxu1 }
 0x171   :  { %1538 = vmatmul.mubr.bf16.gmra.mrb[76].mxu0 %v7371_v40 }
 0x172   :  { %1547 = vmatprep.mubr.bf16.mxu0 %v7380_v41 }
 0x174   :  { %v7670_v19 = vpop.f32.mrb[20].mxu1 }
 0x175   :  { %v7673_v21 = vpop.f32.mrb[21].mxu1 }
 0x176   :  { %v7675_v24 = vpop.f32.mrb[22].mxu1 }
 0x177   :  { %v7677_v27 = vpop.f32.mrb[23].mxu1 }
 0x179   :  { %1548 = vmatmul.mubr.bf16.gmra.mrb[80].mxu0 %v7382_v42 }
 0x17a   :  { %1557 = vmatprep.mubr.bf16.mxu0 %v7387_v43 }
 0x17c   :  { %v7682_v37 = vpop.f32.mrb[24].mxu1 }
 0x17d   :  { %v7685_v39 = vpop.f32.mrb[25].mxu1 }
 0x17e   :  { %v7687_v42 = vpop.f32.mrb[26].mxu1 }
 0x181   :  { %1558 = vmatmul.mubr.bf16.gmra.mrb[84].mxu0 %v7390_v44 }
 0x182   :  { %1567 = vmatprep.mubr.bf16.mxu0 %v7395_v45  ;;  %v7689_v45 = vpop.f32.mrb[27].mxu1 }
 0x189   :  { %1568 = vmatmul.mubr.bf16.gmra.mrb[88].mxu0 %v7397_v46 }
 0x18a   :  { %1577 = vmatprep.mubr.bf16.mxu0 %v7402_v47 }
 0x191   :  { %1578 = vmatmul.mubr.bf16.gmra.mrb[92].mxu0 %v7404_v52 }
 0x1ac   :  { %v1349_v12 = vpop.f32.mrb[0].mxu0 }
 0x1ad   :  { %v6945_v13 = vadd.f32 %v1349_v12, %v7658_v8  ;;  %v1351_v14 = vpop.f32.mrb[1].mxu0 }
 0x1ae   :  { %v6946_v15 = vadd.f32 %v1351_v14, %v7663_v10  ;;  %v1353_v16 = vpop.f32.mrb[2].mxu0 }
 0x1af   :  { %v6947_v17 = vadd.f32 %v1353_v16, %v7658_v8  ;;  %v1355_v18 = vpop.f32.mrb[3].mxu0  ;;  %v1588_v22 = vmax.f32 %v6945_v13, 0.0 }
 0x1b0   :  { %v6948_v20 = vadd.f32 %v1355_v18, %v7663_v10  ;;  %v1589_v25 = vmax.f32 %v6946_v15, 0.0 }
 0x1b1   :  { %v1590_v23 = vmax.f32 %v6947_v17, 0.0  ;;  %v7694_v17 = vpop.f32.mrb[28].mxu1 }
 0x1b2   :  { %v1591_v26 = vmax.f32 %v6948_v20, 0.0  ;;  %v7697_v20 = vpop.f32.mrb[29].mxu1 }
 0x1b3   :  { %v1684_v28 = vpack.c.bf16 %v1590_v23, %v1588_v22 }
 0x1b4   :  { %v1685_v29 = vpack.c.bf16 %v1591_v26, %v1589_v25  ;;  %v1359_v30 = vpop.f32.mrb[4].mxu0  ;;  %v7699_v25 = vpop.f32.mrb[30].mxu1 }
 0x1b5   :  { %v6949_v31 = vadd.f32 %v1359_v30, %v7658_v8  ;;  %v1361_v32 = vpop.f32.mrb[5].mxu0 }
 0x1b6   :  { %v6950_v33 = vadd.f32 %v1361_v32, %v7663_v10  ;;  %v1363_v34 = vpop.f32.mrb[6].mxu0  ;;  %1899 = vmatprep.mubr.bf16.mxu1 %v1685_v29  ;;  %v7701_v29 = vpop.f32.mrb[31].mxu1 }
 0x1b7   :  { %v6951_v35 = vadd.f32 %v1363_v34, %v7658_v8  ;;  %v1365_v36 = vpop.f32.mrb[7].mxu0  ;;  %1900 = vmatmul.mubr.bf16.vlgmr.msra.gmra.mrb[48].mxu1 %v1684_v28  ;;  %v1592_v40 = vmax.f32 %v6949_v31, 0.0 }
 0x1b8   :  { %v6952_v38 = vadd.f32 %v1365_v36, %v7663_v10  ;;  %v1593_v43 = vmax.f32 %v6950_v33, 0.0 }
 0x1b9   :  { %v1594_v41 = vmax.f32 %v6951_v35, 0.0 }
 0x1ba   :  { %v1595_v44 = vmax.f32 %v6952_v38, 0.0 }
 0x1bb   :  { %v1686_v46 = vpack.c.bf16 %v1594_v41, %v1592_v40 }
 0x1bc   :  { %v1687_v47 = vpack.c.bf16 %v1595_v44, %v1593_v43  ;;  %v1369_v52 = vpop.f32.mrb[8].mxu0 }
 0x1bd   :  { %v6953_v4 = vadd.f32 %v1369_v52, %v7658_v8  ;;  %v1371_v12 = vpop.f32.mrb[9].mxu0 }
 0x1be   :  { %v6954_v13 = vadd.f32 %v1371_v12, %v7663_v10  ;;  %v1373_v14 = vpop.f32.mrb[10].mxu0  ;;  %1907 = vmatprep.mubr.bf16.mxu1 %v1687_v47 }
 0x1bf   :  { %v6955_v15 = vadd.f32 %v1373_v14, %v7658_v8  ;;  %v1375_v16 = vpop.f32.mrb[11].mxu0  ;;  %1908 = vmatmul.mubr.bf16.gmra.mrb[52].mxu1 %v1686_v46  ;;  %v1596_v22 = vmax.f32 %v6953_v4, 0.0 }
 0x1c0   :  { %v6956_v18 = vadd.f32 %v1375_v16, %v7663_v10  ;;  %v1597_v26 = vmax.f32 %v6954_v13, 0.0 }
 0x1c1   :  { %v1598_v23 = vmax.f32 %v6955_v15, 0.0 }
 0x1c2   :  { %v1599_v28 = vmax.f32 %v6956_v18, 0.0 }
 0x1c3   :  { %v1688_v30 = vpack.c.bf16 %v1598_v23, %v1596_v22  ;;  %v7710_v23 = vpop.f32.mrb[32].mxu1 }
 0x1c4   :  { %v1689_v31 = vpack.c.bf16 %v1599_v28, %v1597_v26  ;;  %v1379_v32 = vpop.f32.mrb[12].mxu0  ;;  %v7713_v28 = vpop.f32.mrb[33].mxu1 }
 0x1c5   :  { %v6957_v33 = vadd.f32 %v1379_v32, %v7658_v8  ;;  %v1381_v34 = vpop.f32.mrb[13].mxu0  ;;  %v7715_v32 = vpop.f32.mrb[34].mxu1 }
 0x1c6   :  { %v6958_v35 = vadd.f32 %v1381_v34, %v7663_v10  ;;  %v1383_v36 = vpop.f32.mrb[14].mxu0  ;;  %1915 = vmatprep.mubr.bf16.mxu1 %v1689_v31 }
 0x1c7   :  { %v6959_v38 = vadd.f32 %v1383_v36, %v7658_v8  ;;  %v1385_v40 = vpop.f32.mrb[15].mxu0  ;;  %1916 = vmatmul.mubr.bf16.gmra.mrb[56].mxu1 %v1688_v30  ;;  %v1600_v43 = vmax.f32 %v6957_v33, 0.0 }
 0x1c8   :  { %v6960_v41 = vadd.f32 %v1385_v40, %v7663_v10  ;;  %v1601_v46 = vmax.f32 %v6958_v35, 0.0  ;;  %v7717_v35 = vpop.f32.mrb[35].mxu1 }
 0x1c9   :  { %v1602_v44 = vmax.f32 %v6959_v38, 0.0 }
 0x1ca   :  { %v1603_v47 = vmax.f32 %v6960_v41, 0.0  ;;  %v7719_v41 = vpop.f32.mrb[36].mxu1 }
 0x1cb   :  { %v1690_v52 = vpack.c.bf16 %v1602_v44, %v1600_v43 }
 0x1cc   :  { %v1691_v4 = vpack.c.bf16 %v1603_v47, %v1601_v46  ;;  %v1389_v12 = vpop.f32.mrb[16].mxu0  ;;  %v7722_v46 = vpop.f32.mrb[37].mxu1 }
 0x1cd   :  { %v6961_v13 = vadd.f32 %v1389_v12, %v7658_v8  ;;  %v1391_v14 = vpop.f32.mrb[17].mxu0 }
 0x1ce   :  { %v6962_v15 = vadd.f32 %v1391_v14, %v7663_v10  ;;  %v1393_v16 = vpop.f32.mrb[18].mxu0  ;;  %1923 = vmatprep.mubr.bf16.mxu1 %v1691_v4  ;;  %v7725_v4 = vpop.f32.mrb[38].mxu1 }
 0x1cf   :  { %v6963_v18 = vadd.f32 %v1393_v16, %v7658_v8  ;;  %v1395_v22 = vpop.f32.mrb[19].mxu0  ;;  %1924 = vmatmul.mubr.bf16.gmra.mrb[60].mxu1 %v1690_v52  ;;  %v1604_v30 = vmax.f32 %v6961_v13, 0.0  ;;  %v7728_v14 = vpop.f32.mrb[39].mxu1 }
 0x1d0   :  { %v6964_v26 = vadd.f32 %v1395_v22, %v7663_v10  ;;  %v1605_v33 = vmax.f32 %v6962_v15, 0.0 }
 0x1d1   :  { %v1606_v31 = vmax.f32 %v6963_v18, 0.0 }
 0x1d2   :  { %v1607_v34 = vmax.f32 %v6964_v26, 0.0 }
 0x1d3   :  { %v1692_v36 = vpack.c.bf16 %v1606_v31, %v1604_v30 }
 0x1d4   :  { %v1693_v38 = vpack.c.bf16 %v1607_v34, %v1605_v33  ;;  %v1399_v40 = vpop.f32.mrb[20].mxu0  ;;  %v7731_v34 = vpop.f32.mrb[40].mxu1 }
 0x1d5   :  { %v6965_v43 = vadd.f32 %v1399_v40, %v7658_v8  ;;  %v1401_v44 = vpop.f32.mrb[21].mxu0 }
 0x1d6   :  { %v6966_v47 = vadd.f32 %v1401_v44, %v7663_v10  ;;  %v1403_v52 = vpop.f32.mrb[22].mxu0  ;;  %1931 = vmatprep.mubr.bf16.mxu1 %v1693_v38  ;;  %v7734_v44 = vpop.f32.mrb[41].mxu1 }
 0x1d7   :  { %v6967_v12 = vadd.f32 %v1403_v52, %v7658_v8  ;;  %v1405_v13 = vpop.f32.mrb[23].mxu0  ;;  %1932 = vmatmul.mubr.bf16.gmra.mrb[64].mxu1 %v1692_v36  ;;  %v1608_v16 = vmax.f32 %v6965_v43, 0.0  ;;  %v7737_v61 = vpop.f32.mrb[42].mxu1 }
 0x1d8   :  { %v6968_v15 = vadd.f32 %v1405_v13, %v7663_v10  ;;  %v1609_v22 = vmax.f32 %v6966_v47, 0.0 }
 0x1d9   :  { %v1610_v18 = vmax.f32 %v6967_v12, 0.0  ;;  %v7740_v12 = vpop.f32.mrb[43].mxu1 }
 0x1da   :  { %v1611_v26 = vmax.f32 %v6968_v15, 0.0  ;;  %9385 = vst [vmem:[#allocation16_spill] sm:$0xff] %v7740_v12 }
 0x1db   :  { %v1694_v30 = vpack.c.bf16 %v1610_v18, %v1608_v16 }
 0x1dc   :  { %v1695_v31 = vpack.c.bf16 %v1611_v26, %v1609_v22  ;;  %v1409_v33 = vpop.f32.mrb[24].mxu0 }
 0x1dd   :  { %v6969_v38 = vadd.f32 %v1409_v33, %v7658_v8  ;;  %v1411_v40 = vpop.f32.mrb[25].mxu0 }
 0x1de   :  { %v6970_v36 = vadd.f32 %v1411_v40, %v7663_v10  ;;  %v1413_v52 = vpop.f32.mrb[26].mxu0  ;;  %1939 = vmatprep.mubr.bf16.mxu1 %v1695_v31  ;;  %v7743_v40 = vpop.f32.mrb[44].mxu1 }
 0x1df   :  { %v6971_v43 = vadd.f32 %v1413_v52, %v7658_v8  ;;  %v1415_v47 = vpop.f32.mrb[27].mxu0  ;;  %1940 = vmatmul.mubr.bf16.gmra.mrb[68].mxu1 %v1694_v30  ;;  %v1612_v15 = vmax.f32 %v6969_v38, 0.0  ;;  %9386 = vst [vmem:[#allocation17_spill] sm:$0xff] %v7743_v40  ;;  %v7746_v0 = vpop.f32.mrb[45].mxu1 }
 0x1e0   :  { %v6972_v13 = vadd.f32 %v1415_v47, %v7663_v10  ;;  %v1613_v18 = vmax.f32 %v6970_v36, 0.0  ;;  %9387 = vst [vmem:[#allocation18_spill] sm:$0xff] %v7746_v0  ;;  %v7749_v12 = vpop.f32.mrb[46].mxu1 }
 0x1e1   :  { %v1614_v16 = vmax.f32 %v6971_v43, 0.0  ;;  %9388 = vst [vmem:[#allocation19_spill] sm:$0xff] %v7749_v12  ;;  %v7752_v43 = vpop.f32.mrb[47].mxu1 }
 0x1e2   :  { %v1615_v22 = vmax.f32 %v6972_v13, 0.0  ;;  %9389 = vst [vmem:[#allocation20_spill] sm:$0xff] %v7752_v43 }
 0x1e3   :  { %v1696_v26 = vpack.c.bf16 %v1614_v16, %v1612_v15 }
 0x1e4   :  { %v1697_v33 = vpack.c.bf16 %v1615_v22, %v1613_v18  ;;  %v1419_v5 = vpop.f32.mrb[28].mxu0 }
 0x1e5   :  { %v6973_v31 = vadd.f32 %v1419_v5, %v7658_v8  ;;  %v1421_v3 = vpop.f32.mrb[29].mxu0 }
 0x1e6   :  { %v6974_v30 = vadd.f32 %v1421_v3, %v7663_v10  ;;  %v1423_v52 = vpop.f32.mrb[30].mxu0  ;;  %1947 = vmatprep.mubr.bf16.mxu1 %v1697_v33 }
 0x1e7   :  { %v6975_v38 = vadd.f32 %v1423_v52, %v7658_v8  ;;  %v1425_v36 = vpop.f32.mrb[31].mxu0  ;;  %1948 = vmatmul.mubr.bf16.gmra.mrb[72].mxu1 %v1696_v26  ;;  %v1616_v13 = vmax.f32 %v6973_v31, 0.0 }
 0x1e8   :  { %v6976_v47 = vadd.f32 %v1425_v36, %v7663_v10  ;;  %v1617_v5 = vmax.f32 %v6974_v30, 0.0 }
 0x1e9   :  { %v1618_v15 = vmax.f32 %v6975_v38, 0.0 }
 0x1ea   :  { %v1619_v16 = vmax.f32 %v6976_v47, 0.0 }
 0x1eb   :  { %v1698_v18 = vpack.c.bf16 %v1618_v15, %v1616_v13 }
 0x1ec   :  { %v1699_v22 = vpack.c.bf16 %v1619_v16, %v1617_v5  ;;  %v1429_v0 = vpop.f32.mrb[32].mxu0 }
 0x1ed   :  { %v6977_v3 = vadd.f32 %v1429_v0, %v7658_v8  ;;  %v1431_v33 = vpop.f32.mrb[33].mxu0 }
 0x1ee   :  { %v6978_v12 = vadd.f32 %v1431_v33, %v7663_v10  ;;  %v1433_v40 = vpop.f32.mrb[34].mxu0  ;;  %1955 = vmatprep.mubr.bf16.mxu1 %v1699_v22 }
 0x1ef   :  { %v6979_v26 = vadd.f32 %v1433_v40, %v7658_v8  ;;  %v1435_v52 = vpop.f32.mrb[35].mxu0  ;;  %1956 = vmatmul.mubr.bf16.gmra.mrb[76].mxu1 %v1698_v18  ;;  %v1620_v31 = vmax.f32 %v6977_v3, 0.0 }
 0x1f0   :  { %v6980_v36 = vadd.f32 %v1435_v52, %v7663_v10  ;;  %v1621_v30 = vmax.f32 %v6978_v12, 0.0 }
 0x1f1   :  { %v1622_v38 = vmax.f32 %v6979_v26, 0.0 }
 0x1f2   :  { %v1623_v47 = vmax.f32 %v6980_v36, 0.0 }
 0x1f3   :  { %v1700_v13 = vpack.c.bf16 %v1622_v38, %v1620_v31 }
 0x1f4   :  { %v1701_v15 = vpack.c.bf16 %v1623_v47, %v1621_v30  ;;  %v1439_v5 = vpop.f32.mrb[36].mxu0 }
 0x1f5   :  { %v6981_v0 = vadd.f32 %v1439_v5, %v7658_v8  ;;  %v1441_v16 = vpop.f32.mrb[37].mxu0 }
 0x1f6   :  { %v6982_v33 = vadd.f32 %v1441_v16, %v7663_v10  ;;  %v1443_v43 = vpop.f32.mrb[38].mxu0  ;;  %1963 = vmatprep.mubr.bf16.mxu1 %v1701_v15 }
 0x1f7   :  { %v6983_v40 = vadd.f32 %v1443_v43, %v7658_v8  ;;  %v1445_v22 = vpop.f32.mrb[39].mxu0  ;;  %1964 = vmatmul.mubr.bf16.gmra.mrb[80].mxu1 %v1700_v13  ;;  %v1624_v3 = vmax.f32 %v6981_v0, 0.0 }
 0x1f8   :  { %v6984_v18 = vadd.f32 %v1445_v22, %v7663_v10  ;;  %v1625_v12 = vmax.f32 %v6982_v33, 0.0 }
 0x1f9   :  { %v1626_v26 = vmax.f32 %v6983_v40, 0.0 }
 0x1fa   :  { %v1627_v52 = vmax.f32 %v6984_v18, 0.0 }
 0x1fb   :  { %v1702_v36 = vpack.c.bf16 %v1626_v26, %v1624_v3 }
 0x1fc   :  { %v1703_v31 = vpack.c.bf16 %v1627_v52, %v1625_v12  ;;  %v1449_v38 = vpop.f32.mrb[40].mxu0 }
 0x1fd   :  { %v6985_v30 = vadd.f32 %v1449_v38, %v7658_v8  ;;  %v1451_v47 = vpop.f32.mrb[41].mxu0 }
 0x1fe   :  { %v6986_v5 = vadd.f32 %v1451_v47, %v7663_v10  ;;  %v1453_v16 = vpop.f32.mrb[42].mxu0  ;;  %1971 = vmatprep.mubr.bf16.mxu1 %v1703_v31 }
 0x1ff   :  { %v6987_v43 = vadd.f32 %v1453_v16, %v7658_v8  ;;  %v1455_v15 = vpop.f32.mrb[43].mxu0  ;;  %1972 = vmatmul.mubr.bf16.gmra.mrb[84].mxu1 %v1702_v36  ;;  %v1628_v0 = vmax.f32 %v6985_v30, 0.0 }
 0x200   :  { %v6988_v13 = vadd.f32 %v1455_v15, %v7663_v10  ;;  %v1629_v33 = vmax.f32 %v6986_v5, 0.0  ;;  %v1197_v5 = vadd.f32 %v7609_v48, %v7658_v8 }
 0x201   :  { %v1630_v40 = vmax.f32 %v6987_v43, 0.0 }
 0x202   :  { %v1631_v22 = vmax.f32 %v6988_v13, 0.0 }
 0x203   :  { %v1704_v18 = vpack.c.bf16 %v1630_v40, %v1628_v0  ;;  %v1199_v0 = vadd.f32 %v7611_v49, %v7663_v10 }
 0x204   :  { %v1705_v3 = vpack.c.bf16 %v1631_v22, %v1629_v33  ;;  %v1459_v26 = vpop.f32.mrb[44].mxu0 }
 0x205   :  { %v6989_v12 = vadd.f32 %v1459_v26, %v7658_v8  ;;  %v1461_v52 = vpop.f32.mrb[45].mxu0 }
 0x206   :  { %v6990_v38 = vadd.f32 %v1461_v52, %v7663_v10  ;;  %v1463_v47 = vpop.f32.mrb[46].mxu0  ;;  %1979 = vmatprep.mubr.bf16.mxu1 %v1705_v3  ;;  %v1201_v3 = vadd.f32 %v7613_v50, %v7658_v8  ;;  %v1209_v50 = vadd.f32 %v7619_v54, %v7663_v10 }
 0x207   :  { %v6991_v31 = vadd.f32 %v1463_v47, %v7658_v8  ;;  %v1465_v16 = vpop.f32.mrb[47].mxu0  ;;  %1980 = vmatmul.mubr.bf16.gmra.mrb[88].mxu1 %v1704_v18  ;;  %v1632_v30 = vmax.f32 %v6989_v12, 0.0  ;;  %v1203_v12 = vadd.f32 %v7615_v51, %v7663_v10 }
 0x208   :  { %v6992_v36 = vadd.f32 %v1465_v16, %v7663_v10  ;;  %v1633_v15 = vmax.f32 %v6990_v38, 0.0 }
 0x209   :  { %v1634_v43 = vmax.f32 %v6991_v31, 0.0 }
 0x20a   :  { %v1635_v13 = vmax.f32 %v6992_v36, 0.0  ;;  %v1207_v36 = vadd.f32 %v7617_v53, %v7658_v8 }
 0x20b   :  { %v1706_v40 = vpack.c.bf16 %v1634_v43, %v1632_v30 }
 0x20c   :  { %v1707_v33 = vpack.c.bf16 %v1635_v13, %v1633_v15  ;;  %v1469_v22 = vpop.f32.mrb[48].mxu0  ;;  %v1211_v13 = vadd.f32 %v7621_v55, %v7658_v8  ;;  %v1219_v55 = vadd.f32 %v7627_v58, %v7663_v10 }
 0x20d   :  { %v1470_v26 = vadd.f32 %v1469_v22, %v1197_v5  ;;  %v1471_v18 = vpop.f32.mrb[49].mxu0 }
 0x20e   :  { %v1472_v52 = vadd.f32 %v1471_v18, %v1199_v0  ;;  %v1473_v47 = vpop.f32.mrb[50].mxu0  ;;  %1987 = vmatprep.mubr.bf16.mxu1 %v1707_v33 }
 0x20f   :  { %v1474_v48 = vadd.f32 %v1473_v47, %v1201_v3  ;;  %v1475_v38 = vpop.f32.mrb[51].mxu0  ;;  %1988 = vmatmul.mubr.bf16.gmra.mrb[92].mxu1 %v1706_v40  ;;  %v1636_v16 = vmax.f32 %v1470_v26, 0.0  ;;  %v1213_v40 = vadd.f32 %v7623_v56, %v7663_v10 }
 0x210   :  { %v1476_v31 = vadd.f32 %v1475_v38, %v1203_v12  ;;  %v1637_v30 = vmax.f32 %v1472_v52, 0.0  ;;  %v1217_v52 = vadd.f32 %v7625_v57, %v7658_v8 }
 0x211   :  { %v1638_v49 = vmax.f32 %v1474_v48, 0.0 }
 0x212   :  { %v1639_v43 = vmax.f32 %v1476_v31, 0.0 }
 0x213   :  { %v1708_v5 = vpack.c.bf16 %v1638_v49, %v1636_v16  ;;  %v1221_v16 = vadd.f32 %v7629_v59, %v7658_v8  ;;  %v1229_v59 = vadd.f32 %v7635_v63, %v7663_v10 }
 0x214   :  { %v1709_v15 = vpack.c.bf16 %v1639_v43, %v1637_v30  ;;  %v1479_v51 = vpop.f32.mrb[52].mxu0  ;;  %v1223_v30 = vadd.f32 %v7631_v60, %v7663_v10 }
 0x215   :  { %v1480_v0 = vadd.f32 %v1479_v51, %v1207_v36  ;;  %v1481_v33 = vpop.f32.mrb[53].mxu0 }
 0x216   :  { %v1482_v22 = vadd.f32 %v1481_v33, %v1209_v50  ;;  %v1483_v3 = vpop.f32.mrb[54].mxu0  ;;  %1995 = vmatprep.mubr.bf16.mxu1 %v1709_v15 }
 0x217   :  { %v1484_v53 = vadd.f32 %v1483_v3, %v1211_v13  ;;  %v1485_v26 = vpop.f32.mrb[55].mxu0  ;;  %1996 = vmatmul.mubr.bf16.gmra.mrb[96].mxu1 %v1708_v5  ;;  %v1640_v12 = vmax.f32 %v1480_v0, 0.0  ;;  %v1227_v13 = vadd.f32 %v7633_v62, %v7658_v8  ;;  %v1231_v3 = vadd.f32 %v7640_v1, %v7658_v8 }
 0x218   :  { %v1486_v18 = vadd.f32 %v1485_v26, %v1213_v40  ;;  %v1641_v47 = vmax.f32 %v1482_v22, 0.0  ;;  %v1239_v1 = vadd.f32 %v7655_v7, %v7663_v10 }
 0x219   :  { %v1642_v54 = vmax.f32 %v1484_v53, 0.0 }
 0x21a   :  { %v1643_v48 = vmax.f32 %v1486_v18, 0.0  ;;  %v1233_v18 = vadd.f32 %v7642_v2, %v7663_v10 }
 0x21b   :  { %v1710_v38 = vpack.c.bf16 %v1642_v54, %v1640_v12 }
 0x21c   :  { %v1711_v31 = vpack.c.bf16 %v1643_v48, %v1641_v47  ;;  %v1489_v56 = vpop.f32.mrb[56].mxu0 }
 0x21d   :  { %v1490_v49 = vadd.f32 %v1489_v56, %v1217_v52  ;;  %v1491_v36 = vpop.f32.mrb[57].mxu0 }
 0x21e   :  { %v1492_v43 = vadd.f32 %v1491_v36, %v1219_v55  ;;  %v1493_v50 = vpop.f32.mrb[58].mxu0  ;;  %2003 = vmatprep.mubr.bf16.mxu1 %v1711_v31  ;;  %v1237_v55 = vadd.f32 %v7653_v6, %v7658_v8 }
 0x21f   :  { %v1494_v57 = vadd.f32 %v1493_v50, %v1221_v16  ;;  %v1495_v5 = vpop.f32.mrb[59].mxu0  ;;  %2004 = vmatmul.mubr.bf16.gmra.mrb[100].mxu1 %v1710_v38  ;;  %v1644_v51 = vmax.f32 %v1490_v49, 0.0  ;;  %v1241_v49 = vadd.f32 %v7660_v9, %v7658_v8  ;;  %v1249_v9 = vadd.f32 %v7673_v21, %v7663_v10 }
 0x220   :  { %v1496_v15 = vadd.f32 %v1495_v5, %v1223_v30  ;;  %v1645_v0 = vmax.f32 %v1492_v43, 0.0  ;;  %v1243_v43 = vadd.f32 %v7665_v11, %v7663_v10 }
 0x221   :  { %v1646_v58 = vmax.f32 %v1494_v57, 0.0 }
 0x222   :  { %v1647_v33 = vmax.f32 %v1496_v15, 0.0 }
 0x223   :  { %v1712_v40 = vpack.c.bf16 %v1646_v58, %v1644_v51  ;;  %v1247_v58 = vadd.f32 %v7670_v19, %v7658_v8 }
 0x224   :  { %v1713_v22 = vpack.c.bf16 %v1647_v33, %v1645_v0  ;;  %v1499_v60 = vpop.f32.mrb[60].mxu0 }
 0x225   :  { %v1500_v53 = vadd.f32 %v1499_v60, %v1227_v13  ;;  %v1501_v26 = vpop.f32.mrb[61].mxu0 }
 0x226   :  { %v1502_v12 = vadd.f32 %v1501_v26, %v1229_v59  ;;  %v1503_v54 = vpop.f32.mrb[62].mxu0  ;;  %2011 = vmatprep.mubr.bf16.mxu1 %v1713_v22 }
 0x227   :  { %v1504_v62 = vadd.f32 %v1503_v54, %v1231_v3  ;;  %v1505_v52 = vpop.f32.mrb[63].mxu0  ;;  %2012 = vmatmul.mubr.bf16.gmra.mrb[104].mxu1 %v1712_v40  ;;  %v1648_v48 = vmax.f32 %v1500_v53, 0.0  ;;  %v1251_v40 = vadd.f32 %v7675_v24, %v7658_v8  ;;  %v1253_v3 = vadd.f32 %v7677_v27, %v7663_v10 }
 0x228   :  { %v1506_v47 = vadd.f32 %v1505_v52, %v1233_v18  ;;  %v1649_v38 = vmax.f32 %v1502_v12, 0.0  ;;  %v1259_v24 = vadd.f32 %v7685_v39, %v7663_v10 }
 0x229   :  { %v1650_v63 = vmax.f32 %v1504_v62, 0.0  ;;  %v1257_v62 = vadd.f32 %v7682_v37, %v7658_v8 }
 0x22a   :  { %v1651_v31 = vmax.f32 %v1506_v47, 0.0 }
 0x22b   :  { %v1714_v56 = vpack.c.bf16 %v1650_v63, %v1648_v48 }
 0x22c   :  { %v1715_v16 = vpack.c.bf16 %v1651_v31, %v1649_v38  ;;  %v1509_v2 = vpop.f32.mrb[64].mxu0 }
 0x22d   :  { %v1510_v36 = vadd.f32 %v1509_v2, %v1237_v55  ;;  %v1511_v30 = vpop.f32.mrb[65].mxu0  ;;  %v1261_v55 = vadd.f32 %v7687_v42, %v7658_v8  ;;  %v1269_v42 = vadd.f32 %v7697_v20, %v7663_v10 }
 0x22e   :  { %v1512_v50 = vadd.f32 %v1511_v30, %v1239_v1  ;;  %v1513_v57 = vpop.f32.mrb[66].mxu0  ;;  %2019 = vmatprep.mubr.bf16.mxu1 %v1715_v16  ;;  %v1263_v1 = vadd.f32 %v7689_v45, %v7663_v10  ;;  %v1267_v30 = vadd.f32 %v7694_v17, %v7658_v8 }
 0x22f   :  { %v1514_v6 = vadd.f32 %v1513_v57, %v1241_v49  ;;  %v1515_v5 = vpop.f32.mrb[67].mxu0  ;;  %2020 = vmatmul.mubr.bf16.gmra.mrb[108].mxu1 %v1714_v56  ;;  %v1652_v51 = vmax.f32 %v1510_v36, 0.0 }
 0x230   :  { %v1516_v15 = vadd.f32 %v1515_v5, %v1243_v43  ;;  %v1653_v13 = vmax.f32 %v1512_v50, 0.0  ;;  %v1271_v5 = vadd.f32 %v7699_v25, %v7658_v8  ;;  %v1279_v25 = vadd.f32 %v7713_v28, %v7663_v10 }
 0x231   :  { %v1654_v7 = vmax.f32 %v1514_v6, 0.0 }
 0x232   :  { %v1655_v0 = vmax.f32 %v1516_v15, 0.0 }
 0x233   :  { %v1716_v33 = vpack.c.bf16 %v1654_v7, %v1652_v51  ;;  %v1273_v7 = vadd.f32 %v7701_v29, %v7663_v10  ;;  %v1281_v29 = vadd.f32 %v7715_v32, %v7658_v8  ;;  %v1287_v32 = vadd.f32 %v7719_v41, %v7658_v8 }
 0x234   :  { %v1717_v59 = vpack.c.bf16 %v1655_v0, %v1653_v13  ;;  %v1519_v11 = vpop.f32.mrb[68].mxu0 }
 0x235   :  { %v1520_v22 = vadd.f32 %v1519_v11, %v1247_v58  ;;  %v1521_v60 = vpop.f32.mrb[69].mxu0 }
 0x236   :  { %v1522_v53 = vadd.f32 %v1521_v60, %v1249_v9  ;;  %v1523_v26 = vpop.f32.mrb[70].mxu0  ;;  %2027 = vmatprep.mubr.bf16.mxu1 %v1717_v59  ;;  %v1277_v59 = vadd.f32 %v7710_v23, %v7658_v8 }
 0x237   :  { %v1524_v19 = vadd.f32 %v1523_v26, %v1251_v40  ;;  %v1525_v18 = vpop.f32.mrb[71].mxu0  ;;  %2028 = vmatmul.mubr.bf16.gmra.mrb[112].mxu1 %v1716_v33  ;;  %v1656_v54 = vmax.f32 %v1520_v22, 0.0 }
 0x238   :  { %v1526_v12 = vadd.f32 %v1525_v18, %v1253_v3  ;;  %v1657_v52 = vmax.f32 %v1522_v53, 0.0  ;;  %v1283_v53 = vadd.f32 %v7717_v35, %v7663_v10 }
 0x239   :  { %v1658_v21 = vmax.f32 %v1524_v19, 0.0 }
 0x23a   :  { %v1659_v47 = vmax.f32 %v1526_v12, 0.0 }
 0x23b   :  { %v1718_v48 = vpack.c.bf16 %v1658_v21, %v1656_v54 }
 0x23c   :  { %v1719_v63 = vpack.c.bf16 %v1659_v47, %v1657_v52  ;;  %v1529_v27 = vpop.f32.mrb[72].mxu0 }
 0x23d   :  { %v1530_v38 = vadd.f32 %v1529_v27, %v1257_v62  ;;  %v1531_v31 = vpop.f32.mrb[73].mxu0 }
 0x23e   :  { %v1532_v56 = vadd.f32 %v1531_v31, %v1259_v24  ;;  %v1533_v16 = vpop.f32.mrb[74].mxu0  ;;  %2035 = vmatprep.mubr.bf16.mxu1 %v1719_v63  ;;  %v1289_v24 = vadd.f32 %v7722_v46, %v7663_v10 }
 0x23f   :  { %v1534_v37 = vadd.f32 %v1533_v16, %v1261_v55  ;;  %v1535_v2 = vpop.f32.mrb[75].mxu0  ;;  %2036 = vmatmul.mubr.bf16.gmra.mrb[116].mxu1 %v1718_v48  ;;  %v1660_v36 = vmax.f32 %v1530_v38, 0.0  ;;  %v1291_v48 = vadd.f32 %v7725_v4, %v7658_v8  ;;  %v1293_v55 = vadd.f32 %v7728_v14, %v7663_v10 }
 0x240   :  { %v1536_v49 = vadd.f32 %v1535_v2, %v1263_v1  ;;  %v1661_v43 = vmax.f32 %v1532_v56, 0.0  ;;  %v1297_v4 = vadd.f32 %v7731_v34, %v7658_v8 }
 0x241   :  { %v1662_v39 = vmax.f32 %v1534_v37, 0.0 }
 0x242   :  { %v1663_v50 = vmax.f32 %v1536_v49, 0.0 }
 0x243   :  { %v1720_v57 = vpack.c.bf16 %v1662_v39, %v1660_v36  ;;  %v1299_v39 = vadd.f32 %v7734_v44, %v7663_v10 }
 0x244   :  { %v1721_v6 = vpack.c.bf16 %v1663_v50, %v1661_v43  ;;  %v1539_v45 = vpop.f32.mrb[76].mxu0 }
 0x245   :  { %v1540_v15 = vadd.f32 %v1539_v45, %v1267_v30  ;;  %v1541_v51 = vpop.f32.mrb[77].mxu0  ;;  %v1301_v30 = vadd.f32 %v7737_v61, %v7658_v8 }
 0x246   :  { %v1542_v58 = vadd.f32 %v1541_v51, %v1269_v42  ;;  %v1543_v13 = vpop.f32.mrb[78].mxu0  ;;  %2043 = vmatprep.mubr.bf16.mxu1 %v1721_v6  ;;  %v9390_v42 = vld [vmem:[#allocation16_spill] sm:$0xff] }
 0x247   :  { %v1544_v17 = vadd.f32 %v1543_v13, %v1271_v5  ;;  %v1545_v0 = vpop.f32.mrb[79].mxu0  ;;  %2044 = vmatmul.mubr.bf16.gmra.mrb[120].mxu1 %v1720_v57  ;;  %v1664_v33 = vmax.f32 %v1540_v15, 0.0  ;;  %v1303_v57 = vadd.f32 %v9390_v42, %v7663_v10 }
 0x248   :  { %v1546_v9 = vadd.f32 %v1545_v0, %v1273_v7  ;;  %v1665_v11 = vmax.f32 %v1542_v58, 0.0 }
 0x249   :  { %v1666_v20 = vmax.f32 %v1544_v17, 0.0  ;;  %v9391_v17 = vld [vmem:[#allocation17_spill] sm:$0xff] }
 0x24a   :  { %v1667_v40 = vmax.f32 %v1546_v9, 0.0  ;;  %v1307_v61 = vadd.f32 %v9391_v17, %v7658_v8  ;;  %v9392_v9 = vld [vmem:[#allocation18_spill] sm:$0xff] }
 0x24b   :  { %v1722_v22 = vpack.c.bf16 %v1666_v20, %v1664_v33  ;;  %v1309_v33 = vadd.f32 %v9392_v9, %v7663_v10 }
 0x24c   :  { %v1723_v60 = vpack.c.bf16 %v1667_v40, %v1665_v11  ;;  %v1549_v3 = vpop.f32.mrb[80].mxu0 }
 0x24d   :  { %v1550_v26 = vadd.f32 %v1549_v3, %v1277_v59  ;;  %v1551_v19 = vpop.f32.mrb[81].mxu0  ;;  %v9393_v59 = vld [vmem:[#allocation19_spill] sm:$0xff] }
 0x24e   :  { %2051 = vmatprep.mubr.bf16.mxu1 %v1723_v60  ;;  %v1552_v18 = vadd.f32 %v1551_v19, %v1279_v25  ;;  %v1553_v12 = vpop.f32.mrb[82].mxu0  ;;  %v1311_v11 = vadd.f32 %v9393_v59, %v7658_v8 }
 0x24f   :  { %2052 = vmatmul.mubr.bf16.gmra.mrb[124].mxu1 %v1722_v22  ;;  %v1668_v23 = vmax.f32 %v1550_v26, 0.0  ;;  %v1554_v54 = vadd.f32 %v1553_v12, %v1281_v29  ;;  %v1555_v21 = vpop.f32.mrb[83].mxu0  ;;  %v9394_v22 = vld [vmem:[#allocation20_spill] sm:$0xff] }
 0x250   :  { %v1669_v62 = vmax.f32 %v1552_v18, 0.0  ;;  %v1556_v28 = vadd.f32 %v1555_v21, %v1283_v53  ;;  %v1313_v29 = vadd.f32 %v9394_v22, %v7663_v10  ;;  %v7870_v10 = vld [vmem:[%s9350_s4] ss:$0 sm:$0xff] }
 0x251   :  { %v1670_v52 = vmax.f32 %v1554_v54, 0.0 }
 0x252   :  { %v1671_v47 = vmax.f32 %v1556_v28, 0.0 }
 0x253   :  { %v1724_v35 = vpack.c.bf16 %v1670_v52, %v1668_v23 }
 0x254   :  { %v1725_v63 = vpack.c.bf16 %v1671_v47, %v1669_v62  ;;  %v1559_v27 = vpop.f32.mrb[84].mxu0 }
 0x255   :  { %v1560_v38 = vadd.f32 %v1559_v27, %v1287_v32  ;;  %v1561_v31 = vpop.f32.mrb[85].mxu0 }
 0x256   :  { %v1562_v1 = vadd.f32 %v1561_v31, %v1289_v24  ;;  %v1563_v56 = vpop.f32.mrb[86].mxu0  ;;  %2059 = vmatprep.mubr.bf16.mxu1 %v1725_v63 }
 0x257   :  { %v1672_v16 = vmax.f32 %v1560_v38, 0.0  ;;  %v1564_v41 = vadd.f32 %v1563_v56, %v1291_v48  ;;  %v1565_v37 = vpop.f32.mrb[87].mxu0  ;;  %2060 = vmatmul.mubr.bf16.gmra.mrb[128].mxu1 %v1724_v35  ;;  %v7876_v35 = vld [vmem:[%s9351_s5] ss:$0 sm:$0xff] }
 0x258   :  { %v1673_v2 = vmax.f32 %v1562_v1, 0.0  ;;  %v1566_v46 = vadd.f32 %v1565_v37, %v1293_v55 }
 0x259   :  { %v1674_v49 = vmax.f32 %v1564_v41, 0.0 }
 0x25a   :  { %v1675_v36 = vmax.f32 %v1566_v46, 0.0 }
 0x25b   :  { %v1726_v14 = vpack.c.bf16 %v1674_v49, %v1672_v16 }
 0x25c   :  { %v1727_v43 = vpack.c.bf16 %v1675_v36, %v1673_v2  ;;  %v1569_v50 = vpop.f32.mrb[88].mxu0 }
 0x25d   :  { %v1570_v6 = vadd.f32 %v1569_v50, %v1297_v4  ;;  %v1571_v45 = vpop.f32.mrb[89].mxu0 }
 0x25e   :  { %v1572_v5 = vadd.f32 %v1571_v45, %v1299_v39  ;;  %v1573_v15 = vpop.f32.mrb[90].mxu0  ;;  %2067 = vmatprep.mubr.bf16.mxu1 %v1727_v43 }
 0x25f   :  { %v1676_v51 = vmax.f32 %v1570_v6, 0.0  ;;  %v1574_v34 = vadd.f32 %v1573_v15, %v1301_v30  ;;  %v1575_v7 = vpop.f32.mrb[91].mxu0  ;;  %2068 = vmatmul.mubr.bf16.gmra.mrb[132].mxu1 %v1726_v14 }
 0x260   :  { %v1677_v58 = vmax.f32 %v1572_v5, 0.0  ;;  %v1576_v44 = vadd.f32 %v1575_v7, %v1303_v57 }
 0x261   :  { %v1678_v13 = vmax.f32 %v1574_v34, 0.0 }
 0x262   :  { %v1679_v0 = vmax.f32 %v1576_v44, 0.0 }
 0x263   :  { %v1728_v20 = vpack.c.bf16 %v1678_v13, %v1676_v51 }
 0x264   :  { %v1729_v40 = vpack.c.bf16 %v1679_v0, %v1677_v58  ;;  %v1579_v25 = vpop.f32.mrb[92].mxu0 }
 0x265   :  { %v1580_v60 = vadd.f32 %v1579_v25, %v1307_v61  ;;  %v1581_v3 = vpop.f32.mrb[93].mxu0 }
 0x266   :  { %v1582_v53 = vadd.f32 %v1581_v3, %v1309_v33  ;;  %v1583_v26 = vpop.f32.mrb[94].mxu0  ;;  %2075 = vmatprep.mubr.bf16.mxu1 %v1729_v40 }
 0x267   :  { %v1680_v19 = vmax.f32 %v1580_v60, 0.0  ;;  %v1584_v18 = vadd.f32 %v1583_v26, %v1311_v11  ;;  %v1585_v12 = vpop.f32.mrb[95].mxu0  ;;  %2076 = vmatmul.mubr.bf16.gmra.mrb[136].mxu1 %v1728_v20 }
 0x268   :  { %v1681_v23 = vmax.f32 %v1582_v53, 0.0  ;;  %v1586_v54 = vadd.f32 %v1585_v12, %v1313_v29 }
 0x269   :  { %v1682_v21 = vmax.f32 %v1584_v18, 0.0 }
 0x26a   :  { %v1683_v62 = vmax.f32 %v1586_v54, 0.0 }
 0x26b   :  { %v1730_v28 = vpack.c.bf16 %v1682_v21, %v1680_v19 }
 0x26c   :  { %v1731_v8 = vpack.c.bf16 %v1683_v62, %v1681_v23 }
 0x26e   :  { %2083 = vmatprep.mubr.bf16.mxu1 %v1731_v8 }
 0x26f   :  { %2084 = vmatmul.mubr.bf16.gmra.mrb[140].mxu1 %v1730_v28 }
 0x28a   :  { %v1901_v52 = vpop.f32.mrb[48].mxu1 }
 0x28b   :  { %v1902_v32 = vadd.f32 %v7870_v10, %v1901_v52  ;;  %v1903_v47 = vpop.f32.mrb[49].mxu1 }
 0x28c   :  { %v1904_v24 = vpop.f32.mrb[50].mxu1 }
 0x28d   :  { %v2092_v48 = vmax.f32 %v1902_v32, 0.0  ;;  %v1905_v63 = vadd.f32 %v7870_v10, %v1904_v24  ;;  %v1906_v27 = vpop.f32.mrb[51].mxu1 }
 0x28f   :  { %v2093_v55 = vmax.f32 %v1905_v63, 0.0  ;;  %v2147_v38 = vmul.f32 %v7876_v35, %v2092_v48 }
 0x291   :  { %2195 = vadd.xlane.f32.xlu0 %v2147_v38  ;;  %v2148_v16 = vmul.f32 %v7876_v35, %v2093_v55 }
 0x292   :  { %v1909_v31 = vpop.f32.mrb[52].mxu1 }
 0x293   :  { %v1910_v1 = vadd.f32 %v7870_v10, %v1909_v31  ;;  %v1911_v56 = vpop.f32.mrb[53].mxu1 }
 0x294   :  { %v1912_v41 = vpop.f32.mrb[54].mxu1 }
 0x295   :  { %v2094_v37 = vmax.f32 %v1910_v1, 0.0  ;;  %v1913_v2 = vadd.f32 %v7870_v10, %v1912_v41  ;;  %v1914_v46 = vpop.f32.mrb[55].mxu1  ;;  %2197 = vadd.xlane.f32.xlu0 %v2148_v16 }
 0x297   :  { %v2095_v49 = vmax.f32 %v1913_v2, 0.0  ;;  %v2149_v4 = vmul.f32 %v7876_v35, %v2094_v37 }
 0x299   :  { %2199 = vadd.xlane.f32.xlu1 %v2149_v4  ;;  %v2150_v30 = vmul.f32 %v7876_v35, %v2095_v49 }
 0x29a   :  { %v1917_v36 = vpop.f32.mrb[56].mxu1 }
 0x29b   :  { %v1918_v39 = vadd.f32 %v7870_v10, %v1917_v36  ;;  %v1919_v14 = vpop.f32.mrb[57].mxu1 }
 0x29c   :  { %v1920_v43 = vpop.f32.mrb[58].mxu1 }
 0x29d   :  { %v2096_v50 = vmax.f32 %v1918_v39, 0.0  ;;  %v1921_v42 = vadd.f32 %v7870_v10, %v1920_v43  ;;  %v1922_v57 = vpop.f32.mrb[59].mxu1  ;;  %2201 = vadd.xlane.f32.xlu1 %v2150_v30 }
 0x29f   :  { %v2097_v6 = vmax.f32 %v1921_v42, 0.0  ;;  %v2151_v45 = vmul.f32 %v7876_v35, %v2096_v50 }
 0x2a1   :  { %2203 = vadd.xlane.f32.xlu0 %v2151_v45  ;;  %v2152_v5 = vmul.f32 %v7876_v35, %v2097_v6 }
 0x2a2   :  { %v1925_v15 = vpop.f32.mrb[60].mxu1 }
 0x2a3   :  { %v1926_v51 = vadd.f32 %v7870_v10, %v1925_v15  ;;  %v1927_v34 = vpop.f32.mrb[61].mxu1  ;;  %2205 = vadd.xlane.f32.xlu1 %v2152_v5 }
 0x2a4   :  { %v1928_v7 = vpop.f32.mrb[62].mxu1 }
 0x2a5   :  { %v2098_v58 = vmax.f32 %v1926_v51, 0.0  ;;  %v1929_v44 = vadd.f32 %v7870_v10, %v1928_v7  ;;  %v1930_v13 = vpop.f32.mrb[63].mxu1 }
 0x2a7   :  { %v2099_v17 = vmax.f32 %v1929_v44, 0.0  ;;  %v2153_v61 = vmul.f32 %v7876_v35, %v2098_v58 }
 0x2a9   :  { %2207 = vadd.xlane.f32.xlu0 %v2153_v61  ;;  %v2154_v0 = vmul.f32 %v7876_v35, %v2099_v17 }
 0x2aa   :  { %v1933_v9 = vpop.f32.mrb[64].mxu1 }
 0x2ab   :  { %v1934_v33 = vadd.f32 %v7870_v10, %v1933_v9  ;;  %v1935_v20 = vpop.f32.mrb[65].mxu1  ;;  %2209 = vadd.xlane.f32.xlu1 %v2154_v0 }
 0x2ac   :  { %v1936_v59 = vpop.f32.mrb[66].mxu1 }
 0x2ad   :  { %v2100_v11 = vmax.f32 %v1934_v33, 0.0  ;;  %v1937_v40 = vadd.f32 %v7870_v10, %v1936_v59  ;;  %v1938_v25 = vpop.f32.mrb[67].mxu1 }
 0x2af   :  { %v2101_v22 = vmax.f32 %v1937_v40, 0.0  ;;  %v2155_v29 = vmul.f32 %v7876_v35, %v2100_v11 }
 0x2b1   :  { %2211 = vadd.xlane.f32.xlu0 %v2155_v29  ;;  %v2156_v60 = vmul.f32 %v7876_v35, %v2101_v22 }
 0x2b2   :  { %v1941_v3 = vpop.f32.mrb[68].mxu1 }
 0x2b3   :  { %v1942_v53 = vadd.f32 %v7870_v10, %v1941_v3  ;;  %v1943_v26 = vpop.f32.mrb[69].mxu1  ;;  %2213 = vadd.xlane.f32.xlu1 %v2156_v60 }
 0x2b4   :  { %v1944_v19 = vpop.f32.mrb[70].mxu1 }
 0x2b5   :  { %v2102_v18 = vmax.f32 %v1942_v53, 0.0  ;;  %v1945_v12 = vadd.f32 %v7870_v10, %v1944_v19  ;;  %v1946_v23 = vpop.f32.mrb[71].mxu1 }
 0x2b7   :  { %v2103_v54 = vmax.f32 %v1945_v12, 0.0  ;;  %v2157_v21 = vmul.f32 %v7876_v35, %v2102_v18 }
 0x2b9   :  { %2215 = vadd.xlane.f32.xlu0 %v2157_v21  ;;  %v2158_v62 = vmul.f32 %v7876_v35, %v2103_v54 }
 0x2ba   :  { %v1949_v28 = vpop.f32.mrb[72].mxu1 }
 0x2bb   :  { %v1950_v8 = vadd.f32 %v7870_v10, %v1949_v28  ;;  %v1951_v52 = vpop.f32.mrb[73].mxu1  ;;  %2217 = vadd.xlane.f32.xlu1 %v2158_v62 }
 0x2bc   :  { %v1952_v32 = vpop.f32.mrb[74].mxu1 }
 0x2bd   :  { %v2104_v47 = vmax.f32 %v1950_v8, 0.0  ;;  %v1953_v24 = vadd.f32 %v7870_v10, %v1952_v32  ;;  %v1954_v48 = vpop.f32.mrb[75].mxu1 }
 0x2bf   :  { %v2105_v63 = vmax.f32 %v1953_v24, 0.0  ;;  %v2159_v27 = vmul.f32 %v7876_v35, %v2104_v47 }
 0x2c1   :  { %2219 = vadd.xlane.f32.xlu0 %v2159_v27  ;;  %v2160_v55 = vmul.f32 %v7876_v35, %v2105_v63 }
 0x2c2   :  { %v1957_v38 = vpop.f32.mrb[76].mxu1 }
 0x2c3   :  { %v1958_v31 = vadd.f32 %v7870_v10, %v1957_v38  ;;  %v1959_v1 = vpop.f32.mrb[77].mxu1  ;;  %2221 = vadd.xlane.f32.xlu1 %v2160_v55 }
 0x2c4   :  { %v1960_v56 = vpop.f32.mrb[78].mxu1 }
 0x2c5   :  { %v2106_v16 = vmax.f32 %v1958_v31, 0.0  ;;  %v1961_v41 = vadd.f32 %v7870_v10, %v1960_v56  ;;  %v1962_v37 = vpop.f32.mrb[79].mxu1 }
 0x2c7   :  { %v2107_v2 = vmax.f32 %v1961_v41, 0.0  ;;  %v2161_v46 = vmul.f32 %v7876_v35, %v2106_v16 }
 0x2c9   :  { %2223 = vadd.xlane.f32.xlu0 %v2161_v46  ;;  %v2162_v49 = vmul.f32 %v7876_v35, %v2107_v2 }
 0x2ca   :  { %v1965_v4 = vpop.f32.mrb[80].mxu1 }
 0x2cb   :  { %v1966_v36 = vadd.f32 %v7870_v10, %v1965_v4  ;;  %v1967_v39 = vpop.f32.mrb[81].mxu1  ;;  %2225 = vadd.xlane.f32.xlu1 %v2162_v49 }
 0x2cc   :  { %v1968_v14 = vpop.f32.mrb[82].mxu1 }
 0x2cd   :  { %v2108_v30 = vmax.f32 %v1966_v36, 0.0  ;;  %v1969_v43 = vadd.f32 %v7870_v10, %v1968_v14  ;;  %v1970_v50 = vpop.f32.mrb[83].mxu1 }
 0x2cf   :  { %v2109_v42 = vmax.f32 %v1969_v43, 0.0  ;;  %v2163_v57 = vmul.f32 %v7876_v35, %v2108_v30 }
 0x2d1   :  { %2227 = vadd.xlane.f32.xlu0 %v2163_v57  ;;  %v2164_v6 = vmul.f32 %v7876_v35, %v2109_v42 }
 0x2d2   :  { %v1973_v45 = vpop.f32.mrb[84].mxu1 }
 0x2d3   :  { %v1974_v5 = vadd.f32 %v7870_v10, %v1973_v45  ;;  %v1975_v15 = vpop.f32.mrb[85].mxu1  ;;  %2229 = vadd.xlane.f32.xlu1 %v2164_v6 }
 0x2d4   :  { %v1976_v51 = vpop.f32.mrb[86].mxu1 }
 0x2d5   :  { %v2110_v34 = vmax.f32 %v1974_v5, 0.0  ;;  %v1977_v7 = vadd.f32 %v7870_v10, %v1976_v51  ;;  %v1978_v58 = vpop.f32.mrb[87].mxu1 }
 0x2d7   :  { %v2111_v44 = vmax.f32 %v1977_v7, 0.0  ;;  %v2165_v13 = vmul.f32 %v7876_v35, %v2110_v34 }
 0x2d9   :  { %2231 = vadd.xlane.f32.xlu0 %v2165_v13  ;;  %v2166_v17 = vmul.f32 %v7876_v35, %v2111_v44 }
 0x2da   :  { %v1981_v61 = vpop.f32.mrb[88].mxu1 }
 0x2db   :  { %v1982_v0 = vadd.f32 %v7870_v10, %v1981_v61  ;;  %v1983_v9 = vpop.f32.mrb[89].mxu1  ;;  %2233 = vadd.xlane.f32.xlu1 %v2166_v17 }
 0x2dc   :  { %v1984_v33 = vpop.f32.mrb[90].mxu1 }
 0x2dd   :  { %v2112_v20 = vmax.f32 %v1982_v0, 0.0  ;;  %v1985_v59 = vadd.f32 %v7870_v10, %v1984_v33  ;;  %v1986_v11 = vpop.f32.mrb[91].mxu1 }
 0x2df   :  { %v2113_v40 = vmax.f32 %v1985_v59, 0.0  ;;  %v2167_v25 = vmul.f32 %v7876_v35, %v2112_v20 }
 0x2e1   :  { %2235 = vadd.xlane.f32.xlu0 %v2167_v25  ;;  %v2168_v22 = vmul.f32 %v7876_v35, %v2113_v40 }
 0x2e2   :  { %v1989_v29 = vpop.f32.mrb[92].mxu1 }
 0x2e3   :  { %v1990_v60 = vadd.f32 %v7870_v10, %v1989_v29  ;;  %v1991_v3 = vpop.f32.mrb[93].mxu1  ;;  %2237 = vadd.xlane.f32.xlu1 %v2168_v22 }
 0x2e4   :  { %v1992_v53 = vpop.f32.mrb[94].mxu1 }
 0x2e5   :  { %v2114_v26 = vmax.f32 %v1990_v60, 0.0  ;;  %v1993_v19 = vadd.f32 %v7870_v10, %v1992_v53  ;;  %v1994_v18 = vpop.f32.mrb[95].mxu1 }
 0x2e7   :  { %v2115_v12 = vmax.f32 %v1993_v19, 0.0  ;;  %v2169_v23 = vmul.f32 %v7876_v35, %v2114_v26 }
 0x2e9   :  { %2239 = vadd.xlane.f32.xlu0 %v2169_v23  ;;  %v2170_v54 = vmul.f32 %v7876_v35, %v2115_v12 }
 0x2ea   :  { %v1997_v21 = vpop.f32.mrb[96].mxu1 }
 0x2eb   :  { %v1998_v62 = vadd.f32 %v7870_v10, %v1997_v21  ;;  %v1999_v28 = vpop.f32.mrb[97].mxu1  ;;  %2241 = vadd.xlane.f32.xlu1 %v2170_v54 }
 0x2ec   :  { %v2000_v8 = vpop.f32.mrb[98].mxu1 }
 0x2ed   :  { %v2116_v52 = vmax.f32 %v1998_v62, 0.0  ;;  %v2001_v32 = vadd.f32 %v7870_v10, %v2000_v8  ;;  %v2002_v47 = vpop.f32.mrb[99].mxu1 }
 0x2ef   :  { %v2117_v24 = vmax.f32 %v2001_v32, 0.0  ;;  %v2171_v48 = vmul.f32 %v7876_v35, %v2116_v52  ;;  %v7954_v32 = vstv %s9352_s6 }
 0x2f1   :  { %2243 = vadd.xlane.f32.xlu0 %v2171_v48  ;;  %v2172_v63 = vmul.f32 %v7876_v35, %v2117_v24 }
 0x2f2   :  { %v2005_v27 = vpop.f32.mrb[100].mxu1 }
 0x2f3   :  { %v2006_v55 = vadd.f32 %v7870_v10, %v2005_v27  ;;  %v2007_v38 = vpop.f32.mrb[101].mxu1  ;;  %2245 = vadd.xlane.f32.xlu1 %v2172_v63  ;;  %v7513_v27 = vmov 1966171168  }
 0x2f4   :  { %v2008_v31 = vpop.f32.mrb[102].mxu1 }
 0x2f5   :  { %v2118_v1 = vmax.f32 %v2006_v55, 0.0  ;;  %v2009_v56 = vadd.f32 %v7870_v10, %v2008_v31  ;;  %v2010_v16 = vpop.f32.mrb[103].mxu1  ;;  %v3930_v55 = vunpack.c.l.s4 %v7513_v27 }
 0x2f7   :  { %v2119_v41 = vmax.f32 %v2009_v56, 0.0  ;;  %v2173_v37 = vmul.f32 %v7876_v35, %v2118_v1  ;;  %v9395_v56 = vld [vmem:[#allocation13_spill] sm:$0xff] }
 0x2f8   :  { %v7960_v16 = vsub.s32 2, %v9395_v56 }
 0x2f9   :  { %2247 = vadd.xlane.f32.xlu0 %v2173_v37  ;;  %v2174_v2 = vmul.f32 %v7876_v35, %v2119_v41  ;;  %v7963_v41 = vsub.s32 3, %v9395_v56 }
 0x2fa   :  { %v2013_v46 = vpop.f32.mrb[104].mxu1 }
 0x2fb   :  { %v2014_v49 = vadd.f32 %v7870_v10, %v2013_v46  ;;  %v2015_v4 = vpop.f32.mrb[105].mxu1  ;;  %2249 = vadd.xlane.f32.xlu1 %v2174_v2 }
 0x2fc   :  { %v2016_v36 = vpop.f32.mrb[106].mxu1  ;;  %v7971_v4 = vsub.s32 5, %v9395_v56 }
 0x2fd   :  { %v2120_v39 = vmax.f32 %v2014_v49, 0.0  ;;  %v2017_v14 = vadd.f32 %v7870_v10, %v2016_v36  ;;  %v2018_v30 = vpop.f32.mrb[107].mxu1  ;;  %v7968_v49 = vsub.s32 4, %v9395_v56 }
 0x2fe   :  { %v3931_v30 = vunpack.c.0.s8 %v3930_v55 }
 0x2ff   :  { %v2121_v43 = vmax.f32 %v2017_v14, 0.0  ;;  %v2175_v50 = vmul.f32 %v7876_v35, %v2120_v39  ;;  %v7974_v39 = vsub.s32 6, %v9395_v56  ;;  %v7977_v14 = vsub.s32 7, %v9395_v56 }
 0x301   :  { %2251 = vadd.xlane.f32.xlu0 %v2175_v50  ;;  %v2176_v42 = vmul.f32 %v7876_v35, %v2121_v43  ;;  %v9396_v43 = vld [vmem:[#allocation14_spill] sm:$0xff] }
 0x302   :  { %v2021_v57 = vpop.f32.mrb[108].mxu1 }
 0x303   :  { %v2022_v6 = vadd.f32 %v7870_v10, %v2021_v57  ;;  %v2023_v45 = vpop.f32.mrb[109].mxu1  ;;  %2253 = vadd.xlane.f32.xlu1 %v2176_v42 }
 0x304   :  { %v2024_v5 = vpop.f32.mrb[110].mxu1 }
 0x305   :  { %v2122_v15 = vmax.f32 %v2022_v6, 0.0  ;;  %v2025_v51 = vadd.f32 %v7870_v10, %v2024_v5  ;;  %v2026_v34 = vpop.f32.mrb[111].mxu1  ;;  %v9397_v5 = vld [vmem:[#allocation15_spill] sm:$0xff] }
 0x307   :  { %v2123_v7 = vmax.f32 %v2025_v51, 0.0  ;;  %v2177_v58 = vmul.f32 %v7876_v35, %v2122_v15 }
 0x309   :  { %2255 = vadd.xlane.f32.xlu0 %v2177_v58  ;;  %v2178_v44 = vmul.f32 %v7876_v35, %v2123_v7 }
 0x30a   :  { %v2029_v13 = vpop.f32.mrb[112].mxu1 }
 0x30b   :  { %v2030_v17 = vadd.f32 %v7870_v10, %v2029_v13  ;;  %v2031_v61 = vpop.f32.mrb[113].mxu1  ;;  %2257 = vadd.xlane.f32.xlu1 %v2178_v44 }
 0x30c   :  { %v2032_v0 = vpop.f32.mrb[114].mxu1 }
 0x30d   :  { %v2124_v9 = vmax.f32 %v2030_v17, 0.0  ;;  %v2033_v33 = vadd.f32 %v7870_v10, %v2032_v0  ;;  %v2034_v20 = vpop.f32.mrb[115].mxu1 }
 0x30f   :  { %v2125_v59 = vmax.f32 %v2033_v33, 0.0  ;;  %v2179_v11 = vmul.f32 %v7876_v35, %v2124_v9 }
 0x311   :  { %2259 = vadd.xlane.f32.xlu0 %v2179_v11  ;;  %v2180_v40 = vmul.f32 %v7876_v35, %v2125_v59 }
 0x312   :  { %v2037_v25 = vpop.f32.mrb[116].mxu1 }
 0x313   :  { %v2038_v22 = vadd.f32 %v7870_v10, %v2037_v25  ;;  %v2039_v29 = vpop.f32.mrb[117].mxu1  ;;  %2261 = vadd.xlane.f32.xlu1 %v2180_v40 }
 0x314   :  { %v2040_v60 = vpop.f32.mrb[118].mxu1 }
 0x315   :  { %v2126_v3 = vmax.f32 %v2038_v22, 0.0  ;;  %v2041_v53 = vadd.f32 %v7870_v10, %v2040_v60  ;;  %v2042_v26 = vpop.f32.mrb[119].mxu1 }
 0x317   :  { %v2127_v19 = vmax.f32 %v2041_v53, 0.0  ;;  %v2181_v18 = vmul.f32 %v7876_v35, %v2126_v3 }
 0x319   :  { %2263 = vadd.xlane.f32.xlu0 %v2181_v18  ;;  %v2182_v12 = vmul.f32 %v7876_v35, %v2127_v19  ;;  %v7999_v19 = vsub.s32 %v3931_v30, %v9395_v56 }
 0x31a   :  { %v2045_v23 = vpop.f32.mrb[120].mxu1 }
 0x31b   :  { %v2046_v54 = vadd.f32 %v7870_v10, %v2045_v23  ;;  %v2047_v21 = vpop.f32.mrb[121].mxu1  ;;  %2265 = vadd.xlane.f32.xlu1 %v2182_v12 }
 0x31c   :  { %v2048_v62 = vpop.f32.mrb[122].mxu1 }
 0x31d   :  { %v2128_v28 = vmax.f32 %v2046_v54, 0.0  ;;  %v2049_v8 = vadd.f32 %v7870_v10, %v2048_v62  ;;  %v2050_v52 = vpop.f32.mrb[123].mxu1 }
 0x31e   :  { %v2196_v47 = vpop.xlane.xlu0 %2195 }
 0x31f   :  { %v2129_v24 = vmax.f32 %v2049_v8, 0.0  ;;  %v2183_v48 = vmul.f32 %v7876_v35, %v2128_v28  ;;  %v2293_v63 = vadd.f32 %v7954_v32, %v2196_v47 }
 0x321   :  { %2267 = vadd.xlane.f32.xlu0 %v2183_v48  ;;  %v2184_v38 = vmul.f32 %v7876_v35, %v2129_v24  ;;  %v2392_v50 = vrot.slane %v2293_v63, %v9396_v43  ;;  %v2396_v61 = vrot.slane %v2293_v63, %v9397_v5  ;;  %v2400_v9 = vrot.slane %v2293_v63, %v7960_v16 }
 0x322   :  { %v2053_v31 = vpop.f32.mrb[124].mxu1  ;;  %v2198_v1 = vpop.xlane.xlu0 %2197  ;;  %v2404_v33 = vrot.slane %v2293_v63, %v7963_v41  ;;  %v2408_v20 = vrot.slane %v2293_v63, %v7968_v49  ;;  %v2412_v11 = vrot.slane %v2293_v63, %v7971_v4  ;;  %v2416_v40 = vrot.slane %v2293_v63, %v7974_v39 }
 0x323   :  { %v2054_v37 = vadd.f32 %v7870_v10, %v2053_v31  ;;  %v2294_v2 = vadd.f32 %v7954_v32, %v2198_v1  ;;  %v2055_v46 = vpop.f32.mrb[125].mxu1  ;;  %2269 = vadd.xlane.f32.xlu1 %v2184_v38  ;;  %v2420_v25 = vrot.slane %v2293_v63, %v7977_v14  ;;  %v3925_v12 = vcombine.low %v2392_v50, %v2396_v61 }
 0x324   :  { %v2056_v36 = vpop.f32.mrb[126].mxu1  ;;  %v3926_v23 = vcombine.low %v2400_v9, %v2404_v33  ;;  %v3927_v54 = vcombine.low %v2408_v20, %v2412_v11 }
 0x325   :  { %v2130_v42 = vmax.f32 %v2054_v37, 0.0  ;;  %v2057_v57 = vadd.f32 %v7870_v10, %v2056_v36  ;;  %v2058_v6 = vpop.f32.mrb[127].mxu1  ;;  %v2424_v45 = vrot.slane %v2294_v2, %v9396_v43  ;;  %v2428_v15 = vrot.slane %v2294_v2, %v9397_v5 }
 0x326   :  { %v2432_v51 = vrot.slane %v2294_v2, %v7960_v16  ;;  %v2436_v34 = vrot.slane %v2294_v2, %v7963_v41  ;;  %v2440_v7 = vrot.slane %v2294_v2, %v7968_v49  ;;  %v2444_v58 = vrot.slane %v2294_v2, %v7971_v4 }
 0x327   :  { %v2131_v44 = vmax.f32 %v2057_v57, 0.0  ;;  %v2185_v13 = vmul.f32 %v7876_v35, %v2130_v42  ;;  %v2448_v17 = vrot.slane %v2294_v2, %v7974_v39  ;;  %v2452_v0 = vrot.slane %v2294_v2, %v7977_v14 }
 0x328   :  { %v3974_v22 = vcombine.low %v2424_v45, %v2428_v15  ;;  %v3975_v29 = vcombine.low %v2432_v51, %v2436_v34  ;;  %v3976_v60 = vcombine.low %v2440_v7, %v2444_v58  ;;  %v3928_v21 = vcombine.low %v2416_v40, %v2420_v25  ;;  %v2200_v58 = vpop.xlane.xlu1 %2199 }
 0x329   :  { %2271 = vadd.xlane.f32.xlu0 %v2185_v13  ;;  %v2186_v59 = vmul.f32 %v7876_v35, %v2131_v44  ;;  %v3977_v3 = vcombine.low %v2448_v17, %v2452_v0  ;;  %v3935_v24 = vrot.slane %v3925_v12, %v7999_v19  ;;  %v3942_v48 = vrot.slane %v3926_v23, %v7999_v19 }
 0x32a   :  { %v2061_v53 = vpop.f32.mrb[128].mxu1  ;;  %v3984_v28 = vrot.slane %v3974_v22, %v7999_v19  ;;  %v3991_v8 = vrot.slane %v3975_v29, %v7999_v19  ;;  %v3998_v52 = vrot.slane %v3976_v60, %v7999_v19  ;;  %v3949_v63 = vrot.slane %v3927_v54, %v7999_v19 }
 0x32b   :  { %2273 = vadd.xlane.f32.xlu1 %v2186_v59  ;;  %v2063_v26 = vpop.f32.mrb[129].mxu1  ;;  %v4005_v47 = vrot.slane %v3977_v3, %v7999_v19  ;;  %v3956_v27 = vrot.slane %v3928_v21, %v7999_v19  ;;  %v3957_v2 = vcombine.low %v3935_v24, %v3942_v48  ;;  %v2295_v9 = vadd.f32 %v7954_v32, %v2200_v58 }
 0x32c   :  { %v2064_v18 = vpop.f32.mrb[130].mxu1  ;;  %v4006_v55 = vcombine.low %v3984_v28, %v3991_v8  ;;  %v2202_v0 = vpop.xlane.xlu1 %2201  ;;  %v2062_v12 = vadd.f32 %v7870_v10, %v2061_v53 }
 0x32d   :  { %v2066_v62 = vpop.f32.mrb[131].mxu1  ;;  %v4007_v38 = vcombine.low %v3998_v52, %v4005_v47  ;;  %v3958_v46 = vcombine.low %v3949_v63, %v3956_v27  ;;  %v3965_v42 = vrot.slane %v3957_v2, %v7999_v19  ;;  %v2296_v20 = vadd.f32 %v7954_v32, %v2202_v0 }
 0x32e   :  { %v4014_v30 = vrot.slane %v4006_v55, %v7999_v19  ;;  %v2456_v59 = vrot.slane %v2295_v9, %v9396_v43  ;;  %v2460_v11 = vrot.slane %v2295_v9, %v9397_v5  ;;  %v2464_v40 = vrot.slane %v2295_v9, %v7960_v16 }
 0x32f   :  { %v4021_v50 = vrot.slane %v4007_v38, %v7999_v19  ;;  %v3972_v57 = vrot.slane %v3958_v46, %v7999_v19  ;;  %v2468_v25 = vrot.slane %v2295_v9, %v7963_v41  ;;  %v2472_v22 = vrot.slane %v2295_v9, %v7968_v49 }
 0x330   :  { %v8020_v33 = vpop.xlane.xlu1 %2205  ;;  %v2476_v29 = vrot.slane %v2295_v9, %v7971_v4  ;;  %v2480_v3 = vrot.slane %v2295_v9, %v7974_v39  ;;  %v2484_v26 = vrot.slane %v2295_v9, %v7977_v14  ;;  %v2065_v23 = vadd.f32 %v7870_v10, %v2064_v18 }
 0x331   :  { %v4022_v6 = vcombine.low %v4014_v30, %v4021_v50  ;;  %v3973_v34 = vcombine.low %v3965_v42, %v3972_v57  ;;  %v4023_v54 = vcombine.low %v2456_v59, %v2460_v11  ;;  %v4024_v21 = vcombine.low %v2464_v40, %v2468_v25 }
 0x332   :  { %v2069_v31 = vpop.f32.mrb[132].mxu1  ;;  %v4025_v62 = vcombine.low %v2472_v22, %v2476_v29  ;;  %v2488_v28 = vrot.slane %v2296_v20, %v9396_v43  ;;  %v4026_v52 = vcombine.low %v2480_v3, %v2484_v26  ;;  %v2492_v47 = vrot.slane %v2296_v20, %v9397_v5 }
 0x333   :  { %v2071_v1 = vpop.f32.mrb[133].mxu1  ;;  %v2496_v24 = vrot.slane %v2296_v20, %v7960_v16  ;;  %v2500_v48 = vrot.slane %v2296_v20, %v7963_v41  ;;  %v2504_v63 = vrot.slane %v2296_v20, %v7968_v49  ;;  %v2508_v27 = vrot.slane %v2296_v20, %v7971_v4 }
 0x334   :  { %v8009_v37 = vpop.f32.mrb[134].mxu1  ;;  %v2512_v53 = vrot.slane %v2296_v20, %v7974_v39  ;;  %v2516_v18 = vrot.slane %v2296_v20, %v7977_v14  ;;  %v2132_v55 = vmax.f32 %v2062_v12, 0.0  ;;  %v2133_v1 = vmax.f32 %v2065_v23, 0.0 }
 0x335   :  { %v2074_v36 = vpop.f32.mrb[135].mxu1  ;;  %v2070_v2 = vadd.f32 %v7870_v10, %v2069_v31  ;;  %v4033_v46 = vrot.slane %v4023_v54, %v7999_v19  ;;  %v4047_v30 = vrot.slane %v4025_v62, %v7999_v19  ;;  %v4054_v50 = vrot.slane %v4026_v52, %v7999_v19 }
 0x336   :  { %v4040_v36 = vrot.slane %v4024_v21, %v7999_v19  ;;  %v4072_v42 = vcombine.low %v2488_v28, %v2492_v47  ;;  %v4073_v57 = vcombine.low %v2496_v24, %v2500_v48  ;;  %v2188_v9 = vmul.f32 %v7876_v35, %v2133_v1 }
 0x337   :  { %v2134_v0 = vmax.f32 %v2070_v2, 0.0  ;;  %v4056_v59 = vcombine.low %v4047_v30, %v4054_v50 }
 0x338   :  { %v8029_v60 = vpop.xlane.xlu1 %2209  ;;  %v4055_v20 = vcombine.low %v4033_v46, %v4040_v36  ;;  %v4082_v40 = vrot.slane %v4072_v42, %v7999_v19 }
 0x339   :  { %v2189_v52 = vmul.f32 %v7876_v35, %v2134_v0 }
 0x33a   :  { %v2077_v45 = vpop.f32.mrb[136].mxu1  ;;  %v4063_v47 = vrot.slane %v4055_v20, %v7999_v19 }
 0x33b   :  { %v2079_v15 = vpop.f32.mrb[137].mxu1 }
 0x33c   :  { %6281 = vperm.xlu1 %7150, %v4022_v6   ;;  %v8015_v51 = vpop.f32.mrb[138].mxu1  ;;  %v4074_v6 = vcombine.low %v2504_v63, %v2508_v27  ;;  %v4075_v15 = vcombine.low %v2512_v53, %v2516_v18  ;;  %v2204_v53 = vpop.xlane.xlu0 %2203 }
 0x33d   :  { %v2082_v7 = vpop.f32.mrb[139].mxu1 }
 0x33e   :  { %v2187_v7 = vmul.f32 %v7876_v35, %v2132_v55  ;;  %v4096_v25 = vrot.slane %v4074_v6, %v7999_v19  ;;  %v4103_v22 = vrot.slane %v4075_v15, %v7999_v19 }
 0x33f   :  { %6278 = vperm.xlu0 %7149, %v3973_v34   ;;  %v2078_v34 = vadd.f32 %v7870_v10, %v2077_v45  ;;  %v4089_v45 = vrot.slane %v4073_v57, %v7999_v19 }
 0x340   :  { %v2214_v8 = vpop.xlane.xlu1 %2213  ;;  %v4105_v27 = vcombine.low %v4096_v25, %v4103_v22 }
 0x341   :  { %v2302_v38 = vadd.f32 %v7954_v32, %v2214_v8  ;;  %v2136_v29 = vmax.f32 %v2078_v34, 0.0  ;;  %v4104_v63 = vcombine.low %v4082_v40, %v4089_v45  ;;  %v8081_v34 = vadd.f32 %v7954_v32, %v2204_v53 }
 0x342   :  { %v2085_v44 = vpop.f32.mrb[140].mxu1 }
 0x343   :  { %v2087_v13 = vpop.f32.mrb[141].mxu1  ;;  %v2680_v58 = vrot.slane %v2302_v38, %v9396_v43  ;;  %v2684_v31 = vrot.slane %v2302_v38, %v9397_v5  ;;  %v2086_v3 = vadd.f32 %v7870_v10, %v2085_v44  ;;  %v2696_v26 = vrot.slane %v2302_v38, %v7968_v49 }
 0x344   :  { %v8017_v17 = vpop.f32.mrb[142].mxu1  ;;  %v2688_v13 = vrot.slane %v2302_v38, %v7960_v16  ;;  %v2700_v12 = vrot.slane %v2302_v38, %v7971_v4  ;;  %v2704_v23 = vrot.slane %v2302_v38, %v7974_v39  ;;  %v2708_v54 = vrot.slane %v2302_v38, %v7977_v14 }
 0x345   :  { %v2090_v61 = vpop.f32.mrb[143].mxu1  ;;  %v4366_v21 = vcombine.low %v2680_v58, %v2684_v31  ;;  %v4070_v44 = vrot.slane %v4056_v59, %v7999_v19  ;;  %v2138_v24 = vmax.f32 %v2086_v3, 0.0  ;;  %v2191_v48 = vmul.f32 %v7876_v35, %v2136_v29 }
 0x346   :  { %v2692_v61 = vrot.slane %v2302_v38, %v7963_v41  ;;  %v4368_v18 = vcombine.low %v2696_v26, %v2700_v12  ;;  %v4369_v55 = vcombine.low %v2704_v23, %v2708_v54  ;;  %v8089_v58 = vadd.f32 %v7870_v10, %v8009_v37 }
 0x347   :  { %v4376_v38 = vrot.slane %v4366_v21, %v7999_v19  ;;  %v4112_v0 = vrot.slane %v4104_v63, %v7999_v19 }
 0x348   :  { %v2218_v11 = vpop.xlane.xlu1 %2217  ;;  %v4367_v62 = vcombine.low %v2688_v13, %v2692_v61  ;;  %v2193_v13 = vmul.f32 %v7876_v35, %v2138_v24  ;;  %v4071_v61 = vcombine.low %v4063_v47, %v4070_v44  ;;  %v4390_v59 = vrot.slane %v4368_v18, %v7999_v19 }
 0x349   :  { %v2304_v28 = vadd.f32 %v7954_v32, %v2218_v11 }
 0x34a   :  { %v4383_v1 = vrot.slane %v4367_v62, %v7999_v19 }
 0x34b   :  { %v2744_v2 = vrot.slane %v2304_v28, %v9396_v43  ;;  %v2748_v46 = vrot.slane %v2304_v28, %v9397_v5  ;;  %v2752_v36 = vrot.slane %v2304_v28, %v7960_v16  ;;  %v2756_v30 = vrot.slane %v2304_v28, %v7963_v41 }
 0x34c   :  { %v2760_v42 = vrot.slane %v2304_v28, %v7968_v49  ;;  %v2764_v57 = vrot.slane %v2304_v28, %v7971_v4  ;;  %v2768_v6 = vrot.slane %v2304_v28, %v7974_v39  ;;  %v2772_v15 = vrot.slane %v2304_v28, %v7977_v14 }
 0x34d   :  { %v8098_v11 = vcombine.low %v4376_v38, %v4383_v1  ;;  %v4464_v10 = vcombine.low %v2744_v2, %v2748_v46  ;;  %v4465_v37 = vcombine.low %v2752_v36, %v2756_v30 }
 0x34e   :  { %v4466_v40 = vcombine.low %v2760_v42, %v2764_v57  ;;  %v4467_v45 = vcombine.low %v2768_v6, %v2772_v15 }
 0x34f   :  { %v4406_v53 = vrot.slane %v8098_v11, %v7999_v19  ;;  %v4474_v18 = vrot.slane %v4464_v10, %v7999_v19 }
 0x350   :  { %v2222_v8 = vpop.xlane.xlu1 %2221  ;;  %v4488_v38 = vrot.slane %v4466_v40, %v7999_v19  ;;  %v4495_v1 = vrot.slane %v4467_v45, %v7999_v19 }
 0x351   :  { %v2306_v31 = vadd.f32 %v7954_v32, %v2222_v8 }
 0x352   :  { %v4497_v40 = vcombine.low %v4488_v38, %v4495_v1 }
 0x353   :  { %v2808_v25 = vrot.slane %v2306_v31, %v9396_v43  ;;  %v2812_v35 = vrot.slane %v2306_v31, %v9397_v5  ;;  %v2816_v22 = vrot.slane %v2306_v31, %v7960_v16  ;;  %v2820_v29 = vrot.slane %v2306_v31, %v7963_v41 }
 0x354   :  { %v2824_v26 = vrot.slane %v2306_v31, %v7968_v49  ;;  %v2828_v12 = vrot.slane %v2306_v31, %v7971_v4  ;;  %v2832_v23 = vrot.slane %v2306_v31, %v7974_v39  ;;  %v2836_v54 = vrot.slane %v2306_v31, %v7977_v14 }
 0x355   :  { %v4562_v2 = vcombine.low %v2808_v25, %v2812_v35  ;;  %v4563_v46 = vcombine.low %v2816_v22, %v2820_v29  ;;  %v4511_v1 = vrot.slane %v4497_v40, %v7999_v19 }
 0x356   :  { %v4564_v36 = vcombine.low %v2824_v26, %v2828_v12  ;;  %v4565_v30 = vcombine.low %v2832_v23, %v2836_v54 }
 0x357   :  { %v4572_v45 = vrot.slane %v4562_v2, %v7999_v19  ;;  %v4579_v25 = vrot.slane %v4563_v46, %v7999_v19  ;;  %v8152_v2 = vpop.xlane.xlu0 %2207 }
 0x358   :  { %v2226_v50 = vpop.xlane.xlu1 %2225  ;;  %v4586_v35 = vrot.slane %v4564_v36, %v7999_v19  ;;  %v4593_v22 = vrot.slane %v4565_v30, %v7999_v19 }
 0x359   :  { %v2308_v20 = vadd.f32 %v7954_v32, %v2226_v50  ;;  %v4594_v46 = vcombine.low %v4572_v45, %v4579_v25 }
 0x35a   :  { %v4595_v36 = vcombine.low %v4586_v35, %v4593_v22 }
 0x35b   :  { %v2872_v21 = vrot.slane %v2308_v20, %v9396_v43  ;;  %v2876_v62 = vrot.slane %v2308_v20, %v9397_v5  ;;  %v2880_v28 = vrot.slane %v2308_v20, %v7960_v16  ;;  %v2884_v8 = vrot.slane %v2308_v20, %v7963_v41 }
 0x35c   :  { %v2892_v47 = vrot.slane %v2308_v20, %v7971_v4  ;;  %v2896_v44 = vrot.slane %v2308_v20, %v7974_v39  ;;  %v2900_v24 = vrot.slane %v2308_v20, %v7977_v14  ;;  %v4602_v22 = vrot.slane %v4594_v46, %v7999_v19 }
 0x35d   :  { %v4660_v42 = vcombine.low %v2872_v21, %v2876_v62  ;;  %v4661_v57 = vcombine.low %v2880_v28, %v2884_v8 }
 0x35e   :  { %2275 = vadd.xlane.f32.xlu0 %v2187_v7  ;;  %v8085_v7 = vadd.f32 %v7954_v32, %v8020_v33  ;;  %v4397_v33 = vrot.slane %v4369_v55, %v7999_v19  ;;  %v4481_v55 = vrot.slane %v4465_v37, %v7999_v19  ;;  %v4663_v15 = vcombine.low %v2896_v44, %v2900_v24 }
 0x35f   :  { %v4670_v29 = vrot.slane %v4660_v42, %v7999_v19 }
 0x360   :  { %2277 = vadd.xlane.f32.xlu1 %v2188_v9  ;;  %v4119_v9 = vrot.slane %v4105_v27, %v7999_v19  ;;  %v2230_v3 = vpop.xlane.xlu1 %2229  ;;  %v4399_v27 = vcombine.low %v4390_v59, %v4397_v33  ;;  %v4496_v37 = vcombine.low %v4474_v18, %v4481_v55  ;;  %v4691_v12 = vrot.slane %v4663_v15, %v7999_v19 }
 0x362   :  { %2279 = vadd.xlane.f32.xlu0 %v2189_v52  ;;  %v2888_v52 = vrot.slane %v2308_v20, %v7968_v49  ;;  %v4120_v63 = vcombine.low %v4112_v0, %v4119_v9  ;;  %v4504_v38 = vrot.slane %v4496_v37, %v7999_v19 }
 0x364   :  { %v4662_v6 = vcombine.low %v2888_v52, %v2892_v47  ;;  %v4512_v35 = vcombine.low %v4504_v38, %v4511_v1 }
 0x366   :  { %2283 = vadd.xlane.f32.xlu0 %v2191_v48  ;;  %v2310_v48 = vadd.f32 %v7954_v32, %v2230_v3  ;;  %v4677_v3 = vrot.slane %v4661_v57, %v7999_v19  ;;  %v4684_v26 = vrot.slane %v4662_v6, %v7999_v19 }
 0x368   :  { %v2234_v50 = vpop.xlane.xlu1 %2233  ;;  %v2936_v31 = vrot.slane %v2310_v48, %v9396_v43  ;;  %v2944_v0 = vrot.slane %v2310_v48, %v7960_v16  ;;  %v2948_v9 = vrot.slane %v2310_v48, %v7963_v41  ;;  %v2952_v20 = vrot.slane %v2310_v48, %v7968_v49 }
 0x369   :  { %v2956_v59 = vrot.slane %v2310_v48, %v7971_v4  ;;  %v2960_v33 = vrot.slane %v2310_v48, %v7974_v39  ;;  %v2964_v11 = vrot.slane %v2310_v48, %v7977_v14  ;;  %v2312_v10 = vadd.f32 %v7954_v32, %v2234_v50 }
 0x36a   :  { %2287 = vadd.xlane.f32.xlu0 %v2193_v13  ;;  %v2940_v13 = vrot.slane %v2310_v48, %v9397_v5  ;;  %v4759_v21 = vcombine.low %v2944_v0, %v2948_v9  ;;  %v4692_v30 = vcombine.low %v4670_v29, %v4677_v3  ;;  %v4693_v50 = vcombine.low %v4684_v26, %v4691_v12 }
 0x36b   :  { %v4760_v62 = vcombine.low %v2952_v20, %v2956_v59  ;;  %v4761_v28 = vcombine.low %v2960_v33, %v2964_v11  ;;  %v3000_v8 = vrot.slane %v2312_v10, %v9396_v43  ;;  %v3004_v52 = vrot.slane %v2312_v10, %v9397_v5 }
 0x36c   :  { %v4758_v54 = vcombine.low %v2936_v31, %v2940_v13  ;;  %v3008_v47 = vrot.slane %v2312_v10, %v7960_v16  ;;  %v3012_v44 = vrot.slane %v2312_v10, %v7963_v41  ;;  %v3016_v24 = vrot.slane %v2312_v10, %v7968_v49 }
 0x36d   :  { %v3020_v48 = vrot.slane %v2312_v10, %v7971_v4  ;;  %v4775_v57 = vrot.slane %v4759_v21, %v7999_v19  ;;  %v4782_v6 = vrot.slane %v4760_v62, %v7999_v19  ;;  %v4789_v15 = vrot.slane %v4761_v28, %v7999_v19 }
 0x36e   :  { %v4768_v42 = vrot.slane %v4758_v54, %v7999_v19  ;;  %v4857_v13 = vcombine.low %v3008_v47, %v3012_v44  ;;  %v4609_v29 = vrot.slane %v4595_v36, %v7999_v19  ;;  %v4700_v3 = vrot.slane %v4692_v30, %v7999_v19 }
 0x36f   :  { %v4858_v0 = vcombine.low %v3016_v24, %v3020_v48  ;;  %v4707_v26 = vrot.slane %v4693_v50, %v7999_v19 }
 0x370   :  { %v2238_v23 = vpop.xlane.xlu1 %2237  ;;  %v4790_v12 = vcombine.low %v4768_v42, %v4775_v57  ;;  %v4873_v21 = vrot.slane %v4857_v13, %v7999_v19  ;;  %v4610_v50 = vcombine.low %v4602_v22, %v4609_v29  ;;  %v2520_v57 = vrot.slane %v8081_v34, %v9396_v43 }
 0x371   :  { %6284 = vperm.xlu1 %7150, %v4071_v61   ;;  %v4413_v61 = vrot.slane %v4399_v27, %v7999_v19  ;;  %v3028_v27 = vrot.slane %v2312_v10, %v7977_v14  ;;  %v2314_v18 = vadd.f32 %v7954_v32, %v2238_v23  ;;  %v4791_v23 = vcombine.low %v4782_v6, %v4789_v15 }
 0x372   :  { %v4880_v62 = vrot.slane %v4858_v0, %v7999_v19  ;;  %v4708_v42 = vcombine.low %v4700_v3, %v4707_v26  ;;  %v4798_v15 = vrot.slane %v4790_v12, %v7999_v19 }
 0x373   :  { %v4414_v55 = vcombine.low %v4406_v53, %v4413_v61  ;;  %v4856_v53 = vcombine.low %v3000_v8, %v3004_v52  ;;  %v3064_v20 = vrot.slane %v2314_v18, %v9396_v43  ;;  %v3068_v59 = vrot.slane %v2314_v18, %v9397_v5 }
 0x374   :  { %v3072_v33 = vrot.slane %v2314_v18, %v7960_v16  ;;  %v3076_v11 = vrot.slane %v2314_v18, %v7963_v41  ;;  %v3080_v61 = vrot.slane %v2314_v18, %v7968_v49  ;;  %v3084_v37 = vrot.slane %v2314_v18, %v7971_v4 }
 0x375   :  { %6287 = vperm.xlu1 %7150, %v4120_v63   ;;  %v3024_v63 = vrot.slane %v2312_v10, %v7974_v39  ;;  %v8162_v10 = vpop.xlane.xlu0 %2211  ;;  %v3088_v40 = vrot.slane %v2314_v18, %v7974_v39  ;;  %v3092_v45 = vrot.slane %v2314_v18, %v7977_v14  ;;  %v4866_v54 = vrot.slane %v4856_v53, %v7999_v19 }
 0x376   :  { %v4954_v47 = vcombine.low %v3064_v20, %v3068_v59  ;;  %v4955_v44 = vcombine.low %v3072_v33, %v3076_v11  ;;  %v4956_v24 = vcombine.low %v3080_v61, %v3084_v37 }
 0x377   :  { %v4859_v9 = vcombine.low %v3024_v63, %v3028_v27  ;;  %v4957_v48 = vcombine.low %v3088_v40, %v3092_v45  ;;  %v4888_v53 = vcombine.low %v4866_v54, %v4873_v21  ;;  %v2524_v54 = vrot.slane %v8081_v34, %v9397_v5 }
 0x378   :  { %v2242_v31 = vpop.xlane.xlu1 %2241  ;;  %v4964_v0 = vrot.slane %v4954_v47, %v7999_v19  ;;  %v4978_v20 = vrot.slane %v4956_v24, %v7999_v19  ;;  %v2528_v21 = vrot.slane %v8081_v34, %v7960_v16 }
 0x379   :  { %v2316_v25 = vadd.f32 %v7954_v32, %v2242_v31  ;;  %v4887_v28 = vrot.slane %v4859_v9, %v7999_v19  ;;  %v8177_v8 = vpop.xlane.xlu0 %2215  ;;  %v4805_v31 = vrot.slane %v4791_v23, %v7999_v19  ;;  %v4971_v9 = vrot.slane %v4955_v44, %v7999_v19 }
 0x37a   :  { %v4985_v59 = vrot.slane %v4957_v48, %v7999_v19 }
 0x37b   :  { %v3128_v63 = vrot.slane %v2316_v25, %v9396_v43  ;;  %v3132_v27 = vrot.slane %v2316_v25, %v9397_v5  ;;  %v3136_v18 = vrot.slane %v2316_v25, %v7960_v16  ;;  %v3144_v38 = vrot.slane %v2316_v25, %v7968_v49 }
 0x37c   :  { %v3148_v1 = vrot.slane %v2316_v25, %v7971_v4  ;;  %v3152_v46 = vrot.slane %v2316_v25, %v7974_v39  ;;  %v3156_v36 = vrot.slane %v2316_v25, %v7977_v14  ;;  %v4889_v13 = vcombine.low %v4880_v62, %v4887_v28 }
 0x37d   :  { %v8190_v6 = vpop.xlane.xlu0 %2219  ;;  %v5052_v33 = vcombine.low %v3128_v63, %v3132_v27  ;;  %v4806_v23 = vcombine.low %v4798_v15, %v4805_v31  ;;  %v2532_v62 = vrot.slane %v8081_v34, %v7963_v41  ;;  %v4896_v28 = vrot.slane %v4888_v53, %v7999_v19 }
 0x37e   :  { %v5054_v61 = vcombine.low %v3144_v38, %v3148_v1  ;;  %v5055_v37 = vcombine.low %v3152_v46, %v3156_v36  ;;  %v4986_v47 = vcombine.low %v4964_v0, %v4971_v9  ;;  %v4987_v44 = vcombine.low %v4978_v20, %v4985_v59 }
 0x37f   :  { %v5062_v24 = vrot.slane %v5052_v33, %v7999_v19  ;;  %v2536_v36 = vrot.slane %v8081_v34, %v7968_v49  ;;  %v2135_v15 = vmax.f32 %v8089_v58, 0.0  ;;  %v4121_v53 = vcombine.low %v2520_v57, %v2524_v54 }
 0x380   :  { %6305 = vperm.xlu0 %7149, %v4414_v55   ;;  %v2246_v52 = vpop.xlane.xlu1 %2245  ;;  %v3140_v55 = vrot.slane %v2316_v25, %v7963_v41  ;;  %v5076_v63 = vrot.slane %v5054_v61, %v7999_v19  ;;  %v5083_v27 = vrot.slane %v5055_v37, %v7999_v19  ;;  %v5001_v0 = vrot.slane %v4987_v44, %v7999_v19  ;;  %v8264_v44 = vld [vmem:[%s9351_s5] ss:$0 sm:$0xff] }
 0x381   :  { %v2318_v30 = vadd.f32 %v7954_v32, %v2246_v52  ;;  %v8202_v22 = vpop.xlane.xlu0 %2223  ;;  %v4903_v52 = vrot.slane %v4889_v13, %v7999_v19  ;;  %v4994_v13 = vrot.slane %v4986_v47, %v7999_v19  ;;  %v4122_v58 = vcombine.low %v2528_v21, %v2532_v62 }
 0x382   :  { %v5053_v11 = vcombine.low %v3136_v18, %v3140_v55  ;;  %v5085_v20 = vcombine.low %v5076_v63, %v5083_v27  ;;  %v2552_v57 = vrot.slane %v8085_v7, %v9396_v43  ;;  %v2580_v54 = vrot.slane %v8085_v7, %v7977_v14 }
 0x383   :  { %v3192_v40 = vrot.slane %v2318_v30, %v9396_v43  ;;  %v3196_v45 = vrot.slane %v2318_v30, %v9397_v5  ;;  %v3200_v25 = vrot.slane %v2318_v30, %v7960_v16  ;;  %v3208_v29 = vrot.slane %v2318_v30, %v7968_v49 }
 0x384   :  { %6311 = vperm.xlu0 %7149, %v4512_v35   ;;  %v3204_v35 = vrot.slane %v2318_v30, %v7963_v41  ;;  %v3212_v3 = vrot.slane %v2318_v30, %v7971_v4  ;;  %v3216_v26 = vrot.slane %v2318_v30, %v7974_v39  ;;  %v3220_v12 = vrot.slane %v2318_v30, %v7977_v14 }
 0x385   :  { %v5069_v48 = vrot.slane %v5053_v11, %v7999_v19  ;;  %v8220_v18 = vpop.xlane.xlu0 %2227  ;;  %v5150_v55 = vcombine.low %v3192_v40, %v3196_v45  ;;  %v2540_v30 = vrot.slane %v8081_v34, %v7971_v4  ;;  %v4904_v31 = vcombine.low %v4896_v28, %v4903_v52 }
 0x386   :  { %v5151_v38 = vcombine.low %v3200_v25, %v3204_v35  ;;  %v5152_v1 = vcombine.low %v3208_v29, %v3212_v3  ;;  %v5153_v46 = vcombine.low %v3216_v26, %v3220_v12  ;;  %v2556_v25 = vrot.slane %v8085_v7, %v9397_v5 }
 0x387   :  { %v5084_v9 = vcombine.low %v5062_v24, %v5069_v48  ;;  %v5160_v33 = vrot.slane %v5150_v55, %v7999_v19  ;;  %v4123_v37 = vcombine.low %v2536_v36, %v2540_v30  ;;  %v2560_v35 = vrot.slane %v8085_v7, %v7960_v16 }
 0x388   :  { %6317 = vperm.xlu0 %7149, %v4610_v50   ;;  %v2544_v50 = vrot.slane %v8081_v34, %v7974_v39  ;;  %v5167_v11 = vrot.slane %v5151_v38, %v7999_v19  ;;  %v5174_v61 = vrot.slane %v5152_v1, %v7999_v19  ;;  %v8241_v45 = vpop.xlane.xlu1 %2249  ;;  %v2564_v29 = vrot.slane %v8085_v7, %v7963_v41 }
 0x389   :  { %v8233_v59 = vpop.xlane.xlu0 %2231  ;;  %v2568_v3 = vrot.slane %v8085_v7, %v7968_v49  ;;  %v5002_v26 = vcombine.low %v4994_v13, %v5001_v0  ;;  %v2572_v12 = vrot.slane %v8085_v7, %v7971_v4  ;;  %v5092_v62 = vrot.slane %v5084_v9, %v7999_v19 }
 0x38a   :  { %v5099_v28 = vrot.slane %v5085_v20, %v7999_v19  ;;  %v5182_v52 = vcombine.low %v5160_v33, %v5167_v11  ;;  %v2190_v24 = vmul.f32 %v8264_v44, %v2135_v15  ;;  %v4138_v63 = vrot.slane %v4122_v58, %v7999_v19 }
 0x38b   :  { %v4145_v27 = vrot.slane %v4123_v37, %v7999_v19  ;;  %v4170_v55 = vcombine.low %v2552_v57, %v2556_v25  ;;  %v4171_v38 = vcombine.low %v2560_v35, %v2564_v29  ;;  %v4172_v1 = vcombine.low %v2568_v3, %v2572_v12 }
 0x38c   :  { %6323 = vperm.xlu0 %7149, %v4708_v42   ;;  %v2548_v42 = vrot.slane %v8081_v34, %v7977_v14  ;;  %v5181_v34 = vrot.slane %v5153_v46, %v7999_v19  ;;  %v5100_v30 = vcombine.low %v5092_v62, %v5099_v28  ;;  %v8288_v57 = vadd.f32 %v7954_v32, %v8152_v2 }
 0x38d   :  { %v8257_v21 = vpop.xlane.xlu0 %2235  ;;  %v4187_v13 = vrot.slane %v4171_v38, %v7999_v19  ;;  %v4194_v0 = vrot.slane %v4172_v1, %v7999_v19 }
 0x38e   :  { %v4124_v40 = vcombine.low %v2544_v50, %v2548_v42  ;;  %v5183_v47 = vcombine.low %v5174_v61, %v5181_v34  ;;  %v5190_v50 = vrot.slane %v5182_v52, %v7999_v19 }
 0x390   :  { %6329 = vperm.xlu0 %7149, %v4806_v23   ;;  %v2576_v23 = vrot.slane %v8085_v7, %v7974_v39  ;;  %v8267_v48 = vpop.xlane.xlu1 %2253  ;;  %v4131_v7 = vrot.slane %v4121_v53, %v7999_v19  ;;  %v5197_v42 = vrot.slane %v5183_v47, %v7999_v19  ;;  %v4152_v15 = vrot.slane %v4124_v40, %v7999_v19 }
 0x391   :  { %v8272_v36 = vpop.xlane.xlu0 %2239  ;;  %v4180_v53 = vrot.slane %v4170_v55, %v7999_v19 }
 0x392   :  { %v4173_v46 = vcombine.low %v2576_v23, %v2580_v54  ;;  %v5198_v33 = vcombine.low %v5190_v50, %v5197_v42  ;;  %v4153_v11 = vcombine.low %v4131_v7, %v4138_v63  ;;  %v4154_v61 = vcombine.low %v4145_v27, %v4152_v15 }
 0x393   :  { %v4202_v37 = vcombine.low %v4180_v53, %v4187_v13  ;;  %v9399_v15 = vlaneseq }
 0x394   :  { %6335 = vperm.xlu0 %7149, %v4904_v31   ;;  %v4201_v9 = vrot.slane %v4173_v46, %v7999_v19  ;;  %v4161_v35 = vrot.slane %v4153_v11, %v7999_v19  ;;  %v4168_v29 = vrot.slane %v4154_v61, %v7999_v19 }
 0x395   :  { %v8283_v20 = vpop.xlane.xlu0 %2243  ;;  %v4210_v52 = vrot.slane %v4202_v37, %v7999_v19  ;;  %v8311_v53 = vand.u32 127, %v9399_v15  ;;  %v2596_v37 = vrot.slane %v8288_v57, %v7963_v41 }
 0x396   :  { %v4203_v40 = vcombine.low %v4194_v0, %v4201_v9 }
 0x397   :  { %9400 = vst [vmem:[#allocation17_spill] sm:$0xff] %v8311_v53 }
 0x398   :  { %6341 = vperm.xlu0 %7149, %v5002_v26   ;;  %v8277_v31 = vpop.xlane.xlu1 %2257  ;;  %v4217_v47 = vrot.slane %v4203_v40, %v7999_v19 }
 0x399   :  { %2281 = vadd.xlane.f32.xlu1 %v2190_v24  ;;  %9398 = vst [vmem:[#allocation16_spill] sm:$0xff] %v8277_v31  ;;  %v8290_v25 = vpop.xlane.xlu0 %2247 }
 0x39a   :  { %v4218_v0 = vcombine.low %v4210_v52, %v4217_v47  ;;  %v2600_v52 = vrot.slane %v8288_v57, %v7968_v49 }
 0x39c   :  { %6347 = vperm.xlu0 %7149, %v5100_v30   ;;  %v4169_v30 = vcombine.low %v4161_v35, %v4168_v29 }
 0x39d   :  { %v8304_v63 = vpop.xlane.xlu0 %2251 }
 0x3a0   :  { %v2262_v34 = vpop.xlane.xlu1 %2261  ;;  %6353 = vperm.xlu0 %7149, %v5198_v33   ;;  %v2584_v33 = vrot.slane %v8288_v57, %v9396_v43 }
 0x3a1   :  { %v2326_v58 = vadd.f32 %v7954_v32, %v2262_v34  ;;  %v8316_v11 = vpop.xlane.xlu0 %2255  ;;  %v2588_v34 = vrot.slane %v8288_v57, %v9397_v5 }
 0x3a3   :  { %v3448_v3 = vrot.slane %v2326_v58, %v9396_v43  ;;  %v3452_v26 = vrot.slane %v2326_v58, %v9397_v5  ;;  %v3456_v12 = vrot.slane %v2326_v58, %v7960_v16  ;;  %v3460_v23 = vrot.slane %v2326_v58, %v7963_v41 }
 0x3a4   :  { %v3464_v54 = vrot.slane %v2326_v58, %v7968_v49  ;;  %v3468_v62 = vrot.slane %v2326_v58, %v7971_v4  ;;  %v3472_v2 = vrot.slane %v2326_v58, %v7974_v39  ;;  %v3476_v28 = vrot.slane %v2326_v58, %v7977_v14 }
 0x3a5   :  { %v5542_v24 = vcombine.low %v3448_v3, %v3452_v26  ;;  %v5543_v7 = vcombine.low %v3456_v12, %v3460_v23  ;;  %v2592_v58 = vrot.slane %v8288_v57, %v7960_v16  ;;  %v8336_v47 = vpop.xlane.xlu0 %2259 }
 0x3a6   :  { %v5544_v27 = vcombine.low %v3464_v54, %v3468_v62  ;;  %v5545_v55 = vcombine.low %v3472_v2, %v3476_v28 }
 0x3a7   :  { %v5552_v38 = vrot.slane %v5542_v24, %v7999_v19  ;;  %v5559_v1 = vrot.slane %v5543_v7, %v7999_v19 }
 0x3a8   :  { %v2266_v46 = vpop.xlane.xlu1 %2265  ;;  %v5566_v50 = vrot.slane %v5544_v27, %v7999_v19  ;;  %v5573_v42 = vrot.slane %v5545_v55, %v7999_v19  ;;  %v2604_v55 = vrot.slane %v8288_v57, %v7971_v4 }
 0x3a9   :  { %v2328_v13 = vadd.f32 %v7954_v32, %v2266_v46  ;;  %v5574_v9 = vcombine.low %v5552_v38, %v5559_v1  ;;  %v8342_v38 = vadd.f32 %v7954_v32, %v8029_v60 }
 0x3aa   :  { %6290 = vperm.xlu1 %7150, %v4169_v30   ;;  %v5575_v61 = vcombine.low %v5566_v50, %v5573_v42 }
 0x3ab   :  { %v5582_v40 = vrot.slane %v5574_v9, %v7999_v19  ;;  %v3512_v35 = vrot.slane %v2328_v13, %v9396_v43  ;;  %v3516_v29 = vrot.slane %v2328_v13, %v9397_v5  ;;  %v3520_v3 = vrot.slane %v2328_v13, %v7960_v16 }
 0x3ac   :  { %v5589_v26 = vrot.slane %v5575_v61, %v7999_v19  ;;  %v3524_v12 = vrot.slane %v2328_v13, %v7963_v41  ;;  %v3528_v23 = vrot.slane %v2328_v13, %v7968_v49  ;;  %v3532_v54 = vrot.slane %v2328_v13, %v7971_v4 }
 0x3ad   :  { %v3536_v62 = vrot.slane %v2328_v13, %v7974_v39  ;;  %v3540_v2 = vrot.slane %v2328_v13, %v7977_v14  ;;  %v5640_v28 = vcombine.low %v3512_v35, %v3516_v29  ;;  %v6427_v13 = vadd.s32 4294967288, %v8311_v53  ;;  %v8358_v35 = vpop.xlane.xlu0 %2263 }
 0x3ae   :  { %6293 = vperm.xlu1 %7150, %v4218_v0   ;;  %v5590_v24 = vcombine.low %v5582_v40, %v5589_v26  ;;  %v5641_v7 = vcombine.low %v3520_v3, %v3524_v12  ;;  %v5642_v27 = vcombine.low %v3528_v23, %v3532_v54  ;;  %v8350_v0 = vsub.s32 %v8311_v53, %v9395_v56 }
 0x3af   :  { %v5643_v1 = vcombine.low %v3536_v62, %v3540_v2  ;;  %v5650_v46 = vrot.slane %v5640_v28, %v7999_v19  ;;  %v2608_v61 = vrot.slane %v8288_v57, %v7974_v39  ;;  %v2612_v40 = vrot.slane %v8288_v57, %v7977_v14  ;;  %9402 = vst [vmem:[#allocation19_spill] sm:$0xff] %v8358_v35 }
 0x3b0   :  { %6377 = vperm.xlu0 %7149, %v5590_v24   ;;  %v2270_v30 = vpop.xlane.xlu1 %2269  ;;  %v5657_v50 = vrot.slane %v5641_v7, %v7999_v19  ;;  %v5664_v42 = vrot.slane %v5642_v27, %v7999_v19  ;;  %9401 = vst [vmem:[#allocation18_spill] sm:$0xff] %v8350_v0  ;;  %v8360_v3 = vcombine.low %v2584_v33, %v2588_v34 }
 0x3b1   :  { %v2330_v9 = vadd.f32 %v7954_v32, %v2270_v30  ;;  %v5671_v60 = vrot.slane %v5643_v1, %v7999_v19  ;;  %v8362_v26 = vcombine.low %v2592_v58, %v2596_v37  ;;  %v8364_v12 = vcombine.low %v2600_v52, %v2604_v55  ;;  %v8376_v7 = vpop.xlane.xlu0 %2267 }
 0x3b2   :  { %v5672_v29 = vcombine.low %v5650_v46, %v5657_v50  ;;  %9403 = vst [vmem:[#allocation20_spill] sm:$0xff] %v8376_v7  ;;  %v4222_v1 = vcombine.low %v2608_v61, %v2612_v40  ;;  %v8379_v30 = vsub.s32 %v6427_v13, %v9395_v56 }
 0x3b3   :  { %v5673_v23 = vcombine.low %v5664_v42, %v5671_v60  ;;  %v3576_v54 = vrot.slane %v2330_v9, %v9396_v43  ;;  %v3580_v62 = vrot.slane %v2330_v9, %v9397_v5  ;;  %v3584_v2 = vrot.slane %v2330_v9, %v7960_v16 }
 0x3b4   :  { %v5680_v28 = vrot.slane %v5672_v29, %v7999_v19  ;;  %v3588_v57 = vrot.slane %v2330_v9, %v7963_v41  ;;  %v3592_v24 = vrot.slane %v2330_v9, %v7968_v49  ;;  %v3596_v33 = vrot.slane %v2330_v9, %v7971_v4  ;;  %9404 = vst [vmem:[#allocation14_spill] sm:$0xff] %v8379_v30 }
 0x3b5   :  { %v5687_v34 = vrot.slane %v5673_v23, %v7999_v19  ;;  %v3600_v58 = vrot.slane %v2330_v9, %v7974_v39  ;;  %v3604_v37 = vrot.slane %v2330_v9, %v7977_v14  ;;  %v5738_v52 = vcombine.low %v3576_v54, %v3580_v62 }
 0x3b6   :  { %v5739_v27 = vcombine.low %v3584_v2, %v3588_v57  ;;  %v5740_v55 = vcombine.low %v3592_v24, %v3596_v33  ;;  %v4229_v9 = vrot.slane %v8360_v3, %v7999_v19  ;;  %v2616_v54 = vrot.slane %v8342_v38, %v9396_v43  ;;  %v8394_v2 = vpop.xlane.xlu0 %2271 }
 0x3b7   :  { %v5688_v46 = vcombine.low %v5680_v28, %v5687_v34  ;;  %v5741_v50 = vcombine.low %v3600_v58, %v3604_v37  ;;  %v5748_v42 = vrot.slane %v5738_v52, %v7999_v19  ;;  %v4236_v40 = vrot.slane %v8362_v26, %v7999_v19  ;;  %9405 = vst [vmem:[#allocation15_spill] sm:$0xff] %v8394_v2 }
 0x3b8   :  { %v2274_v60 = vpop.xlane.xlu1 %2273  ;;  %v5755_v29 = vrot.slane %v5739_v27, %v7999_v19  ;;  %v5762_v23 = vrot.slane %v5740_v55, %v7999_v19  ;;  %v4243_v62 = vrot.slane %v8364_v12, %v7999_v19  ;;  %v4250_v57 = vrot.slane %v4222_v1, %v7999_v19 }
 0x3b9   :  { %6383 = vperm.xlu0 %7149, %v5688_v46   ;;  %v2332_v61 = vadd.f32 %v7954_v32, %v2274_v60  ;;  %v5769_v13 = vrot.slane %v5741_v50, %v7999_v19  ;;  %v2620_v3 = vrot.slane %v8342_v38, %v9397_v5  ;;  %v2624_v24 = vrot.slane %v8342_v38, %v7960_v16 }
 0x3ba   :  { %v5770_v28 = vcombine.low %v5748_v42, %v5755_v29  ;;  %v2628_v42 = vrot.slane %v8342_v38, %v7963_v41 }
 0x3bb   :  { %v5771_v33 = vcombine.low %v5762_v23, %v5769_v13  ;;  %v3640_v34 = vrot.slane %v2332_v61, %v9396_v43  ;;  %v3644_v58 = vrot.slane %v2332_v61, %v9397_v5  ;;  %v3648_v26 = vrot.slane %v2332_v61, %v7960_v16 }
 0x3bc   :  { %v6282_v37 = vpop.permute.xlu1 %6281  ;;  %v5778_v12 = vrot.slane %v5770_v28, %v7999_v19  ;;  %v3652_v52 = vrot.slane %v2332_v61, %v7963_v41  ;;  %v3656_v27 = vrot.slane %v2332_v61, %v7968_v49  ;;  %v3660_v55 = vrot.slane %v2332_v61, %v7971_v4 }
 0x3bd   :  { %v5785_v1 = vrot.slane %v5771_v33, %v7999_v19  ;;  %v3664_v46 = vrot.slane %v2332_v61, %v7974_v39  ;;  %v3668_v50 = vrot.slane %v2332_v61, %v7977_v14  ;;  %v5836_v29 = vcombine.low %v3640_v34, %v3644_v58 }
 0x3be   :  { %v6279_v60 = vpop.permute.xlu0 %6278  ;;  %v5837_v23 = vcombine.low %v3648_v26, %v3652_v52  ;;  %v5838_v13 = vcombine.low %v3656_v27, %v3660_v55  ;;  %v2632_v28 = vrot.slane %v8342_v38, %v7968_v49  ;;  %v6431_v15 = vrot.slane %v6282_v37, %v8379_v30 }
 0x3bf   :  { %v6426_v31 = vrot.slane %v6279_v60, %v8350_v0  ;;  %v5786_v2 = vcombine.low %v5778_v12, %v5785_v1  ;;  %v5839_v33 = vcombine.low %v3664_v46, %v3668_v50  ;;  %v5846_v7 = vrot.slane %v5836_v29, %v7999_v19  ;;  %v7408_v46 = vld [vmem:[%s9350_s4] ss:$0 sm:$0xff]  ;;  %s7514_s4 = smov [#allocation9]  }
 0x3c0   :  { %v5853_v61 = vrot.slane %v5837_v23, %v7999_v19  ;;  %v5860_v35 = vrot.slane %v5838_v13, %v7999_v19  ;;  %v2636_v34 = vrot.slane %v8342_v38, %v7971_v4  ;;  %v2640_v37 = vrot.slane %v8342_v38, %v7974_v39  ;;  %s6725_s25 = sshll.u32 %s7514_s4, 4  ;;  %s6726_s25 = int_to_ptr.vmem [resolvable:$true] %s6725_s25 }
 0x3c1   :  { %v8423_v58 = vsel %vm6432_vm0, %v6431_v15, %v6426_v31  ;;  %6389 = vperm.xlu0 %7149, %v5786_v2   ;;  %v5867_v26 = vrot.slane %v5839_v33, %v7999_v19  ;;  %v2644_v12 = vrot.slane %v8342_v38, %v7977_v14  ;;  %v4268_v27 = vcombine.low %v2616_v54, %v2620_v3  ;;  %s7475_s26 = scalar_lea.vmem %s6726_s25, 48  ;;  %s7479_s27 = scalar_lea.vmem %s6726_s25, 64 }
 0x3c2   :  { %9406 = vst [vmem:[#allocation21_spill] sm:$0xff] %v8423_v58  ;;  %v5868_v52 = vcombine.low %v5846_v7, %v5853_v61  ;;  %v4269_v55 = vcombine.low %v2624_v24, %v2628_v42  ;;  %v2081_v31 = vadd.f32 %v7408_v46, %v8015_v51  ;;  %v4251_v2 = vcombine.low %v4229_v9, %v4236_v40  ;;  %p7476_p10 = scmp.ne.s32.totalorder %s6726_s25, %s7475_s26  ;;  %p7480_p11 = scmp.lt.s32.totalorder %s6726_s25, %s6726_s25 }
 0x3c3   :  { %v5869_v1 = vcombine.low %v5860_v35, %v5867_v26  ;;  %v4252_v60 = vcombine.low %v4243_v62, %v4250_v57  ;;  %v4270_v29 = vcombine.low %v2632_v28, %v2636_v34  ;;  %v4271_v23 = vcombine.low %v2640_v37, %v2644_v12  ;;  %p7481_p12 = scmp.lt.s32.totalorder %s7479_s27, %s7475_s26 }
 0x3c4   :  { %v5876_v15 = vrot.slane %v5868_v52, %v7999_v19  ;;  %v4278_v38 = vrot.slane %v4268_v27, %v7999_v19  ;;  %v4285_v7 = vrot.slane %v4269_v55, %v7999_v19  ;;  %v8439_v35 = vadd.f32 %v7408_v46, %v8017_v17 }
 0x3c5   :  { %v5883_v50 = vrot.slane %v5869_v1, %v7999_v19  ;;  %v2137_v3 = vmax.f32 %v2081_v31, 0.0  ;;  %v4259_v51 = vrot.slane %v4251_v2, %v7999_v19  ;;  %v4266_v24 = vrot.slane %v4252_v60, %v7999_v19  ;;  %p7482_p13 = por %p7481_p12, %p7480_p11 }
 0x3c6   :  { %v4292_v9 = vrot.slane %v4270_v29, %v7999_v19  ;;  %v4299_v40 = vrot.slane %v4271_v23, %v7999_v19  ;;  %v2301_v62 = vadd.f32 %v7954_v32, %v8162_v10  ;;  %v2303_v57 = vadd.f32 %v7954_v32, %v8177_v8 }
 0x3c7   :  { %v5884_v54 = vcombine.low %v5876_v15, %v5883_v50  ;;  %v8449_v42 = vcombine.low %v4278_v38, %v4285_v7  ;;  %v2305_v17 = vadd.f32 %v7954_v32, %v8190_v6  ;;  %v8455_v13 = vadd.f32 %v7954_v32, %v8202_v22  ;;  %p7483_p0 = pnand %p7482_p13, %p7476_p10 }
 0x3c8   :  { %v8460_v33 = vadd.f32 %v7954_v32, %v8220_v18  ;;  %v8464_v10 = vadd.f32 %v7954_v32, %v8233_v59  ;;  %v8468_v8 = vadd.f32 %v7954_v32, %v8257_v21  ;;  %v8472_v6 = vadd.f32 %v7954_v32, %v8272_v36 }
 0x3c9   :  { %6395 = vperm.xlu0 %7149, %v5884_v54   ;;  %v2192_v22 = vmul.f32 %v8264_v44, %v2137_v3  ;;  %v8477_v61 = vadd.f32 %v7954_v32, %v8283_v20  ;;  %v8479_v18 = vcombine.low %v4259_v51, %v4266_v24  ;;  %v8481_v34 = vcombine.low %v4292_v9, %v4299_v40 }
 0x3ca   :  { %9407 = vst [vmem:[#allocation22_spill] sm:$0xff] %v8468_v8  ;;  %9408 = vst [vmem:[#allocation23_spill] sm:$0xff] %v8472_v6  ;;  %v6434_v59 = vadd.s32 4294967280, %v8311_v53  ;;  %v8486_v21 = vadd.f32 %v7954_v32, %v8290_v25  ;;  %v2648_v26 = vrot.slane %v2301_v62, %v9396_v43  ;;  %v2652_v37 = vrot.slane %v2301_v62, %v9397_v5 }
 0x3cb   :  { %9409 = vst [vmem:[#allocation24_spill] sm:$0xff] %v8477_v61  ;;  %v2656_v20 = vrot.slane %v2301_v62, %v7960_v16  ;;  %v2660_v12 = vrot.slane %v2301_v62, %v7963_v41  ;;  %v2664_v52 = vrot.slane %v2301_v62, %v7968_v49  ;;  %v2668_v27 = vrot.slane %v2301_v62, %v7971_v4 }
 0x3cc   :  { %9410 = vst [vmem:[#allocation25_spill] sm:$0xff] %v8486_v21  ;;  %v2672_v55 = vrot.slane %v2301_v62, %v7974_v39  ;;  %v2676_v25 = vrot.slane %v2301_v62, %v7977_v14  ;;  %v2712_v1 = vrot.slane %v2303_v57, %v9396_v43  ;;  %v2716_v46 = vrot.slane %v2303_v57, %v9397_v5 }
 0x3cd   :  { %v2720_v31 = vrot.slane %v2303_v57, %v7960_v16  ;;  %v2724_v15 = vrot.slane %v2303_v57, %v7963_v41  ;;  %v2728_v2 = vrot.slane %v2303_v57, %v7968_v49  ;;  %v2732_v50 = vrot.slane %v2303_v57, %v7971_v4 }
 0x3ce   :  { %v2736_v60 = vrot.slane %v2303_v57, %v7974_v39  ;;  %v2740_v29 = vrot.slane %v2303_v57, %v7977_v14  ;;  %v2776_v23 = vrot.slane %v2305_v17, %v9396_v43  ;;  %v2780_v38 = vrot.slane %v2305_v17, %v9397_v5 }
 0x3cf   :  { %v2784_v7 = vrot.slane %v2305_v17, %v7960_v16  ;;  %v2788_v54 = vrot.slane %v2305_v17, %v7963_v41  ;;  %v2792_v3 = vrot.slane %v2305_v17, %v7968_v49  ;;  %v2796_v51 = vrot.slane %v2305_v17, %v7971_v4 }
 0x3d0   :  { %v8515_v9 = vsub.s32 %v6434_v59, %v9395_v56  ;;  %v2800_v40 = vrot.slane %v2305_v17, %v7974_v39  ;;  %v2804_v62 = vrot.slane %v2305_v17, %v7977_v14  ;;  %v4317_v57 = vcombine.low %v2648_v26, %v2652_v37 }
 0x3d1   :  { %v4319_v28 = vcombine.low %v2664_v52, %v2668_v27  ;;  %v4320_v36 = vcombine.low %v2672_v55, %v2676_v25  ;;  %v4415_v30 = vcombine.low %v2712_v1, %v2716_v46  ;;  %v4416_v0 = vcombine.low %v2720_v31, %v2724_v15 }
 0x3d2   :  { %2285 = vadd.xlane.f32.xlu1 %v2192_v22  ;;  %9411 = vst [vmem:[#allocation26_spill] sm:$0xff] %v8515_v9  ;;  %v4318_v22 = vcombine.low %v2656_v20, %v2660_v12  ;;  %v4417_v21 = vcombine.low %v2728_v2, %v2732_v50  ;;  %v4418_v61 = vcombine.low %v2736_v60, %v2740_v29 }
 0x3d3   :  { %v4513_v6 = vcombine.low %v2776_v23, %v2780_v38  ;;  %v4514_v8 = vcombine.low %v2784_v7, %v2788_v54  ;;  %v4515_v58 = vcombine.low %v2792_v3, %v2796_v51  ;;  %v2840_v24 = vrot.slane %v8455_v13, %v9396_v43 }
 0x3d4   :  { %v4516_v59 = vcombine.low %v2800_v40, %v2804_v62  ;;  %v2844_v9 = vrot.slane %v8455_v13, %v9397_v5  ;;  %v2848_v17 = vrot.slane %v8455_v13, %v7960_v16  ;;  %v2852_v26 = vrot.slane %v8455_v13, %v7963_v41 }
 0x3d5   :  { %v2856_v37 = vrot.slane %v8455_v13, %v7968_v49  ;;  %v2860_v20 = vrot.slane %v8455_v13, %v7971_v4  ;;  %v2864_v12 = vrot.slane %v8455_v13, %v7974_v39  ;;  %v2868_v52 = vrot.slane %v8455_v13, %v7977_v14 }
 0x3d6   :  { %v4327_v27 = vrot.slane %v4317_v57, %v7999_v19  ;;  %v4334_v55 = vrot.slane %v4318_v22, %v7999_v19  ;;  %v4341_v25 = vrot.slane %v4319_v28, %v7999_v19  ;;  %v4348_v1 = vrot.slane %v4320_v36, %v7999_v19 }
 0x3d7   :  { %v4425_v46 = vrot.slane %v4415_v30, %v7999_v19  ;;  %v4432_v31 = vrot.slane %v4416_v0, %v7999_v19  ;;  %v4439_v15 = vrot.slane %v4417_v21, %v7999_v19  ;;  %v4446_v2 = vrot.slane %v4418_v61, %v7999_v19 }
 0x3d8   :  { %v4523_v50 = vrot.slane %v4513_v6, %v7999_v19  ;;  %v4530_v13 = vrot.slane %v4514_v8, %v7999_v19  ;;  %v4537_v60 = vrot.slane %v4515_v58, %v7999_v19  ;;  %v4544_v29 = vrot.slane %v4516_v59, %v7999_v19 }
 0x3d9   :  { %v4611_v23 = vcombine.low %v2840_v24, %v2844_v9  ;;  %v4612_v28 = vcombine.low %v2848_v17, %v2852_v26  ;;  %v4613_v38 = vcombine.low %v2856_v37, %v2860_v20  ;;  %v4614_v36 = vcombine.low %v2864_v12, %v2868_v52 }
 0x3da   :  { %v2904_v30 = vrot.slane %v8460_v33, %v9396_v43  ;;  %v2908_v0 = vrot.slane %v8460_v33, %v9397_v5  ;;  %v2912_v61 = vrot.slane %v8460_v33, %v7960_v16  ;;  %v2916_v8 = vrot.slane %v8460_v33, %v7963_v41 }
 0x3db   :  { %v2920_v58 = vrot.slane %v8460_v33, %v7968_v49  ;;  %v2924_v6 = vrot.slane %v8460_v33, %v7971_v4  ;;  %v2928_v21 = vrot.slane %v8460_v33, %v7974_v39  ;;  %v2932_v7 = vrot.slane %v8460_v33, %v7977_v14 }
 0x3dc   :  { %v8565_v54 = vadd.f32 %v7954_v32, %v8241_v45  ;;  %v6441_v3 = vadd.s32 4294967272, %v8311_v53  ;;  %v4349_v51 = vcombine.low %v4327_v27, %v4334_v55  ;;  %v4350_v24 = vcombine.low %v4341_v25, %v4348_v1 }
 0x3dd   :  { %v4447_v9 = vcombine.low %v4425_v46, %v4432_v31  ;;  %v4448_v40 = vcombine.low %v4439_v15, %v4446_v2  ;;  %v4545_v62 = vcombine.low %v4523_v50, %v4530_v13  ;;  %v4546_v57 = vcombine.low %v4537_v60, %v4544_v29 }
 0x3de   :  { %v4621_v22 = vrot.slane %v4611_v23, %v7999_v19  ;;  %v4628_v59 = vrot.slane %v4612_v28, %v7999_v19  ;;  %v4635_v17 = vrot.slane %v4613_v38, %v7999_v19  ;;  %v4642_v33 = vrot.slane %v4614_v36, %v7999_v19 }
 0x3df   :  { %v4709_v45 = vcombine.low %v2904_v30, %v2908_v0  ;;  %v4710_v26 = vcombine.low %v2912_v61, %v2916_v8  ;;  %v4711_v37 = vcombine.low %v2920_v58, %v2924_v6  ;;  %v4712_v20 = vcombine.low %v2928_v21, %v2932_v7 }
 0x3e0   :  { %v9412_v12 = vrot.slane %v8481_v34, %v7999_v19  ;;  %v9413_v52 = vrot.slane %v8449_v42, %v7999_v19  ;;  %v8580_v55 = vsub.s32 %v6441_v3, %v9395_v56  ;;  %v9415_v25 = vmax.f32 %v8439_v35, 0.0 }
 0x3e1   :  { %v4357_v46 = vrot.slane %v4349_v51, %v7999_v19  ;;  %v4364_v31 = vrot.slane %v4350_v24, %v7999_v19  ;;  %v4455_v34 = vrot.slane %v4447_v9, %v7999_v19  ;;  %v4462_v15 = vrot.slane %v4448_v40, %v7999_v19 }
 0x3e2   :  { %v4316_v27 = vcombine.low %v9413_v52, %v9412_v12  ;;  %9414 = vst [vmem:[#allocation27_spill] sm:$0xff] %v8580_v55  ;;  %v8585_v1 = vmul.f32 %v8264_v44, %v9415_v25  ;;  %v4553_v42 = vrot.slane %v4545_v62, %v7999_v19  ;;  %v4560_v2 = vrot.slane %v4546_v57, %v7999_v19 }
 0x3e3   :  { %6296 = vperm.xlu1 %7150, %v8479_v18   ;;  %v6455_v18 = vadd.s32 4294967256, %v8311_v53  ;;  %v8594_v50 = vcombine.low %v4621_v22, %v4628_v59  ;;  %v8596_v35 = vcombine.low %v4635_v17, %v4642_v33  ;;  %v4719_v44 = vrot.slane %v4709_v45, %v7999_v19 }
 0x3e4   :  { %v4726_v13 = vrot.slane %v4710_v26, %v7999_v19  ;;  %v4733_v60 = vrot.slane %v4711_v37, %v7999_v19  ;;  %v4740_v29 = vrot.slane %v4712_v20, %v7999_v19  ;;  %v8604_v23 = vadd.f32 %v7954_v32, %v8304_v63 }
 0x3e5   :  { %v8608_v28 = vadd.f32 %v7954_v32, %v8267_v48  ;;  %v8612_v38 = vadd.f32 %v7954_v32, %v8316_v11  ;;  %v8615_v36 = vsub.s32 %v6455_v18, %v9395_v56  ;;  %v8617_v30 = vcombine.low %v4357_v46, %v4364_v31  ;;  %v9419_v11 = vld [vmem:[#allocation19_spill] sm:$0xff] }
 0x3e6   :  { %v8619_v0 = vcombine.low %v4455_v34, %v4462_v15  ;;  %v2968_v63 = vrot.slane %v8464_v10, %v9396_v43  ;;  %v2972_v61 = vrot.slane %v8464_v10, %v9397_v5  ;;  %v8627_v48 = vadd.f32 %v7954_v32, %v8336_v47 }
 0x3e7   :  { %6299 = vperm.xlu1 %7150, %v4316_v27   ;;  %9416 = vst [vmem:[#allocation28_spill] sm:$0xff] %v8612_v38  ;;  %9417 = vst [vmem:[#allocation29_spill] sm:$0xff] %v8615_v36  ;;  %v8631_v8 = vadd.f32 %v7954_v32, %v9419_v11  ;;  %v8633_v58 = vcombine.low %v4553_v42, %v4560_v2  ;;  %v8636_v6 = vadd.s32 4294967264, %v8311_v53 }
 0x3e8   :  { %9418 = vst [vmem:[#allocation30_spill] sm:$0xff] %v8627_v48  ;;  %v8642_v51 = vcombine.low %v4719_v44, %v4726_v13  ;;  %v8644_v47 = vcombine.low %v4733_v60, %v4740_v29  ;;  %v2976_v9 = vrot.slane %v8464_v10, %v7960_v16  ;;  %v2980_v40 = vrot.slane %v8464_v10, %v7963_v41  ;;  %v9421_v29 = vld [vmem:[#allocation26_spill] sm:$0xff] }
 0x3e9   :  { %9420 = vst [vmem:[#allocation19_spill] sm:$0xff] %v8631_v8  ;;  %v2984_v62 = vrot.slane %v8464_v10, %v7968_v49  ;;  %v2988_v22 = vrot.slane %v8464_v10, %v7971_v4  ;;  %v2996_v17 = vrot.slane %v8464_v10, %v7977_v14  ;;  %v8659_v33 = vcombine.low %v2968_v63, %v2972_v61 }
 0x3ea   :  { %v8671_v34 = vcombine.low %v2976_v9, %v2980_v40 }
 0x3eb   :  { %v2276_v21 = vpop.xlane.xlu0 %2275  ;;  %v4809_v3 = vcombine.low %v2984_v62, %v2988_v22 }
 0x3ec   :  { %v2333_v24 = vadd.f32 %v7954_v32, %v2276_v21 }
 0x3ed   :  { %v2278_v57 = vpop.xlane.xlu1 %2277 }
 0x3ee   :  { %v2334_v45 = vadd.f32 %v7954_v32, %v2278_v57  ;;  %v3672_v26 = vrot.slane %v2333_v24, %v9396_v43  ;;  %v3676_v37 = vrot.slane %v2333_v24, %v9397_v5  ;;  %v3680_v20 = vrot.slane %v2333_v24, %v7960_v16 }
 0x3ef   :  { %v3684_v12 = vrot.slane %v2333_v24, %v7963_v41  ;;  %v3688_v52 = vrot.slane %v2333_v24, %v7968_v49  ;;  %v3692_v27 = vrot.slane %v2333_v24, %v7971_v4  ;;  %v3696_v25 = vrot.slane %v2333_v24, %v7974_v39  ;;  %v2280_v15 = vpop.xlane.xlu0 %2279 }
 0x3f0   :  { %v3700_v18 = vrot.slane %v2333_v24, %v7977_v14  ;;  %v5885_v46 = vcombine.low %v3672_v26, %v3676_v37  ;;  %v3704_v31 = vrot.slane %v2334_v45, %v9396_v43  ;;  %v3708_v13 = vrot.slane %v2334_v45, %v9397_v5  ;;  %v9422_v37 = vld [vmem:[#allocation21_spill] sm:$0xff] }
 0x3f1   :  { %v6285_v42 = vpop.permute.xlu1 %6284  ;;  %v5886_v2 = vcombine.low %v3680_v20, %v3684_v12  ;;  %v5887_v44 = vcombine.low %v3688_v52, %v3692_v27  ;;  %v3712_v60 = vrot.slane %v2334_v45, %v7960_v16  ;;  %v3716_v21 = vrot.slane %v2334_v45, %v7963_v41 }
 0x3f2   :  { %v6438_v63 = vrot.slane %v6285_v42, %v9421_v29  ;;  %v5888_v61 = vcombine.low %v3696_v25, %v3700_v18  ;;  %v5895_v11 = vrot.slane %v5885_v46, %v7999_v19  ;;  %v3720_v40 = vrot.slane %v2334_v45, %v7968_v49 }
 0x3f3   :  { %v5902_v24 = vrot.slane %v5886_v2, %v7999_v19  ;;  %v5909_v9 = vrot.slane %v5887_v44, %v7999_v19  ;;  %v3724_v57 = vrot.slane %v2334_v45, %v7971_v4  ;;  %v2335_v26 = vadd.f32 %v7954_v32, %v2280_v15 }
 0x3f4   :  { %v6440_v20 = vsel %vm6439_vm1, %v6438_v63, %v9422_v37  ;;  %v5916_v12 = vrot.slane %v5888_v61, %v7999_v19  ;;  %v3728_v52 = vrot.slane %v2334_v45, %v7974_v39  ;;  %v3732_v18 = vrot.slane %v2334_v45, %v7977_v14 }
 0x3f5   :  { %v6288_v27 = vpop.permute.xlu1 %6287  ;;  %v5917_v25 = vcombine.low %v5895_v11, %v5902_v24  ;;  %v5934_v46 = vcombine.low %v3704_v31, %v3708_v13  ;;  %v5935_v42 = vcombine.low %v3712_v60, %v3716_v21  ;;  %v5936_v7 = vcombine.low %v3720_v40, %v3724_v57 }
 0x3f6   :  { %v6445_v2 = vrot.slane %v6288_v27, %v8580_v55  ;;  %v5918_v44 = vcombine.low %v5909_v9, %v5916_v12  ;;  %v5937_v59 = vcombine.low %v3728_v52, %v3732_v18  ;;  %v3736_v31 = vrot.slane %v2335_v26, %v9396_v43 }
 0x3f7   :  { %v5925_v15 = vrot.slane %v5917_v25, %v7999_v19  ;;  %v5944_v63 = vrot.slane %v5934_v46, %v7999_v19  ;;  %v5951_v61 = vrot.slane %v5935_v42, %v7999_v19  ;;  %v5958_v45 = vrot.slane %v5936_v7, %v7999_v19 }
 0x3f8   :  { %v8693_v37 = vsel %vm6446_vm2, %v6445_v2, %v6440_v20  ;;  %v5932_v11 = vrot.slane %v5918_v44, %v7999_v19  ;;  %v5965_v13 = vrot.slane %v5937_v59, %v7999_v19  ;;  %v3740_v62 = vrot.slane %v2335_v26, %v9397_v5 }
 0x3f9   :  { %9423 = vst [vmem:[#allocation21_spill] sm:$0xff] %v8693_v37  ;;  %v5966_v60 = vcombine.low %v5944_v63, %v5951_v61  ;;  %v3744_v22 = vrot.slane %v2335_v26, %v7960_v16  ;;  %v3748_v24 = vrot.slane %v2335_v26, %v7963_v41  ;;  %v3752_v9 = vrot.slane %v2335_v26, %v7968_v49  ;;  %v9425_v61 = vld [vmem:[#allocation22_spill] sm:$0xff] }
 0x3fa   :  { %v5933_v21 = vcombine.low %v5925_v15, %v5932_v11  ;;  %v3756_v40 = vrot.slane %v2335_v26, %v7971_v4  ;;  %v5967_v57 = vcombine.low %v5958_v45, %v5965_v13  ;;  %v3760_v7 = vrot.slane %v2335_v26, %v7974_v39 }
 0x3fb   :  { %v5974_v20 = vrot.slane %v5966_v60, %v7999_v19  ;;  %v3764_v12 = vrot.slane %v2335_v26, %v7977_v14  ;;  %v5983_v59 = vcombine.low %v3736_v31, %v3740_v62  ;;  %v5984_v52 = vcombine.low %v3744_v22, %v3748_v24 }
 0x3fc   :  { %6398 = vperm.xlu0 %7149, %v5933_v21   ;;  %v5985_v27 = vcombine.low %v3752_v9, %v3756_v40  ;;  %v9424_v25 = vrot.slane %v8464_v10, %v7974_v39  ;;  %v5981_v46 = vrot.slane %v5967_v57, %v7999_v19  ;;  %v4817_v2 = vrot.slane %v8659_v33, %v7999_v19 }
 0x3fd   :  { %v5986_v42 = vcombine.low %v3760_v7, %v3764_v12  ;;  %v4824_v26 = vrot.slane %v8671_v34, %v7999_v19  ;;  %v5993_v44 = vrot.slane %v5983_v59, %v7999_v19  ;;  %v6000_v15 = vrot.slane %v5984_v52, %v7999_v19 }
 0x3fe   :  { %v4810_v18 = vcombine.low %v9424_v25, %v2996_v17  ;;  %v6007_v63 = vrot.slane %v5985_v27, %v7999_v19  ;;  %v3032_v11 = vrot.slane %v9425_v61, %v9396_v43  ;;  %v5982_v10 = vcombine.low %v5974_v20, %v5981_v46  ;;  %v9427_v20 = vld [vmem:[#allocation20_spill] sm:$0xff] }
 0x3ff   :  { %v6014_v17 = vrot.slane %v5986_v42, %v7999_v19  ;;  %v3036_v45 = vrot.slane %v9425_v61, %v9397_v5  ;;  %v3040_v33 = vrot.slane %v9425_v61, %v7960_v16  ;;  %v6015_v31 = vcombine.low %v5993_v44, %v6000_v15  ;;  %v9431_v42 = vld [vmem:[#allocation23_spill] sm:$0xff] }
 0x400   :  { %v4831_v34 = vrot.slane %v4809_v3, %v7999_v19  ;;  %v3044_v13 = vrot.slane %v9425_v61, %v7963_v41  ;;  %v3048_v60 = vrot.slane %v9425_v61, %v7968_v49  ;;  %6401 = vperm.xlu0 %7149, %v5982_v10   ;;  %v4838_v22 = vrot.slane %v4810_v18, %v7999_v19 }
 0x401   :  { %v6016_v62 = vcombine.low %v6007_v63, %v6014_v17  ;;  %v8734_v21 = vcombine.low %v4817_v2, %v4824_v26  ;;  %v3052_v24 = vrot.slane %v9425_v61, %v7971_v4  ;;  %v6023_v9 = vrot.slane %v6015_v31, %v7999_v19  ;;  %v9432_v31 = vld [vmem:[#allocation24_spill] sm:$0xff] }
 0x402   :  { %v8741_v3 = vsub.s32 %v8636_v6, %v9395_v56  ;;  %v3056_v40 = vrot.slane %v9425_v61, %v7974_v39  ;;  %v3060_v57 = vrot.slane %v9425_v61, %v7977_v14  ;;  %v8749_v7 = vadd.f32 %v7954_v32, %v9427_v20 }
 0x403   :  { %v6030_v12 = vrot.slane %v6016_v62, %v7999_v19  ;;  %v9429_v59 = vrot.slane %v8596_v35, %v7999_v19  ;;  %v9430_v52 = vrot.slane %v8594_v50, %v7999_v19  ;;  %v4905_v18 = vcombine.low %v3032_v11, %v3036_v45 }
 0x404   :  { %9426 = vst [vmem:[#allocation22_spill] sm:$0xff] %v8741_v3  ;;  %9428 = vst [vmem:[#allocation20_spill] sm:$0xff] %v8749_v7  ;;  %v4906_v46 = vcombine.low %v3040_v33, %v3044_v13  ;;  %v3096_v2 = vrot.slane %v9431_v42, %v9396_v43  ;;  %v8766_v44 = vcombine.low %v4831_v34, %v4838_v22 }
 0x405   :  { %v8758_v6 = vcombine.low %v9430_v52, %v9429_v59  ;;  %v6031_v26 = vcombine.low %v6023_v9, %v6030_v12  ;;  %v8770_v50 = vcombine.low %v3048_v60, %v3052_v24  ;;  %v8772_v15 = vcombine.low %v3056_v40, %v3060_v57  ;;  %v9433_v57 = vld [vmem:[#allocation25_spill] sm:$0xff] }
 0x406   :  { %v3100_v63 = vrot.slane %v9431_v42, %v9397_v5  ;;  %v3104_v61 = vrot.slane %v9431_v42, %v7960_v16  ;;  %v3108_v11 = vrot.slane %v9431_v42, %v7963_v41  ;;  %v3112_v10 = vrot.slane %v9431_v42, %v7968_v49 }
 0x407   :  { %6404 = vperm.xlu0 %7149, %v6031_v26   ;;  %v3116_v17 = vrot.slane %v9431_v42, %v7971_v4  ;;  %v3120_v45 = vrot.slane %v9431_v42, %v7974_v39  ;;  %v3124_v33 = vrot.slane %v9431_v42, %v7977_v14  ;;  %v3160_v34 = vrot.slane %v9432_v31, %v9396_v43 }
 0x408   :  { %v3164_v13 = vrot.slane %v9432_v31, %v9397_v5  ;;  %v3168_v60 = vrot.slane %v9432_v31, %v7960_v16  ;;  %v3172_v62 = vrot.slane %v9432_v31, %v7963_v41  ;;  %v3176_v22 = vrot.slane %v9432_v31, %v7968_v49 }
 0x409   :  { %v3180_v24 = vrot.slane %v9432_v31, %v7971_v4  ;;  %v3184_v9 = vrot.slane %v9432_v31, %v7974_v39  ;;  %v3188_v40 = vrot.slane %v9432_v31, %v7977_v14  ;;  %v3224_v20 = vrot.slane %v9433_v57, %v9396_v43 }
 0x40a   :  { %v3228_v12 = vrot.slane %v9433_v57, %v9397_v5  ;;  %v3232_v59 = vrot.slane %v9433_v57, %v7960_v16  ;;  %v3236_v52 = vrot.slane %v9433_v57, %v7963_v41  ;;  %v3240_v42 = vrot.slane %v9433_v57, %v7968_v49 }
 0x40b   :  { %2289 = vadd.xlane.f32.xlu1 %v8585_v1  ;;  %v3244_v26 = vrot.slane %v9433_v57, %v7971_v4  ;;  %v3248_v31 = vrot.slane %v9433_v57, %v7974_v39  ;;  %v3252_v35 = vrot.slane %v9433_v57, %v7977_v14  ;;  %v4915_v27 = vrot.slane %v4905_v18, %v7999_v19 }
 0x40c   :  { %v4922_v25 = vrot.slane %v4906_v46, %v7999_v19  ;;  %v5003_v55 = vcombine.low %v3096_v2, %v3100_v63  ;;  %v5004_v29 = vcombine.low %v3104_v61, %v3108_v11  ;;  %v5005_v56 = vcombine.low %v3112_v10, %v3116_v17 }
 0x40d   :  { %v5006_v1 = vcombine.low %v3120_v45, %v3124_v33  ;;  %v5101_v53 = vcombine.low %v3160_v34, %v3164_v13  ;;  %v5102_v7 = vcombine.low %v3168_v60, %v3172_v62  ;;  %v4854_v8 = vrot.slane %v8766_v44, %v7999_v19 }
 0x40e   :  { %v4929_v48 = vrot.slane %v8770_v50, %v7999_v19  ;;  %v5103_v36 = vcombine.low %v3176_v22, %v3180_v24  ;;  %v5104_v38 = vcombine.low %v3184_v9, %v3188_v40  ;;  %v5199_v37 = vcombine.low %v3224_v20, %v3228_v12  ;;  %v2284_v12 = vpop.xlane.xlu0 %2283 }
 0x40f   :  { %v5200_v57 = vcombine.low %v3232_v59, %v3236_v52  ;;  %v5201_v3 = vcombine.low %v3240_v42, %v3244_v26  ;;  %v5202_v18 = vcombine.low %v3248_v31, %v3252_v35  ;;  %v4936_v46 = vrot.slane %v8772_v15, %v7999_v19 }
 0x410   :  { %v8829_v2 = vcombine.low %v4915_v27, %v4922_v25  ;;  %v5013_v63 = vrot.slane %v5003_v55, %v7999_v19  ;;  %v5020_v61 = vrot.slane %v5004_v29, %v7999_v19  ;;  %v5027_v44 = vrot.slane %v5005_v56, %v7999_v19 }
 0x411   :  { %v5034_v11 = vrot.slane %v5006_v1, %v7999_v19  ;;  %v5111_v50 = vrot.slane %v5101_v53, %v7999_v19  ;;  %v5118_v10 = vrot.slane %v5102_v7, %v7999_v19  ;;  %v5125_v17 = vrot.slane %v5103_v36, %v7999_v19 }
 0x412   :  { %v5132_v35 = vrot.slane %v5104_v38, %v7999_v19  ;;  %v3256_v27 = vrot.slane %v8565_v54, %v9396_v43  ;;  %v3260_v55 = vrot.slane %v8565_v54, %v9397_v5  ;;  %v5209_v29 = vrot.slane %v5199_v37, %v7999_v19 }
 0x413   :  { %v5216_v56 = vrot.slane %v5200_v57, %v7999_v19  ;;  %v5223_v25 = vrot.slane %v5201_v3, %v7999_v19  ;;  %v5230_v53 = vrot.slane %v5202_v18, %v7999_v19  ;;  %v3264_v7 = vrot.slane %v8565_v54, %v7960_v16 }
 0x414   :  { %v3268_v38 = vrot.slane %v8565_v54, %v7963_v41  ;;  %v3272_v36 = vrot.slane %v8565_v54, %v7968_v49  ;;  %v3276_v15 = vrot.slane %v8565_v54, %v7971_v4  ;;  %v9434_v37 = vrot.slane %v8644_v47, %v7999_v19 }
 0x415   :  { %v9435_v3 = vrot.slane %v8642_v51, %v7999_v19  ;;  %v9436_v33 = vrot.slane %v8734_v21, %v7999_v19  ;;  %v3280_v13 = vrot.slane %v8565_v54, %v7974_v39  ;;  %v3284_v60 = vrot.slane %v8565_v54, %v7977_v14 }
 0x416   :  { %v4938_v62 = vcombine.low %v4929_v48, %v4936_v46  ;;  %v4945_v47 = vrot.slane %v8829_v2, %v7999_v19  ;;  %v5035_v22 = vcombine.low %v5013_v63, %v5020_v61  ;;  %v5036_v24 = vcombine.low %v5027_v44, %v5034_v11 }
 0x417   :  { %v8861_v45 = vcombine.low %v9435_v3, %v9434_v37  ;;  %v8866_v34 = vcombine.low %v9436_v33, %v4854_v8  ;;  %v5133_v51 = vcombine.low %v5111_v50, %v5118_v10  ;;  %v5134_v9 = vcombine.low %v5125_v17, %v5132_v35 }
 0x418   :  { %v5231_v40 = vcombine.low %v5209_v29, %v5216_v56  ;;  %v5232_v20 = vcombine.low %v5223_v25, %v5230_v53  ;;  %v5248_v21 = vcombine.low %v3256_v27, %v3260_v55  ;;  %v5249_v8 = vcombine.low %v3264_v7, %v3268_v38 }
 0x419   :  { %v5250_v59 = vcombine.low %v3272_v36, %v3276_v15  ;;  %v3288_v52 = vrot.slane %v8604_v23, %v9396_v43  ;;  %v5251_v42 = vcombine.low %v3280_v13, %v3284_v60  ;;  %v3292_v54 = vrot.slane %v8604_v23, %v9397_v5 }
 0x41a   :  { %v3296_v48 = vrot.slane %v8604_v23, %v7960_v16  ;;  %v3300_v26 = vrot.slane %v8604_v23, %v7963_v41  ;;  %v3304_v31 = vrot.slane %v8604_v23, %v7968_v49  ;;  %v3308_v1 = vrot.slane %v8604_v23, %v7971_v4 }
 0x41b   :  { %v3312_v57 = vrot.slane %v8604_v23, %v7974_v39  ;;  %v3316_v18 = vrot.slane %v8604_v23, %v7977_v14  ;;  %v2337_v46 = vadd.f32 %v7954_v32, %v2284_v12  ;;  %v4952_v2 = vrot.slane %v4938_v62, %v7999_v19 }
 0x41c   :  { %v5043_v63 = vrot.slane %v5035_v22, %v7999_v19  ;;  %v5050_v61 = vrot.slane %v5036_v24, %v7999_v19  ;;  %6302 = vperm.xlu1 %7150, %v8617_v30   ;;  %v5141_v44 = vrot.slane %v5133_v51, %v7999_v19  ;;  %v5148_v11 = vrot.slane %v5134_v9, %v7999_v19 }
 0x41d   :  { %v5239_v50 = vrot.slane %v5231_v40, %v7999_v19  ;;  %v5246_v10 = vrot.slane %v5232_v20, %v7999_v19  ;;  %v5258_v23 = vrot.slane %v5248_v21, %v7999_v19  ;;  %v5265_v17 = vrot.slane %v5249_v8, %v7999_v19 }
 0x41e   :  { %v5272_v35 = vrot.slane %v5250_v59, %v7999_v19  ;;  %v5279_v27 = vrot.slane %v5251_v42, %v7999_v19  ;;  %v5297_v55 = vcombine.low %v3288_v52, %v3292_v54  ;;  %v5298_v29 = vcombine.low %v3296_v48, %v3300_v26 }
 0x41f   :  { %v5299_v56 = vcombine.low %v3304_v31, %v3308_v1  ;;  %v5300_v30 = vcombine.low %v3312_v57, %v3316_v18  ;;  %v3800_v25 = vrot.slane %v2337_v46, %v9396_v43  ;;  %v3804_v53 = vrot.slane %v2337_v46, %v9397_v5 }
 0x420   :  { %v3808_v7 = vrot.slane %v2337_v46, %v7960_v16  ;;  %v3812_v38 = vrot.slane %v2337_v46, %v7963_v41  ;;  %6308 = vperm.xlu1 %7150, %v8619_v0   ;;  %v3816_v36 = vrot.slane %v2337_v46, %v7968_v49  ;;  %v3820_v15 = vrot.slane %v2337_v46, %v7971_v4 }
 0x421   :  { %v3824_v37 = vrot.slane %v2337_v46, %v7974_v39  ;;  %v3828_v3 = vrot.slane %v2337_v46, %v7977_v14  ;;  %v8912_v33 = vcombine.low %v4945_v47, %v4952_v2  ;;  %v8914_v13 = vcombine.low %v5043_v63, %v5050_v61 }
 0x422   :  { %v8916_v60 = vcombine.low %v5258_v23, %v5265_v17  ;;  %v8918_v62 = vcombine.low %v5272_v35, %v5279_v27  ;;  %v8920_v22 = vcombine.low %v5141_v44, %v5148_v11  ;;  %v8922_v0 = vcombine.low %v5239_v50, %v5246_v10 }
 0x423   :  { %v5307_v24 = vrot.slane %v5297_v55, %v7999_v19  ;;  %v5314_v51 = vrot.slane %v5298_v29, %v7999_v19  ;;  %v5321_v9 = vrot.slane %v5299_v56, %v7999_v19  ;;  %v5328_v47 = vrot.slane %v5300_v30, %v7999_v19  ;;  %v9437_v56 = vld [vmem:[#allocation22_spill] sm:$0xff] }
 0x424   :  { %v3320_v40 = vrot.slane %v8608_v28, %v9396_v43  ;;  %v3324_v20 = vrot.slane %v8608_v28, %v9397_v5  ;;  %6314 = vperm.xlu1 %7150, %v8633_v58   ;;  %v6081_v12 = vcombine.low %v3800_v25, %v3804_v53  ;;  %v6082_v21 = vcombine.low %v3808_v7, %v3812_v38 }
 0x425   :  { %v6083_v8 = vcombine.low %v3816_v36, %v3820_v15  ;;  %v6084_v59 = vcombine.low %v3824_v37, %v3828_v3  ;;  %v5288_v52 = vrot.slane %v8916_v60, %v7999_v19  ;;  %v5295_v42 = vrot.slane %v8918_v62, %v7999_v19  ;;  %v9438_v3 = vld [vmem:[#allocation21_spill] sm:$0xff] }
 0x426   :  { %v3328_v54 = vrot.slane %v8608_v28, %v7960_v16  ;;  %v3332_v48 = vrot.slane %v8608_v28, %v7963_v41  ;;  %v2282_v26 = vpop.xlane.xlu1 %2281  ;;  %v8941_v31 = vcombine.low %v5307_v24, %v5314_v51  ;;  %v3336_v58 = vrot.slane %v8608_v28, %v7968_v49 }
 0x427   :  { %v3340_v1 = vrot.slane %v8608_v28, %v7971_v4  ;;  %v3344_v57 = vrot.slane %v8608_v28, %v7974_v39  ;;  %v2336_v18 = vadd.f32 %v7954_v32, %v2282_v26  ;;  %v8950_v46 = vcombine.low %v5321_v9, %v5328_v47  ;;  %v9439_v47 = vld [vmem:[#allocation28_spill] sm:$0xff] }
 0x428   :  { %v3348_v2 = vrot.slane %v8608_v28, %v7977_v14  ;;  %v8954_v63 = vcombine.low %v3320_v40, %v3324_v20  ;;  %6320 = vperm.xlu1 %7150, %v8758_v6   ;;  %v6091_v61 = vrot.slane %v6081_v12, %v7999_v19  ;;  %v6098_v44 = vrot.slane %v6082_v21, %v7999_v19 }
 0x429   :  { %v6105_v11 = vrot.slane %v6083_v8, %v7999_v19  ;;  %v6112_v50 = vrot.slane %v6084_v59, %v7999_v19  ;;  %v3768_v10 = vrot.slane %v2336_v18, %v9396_v43  ;;  %v3772_v23 = vrot.slane %v2336_v18, %v9397_v5  ;;  %v9440_v59 = vld [vmem:[#allocation29_spill] sm:$0xff] }
 0x42a   :  { %v3776_v17 = vrot.slane %v2336_v18, %v7960_v16  ;;  %v3780_v28 = vrot.slane %v2336_v18, %v7963_v41  ;;  %v6291_v35 = vpop.permute.xlu1 %6290  ;;  %v3784_v27 = vrot.slane %v2336_v18, %v7968_v49  ;;  %v3788_v6 = vrot.slane %v2336_v18, %v7971_v4 }
 0x42b   :  { %v3792_v55 = vrot.slane %v2336_v18, %v7974_v39  ;;  %v3796_v29 = vrot.slane %v2336_v18, %v7977_v14  ;;  %v6452_v30 = vrot.slane %v6291_v35, %v9437_v56  ;;  %v6032_v25 = vcombine.low %v3768_v10, %v3772_v23 }
 0x42c   :  { %v6033_v53 = vcombine.low %v3776_v17, %v3780_v28  ;;  %v8970_v7 = vcombine.low %v3328_v54, %v3332_v48  ;;  %6326 = vperm.xlu1 %7150, %v8861_v45   ;;  %v6034_v38 = vcombine.low %v3784_v27, %v3788_v6  ;;  %v8973_v15 = vcombine.low %v3336_v58, %v3340_v1  ;;  %v9441_v17 = vld [vmem:[#allocation30_spill] sm:$0xff] }
 0x42d   :  { %v6035_v36 = vcombine.low %v3792_v55, %v3796_v29  ;;  %v8975_v37 = vcombine.low %v3344_v57, %v3348_v2  ;;  %v6454_v24 = vsel %vm6453_vm3, %v6452_v30, %v9438_v3  ;;  %v6042_v51 = vrot.slane %v6032_v25, %v7999_v19 }
 0x42e   :  { %v6049_v9 = vrot.slane %v6033_v53, %v7999_v19  ;;  %v3352_v40 = vrot.slane %v9439_v47, %v9396_v43  ;;  %v6294_v20 = vpop.permute.xlu1 %6293  ;;  %v6056_v12 = vrot.slane %v6034_v38, %v7999_v19  ;;  %v6113_v21 = vcombine.low %v6091_v61, %v6098_v44 }
 0x42f   :  { %v6063_v45 = vrot.slane %v6035_v36, %v7999_v19  ;;  %v6114_v8 = vcombine.low %v6105_v11, %v6112_v50  ;;  %v6459_v54 = vrot.slane %v6294_v20, %v9440_v59  ;;  %v3356_v26 = vrot.slane %v9439_v47, %v9397_v5 }
 0x430   :  { %v6064_v48 = vcombine.low %v6042_v51, %v6049_v9  ;;  %v3360_v58 = vrot.slane %v9439_v47, %v7960_v16  ;;  %6332 = vperm.xlu1 %7150, %v8866_v34   ;;  %v3364_v57 = vrot.slane %v9439_v47, %v7963_v41  ;;  %v3368_v18 = vrot.slane %v9439_v47, %v7968_v49 }
 0x431   :  { %v6065_v1 = vcombine.low %v6056_v12, %v6063_v45  ;;  %v3372_v2 = vrot.slane %v9439_v47, %v7971_v4  ;;  %v8998_v61 = vsel %vm6460_vm4, %v6459_v54, %v6454_v24  ;;  %v3376_v11 = vrot.slane %v9439_v47, %v7974_v39 }
 0x432   :  { %v6072_v44 = vrot.slane %v6064_v48, %v7999_v19  ;;  %v3380_v34 = vrot.slane %v9439_v47, %v7977_v14  ;;  %v6121_v10 = vrot.slane %v6113_v21, %v7999_v19  ;;  %v6128_v23 = vrot.slane %v6114_v8, %v7999_v19  ;;  %v9442_v21 = vld [vmem:[#allocation19_spill] sm:$0xff] }
 0x433   :  { %v6079_v50 = vrot.slane %v6065_v1, %v7999_v19  ;;  %v3416_v28 = vrot.slane %v9441_v17, %v9396_v43  ;;  %v3420_v35 = vrot.slane %v9441_v17, %v9397_v5  ;;  %v3424_v27 = vrot.slane %v9441_v17, %v7960_v16 }
 0x434   :  { %v3428_v6 = vrot.slane %v9441_v17, %v7963_v41  ;;  %v3432_v55 = vrot.slane %v9441_v17, %v7968_v49  ;;  %6338 = vperm.xlu1 %7150, %v8912_v33   ;;  %v3436_v30 = vrot.slane %v9441_v17, %v7971_v4  ;;  %v3440_v25 = vrot.slane %v9441_v17, %v7974_v39 }
 0x435   :  { %v6080_v29 = vcombine.low %v6072_v44, %v6079_v50  ;;  %v3444_v53 = vrot.slane %v9441_v17, %v7977_v14  ;;  %v9031_v38 = vcombine.low %v5288_v52, %v5295_v42  ;;  %v5337_v33 = vrot.slane %v8941_v31, %v7999_v19 }
 0x436   :  { %v5344_v36 = vrot.slane %v8950_v46, %v7999_v19  ;;  %v5356_v3 = vrot.slane %v8954_v63, %v7999_v19  ;;  %v5363_v24 = vrot.slane %v8970_v7, %v7999_v19  ;;  %v5370_v62 = vrot.slane %v8973_v15, %v7999_v19 }
 0x437   :  { %6407 = vperm.xlu0 %7149, %v6080_v29   ;;  %v5377_v60 = vrot.slane %v8975_v37, %v7999_v19  ;;  %v5395_v52 = vcombine.low %v3352_v40, %v3356_v26  ;;  %v6129_v42 = vcombine.low %v6121_v10, %v6128_v23  ;;  %v5396_v51 = vcombine.low %v3360_v58, %v3364_v57 }
 0x438   :  { %v5397_v9 = vcombine.low %v3368_v18, %v3372_v2  ;;  %v5398_v47 = vcombine.low %v3376_v11, %v3380_v34  ;;  %6344 = vperm.xlu1 %7150, %v8914_v13   ;;  %v5493_v20 = vcombine.low %v3416_v28, %v3420_v35  ;;  %v5494_v12 = vcombine.low %v3424_v27, %v3428_v6  ;;  %v9443_v35 = vld [vmem:[#allocation20_spill] sm:$0xff] }
 0x439   :  { %v5495_v63 = vcombine.low %v3432_v55, %v3436_v30  ;;  %v5496_v45 = vcombine.low %v3440_v25, %v3444_v53  ;;  %v3480_v7 = vrot.slane %v9442_v21, %v9396_v43  ;;  %v3484_v15 = vrot.slane %v9442_v21, %v9397_v5 }
 0x43a   :  { %v3488_v37 = vrot.slane %v9442_v21, %v7960_v16  ;;  %v3492_v40 = vrot.slane %v9442_v21, %v7963_v41  ;;  %v3496_v13 = vrot.slane %v9442_v21, %v7968_v49  ;;  %v3500_v8 = vrot.slane %v9442_v21, %v7971_v4 }
 0x43b   :  { %6410 = vperm.xlu0 %7149, %v6129_v42   ;;  %v3504_v54 = vrot.slane %v9442_v21, %v7974_v39  ;;  %v3508_v48 = vrot.slane %v9442_v21, %v7977_v14  ;;  %v5378_v26 = vcombine.low %v5356_v3, %v5363_v24  ;;  %v5379_v58 = vcombine.low %v5370_v62, %v5377_v60 }
 0x43c   :  { %v5405_v1 = vrot.slane %v5395_v52, %v7999_v19  ;;  %v5412_v57 = vrot.slane %v5396_v51, %v7999_v19  ;;  %6350 = vperm.xlu1 %7150, %v8920_v22   ;;  %v5419_v18 = vrot.slane %v5397_v9, %v7999_v19  ;;  %v5426_v2 = vrot.slane %v5398_v47, %v7999_v19 }
 0x43d   :  { %v5503_v44 = vrot.slane %v5493_v20, %v7999_v19  ;;  %v5510_v11 = vrot.slane %v5494_v12, %v7999_v19  ;;  %v5517_v34 = vrot.slane %v5495_v63, %v7999_v19  ;;  %v5524_v50 = vrot.slane %v5496_v45, %v7999_v19  ;;  %v9444_v20 = vld [vmem:[#allocation15_spill] sm:$0xff] }
 0x43e   :  { %v5591_v10 = vcombine.low %v3480_v7, %v3484_v15  ;;  %v5592_v23 = vcombine.low %v3488_v37, %v3492_v40  ;;  %v5593_v17 = vcombine.low %v3496_v13, %v3500_v8  ;;  %v5594_v28 = vcombine.low %v3504_v54, %v3508_v48  ;;  %v9445_v7 = vld [vmem:[#allocation16_spill] sm:$0xff] }
 0x43f   :  { %v3544_v27 = vrot.slane %v9443_v35, %v9396_v43  ;;  %v3548_v22 = vrot.slane %v9443_v35, %v9397_v5  ;;  %v3552_v6 = vrot.slane %v9443_v35, %v7960_v16  ;;  %v3556_v55 = vrot.slane %v9443_v35, %v7963_v41 }
 0x440   :  { %v3560_v29 = vrot.slane %v9443_v35, %v7968_v49  ;;  %v3564_v30 = vrot.slane %v9443_v35, %v7971_v4  ;;  %6356 = vperm.xlu1 %7150, %v8922_v0   ;;  %v5386_v25 = vrot.slane %v5378_v26, %v7999_v19  ;;  %v5393_v53 = vrot.slane %v5379_v58, %v7999_v19 }
 0x441   :  { %v3568_v3 = vrot.slane %v9443_v35, %v7974_v39  ;;  %v3572_v24 = vrot.slane %v9443_v35, %v7977_v14  ;;  %v5427_v62 = vcombine.low %v5405_v1, %v5412_v57  ;;  %v5428_v60 = vcombine.low %v5419_v18, %v5426_v2 }
 0x442   :  { %v5525_v52 = vcombine.low %v5503_v44, %v5510_v11  ;;  %v5526_v42 = vcombine.low %v5517_v34, %v5524_v50  ;;  %v5601_v51 = vrot.slane %v5591_v10, %v7999_v19  ;;  %v5608_v9 = vrot.slane %v5592_v23, %v7999_v19  ;;  %v2288_v44 = vpop.xlane.xlu0 %2287 }
 0x443   :  { %v5615_v0 = vrot.slane %v5593_v17, %v7999_v19  ;;  %v5622_v47 = vrot.slane %v5594_v28, %v7999_v19  ;;  %v2331_v12 = vadd.f32 %v7954_v32, %v9444_v20  ;;  %v5689_v63 = vcombine.low %v3544_v27, %v3548_v22 }
 0x444   :  { %v5690_v45 = vcombine.low %v3552_v6, %v3556_v55  ;;  %v5691_v21 = vcombine.low %v3560_v29, %v3564_v30  ;;  %v2324_v15 = vadd.f32 %v7954_v32, %v9445_v7  ;;  %6359 = vperm.xlu1 %7150, %v9031_v38   ;;  %v5692_v37 = vcombine.low %v3568_v3, %v3572_v24 }
 0x445   :  { %v5345_v40 = vcombine.low %v5337_v33, %v5344_v36  ;;  %v5394_v13 = vcombine.low %v5386_v25, %v5393_v53  ;;  %v5435_v8 = vrot.slane %v5427_v62, %v7999_v19  ;;  %v5442_v54 = vrot.slane %v5428_v60, %v7999_v19 }
 0x446   :  { %v5533_v48 = vrot.slane %v5525_v52, %v7999_v19  ;;  %v5540_v26 = vrot.slane %v5526_v42, %v7999_v19  ;;  %v5623_v58 = vcombine.low %v5601_v51, %v5608_v9  ;;  %v5624_v1 = vcombine.low %v5615_v0, %v5622_v47 }
 0x447   :  { %v5699_v38 = vrot.slane %v5689_v63, %v7999_v19  ;;  %v5706_v57 = vrot.slane %v5690_v45, %v7999_v19  ;;  %v5713_v46 = vrot.slane %v5691_v21, %v7999_v19  ;;  %v3608_v31 = vrot.slane %v2331_v12, %v9396_v43 }
 0x448   :  { %6362 = vperm.xlu1 %7150, %v5345_v40   ;;  %v5720_v33 = vrot.slane %v5692_v37, %v7999_v19  ;;  %v3612_v36 = vrot.slane %v2331_v12, %v9397_v5  ;;  %v3616_v18 = vrot.slane %v2331_v12, %v7960_v16  ;;  %v3620_v2 = vrot.slane %v2331_v12, %v7963_v41 }
 0x449   :  { %v3624_v11 = vrot.slane %v2331_v12, %v7968_v49  ;;  %v3628_v34 = vrot.slane %v2331_v12, %v7971_v4  ;;  %v3632_v50 = vrot.slane %v2331_v12, %v7974_v39  ;;  %v3636_v10 = vrot.slane %v2331_v12, %v7977_v14 }
 0x44a   :  { %v3384_v23 = vrot.slane %v2324_v15, %v9396_v43  ;;  %v3388_v17 = vrot.slane %v2324_v15, %v9397_v5  ;;  %v3392_v28 = vrot.slane %v2324_v15, %v7960_v16  ;;  %v3396_v35 = vrot.slane %v2324_v15, %v7963_v41 }
 0x44b   :  { %v3400_v27 = vrot.slane %v2324_v15, %v7968_v49  ;;  %v3404_v22 = vrot.slane %v2324_v15, %v7971_v4  ;;  %v3408_v6 = vrot.slane %v2324_v15, %v7974_v39  ;;  %v3412_v55 = vrot.slane %v2324_v15, %v7977_v14 }
 0x44c   :  { %v2339_v29 = vadd.f32 %v7954_v32, %v2288_v44  ;;  %6365 = vperm.xlu1 %7150, %v5394_v13   ;;  %v5443_v30 = vcombine.low %v5435_v8, %v5442_v54  ;;  %v5541_v25 = vcombine.low %v5533_v48, %v5540_v26  ;;  %v5631_v53 = vrot.slane %v5623_v58, %v7999_v19 }
 0x44d   :  { %v5638_v3 = vrot.slane %v5624_v1, %v7999_v19  ;;  %v5721_v24 = vcombine.low %v5699_v38, %v5706_v57  ;;  %v5722_v62 = vcombine.low %v5713_v46, %v5720_v33  ;;  %v5787_v60 = vcombine.low %v3608_v31, %v3612_v36 }
 0x44e   :  { %v5788_v52 = vcombine.low %v3616_v18, %v3620_v2  ;;  %v5789_v42 = vcombine.low %v3624_v11, %v3628_v34  ;;  %v5790_v51 = vcombine.low %v3632_v50, %v3636_v10  ;;  %v5444_v9 = vcombine.low %v3384_v23, %v3388_v17 }
 0x44f   :  { %v5445_v0 = vcombine.low %v3392_v28, %v3396_v35  ;;  %v5446_v47 = vcombine.low %v3400_v27, %v3404_v22  ;;  %v5447_v20 = vcombine.low %v3408_v6, %v3412_v55  ;;  %v3864_v12 = vrot.slane %v2339_v29, %v9396_v43  ;;  %v9446_v6 = vld [vmem:[#allocation17_spill] sm:$0xff] }
 0x450   :  { %6368 = vperm.xlu1 %7150, %v5443_v30   ;;  %v3868_v63 = vrot.slane %v2339_v29, %v9397_v5  ;;  %v3872_v45 = vrot.slane %v2339_v29, %v7960_v16  ;;  %v3876_v21 = vrot.slane %v2339_v29, %v7963_v41  ;;  %v3880_v7 = vrot.slane %v2339_v29, %v7968_v49 }
 0x451   :  { %v3884_v15 = vrot.slane %v2339_v29, %v7971_v4  ;;  %v3888_v37 = vrot.slane %v2339_v29, %v7974_v39  ;;  %v3892_v40 = vrot.slane %v2339_v29, %v7977_v14  ;;  %v5797_v13 = vrot.slane %v5787_v60, %v7999_v19 }
 0x452   :  { %v5804_v8 = vrot.slane %v5788_v52, %v7999_v19  ;;  %v5811_v54 = vrot.slane %v5789_v42, %v7999_v19  ;;  %v5818_v48 = vrot.slane %v5790_v51, %v7999_v19  ;;  %v5639_v26 = vcombine.low %v5631_v53, %v5638_v3  ;;  %v9447_v52 = vld [vmem:[#allocation13_spill] sm:$0xff] }
 0x453   :  { %v5454_v58 = vrot.slane %v5444_v9, %v7999_v19  ;;  %v5461_v1 = vrot.slane %v5445_v0, %v7999_v19  ;;  %v5468_v38 = vrot.slane %v5446_v47, %v7999_v19  ;;  %v5475_v57 = vrot.slane %v5447_v20, %v7999_v19 }
 0x454   :  { %6374 = vperm.xlu1 %7150, %v5541_v25   ;;  %v6179_v46 = vcombine.low %v3864_v12, %v3868_v63  ;;  %v6180_v31 = vcombine.low %v3872_v45, %v3876_v21  ;;  %v6181_v33 = vcombine.low %v3880_v7, %v3884_v15  ;;  %v6182_v36 = vcombine.low %v3888_v37, %v3892_v40 }
 0x455   :  { %v5729_v18 = vrot.slane %v5721_v24, %v7999_v19  ;;  %v5736_v2 = vrot.slane %v5722_v62, %v7999_v19  ;;  %v5819_v44 = vcombine.low %v5797_v13, %v5804_v8  ;;  %v5820_v11 = vcombine.low %v5811_v54, %v5818_v48 }
 0x456   :  { %v5476_v34 = vcombine.low %v5454_v58, %v5461_v1  ;;  %v5477_v50 = vcombine.low %v5468_v38, %v5475_v57  ;;  %v6189_v10 = vrot.slane %v6179_v46, %v7999_v19  ;;  %v6196_v23 = vrot.slane %v6180_v31, %v7999_v19 }
 0x457   :  { %v6203_v17 = vrot.slane %v6181_v33, %v7999_v19  ;;  %v6210_v28 = vrot.slane %v6182_v36, %v7999_v19  ;;  %v5737_v35 = vcombine.low %v5729_v18, %v5736_v2  ;;  %v5827_v27 = vrot.slane %v5819_v44, %v7999_v19 }
 0x458   :  { %6380 = vperm.xlu1 %7150, %v5639_v26   ;;  %v5834_v22 = vrot.slane %v5820_v11, %v7999_v19  ;;  %v6462_v55 = vadd.s32 4294967248, %v9446_v6  ;;  %v5484_v29 = vrot.slane %v5476_v34, %v7999_v19  ;;  %v5491_v30 = vrot.slane %v5477_v50, %v7999_v19 }
 0x459   :  { %v6211_v25 = vcombine.low %v6189_v10, %v6196_v23  ;;  %v6212_v53 = vcombine.low %v6203_v17, %v6210_v28  ;;  %v6469_v62 = vadd.s32 4294967240, %v9446_v6  ;;  %v6483_v50 = vadd.s32 4294967224, %v9446_v6  ;;  %v6306_v23 = vpop.permute.xlu0 %6305 }
 0x45a   :  { %v5835_v3 = vcombine.low %v5827_v27, %v5834_v22  ;;  %v9162_v42 = vsub.s32 %v6462_v55, %v9447_v52  ;;  %v5492_v51 = vcombine.low %v5484_v29, %v5491_v30  ;;  %v6476_v10 = vadd.s32 4294967232, %v9446_v6 }
 0x45b   :  { %v6219_v9 = vrot.slane %v6211_v25, %v7999_v19  ;;  %v6226_v0 = vrot.slane %v6212_v53, %v7999_v19  ;;  %v9176_v54 = vsub.s32 %v6469_v62, %v9447_v52  ;;  %v9191_v28 = vsub.s32 %v6483_v50, %v9447_v52 }
 0x45c   :  { %6386 = vperm.xlu1 %7150, %v5737_v35   ;;  %v6497_v35 = vadd.s32 4294967208, %v9446_v6  ;;  %v6511_v27 = vadd.s32 4294967192, %v9446_v6  ;;  %v9197_v55 = vsub.s32 %v6476_v10, %v9447_v52  ;;  %v6490_v29 = vadd.s32 4294967216, %v9446_v6 }
 0x45d   :  { %v6227_v1 = vcombine.low %v6219_v9, %v6226_v0  ;;  %v6312_v9 = vpop.permute.xlu0 %6311 }
 0x45f   :  { %v2286_v24 = vpop.xlane.xlu1 %2285 }
 0x460   :  { %v2338_v60 = vadd.f32 %v7954_v32, %v2286_v24  ;;  %6392 = vperm.xlu1 %7150, %v5835_v3  }
 0x462   :  { %v3832_v47 = vrot.slane %v2338_v60, %v9396_v43  ;;  %v3836_v20 = vrot.slane %v2338_v60, %v9397_v5  ;;  %v3840_v12 = vrot.slane %v2338_v60, %v7960_v16  ;;  %v3844_v63 = vrot.slane %v2338_v60, %v7963_v41 }
 0x463   :  { %v6297_v45 = vpop.permute.xlu1 %6296  ;;  %v3848_v21 = vrot.slane %v2338_v60, %v7968_v49  ;;  %v3852_v7 = vrot.slane %v2338_v60, %v7971_v4  ;;  %v3856_v15 = vrot.slane %v2338_v60, %v7974_v39  ;;  %v3860_v37 = vrot.slane %v2338_v60, %v7977_v14 }
 0x464   :  { %v6466_v40 = vrot.slane %v6297_v45, %v9162_v42  ;;  %6371 = vperm.xlu1 %7150, %v5492_v51   ;;  %v6130_v13 = vcombine.low %v3832_v47, %v3836_v20  ;;  %v6131_v8 = vcombine.low %v3840_v12, %v3844_v63 }
 0x465   :  { %v6132_v48 = vcombine.low %v3848_v21, %v3852_v7  ;;  %v6133_v26 = vcombine.low %v3856_v15, %v3860_v37 }
 0x466   :  { %v6468_v58 = vsel %vm6467_vm5, %v6466_v40, %v8998_v61  ;;  %v6140_v38 = vrot.slane %v6130_v13, %v7999_v19  ;;  %v6147_v57 = vrot.slane %v6131_v8, %v7999_v19  ;;  %v9229_v8 = vsub.s32 %v6511_v27, %v9447_v52 }
 0x467   :  { %v6300_v46 = vpop.permute.xlu1 %6299  ;;  %v6154_v31 = vrot.slane %v6132_v48, %v7999_v19  ;;  %v6161_v33 = vrot.slane %v6133_v26, %v7999_v19  ;;  %v6318_v26 = vpop.permute.xlu0 %6317 }
 0x468   :  { %v6473_v36 = vrot.slane %v6300_v46, %v9176_v54  ;;  %6416 = vperm.xlu1 %7150, %v6227_v1   ;;  %v6162_v18 = vcombine.low %v6140_v38, %v6147_v57 }
 0x469   :  { %v6163_v2 = vcombine.low %v6154_v31, %v6161_v33  ;;  %v6515_v33 = vrot.slane %v6318_v26, %v9229_v8 }
 0x46a   :  { %v6475_v44 = vsel %vm6474_vm6, %v6473_v36, %v6468_v58  ;;  %v6170_v61 = vrot.slane %v6162_v18, %v7999_v19 }
 0x46b   :  { %v6177_v11 = vrot.slane %v6163_v2, %v7999_v19  ;;  %v9243_v10 = vpop.permute.xlu0 %6323 }
 0x46d   :  { %v6178_v34 = vcombine.low %v6170_v61, %v6177_v11 }
 0x46f   :  { %6413 = vperm.xlu0 %7149, %v6178_v34  }
 0x498   :  { %v2290_v17 = vpop.xlane.xlu1 %2289 }
 0x499   :  { %v2340_v22 = vadd.f32 %v7954_v32, %v2290_v17  ;;  %v6330_v17 = vpop.permute.xlu0 %6329 }
 0x49b   :  { %v3896_v30 = vrot.slane %v2340_v22, %v9396_v43  ;;  %v3900_v25 = vrot.slane %v2340_v22, %v9397_v5  ;;  %v3904_v53 = vrot.slane %v2340_v22, %v7960_v16  ;;  %v3908_v3 = vrot.slane %v2340_v22, %v7963_v41 }
 0x49c   :  { %v6303_v24 = vpop.permute.xlu1 %6302  ;;  %v3912_v62 = vrot.slane %v2340_v22, %v7968_v49  ;;  %v3916_v32 = vrot.slane %v2340_v22, %v7971_v4  ;;  %v3920_v60 = vrot.slane %v2340_v22, %v7974_v39  ;;  %v3924_v51 = vrot.slane %v2340_v22, %v7977_v14 }
 0x49d   :  { %v6480_v0 = vrot.slane %v6303_v24, %v9197_v55  ;;  %v6504_v43 = vadd.s32 4294967200, %v9446_v6  ;;  %v6228_v47 = vcombine.low %v3896_v30, %v3900_v25  ;;  %v6229_v5 = vcombine.low %v3904_v53, %v3908_v3  ;;  %v6336_v27 = vpop.permute.xlu0 %6335 }
 0x49e   :  { %v6487_v16 = vrot.slane %v6306_v23, %v9191_v28  ;;  %v9212_v41 = vsub.s32 %v6497_v35, %v9447_v52  ;;  %v6230_v20 = vcombine.low %v3912_v62, %v3916_v32  ;;  %v6231_v49 = vcombine.low %v3920_v60, %v3924_v51 }
 0x49f   :  { %v9215_v4 = vsub.s32 %v6490_v29, %v9447_v52  ;;  %v6482_v39 = vsel %vm6481_vm7, %v6480_v0, %v6475_v44  ;;  %v6238_v14 = vrot.slane %v6228_v47, %v7999_v19  ;;  %v6245_v12 = vrot.slane %v6229_v5, %v7999_v19  ;;  %v9448_v47 = vld [vmem:[#allocation18_spill] sm:$0xff] }
 0x4a0   :  { %v6309_v63 = vpop.permute.xlu1 %6308  ;;  %v6489_v45 = vsel %vm6488_vm8, %v6487_v16, %v6482_v39  ;;  %v6252_v21 = vrot.slane %v6230_v20, %v7999_v19  ;;  %v6259_v7 = vrot.slane %v6231_v49, %v7999_v19  ;;  %v9225_v37 = vsub.s32 %v6504_v43, %v9447_v52  ;;  %v9449_v20 = vld [vmem:[#allocation26_spill] sm:$0xff] }
 0x4a1   :  { %v6494_v15 = vrot.slane %v6309_v63, %v9215_v4  ;;  %v6260_v40 = vcombine.low %v6238_v14, %v6245_v12  ;;  %v6501_v13 = vrot.slane %v6312_v9, %v9212_v41  ;;  %v6342_v29 = vpop.permute.xlu0 %6341  ;;  %v9450_v39 = vld [vmem:[#allocation14_spill] sm:$0xff] }
 0x4a2   :  { %v6261_v48 = vcombine.low %v6252_v21, %v6259_v7 }
 0x4a3   :  { %v6496_v58 = vsel %vm6495_vm9, %v6494_v15, %v6489_v45  ;;  %v6268_v1 = vrot.slane %v6260_v40, %v7999_v19  ;;  %v6539_v40 = vrot.slane %v6330_v17, %v9450_v39 }
 0x4a4   :  { %v6315_v38 = vpop.permute.xlu1 %6314  ;;  %v6503_v57 = vsel %vm6502_vm10, %v6501_v13, %v6496_v58  ;;  %v6275_v46 = vrot.slane %v6261_v48, %v7999_v19  ;;  %v9451_v13 = vld [vmem:[#allocation27_spill] sm:$0xff] }
 0x4a5   :  { %v6508_v31 = vrot.slane %v6315_v38, %v9225_v37  ;;  %v6348_v25 = vpop.permute.xlu0 %6347 }
 0x4a6   :  { %v6276_v36 = vcombine.low %v6268_v1, %v6275_v46 }
 0x4a7   :  { %v6510_v18 = vsel %vm6509_vm11, %v6508_v31, %v6503_v57 }
 0x4a8   :  { %6419 = vperm.xlu0 %7149, %v6276_v36   ;;  %v9239_v2 = vsel %vm6516_vm12, %v6515_v33, %v6510_v18  ;;  %v9241_v44 = vpop.permute.xlu1 %6320  ;;  %v6549_v33 = vrot.slane %v6336_v27, %v9451_v13 }
 0x4a9   :  { %v9255_v3 = vpop.permute.xlu0 %6353 }
 0x4ac   :  { %v6327_v61 = vpop.permute.xlu1 %6326 }
 0x4ad   :  { %v6378_v62 = vpop.permute.xlu0 %6377  ;;  %v6535_v12 = vrot.slane %v6327_v61, %v9448_v47 }
 0x4ae   :  { %v6618_v14 = vrot.slane %v6378_v62, %v9450_v39 }
 0x4af   :  { %v6540_v58 = vsel %vm6432_vm0, %v6539_v40, %v6535_v12 }
 0x4b0   :  { %v6333_v11 = vpop.permute.xlu1 %6332 }
 0x4b1   :  { %v6384_v32 = vpop.permute.xlu0 %6383  ;;  %v6544_v21 = vrot.slane %v6333_v11, %v9449_v20 }
 0x4b2   :  { %v6628_v48 = vrot.slane %v6384_v32, %v9451_v13 }
 0x4b3   :  { %v6545_v38 = vsel %vm6439_vm1, %v6544_v21, %v6540_v58 }
 0x4b4   :  { %v6339_v34 = vpop.permute.xlu1 %6338  ;;  %v6550_v61 = vsel %vm6446_vm2, %v6549_v33, %v6545_v38 }
 0x4b5   :  { %v6390_v51 = vpop.permute.xlu0 %6389  ;;  %v6554_v57 = vrot.slane %v6339_v34, %v9437_v56 }
 0x4b6   :  { %v6638_v36 = vrot.slane %v6390_v51, %v9440_v59 }
 0x4b7   :  { %v6555_v17 = vsel %vm6453_vm3, %v6554_v57, %v6550_v61 }
 0x4b8   :  { %v6345_v50 = vpop.permute.xlu1 %6344 }
 0x4b9   :  { %v6396_v0 = vpop.permute.xlu0 %6395  ;;  %v6564_v62 = vrot.slane %v6345_v50, %v9162_v42  ;;  %v6569_v50 = vrot.slane %v6348_v25, %v9176_v54 }
 0x4ba   :  { %v6648_v34 = vrot.slane %v6396_v0, %v9176_v54 }
 0x4bc   :  { %v9245_v23 = vpop.permute.xlu1 %6350 }
 0x4bd   :  { %v6399_v43 = vpop.permute.xlu0 %6398 }
 0x4c0   :  { %v9247_v35 = vpop.permute.xlu1 %6356 }
 0x4c1   :  { %v6402_v45 = vpop.permute.xlu0 %6401  ;;  %v6584_v39 = vrot.slane %v9247_v35, %v9215_v4 }
 0x4c2   :  { %v6658_v0 = vrot.slane %v6402_v45, %v9191_v28 }
 0x4c4   :  { %v9249_v22 = vpop.permute.xlu1 %6359 }
 0x4c5   :  { %v6405_v18 = vpop.permute.xlu0 %6404  ;;  %v6589_v54 = vrot.slane %v9249_v22, %v9212_v41 }
 0x4c8   :  { %v9251_v30 = vpop.permute.xlu1 %6362 }
 0x4c9   :  { %v6594_v25 = vrot.slane %v9251_v30, %v9225_v37 }
 0x4cc   :  { %v9253_v53 = vpop.permute.xlu1 %6365 }
 0x4cd   :  { %v6599_v35 = vrot.slane %v9253_v53, %v9229_v8 }
 0x4d0   :  { %v9257_v24 = vpop.permute.xlu1 %6368 }
 0x4d4   :  { %v6375_v60 = vpop.permute.xlu1 %6374 }
 0x4d5   :  { %v6614_v5 = vrot.slane %v6375_v60, %v9448_v47  ;;  %v6408_v60 = vpop.permute.xlu0 %6407  ;;  %v6518_v47 = vadd.s32 4294967184, %v9446_v6 }
 0x4d6   :  { %v6668_v30 = vrot.slane %v6408_v60, %v9212_v41 }
 0x4d7   :  { %v6619_v63 = vsel %vm6432_vm0, %v6618_v14, %v6614_v5 }
 0x4d8   :  { %v6381_v9 = vpop.permute.xlu1 %6380 }
 0x4d9   :  { %v6623_v49 = vrot.slane %v6381_v9, %v9449_v20  ;;  %v6653_v9 = vrot.slane %v6399_v43, %v9197_v55  ;;  %v6521_v20 = vsub.s32 %v6518_v47, %v9447_v52  ;;  %v6411_v43 = vpop.permute.xlu0 %6410 }
 0x4da   :  { %v6673_v40 = vrot.slane %v6411_v43, %v9225_v37 }
 0x4db   :  { %v6624_v7 = vsel %vm6439_vm1, %v6623_v49, %v6619_v63  ;;  %v6604_v22 = vrot.slane %v9257_v24, %v6521_v20 }
 0x4dc   :  { %v6387_v16 = vpop.permute.xlu1 %6386  ;;  %v6629_v1 = vsel %vm6446_vm2, %v6628_v48, %v6624_v7 }
 0x4dd   :  { %v6633_v15 = vrot.slane %v6387_v16, %v9437_v56  ;;  %v6559_v56 = vrot.slane %v6342_v29, %v9440_v59  ;;  %v6525_v29 = vadd.s32 4294967176, %v9446_v6 }
 0x4df   :  { %v6634_v46 = vsel %vm6453_vm3, %v6633_v15, %v6629_v1  ;;  %v6560_v27 = vsel %vm6460_vm4, %v6559_v56, %v6555_v17  ;;  %v6528_v12 = vsub.s32 %v6525_v29, %v9447_v52 }
 0x4e0   :  { %v6393_v26 = vpop.permute.xlu1 %6392  ;;  %v6639_v11 = vsel %vm6460_vm4, %v6638_v36, %v6634_v46  ;;  %v6565_v5 = vsel %vm6467_vm5, %v6564_v62, %v6560_v27 }
 0x4e1   :  { %v6643_v31 = vrot.slane %v6393_v26, %v9162_v42  ;;  %v6574_v42 = vrot.slane %v9245_v23, %v9197_v55  ;;  %v6570_v16 = vsel %vm6474_vm6, %v6569_v50, %v6565_v5  ;;  %v6579_v55 = vrot.slane %v9255_v3, %v9191_v28 }
 0x4e2   :  { %v6663_v23 = vrot.slane %v6405_v18, %v9215_v4  ;;  %v6522_v28 = vrot.slane %v9241_v44, %v6521_v20  ;;  %v6529_v41 = vrot.slane %v9243_v10, %v6528_v12  ;;  %v9452_v18 = vlaneseq }
 0x4e3   :  { %v6644_v32 = vsel %vm6467_vm5, %v6643_v31, %v6639_v11  ;;  %v6575_v49 = vsel %vm6481_vm7, %v6574_v42, %v6570_v16 }
 0x4e4   :  { %v6649_v51 = vsel %vm6474_vm6, %v6648_v34, %v6644_v32  ;;  %v6372_v14 = vpop.permute.xlu1 %6371  ;;  %v6580_v63 = vsel %vm6488_vm8, %v6579_v55, %v6575_v49  ;;  %v6524_v24 = vsel %vm6523_vm13, %v6522_v28, %v9239_v2  ;;  %vm6716_vm15 = vcmp.lt.s32.totalorder %v9452_v18, 384 }
 0x4e5   :  { %v6654_v59 = vsel %vm6481_vm7, %v6653_v9, %v6649_v51  ;;  %v6585_v3 = vsel %vm6495_vm9, %v6584_v39, %v6580_v63  ;;  %v6609_v52 = vrot.slane %v6372_v14, %v6528_v12  ;;  %v6531_v1 = vsel %vm6530_vm14, %v6529_v41, %v6524_v24 }
 0x4e6   :  { %v6659_v6 = vsel %vm6488_vm8, %v6658_v0, %v6654_v59  ;;  %v6590_v21 = vsel %vm6502_vm10, %v6589_v54, %v6585_v3 }
 0x4e7   :  { %v6664_v45 = vsel %vm6495_vm9, %v6663_v23, %v6659_v6  ;;  %v6595_v7 = vsel %vm6509_vm11, %v6594_v25, %v6590_v21 }
 0x4e8   :  { %v6600_v15 = vsel %vm6516_vm12, %v6599_v35, %v6595_v7  ;;  %v6669_v53 = vsel %vm6502_vm10, %v6668_v30, %v6664_v45  ;;  %v6417_v26 = vpop.permute.xlu1 %6416 }
 0x4e9   :  { %v6605_v13 = vsel %vm6523_vm13, %v6604_v22, %v6600_v15  ;;  %v6674_v58 = vsel %vm6509_vm11, %v6673_v40, %v6669_v53  ;;  %v6683_v46 = vrot.slane %v6417_v26, %v6521_v20 }
 0x4ea   :  { %v6610_v48 = vsel %vm6530_vm14, %v6609_v52, %v6605_v13 }
 0x4eb   :  { %v6690_v57 = vcombine.low %v6531_v1, %v6610_v48 }
 0x4ed   :  { %v6697_v37 = vrot.slane %v6690_v57, %v7999_v19 }
 0x4ee   :  { %v6414_v4 = vpop.permute.xlu0 %6413 }
 0x4ef   :  { %v6678_v44 = vrot.slane %v6414_v4, %v9229_v8 }
 0x4f1   :  { %v6679_v38 = vsel %vm6516_vm12, %v6678_v44, %v6674_v58 }
 0x4f2   :  { %v6684_v2 = vsel %vm6523_vm13, %v6683_v46, %v6679_v38 }
 0x527   :  { %v6420_v8 = vpop.permute.xlu0 %6419 }
 0x528   :  { %v6688_v31 = vrot.slane %v6420_v8, %v6528_v12 }
 0x52a   :  { %v6689_v33 = vsel %vm6530_vm14, %v6688_v31, %v6684_v2 }
 0x52b   :  { %v6704_v36 = vrot.slane %v6689_v33, %v7999_v19 }
 0x52d   :  { %v6705_v10 = vcombine.low %v6697_v37, %v6704_v36 }
 0x52f   :  { %v6712_v61 = vrot.slane %v6705_v10, %v7999_v19 }
 0x531   :  { %6718 = vst.msk [vmem:[#allocation9] sm:$0x7] %vm6716_vm15, %v6712_v61 }
 0x532   :  { %7486 = shalt.err (!%p7483_p0)
}
 0x533   :  { %s7487_s30 = scalar_lea.hbm %s9353_s7, 48 }
 0x534   :  { %p7488_p1 = scmp.ne.s32.totalorder %s9353_s7, %s7487_s30  ;;  %p7491_p2 = scmp.lt.u32.totalorder %s7487_s30, %s9353_s7 }
 0x536   :  { %p7493_p3 = pnand %p7491_p2, %p7488_p1 }
 0x538   :  { %7496 = shalt.err (!%p7493_p3)
}
 0x539   :  { %6728 = dma.vmem_to_hbm [thread:$0]  %s6726_s25, 48, %s9353_s7, [#allocation5]  }
 0x53a   :  { %7501 = dma.done.wait [#allocation5], 48  }
 0x53b   :  { %7502 = vsyncadd [#allocation5], 4294967248 }
 0x53c   :  { %6732 = vsyncpa [#allocation4], 1 }
 0x53d   :  { %6733 = vsyncpa [#allocation7], 1 }
 0x53e   :  { %6734 = vsyncpa [#allocation5], 1 }

// kernel: tpu_custom_call.1
= control target key start
LH: loop header
LB: loop body
LE: loop exit
PB: predicated region body
PF: predicated region fallthrough
CT: control target
= control target key end

     0   :  { %13 = vsyncpa [#allocation4], 0  ;;  %s9346_s0 = inlined_call_operand.hbm [shape: bf16[384,512], index: 0, kind: input, shape index: {}]   ;;  %s9347_s1 = inlined_call_operand.hbm [shape: bf16[512,256], index: 1, kind: input, shape index: {}]   ;;  %s9348_s2 = inlined_call_operand.vmem [shape: f32[1,256], index: 2, kind: input, shape index: {}]   ;;  %s9349_s3 = inlined_call_operand.hbm [shape: bf16[256,128], index: 3, kind: input, shape index: {}]   ;;  %s9350_s4 = inlined_call_operand.vmem [shape: f32[1,128], index: 4, kind: input, shape index: {}]   ;;  %s9351_s5 = inlined_call_operand.vmem [shape: f32[1,128], index: 5, kind: input, shape index: {}]   ;;  %s9352_s6 = inlined_call_operand.<no memory space> [shape: f32[1], index: 6, kind: input, shape index: {}]   ;;  %s9353_s7 = inlined_call_operand.hbm [shape: f32[1,1,384], index: 7, kind: output, shape index: {}]  }
   0x1   :  { %14 = vsyncpa [#allocation7], 0 }
   0x2   :  { %15 = vsyncpa [#allocation5], 0  ;;  %s7503_s24 = smov [#allocation6]   ;;  %s7409_s28 = scalar_lea.hbm %s9347_s1, 8192 }
   0x3   :  { %s33_s25 = sshll.u32 %s7503_s24, 4  ;;  %p7410_p0 = scmp.ne.s32.totalorder %s9347_s1, %s7409_s28  ;;  %s34_s25 = int_to_ptr.vmem [resolvable:$true] %s33_s25 }
   0x4   :  { %p7413_p1 = scmp.lt.u32.totalorder %s7409_s28, %s9347_s1 }
   0x6   :  { %p7415_p2 = pnand %p7413_p1, %p7410_p0 }
   0x8   :  { %7418 = shalt.err (!%p7415_p2)
}
   0x9   :  { %s7419_s10 = scalar_lea.vmem %s34_s25, 8192  ;;  %p7424_p4 = scmp.lt.s32.totalorder %s34_s25, %s34_s25 }
   0xa   :  { %p7420_p3 = scmp.ne.s32.totalorder %s34_s25, %s7419_s10  ;;  %p7425_p5 = scmp.lt.s32.totalorder %s7419_s10, %s7419_s10 }
   0xc   :  { %p7426_p6 = por %p7425_p5, %p7424_p4 }
   0xe   :  { %p7427_p7 = pnand %p7426_p6, %p7420_p3 }
  0x10   :  { %7430 = shalt.err (!%p7427_p7)
}
  0x11   :  { %s7504_s11 = smov 128   ;;  %s7505_s12 = smov 8  }
  0x12   :  { %39 = dma.hbm_to_vmem [thread:$0]  %s9347_s1, 8192, %s34_s25, [#allocation7], %s7504_s11, %s7504_s11, %s7505_s12  }
  0x13   :  { %s7506_s15 = smov [#allocation3]   ;;  %s7431_s19 = scalar_lea.hbm %s9346_s0, 12288 }
  0x14   :  { %s21_s16 = sshll.u32 %s7506_s15, 4  ;;  %p7432_p8 = scmp.ne.s32.totalorder %s9346_s0, %s7431_s19  ;;  %s22_s16 = int_to_ptr.vmem [resolvable:$true] %s21_s16 }
  0x15   :  { %p7435_p9 = scmp.lt.u32.totalorder %s7431_s19, %s9346_s0 }
  0x17   :  { %p7437_p10 = pnand %p7435_p9, %p7432_p8 }
  0x19   :  { %7440 = shalt.err (!%p7437_p10)
}
  0x1a   :  { %s7441_s24 = scalar_lea.vmem %s22_s16, 12288  ;;  %p7446_p12 = scmp.lt.s32.totalorder %s22_s16, %s22_s16 }
  0x1b   :  { %p7442_p11 = scmp.ne.s32.totalorder %s22_s16, %s7441_s24  ;;  %p7447_p13 = scmp.lt.s32.totalorder %s7441_s24, %s7441_s24 }
  0x1d   :  { %p7448_p0 = por %p7447_p13, %p7446_p12 }
  0x1f   :  { %p7449_p1 = pnand %p7448_p0, %p7442_p11 }
  0x21   :  { %7452 = shalt.err (!%p7449_p1)
}
  0x22   :  { %s7507_s1 = smov 256   ;;  %s7508_s25 = smov 16  }
  0x23   :  { %27 = dma.hbm_to_vmem [thread:$0]  %s9346_s0, 12288, %s22_s16, [#allocation4], %s7507_s1, %s7507_s1, %s7508_s25  }
  0x24   :  { %s7509_s28 = smov [#allocation8]   ;;  %s7453_s9 = scalar_lea.hbm %s9349_s3, 2048 }
  0x25   :  { %s47_s29 = sshll.u32 %s7509_s28, 4  ;;  %p7454_p2 = scmp.ne.s32.totalorder %s9349_s3, %s7453_s9  ;;  %s48_s29 = int_to_ptr.vmem [resolvable:$true] %s47_s29 }
  0x26   :  { %p7457_p3 = scmp.lt.u32.totalorder %s7453_s9, %s9349_s3 }
  0x28   :  { %p7459_p4 = pnand %p7457_p3, %p7454_p2 }
  0x2a   :  { %7462 = shalt.err (!%p7459_p4)
}
  0x2b   :  { %s7463_s14 = scalar_lea.vmem %s48_s29, 2048  ;;  %p7468_p6 = scmp.lt.s32.totalorder %s48_s29, %s48_s29 }
  0x2c   :  { %p7464_p5 = scmp.ne.s32.totalorder %s48_s29, %s7463_s14  ;;  %p7469_p7 = scmp.lt.s32.totalorder %s7463_s14, %s7463_s14 }
  0x2e   :  { %p7470_p8 = por %p7469_p7, %p7468_p6 }
  0x30   :  { %p7471_p9 = pnand %p7470_p8, %p7464_p5 }
  0x32   :  { %7474 = shalt.err (!%p7471_p9)
}
  0x33   :  { %s7510_s0 = smov 64   ;;  %s7511_s15 = smov 4  }
  0x34   :  { %53 = dma.hbm_to_vmem [thread:$0]  %s9349_s3, 2048, %s48_s29, [#allocation7], %s7510_s0, %s7510_s0, %s7511_s15  }
  0x35   :  { %7497 = dma.done.wait [#allocation4], 12288  }
  0x36   :  { %7498 = vsyncadd [#allocation4], 4294955008 }
  0x37   :  { %7499 = dma.done.wait [#allocation7], 10240  }
  0x38   :  { %7500 = vsyncadd [#allocation7], 4294957056  ;;  %v7151_v0 = vld [vmem:[#allocation6 + $0x4] ss:$8 sps:$4 sm:$0xff]   ;;  %v7153_v1 = vld [vmem:[#allocation6] ss:$8 sps:$4 sm:$0xff]  }
  0x39   :  { %1042 = vmatprep.subr.bf16.mxu0 %v7151_v0  ;;  %v7154_v2 = vld [vmem:[#allocation6 + $0x14] ss:$8 sps:$4 sm:$0xff]   ;;  %6913 = vmatprep.subr.bf16.mxu1 %v7151_v0  ;;  %v7156_v3 = vld [vmem:[#allocation6 + $0x10] ss:$8 sps:$4 sm:$0xff]   ;;  %v7157_v4 = vld [vmem:[#allocation6 + $0x24] ss:$8 sps:$4 sm:$0xff]  }
  0x3a   :  { %1043 = vmatpush1.bf16.msra.mxu0 %v7153_v1  ;;  %6929 = vmatpush1.bf16.msra.mxu1 %v7153_v1  ;;  %v7159_v5 = vld [vmem:[#allocation6 + $0x20] ss:$8 sps:$4 sm:$0xff]   ;;  %v7160_v6 = vld [vmem:[#allocation6 + $0x34] ss:$8 sps:$4 sm:$0xff]   ;;  %v7162_v7 = vld [vmem:[#allocation6 + $0x30] ss:$8 sps:$4 sm:$0xff]  }
  0x3b   :  { %1044 = vmatprep.subr.bf16.mxu0 %v7154_v2  ;;  %6914 = vmatprep.subr.bf16.mxu1 %v7154_v2  ;;  %v7163_v8 = vld [vmem:[#allocation6 + $0x44] ss:$8 sps:$4 sm:$0xff]   ;;  %v7165_v9 = vld [vmem:[#allocation6 + $0x40] ss:$8 sps:$4 sm:$0xff]   ;;  %v7166_v10 = vld [vmem:[#allocation6 + $0x54] ss:$8 sps:$4 sm:$0xff]  }
  0x3c   :  { %v7168_v11 = vld [vmem:[#allocation6 + $0x50] ss:$8 sps:$4 sm:$0xff]   ;;  %v7169_v12 = vld [vmem:[#allocation6 + $0x64] ss:$8 sps:$4 sm:$0xff]   ;;  %v7171_v14 = vld [vmem:[#allocation6 + $0x60] ss:$8 sps:$4 sm:$0xff]  }
  0x3d   :  { %v7201_v13 = vld [vmem:[#allocation3 + $0x4] ss:$16 sps:$4 sm:$0xff]   ;;  %v7174_v16 = vld [vmem:[#allocation6 + $0x70] ss:$8 sps:$4 sm:$0xff]   ;;  %v7177_v18 = vld [vmem:[#allocation6 + $0x80] ss:$8 sps:$4 sm:$0xff]  }
  0x3e   :  { %1045 = vmatpush1.bf16.msra.mxu0 %v7156_v3  ;;  %6930 = vmatpush1.bf16.msra.mxu1 %v7156_v3  ;;  %v7172_v15 = vld [vmem:[#allocation6 + $0x74] ss:$8 sps:$4 sm:$0xff]   ;;  %v7175_v17 = vld [vmem:[#allocation6 + $0x84] ss:$8 sps:$4 sm:$0xff]   ;;  %v7180_v20 = vld [vmem:[#allocation6 + $0x90] ss:$8 sps:$4 sm:$0xff]  }
  0x3f   :  { %1046 = vmatprep.subr.bf16.mxu0 %v7157_v4  ;;  %6915 = vmatprep.subr.bf16.mxu1 %v7157_v4  ;;  %v7178_v19 = vld [vmem:[#allocation6 + $0x94] ss:$8 sps:$4 sm:$0xff]   ;;  %v7181_v21 = vld [vmem:[#allocation6 + $0xa4] ss:$8 sps:$4 sm:$0xff]   ;;  %v7183_v22 = vld [vmem:[#allocation6 + $0xa0] ss:$8 sps:$4 sm:$0xff]  }
  0x40   :  { %1074 = vmatprep.mubr.bf16.mxu0 %v7201_v13  ;;  %v7184_v23 = vld [vmem:[#allocation6 + $0xb4] ss:$8 sps:$4 sm:$0xff]   ;;  %v7186_v24 = vld [vmem:[#allocation6 + $0xb0] ss:$8 sps:$4 sm:$0xff]   ;;  %v7187_v25 = vld [vmem:[#allocation6 + $0xc4] ss:$8 sps:$4 sm:$0xff]  }
  0x41   :  { %v7189_v26 = vld [vmem:[#allocation6 + $0xc0] ss:$8 sps:$4 sm:$0xff]   ;;  %v7190_v27 = vld [vmem:[#allocation6 + $0xd4] ss:$8 sps:$4 sm:$0xff]   ;;  %v7192_v28 = vld [vmem:[#allocation6 + $0xd0] ss:$8 sps:$4 sm:$0xff]  }
  0x42   :  { %1047 = vmatpush1.bf16.msra.mxu0 %v7159_v5  ;;  %6931 = vmatpush1.bf16.msra.mxu1 %v7159_v5  ;;  %v7193_v29 = vld [vmem:[#allocation6 + $0xe4] ss:$8 sps:$4 sm:$0xff]   ;;  %v7195_v30 = vld [vmem:[#allocation6 + $0xe0] ss:$8 sps:$4 sm:$0xff]   ;;  %v7196_v31 = vld [vmem:[#allocation6 + $0xf4] ss:$8 sps:$4 sm:$0xff]  }
  0x43   :  { %1048 = vmatprep.subr.bf16.mxu0 %v7160_v6  ;;  %6916 = vmatprep.subr.bf16.mxu1 %v7160_v6  ;;  %v7198_v32 = vld [vmem:[#allocation6 + $0xf0] ss:$8 sps:$4 sm:$0xff]   ;;  %v7204_v33 = vld [vmem:[#allocation6 + $0x104] ss:$8 sps:$4 sm:$0xff]   ;;  %v7202_v35 = vld [vmem:[#allocation6 + $0x100] ss:$8 sps:$4 sm:$0xff]  }
  0x44   :  { %v7199_v34 = vld [vmem:[#allocation3] ss:$16 sps:$4 sm:$0xff]   ;;  %v7208_v36 = vld [vmem:[#allocation3 + $0x24] ss:$16 sps:$4 sm:$0xff]   ;;  %vm6432_vm0 = vcmask 130112   ;;  %vm6439_vm1 = vcmask 195712  }
  0x45   :  { %v7207_v37 = vld [vmem:[#allocation6 + $0x114] ss:$8 sps:$4 sm:$0xff]   ;;  %v7205_v38 = vld [vmem:[#allocation6 + $0x110] ss:$8 sps:$4 sm:$0xff]   ;;  %v7213_v39 = vld [vmem:[#allocation6 + $0x124] ss:$8 sps:$4 sm:$0xff]  }
  0x46   :  { %1049 = vmatpush1.bf16.msra.mxu0 %v7162_v7  ;;  %6932 = vmatpush1.bf16.msra.mxu1 %v7162_v7  ;;  %v7210_v40 = vld [vmem:[#allocation3 + $0x20] ss:$16 sps:$4 sm:$0xff]   ;;  %v7214_v42 = vld [vmem:[#allocation3 + $0x44] ss:$16 sps:$4 sm:$0xff]   ;;  %vm6446_vm2 = vcmask 261312   ;;  %vm6453_vm3 = vcmask 326912  }
  0x47   :  { %1050 = vmatprep.subr.bf16.mxu0 %v7163_v8  ;;  %6917 = vmatprep.subr.bf16.mxu1 %v7163_v8  ;;  %v7211_v41 = vld [vmem:[#allocation6 + $0x120] ss:$8 sps:$4 sm:$0xff]   ;;  %v7219_v43 = vld [vmem:[#allocation6 + $0x134] ss:$8 sps:$4 sm:$0xff]   ;;  %v7217_v44 = vld [vmem:[#allocation6 + $0x130] ss:$8 sps:$4 sm:$0xff]  }
  0x48   :  { %v7225_v45 = vld [vmem:[#allocation6 + $0x144] ss:$8 sps:$4 sm:$0xff]   ;;  %v7216_v46 = vld [vmem:[#allocation3 + $0x40] ss:$16 sps:$4 sm:$0xff]   ;;  %v7228_v49 = vld [vmem:[#allocation6 + $0x154] ss:$8 sps:$4 sm:$0xff]  }
  0x49   :  { %v7220_v47 = vld [vmem:[#allocation3 + $0x64] ss:$16 sps:$4 sm:$0xff]   ;;  %v7223_v48 = vld [vmem:[#allocation6 + $0x140] ss:$8 sps:$4 sm:$0xff]   ;;  %v7226_v50 = vld [vmem:[#allocation6 + $0x150] ss:$8 sps:$4 sm:$0xff]  }
  0x4a   :  { %1051 = vmatpush1.bf16.msra.mxu0 %v7165_v9  ;;  %6933 = vmatpush1.bf16.msra.mxu1 %v7165_v9  ;;  %v7234_v51 = vld [vmem:[#allocation6 + $0x164] ss:$8 sps:$4 sm:$0xff]   ;;  %v7222_v52 = vld [vmem:[#allocation3 + $0x60] ss:$16 sps:$4 sm:$0xff]   ;;  %v7240_v55 = vld [vmem:[#allocation6 + $0x174] ss:$8 sps:$4 sm:$0xff]  }
  0x4b   :  { %1052 = vmatprep.subr.bf16.mxu0 %v7166_v10  ;;  %6918 = vmatprep.subr.bf16.mxu1 %v7166_v10  ;;  %v7229_v53 = vld [vmem:[#allocation3 + $0x84] ss:$16 sps:$4 sm:$0xff]   ;;  %v7232_v54 = vld [vmem:[#allocation6 + $0x160] ss:$8 sps:$4 sm:$0xff]   ;;  %v7238_v56 = vld [vmem:[#allocation6 + $0x170] ss:$8 sps:$4 sm:$0xff]  }
  0x4c   :  { %v7246_v57 = vld [vmem:[#allocation6 + $0x184] ss:$8 sps:$4 sm:$0xff]   ;;  %v7231_v58 = vld [vmem:[#allocation3 + $0x80] ss:$16 sps:$4 sm:$0xff]   ;;  %v7249_v61 = vld [vmem:[#allocation6 + $0x194] ss:$8 sps:$4 sm:$0xff]  }
  0x4d   :  { %v7235_v59 = vld [vmem:[#allocation3 + $0xa4] ss:$16 sps:$4 sm:$0xff]   ;;  %v7244_v60 = vld [vmem:[#allocation6 + $0x180] ss:$8 sps:$4 sm:$0xff]   ;;  %v7247_v62 = vld [vmem:[#allocation6 + $0x190] ss:$8 sps:$4 sm:$0xff]  }
  0x4e   :  { %1053 = vmatpush1.bf16.msra.mxu0 %v7168_v11  ;;  %6934 = vmatpush1.bf16.msra.mxu1 %v7168_v11  ;;  %v7255_v63 = vld [vmem:[#allocation6 + $0x1a4] ss:$8 sps:$4 sm:$0xff]   ;;  %v7237_v0 = vld [vmem:[#allocation3 + $0xa0] ss:$16 sps:$4 sm:$0xff]   ;;  %v7261_v3 = vld [vmem:[#allocation6 + $0x1b4] ss:$8 sps:$4 sm:$0xff]  }
  0x4f   :  { %1054 = vmatprep.subr.bf16.mxu0 %v7169_v12  ;;  %6919 = vmatprep.subr.bf16.mxu1 %v7169_v12  ;;  %v7241_v1 = vld [vmem:[#allocation3 + $0xc4] ss:$16 sps:$4 sm:$0xff]   ;;  %v7253_v2 = vld [vmem:[#allocation6 + $0x1a0] ss:$8 sps:$4 sm:$0xff]   ;;  %v7259_v4 = vld [vmem:[#allocation6 + $0x1b0] ss:$8 sps:$4 sm:$0xff]  }
  0x50   :  { %v7267_v5 = vld [vmem:[#allocation6 + $0x1c4] ss:$8 sps:$4 sm:$0xff]   ;;  %v7243_v6 = vld [vmem:[#allocation3 + $0xc0] ss:$16 sps:$4 sm:$0xff]   ;;  %v7270_v9 = vld [vmem:[#allocation6 + $0x1d4] ss:$8 sps:$4 sm:$0xff]  }
  0x51   :  { %v7250_v7 = vld [vmem:[#allocation3 + $0xe4] ss:$16 sps:$4 sm:$0xff]   ;;  %v7265_v8 = vld [vmem:[#allocation6 + $0x1c0] ss:$8 sps:$4 sm:$0xff]   ;;  %v7268_v10 = vld [vmem:[#allocation6 + $0x1d0] ss:$8 sps:$4 sm:$0xff]  }
  0x52   :  { %1055 = vmatpush1.bf16.msra.mxu0 %v7171_v14  ;;  %6935 = vmatpush1.bf16.msra.mxu1 %v7171_v14  ;;  %v7276_v11 = vld [vmem:[#allocation6 + $0x1e4] ss:$8 sps:$4 sm:$0xff]   ;;  %v7252_v12 = vld [vmem:[#allocation3 + $0xe0] ss:$16 sps:$4 sm:$0xff]   ;;  %vm6460_vm4 = vcmask 392512   ;;  %vm6467_vm5 = vcmask 458112  }
  0x53   :  { %1056 = vmatprep.subr.bf16.mxu0 %v7172_v15  ;;  %6920 = vmatprep.subr.bf16.mxu1 %v7172_v15  ;;  %v7256_v13 = vld [vmem:[#allocation3 + $0x104] ss:$16 sps:$4 sm:$0xff]   ;;  %v7274_v14 = vld [vmem:[#allocation6 + $0x1e0] ss:$8 sps:$4 sm:$0xff]   ;;  %vm6474_vm6 = vcmask 523712   ;;  %vm6481_vm7 = vcmask 589312  }
  0x54   :  { %v7282_v15 = vld [vmem:[#allocation6 + $0x1f4] ss:$8 sps:$4 sm:$0xff]   ;;  %vm6488_vm8 = vcmask 654912   ;;  %vm6495_vm9 = vcmask 720512   ;;  %vm6502_vm10 = vcmask 786112   ;;  %vm6509_vm11 = vcmask 851712  }
  0x55   :  { %vm6516_vm12 = vcmask 917312   ;;  %vm6523_vm13 = vcmask 982912   ;;  %vm6530_vm14 = vcmask 1048512  }
  0x56   :  { %1057 = vmatpush1.bf16.msra.mxu0 %v7174_v16  ;;  %6936 = vmatpush1.bf16.msra.mxu1 %v7174_v16  ;;  %v7319_v16 = vld [vmem:[#allocation3 + $0x180] ss:$16 sps:$4 sm:$0xff]  }
  0x57   :  { %1058 = vmatprep.subr.bf16.mxu0 %v7175_v17  ;;  %6921 = vmatprep.subr.bf16.mxu1 %v7175_v17  ;;  %v7321_v17 = vld [vmem:[#allocation3 + $0x184] ss:$16 sps:$4 sm:$0xff]  }
  0x58   :  { %1194 = vmatprep.mubr.bf16.mxu1 %v7321_v17  ;;  %v7310_v17 = vld [vmem:[#allocation3 + $0x12c] ss:$16 sps:$4 sm:$0xff]  }
  0x5a   :  { %1059 = vmatpush1.bf16.msra.mxu0 %v7177_v18  ;;  %6937 = vmatpush1.bf16.msra.mxu1 %v7177_v18  ;;  %v7280_v18 = vld [vmem:[#allocation6 + $0x1f0] ss:$8 sps:$4 sm:$0xff]  }
  0x5b   :  { %1060 = vmatprep.subr.bf16.mxu0 %v7178_v19  ;;  %6922 = vmatprep.subr.bf16.mxu1 %v7178_v19  ;;  %v7258_v19 = vld [vmem:[#allocation3 + $0x100] ss:$16 sps:$4 sm:$0xff]  }
  0x5e   :  { %1061 = vmatpush1.bf16.msra.mxu0 %v7180_v20  ;;  %6938 = vmatpush1.bf16.msra.mxu1 %v7180_v20  ;;  %v7262_v20 = vld [vmem:[#allocation3 + $0x124] ss:$16 sps:$4 sm:$0xff]  }
  0x5f   :  { %1062 = vmatprep.subr.bf16.mxu0 %v7181_v21  ;;  %6923 = vmatprep.subr.bf16.mxu1 %v7181_v21  ;;  %v7325_v21 = vld [vmem:[#allocation3 + $0x1a4] ss:$16 sps:$4 sm:$0xff]  }
  0x62   :  { %1063 = vmatpush1.bf16.msra.mxu0 %v7183_v22  ;;  %6939 = vmatpush1.bf16.msra.mxu1 %v7183_v22  ;;  %v7327_v22 = vld [vmem:[#allocation3 + $0x1a0] ss:$16 sps:$4 sm:$0xff]  }
  0x63   :  { %1064 = vmatprep.subr.bf16.mxu0 %v7184_v23  ;;  %6924 = vmatprep.subr.bf16.mxu1 %v7184_v23  ;;  %v7264_v23 = vld [vmem:[#allocation3 + $0x120] ss:$16 sps:$4 sm:$0xff]  }
  0x66   :  { %1065 = vmatpush1.bf16.msra.mxu0 %v7186_v24  ;;  %6940 = vmatpush1.bf16.msra.mxu1 %v7186_v24  ;;  %v7271_v24 = vld [vmem:[#allocation3 + $0x144] ss:$16 sps:$4 sm:$0xff]  }
  0x67   :  { %1066 = vmatprep.subr.bf16.mxu0 %v7187_v25  ;;  %6925 = vmatprep.subr.bf16.mxu1 %v7187_v25  ;;  %v7331_v25 = vld [vmem:[#allocation3 + $0x1c4] ss:$16 sps:$4 sm:$0xff]  }
  0x6a   :  { %1067 = vmatpush1.bf16.msra.mxu0 %v7189_v26  ;;  %6941 = vmatpush1.bf16.msra.mxu1 %v7189_v26  ;;  %v7333_v26 = vld [vmem:[#allocation3 + $0x1c0] ss:$16 sps:$4 sm:$0xff]  }
  0x6b   :  { %1068 = vmatprep.subr.bf16.mxu0 %v7190_v27  ;;  %6926 = vmatprep.subr.bf16.mxu1 %v7190_v27  ;;  %v7273_v27 = vld [vmem:[#allocation3 + $0x140] ss:$16 sps:$4 sm:$0xff]  }
  0x6e   :  { %1069 = vmatpush1.bf16.msra.mxu0 %v7192_v28  ;;  %6942 = vmatpush1.bf16.msra.mxu1 %v7192_v28  ;;  %v7277_v28 = vld [vmem:[#allocation3 + $0x164] ss:$16 sps:$4 sm:$0xff]  }
  0x6f   :  { %1070 = vmatprep.subr.bf16.mxu0 %v7193_v29  ;;  %6927 = vmatprep.subr.bf16.mxu1 %v7193_v29  ;;  %v7337_v29 = vld [vmem:[#allocation3 + $0x1e4] ss:$16 sps:$4 sm:$0xff]  }
  0x72   :  { %1071 = vmatpush1.bf16.msra.mxu0 %v7195_v30  ;;  %6943 = vmatpush1.bf16.msra.mxu1 %v7195_v30  ;;  %v7339_v30 = vld [vmem:[#allocation3 + $0x1e0] ss:$16 sps:$4 sm:$0xff]  }
  0x73   :  { %1072 = vmatprep.subr.bf16.mxu0 %v7196_v31  ;;  %6928 = vmatprep.subr.bf16.mxu1 %v7196_v31  ;;  %v7279_v31 = vld [vmem:[#allocation3 + $0x160] ss:$16 sps:$4 sm:$0xff]  }
  0x76   :  { %1073 = vmatpush1.bf16.msra.mxu0 %v7198_v32  ;;  %6944 = vmatpush1.bf16.msra.mxu1 %v7198_v32  ;;  %v7285_v32 = vld [vmem:[#allocation3 + $0xc] ss:$16 sps:$4 sm:$0xff]  }
  0x77   :  { %1315 = vmatprep.subr.bf16.mxu0 %v7204_v33  ;;  %v7343_v33 = vld [vmem:[#allocation3 + $0x204] ss:$16 sps:$4 sm:$0xff]  }
  0x79   :  { %1075 = vmatmul.mubr.bf16.vlgmr.msra.gmra.mrb[0].mxu0 %v7199_v34  ;;  %1195 = vmatmul.mubr.bf16.vlgmr.msra.gmra.mrb[0].mxu1 %v7319_v16  ;;  %v7345_v34 = vld [vmem:[#allocation3 + $0x200] ss:$16 sps:$4 sm:$0xff]   ;;  %v7309_v16 = vld [vmem:[#allocation3 + $0x108] ss:$16 sps:$4 sm:$0xff]  }
  0x7a   :  { %1316 = vmatpush1.bf16.msra.mxu0 %v7202_v35  ;;  %1084 = vmatprep.mubr.bf16.mxu0 %v7208_v36  ;;  %v7512_v35 = vmov 0   ;;  %v7348_v36 = vld [vmem:[#allocation8] sm:$0xff]  }
  0x7b   :  { %1317 = vmatprep.subr.bf16.mxu0 %v7207_v37  ;;  %1204 = vmatprep.mubr.bf16.mxu1 %v7325_v21  ;;  %v7283_v37 = vld [vmem:[#allocation3 + $0x8] ss:$16 sps:$4 sm:$0xff]   ;;  %v7316_v21 = vld [vmem:[#allocation3 + $0x16c] ss:$16 sps:$4 sm:$0xff]  }
  0x7c   :  { %1867 = vmatprep.subr.bf16.mxu1 %v7512_v35  ;;  %7150 = vset.pattern.permute.xlu1 %v7512_v35 }
  0x7d   :  { %7149 = vset.pattern.permute.xlu0 %v7512_v35  ;;  %1868 = vmatpush1.bf16.msra.mxu1 %v7348_v36  ;;  %v7356_v36 = vld [vmem:[#allocation3 + $0x228] ss:$16 sps:$4 sm:$0xff]  }
  0x7e   :  { %1318 = vmatpush1.bf16.msra.mxu0 %v7205_v38  ;;  %v7286_v38 = vld [vmem:[#allocation3 + $0x2c] ss:$16 sps:$4 sm:$0xff]   ;;  %1869 = vmatprep.subr.bf16.mxu1 %v7512_v35 }
  0x7f   :  { %1319 = vmatprep.subr.bf16.mxu0 %v7213_v39  ;;  %v7350_v39 = vld [vmem:[#allocation3 + $0x224] ss:$16 sps:$4 sm:$0xff]  }
  0x81   :  { %1085 = vmatmul.mubr.bf16.gmra.mrb[4].mxu0 %v7210_v40  ;;  %1205 = vmatmul.mubr.bf16.gmra.mrb[4].mxu1 %v7327_v22  ;;  %v7352_v40 = vld [vmem:[#allocation3 + $0x220] ss:$16 sps:$4 sm:$0xff]   ;;  %v7318_v22 = vld [vmem:[#allocation3 + $0x168] ss:$16 sps:$4 sm:$0xff]  }
  0x82   :  { %1320 = vmatpush1.bf16.msra.mxu0 %v7211_v41  ;;  %1094 = vmatprep.mubr.bf16.mxu0 %v7214_v42  ;;  %v7353_v41 = vld [vmem:[#allocation8 + $0x8] sm:$0xff]  }
  0x83   :  { %1321 = vmatprep.subr.bf16.mxu0 %v7219_v43  ;;  %1214 = vmatprep.mubr.bf16.mxu1 %v7331_v25  ;;  %v7288_v42 = vld [vmem:[#allocation3 + $0x28] ss:$16 sps:$4 sm:$0xff]   ;;  %v7289_v43 = vld [vmem:[#allocation3 + $0x4c] ss:$16 sps:$4 sm:$0xff]  }
  0x84   :  { %1870 = vmatpush1.bf16.msra.mxu1 %v7353_v41  ;;  %v7406_v25 = vld [vmem:[#allocation8 + $0x78] sm:$0xff]  }
  0x85   :  { %1871 = vmatprep.subr.bf16.mxu1 %v7512_v35  ;;  %v7380_v41 = vld [vmem:[#allocation3 + $0x28c] ss:$16 sps:$4 sm:$0xff]  }
  0x86   :  { %1322 = vmatpush1.bf16.msra.mxu0 %v7217_v44  ;;  %v7357_v44 = vld [vmem:[#allocation3 + $0x244] ss:$16 sps:$4 sm:$0xff]  }
  0x87   :  { %1323 = vmatprep.subr.bf16.mxu0 %v7225_v45  ;;  %v7359_v45 = vld [vmem:[#allocation8 + $0x10] sm:$0xff]  }
  0x88   :  { %1872 = vmatpush1.bf16.msra.mxu1 %v7359_v45  ;;  %v7395_v45 = vld [vmem:[#allocation3 + $0x2cc] ss:$16 sps:$4 sm:$0xff]  }
  0x89   :  { %1095 = vmatmul.mubr.bf16.gmra.mrb[8].mxu0 %v7216_v46  ;;  %1215 = vmatmul.mubr.bf16.gmra.mrb[8].mxu1 %v7333_v26  ;;  %v7360_v46 = vld [vmem:[#allocation3 + $0x240] ss:$16 sps:$4 sm:$0xff]   ;;  %v7324_v26 = vld [vmem:[#allocation3 + $0x188] ss:$16 sps:$4 sm:$0xff]  }
  0x8a   :  { %1104 = vmatprep.mubr.bf16.mxu0 %v7220_v47  ;;  %1324 = vmatpush1.bf16.msra.mxu0 %v7223_v48  ;;  %v7291_v47 = vld [vmem:[#allocation3 + $0x48] ss:$16 sps:$4 sm:$0xff]   ;;  %v7292_v48 = vld [vmem:[#allocation3 + $0x6c] ss:$16 sps:$4 sm:$0xff]  }
  0x8b   :  { %1325 = vmatprep.subr.bf16.mxu0 %v7228_v49  ;;  %1224 = vmatprep.mubr.bf16.mxu1 %v7337_v29  ;;  %v7364_v49 = vld [vmem:[#allocation8 + $0x18] sm:$0xff]  }
  0x8c   :  { %1873 = vmatprep.subr.bf16.mxu1 %v7512_v35  ;;  %v7334_v29 = vld [vmem:[#allocation3 + $0x1cc] ss:$16 sps:$4 sm:$0xff]  }
  0x8d   :  { %1874 = vmatpush1.bf16.msra.mxu1 %v7364_v49 }
  0x8e   :  { %1326 = vmatpush1.bf16.msra.mxu0 %v7226_v50  ;;  %v7365_v50 = vld [vmem:[#allocation3 + $0x264] ss:$16 sps:$4 sm:$0xff]   ;;  %1875 = vmatprep.subr.bf16.mxu1 %v7512_v35 }
  0x8f   :  { %1327 = vmatprep.subr.bf16.mxu0 %v7234_v51  ;;  %v7367_v51 = vld [vmem:[#allocation3 + $0x260] ss:$16 sps:$4 sm:$0xff]  }
  0x91   :  { %1105 = vmatmul.mubr.bf16.gmra.mrb[12].mxu0 %v7222_v52  ;;  %1225 = vmatmul.mubr.bf16.gmra.mrb[12].mxu1 %v7339_v30  ;;  %v7370_v52 = vld [vmem:[#allocation8 + $0x20] sm:$0xff]   ;;  %v7336_v30 = vld [vmem:[#allocation3 + $0x1c8] ss:$16 sps:$4 sm:$0xff]  }
  0x92   :  { %1114 = vmatprep.mubr.bf16.mxu0 %v7229_v53  ;;  %1328 = vmatpush1.bf16.msra.mxu0 %v7232_v54  ;;  %v7294_v53 = vld [vmem:[#allocation3 + $0x68] ss:$16 sps:$4 sm:$0xff]   ;;  %v7295_v54 = vld [vmem:[#allocation3 + $0x8c] ss:$16 sps:$4 sm:$0xff]  }
  0x93   :  { %1329 = vmatprep.subr.bf16.mxu0 %v7240_v55  ;;  %1234 = vmatprep.mubr.bf16.mxu1 %v7343_v33  ;;  %v7372_v55 = vld [vmem:[#allocation8 + $0x28] sm:$0xff]  }
  0x94   :  { %1876 = vmatpush1.bf16.msra.mxu1 %v7370_v52  ;;  %v7346_v33 = vld [vmem:[#allocation3 + $0x20c] ss:$16 sps:$4 sm:$0xff]   ;;  %v7404_v52 = vld [vmem:[#allocation3 + $0x2e8] ss:$16 sps:$4 sm:$0xff]  }
  0x95   :  { %1877 = vmatprep.subr.bf16.mxu1 %v7512_v35 }
  0x96   :  { %1330 = vmatpush1.bf16.msra.mxu0 %v7238_v56  ;;  %v7377_v56 = vld [vmem:[#allocation3 + $0x284] ss:$16 sps:$4 sm:$0xff]  }
  0x97   :  { %1331 = vmatprep.subr.bf16.mxu0 %v7246_v57  ;;  %v7373_v57 = vld [vmem:[#allocation8 + $0x30] sm:$0xff]  }
  0x98   :  { %1878 = vmatpush1.bf16.msra.mxu1 %v7372_v55 }
  0x99   :  { %1115 = vmatmul.mubr.bf16.gmra.mrb[16].mxu0 %v7231_v58  ;;  %1235 = vmatmul.mubr.bf16.gmra.mrb[16].mxu1 %v7345_v34  ;;  %v7379_v58 = vld [vmem:[#allocation3 + $0x280] ss:$16 sps:$4 sm:$0xff]   ;;  %v7349_v34 = vld [vmem:[#allocation3 + $0x208] ss:$16 sps:$4 sm:$0xff]  }
  0x9a   :  { %1124 = vmatprep.mubr.bf16.mxu0 %v7235_v59  ;;  %1332 = vmatpush1.bf16.msra.mxu0 %v7244_v60  ;;  %v7297_v59 = vld [vmem:[#allocation3 + $0x88] ss:$16 sps:$4 sm:$0xff]   ;;  %v7298_v60 = vld [vmem:[#allocation3 + $0xac] ss:$16 sps:$4 sm:$0xff]  }
  0x9b   :  { %1333 = vmatprep.subr.bf16.mxu0 %v7249_v61  ;;  %1244 = vmatprep.mubr.bf16.mxu1 %v7350_v39  ;;  %v7374_v61 = vld [vmem:[#allocation8 + $0x38] sm:$0xff]  }
  0x9c   :  { %1879 = vmatprep.subr.bf16.mxu1 %v7512_v35  ;;  %v7368_v39 = vld [vmem:[#allocation3 + $0x26c] ss:$16 sps:$4 sm:$0xff]  }
  0x9d   :  { %1880 = vmatpush1.bf16.msra.mxu1 %v7373_v57 }
  0x9e   :  { %1334 = vmatpush1.bf16.msra.mxu0 %v7247_v62  ;;  %1881 = vmatprep.subr.bf16.mxu1 %v7512_v35  ;;  %v7384_v62 = vld [vmem:[#allocation3 + $0x2a4] ss:$16 sps:$4 sm:$0xff]  }
  0x9f   :  { %1335 = vmatprep.subr.bf16.mxu0 %v7255_v63  ;;  %v7386_v63 = vld [vmem:[#allocation3 + $0x2a0] ss:$16 sps:$4 sm:$0xff]  }
  0xa1   :  { %1125 = vmatmul.mubr.bf16.gmra.mrb[20].mxu0 %v7237_v0  ;;  %1245 = vmatmul.mubr.bf16.gmra.mrb[20].mxu1 %v7352_v40  ;;  %v7375_v0 = vld [vmem:[#allocation8 + $0x40] sm:$0xff]   ;;  %v7371_v40 = vld [vmem:[#allocation3 + $0x268] ss:$16 sps:$4 sm:$0xff]  }
  0xa2   :  { %1134 = vmatprep.mubr.bf16.mxu0 %v7241_v1  ;;  %1336 = vmatpush1.bf16.msra.mxu0 %v7253_v2  ;;  %v7300_v1 = vld [vmem:[#allocation3 + $0xa8] ss:$16 sps:$4 sm:$0xff]   ;;  %v7301_v2 = vld [vmem:[#allocation3 + $0xcc] ss:$16 sps:$4 sm:$0xff]  }
  0xa3   :  { %1337 = vmatprep.subr.bf16.mxu0 %v7261_v3  ;;  %1254 = vmatprep.mubr.bf16.mxu1 %v7357_v44  ;;  %v7376_v3 = vld [vmem:[#allocation8 + $0x48] sm:$0xff]  }
  0xa4   :  { %1882 = vmatpush1.bf16.msra.mxu1 %v7374_v61  ;;  %v7390_v44 = vld [vmem:[#allocation3 + $0x2a8] ss:$16 sps:$4 sm:$0xff]   ;;  %v9354_v61 = vlaneseq }
  0xa5   :  { %1883 = vmatprep.subr.bf16.mxu1 %v7512_v35 }
  0xa6   :  { %1338 = vmatpush1.bf16.msra.mxu0 %v7259_v4  ;;  %v7391_v4 = vld [vmem:[#allocation3 + $0x2c4] ss:$16 sps:$4 sm:$0xff]  }
  0xa7   :  { %1339 = vmatprep.subr.bf16.mxu0 %v7267_v5  ;;  %v7394_v5 = vld [vmem:[#allocation3 + $0x2c0] ss:$16 sps:$4 sm:$0xff]  }
  0xa8   :  { %1884 = vmatpush1.bf16.msra.mxu1 %v7375_v0  ;;  %v7638_v0 = vshrl.u32 %v9354_v61, 7 }
  0xa9   :  { %1135 = vmatmul.mubr.bf16.gmra.mrb[24].mxu0 %v7243_v6  ;;  %1255 = vmatmul.mubr.bf16.gmra.mrb[24].mxu1 %v7360_v46  ;;  %v7383_v6 = vld [vmem:[#allocation8 + $0x50] sm:$0xff]   ;;  %v7397_v46 = vld [vmem:[#allocation3 + $0x2c8] ss:$16 sps:$4 sm:$0xff]  }
  0xaa   :  { %1144 = vmatprep.mubr.bf16.mxu0 %v7250_v7  ;;  %1340 = vmatpush1.bf16.msra.mxu0 %v7265_v8  ;;  %v7303_v7 = vld [vmem:[#allocation3 + $0xc8] ss:$16 sps:$4 sm:$0xff]   ;;  %v7304_v8 = vld [vmem:[#allocation3 + $0xec] ss:$16 sps:$4 sm:$0xff]   ;;  %9382 = vst [vmem:[#allocation13_spill] sm:$0xff] %v7638_v0 }
  0xab   :  { %1341 = vmatprep.subr.bf16.mxu0 %v7270_v9  ;;  %1264 = vmatprep.mubr.bf16.mxu1 %v7365_v50  ;;  %v7389_v9 = vld [vmem:[#allocation8 + $0x58] sm:$0xff]  }
  0xac   :  { %1885 = vmatprep.subr.bf16.mxu1 %v7512_v35 }
  0xad   :  { %1886 = vmatpush1.bf16.msra.mxu1 %v7376_v3  ;;  %v7645_v3 = vsub.s32 0, %v7638_v0 }
  0xae   :  { %1342 = vmatpush1.bf16.msra.mxu0 %v7268_v10  ;;  %1887 = vmatprep.subr.bf16.mxu1 %v7512_v35  ;;  %v7399_v10 = vld [vmem:[#allocation3 + $0x2e4] ss:$16 sps:$4 sm:$0xff]  }
  0xaf   :  { %1343 = vmatprep.subr.bf16.mxu0 %v7276_v11  ;;  %v7401_v11 = vld [vmem:[#allocation3 + $0x2e0] ss:$16 sps:$4 sm:$0xff]   ;;  %9383 = vst [vmem:[#allocation14_spill] sm:$0xff] %v7645_v3 }
  0xb1   :  { %1145 = vmatmul.mubr.bf16.gmra.mrb[28].mxu0 %v7252_v12  ;;  %1265 = vmatmul.mubr.bf16.gmra.mrb[28].mxu1 %v7367_v51  ;;  %v7393_v12 = vld [vmem:[#allocation8 + $0x60] sm:$0xff]  }
  0xb2   :  { %1154 = vmatprep.mubr.bf16.mxu0 %v7256_v13  ;;  %1344 = vmatpush1.bf16.msra.mxu0 %v7274_v14  ;;  %v7306_v13 = vld [vmem:[#allocation3 + $0xe8] ss:$16 sps:$4 sm:$0xff]   ;;  %v7307_v14 = vld [vmem:[#allocation3 + $0x10c] ss:$16 sps:$4 sm:$0xff]  }
  0xb3   :  { %1345 = vmatprep.subr.bf16.mxu0 %v7282_v15  ;;  %1274 = vmatprep.mubr.bf16.mxu1 %v7377_v56  ;;  %v7398_v15 = vld [vmem:[#allocation8 + $0x68] sm:$0xff]  }
  0xb4   :  { %1888 = vmatpush1.bf16.msra.mxu1 %v7383_v6 }
  0xb5   :  { %1889 = vmatprep.subr.bf16.mxu1 %v7512_v35 }
  0xb6   :  { %1346 = vmatpush1.bf16.msra.mxu0 %v7280_v18  ;;  %v7312_v18 = vld [vmem:[#allocation3 + $0x128] ss:$16 sps:$4 sm:$0xff]  }
  0xb8   :  { %1890 = vmatpush1.bf16.msra.mxu1 %v7389_v9 }
  0xb9   :  { %1155 = vmatmul.mubr.bf16.gmra.mrb[32].mxu0 %v7258_v19  ;;  %1275 = vmatmul.mubr.bf16.gmra.mrb[32].mxu1 %v7379_v58  ;;  %v7313_v19 = vld [vmem:[#allocation3 + $0x14c] ss:$16 sps:$4 sm:$0xff]  }
  0xba   :  { %1164 = vmatprep.mubr.bf16.mxu0 %v7262_v20  ;;  %1284 = vmatprep.mubr.bf16.mxu1 %v7384_v62  ;;  %v7315_v20 = vld [vmem:[#allocation3 + $0x148] ss:$16 sps:$4 sm:$0xff]  }
  0xbb   :  { %1891 = vmatprep.subr.bf16.mxu1 %v7512_v35 }
  0xbc   :  { %1892 = vmatpush1.bf16.msra.mxu1 %v7393_v12 }
  0xbd   :  { %1893 = vmatprep.subr.bf16.mxu1 %v7512_v35 }
  0xc0   :  { %1894 = vmatpush1.bf16.msra.mxu1 %v7398_v15 }
  0xc1   :  { %1165 = vmatmul.mubr.bf16.gmra.mrb[36].mxu0 %v7264_v23  ;;  %1285 = vmatmul.mubr.bf16.gmra.mrb[36].mxu1 %v7386_v63  ;;  %v7322_v23 = vld [vmem:[#allocation3 + $0x18c] ss:$16 sps:$4 sm:$0xff]  }
  0xc2   :  { %1174 = vmatprep.mubr.bf16.mxu0 %v7271_v24  ;;  %1294 = vmatprep.mubr.bf16.mxu1 %v7391_v4  ;;  %v7405_v24 = vld [vmem:[#allocation8 + $0x70] sm:$0xff]   ;;  %v230_v4 = vld [vmem:[%s9348_s2] sm:$0x3] }
  0xc3   :  { %1895 = vmatprep.subr.bf16.mxu1 %v7512_v35 }
  0xc4   :  { %1896 = vmatpush1.bf16.msra.mxu1 %v7405_v24 }
  0xc5   :  { %1897 = vmatprep.subr.bf16.mxu1 %v7512_v35  ;;  %v7354_v35 = vld [vmem:[#allocation3 + $0x22c] ss:$16 sps:$4 sm:$0xff]  }
  0xc8   :  { %1898 = vmatpush1.bf16.msra.mxu1 %v7406_v25 }
  0xc9   :  { %1175 = vmatmul.mubr.bf16.gmra.mrb[40].mxu0 %v7273_v27  ;;  %1295 = vmatmul.mubr.bf16.gmra.mrb[40].mxu1 %v7394_v5  ;;  %v7328_v27 = vld [vmem:[#allocation3 + $0x1ac] ss:$16 sps:$4 sm:$0xff]   ;;  %v7651_v5 = vsub.s32 1, %v7638_v0 }
  0xca   :  { %1184 = vmatprep.mubr.bf16.mxu0 %v7277_v28  ;;  %1304 = vmatprep.mubr.bf16.mxu1 %v7399_v10  ;;  %v7330_v28 = vld [vmem:[#allocation3 + $0x1a8] ss:$16 sps:$4 sm:$0xff]  }
  0xcb   :  { %9384 = vst [vmem:[#allocation15_spill] sm:$0xff] %v7651_v5  ;;  %v7663_v10 = vrot.slane %v230_v4, %v7651_v5 }
  0xd1   :  { %1185 = vmatmul.mubr.bf16.gmra.mrb[44].mxu0 %v7279_v31  ;;  %1305 = vmatmul.mubr.bf16.gmra.mrb[44].mxu1 %v7401_v11  ;;  %v7340_v31 = vld [vmem:[#allocation3 + $0x1ec] ss:$16 sps:$4 sm:$0xff]  }
  0xd2   :  { %1347 = vmatprep.mubr.bf16.mxu0 %v7285_v32  ;;  %v7342_v32 = vld [vmem:[#allocation3 + $0x1e8] ss:$16 sps:$4 sm:$0xff]  }
  0xd9   :  { %1348 = vmatmul.mubr.bf16.vlgmr.msra.gmra.mrb[0].mxu0 %v7283_v37  ;;  %v7361_v37 = vld [vmem:[#allocation3 + $0x24c] ss:$16 sps:$4 sm:$0xff]  }
  0xda   :  { %1357 = vmatprep.mubr.bf16.mxu0 %v7286_v38  ;;  %v7363_v38 = vld [vmem:[#allocation3 + $0x248] ss:$16 sps:$4 sm:$0xff]  }
  0xe1   :  { %1358 = vmatmul.mubr.bf16.gmra.mrb[4].mxu0 %v7288_v42  ;;  %v7382_v42 = vld [vmem:[#allocation3 + $0x288] ss:$16 sps:$4 sm:$0xff]  }
  0xe2   :  { %1367 = vmatprep.mubr.bf16.mxu0 %v7289_v43  ;;  %v7387_v43 = vld [vmem:[#allocation3 + $0x2ac] ss:$16 sps:$4 sm:$0xff]  }
  0xe9   :  { %1368 = vmatmul.mubr.bf16.gmra.mrb[8].mxu0 %v7291_v47  ;;  %v7402_v47 = vld [vmem:[#allocation3 + $0x2ec] ss:$16 sps:$4 sm:$0xff]  }
  0xea   :  { %1377 = vmatprep.mubr.bf16.mxu0 %v7292_v48 }
  0xf1   :  { %1378 = vmatmul.mubr.bf16.gmra.mrb[12].mxu0 %v7294_v53 }
  0xf2   :  { %1387 = vmatprep.mubr.bf16.mxu0 %v7295_v54 }
  0xf9   :  { %1388 = vmatmul.mubr.bf16.gmra.mrb[16].mxu0 %v7297_v59 }
  0xfa   :  { %1397 = vmatprep.mubr.bf16.mxu0 %v7298_v60 }
 0x101   :  { %1398 = vmatmul.mubr.bf16.gmra.mrb[20].mxu0 %v7300_v1 }
 0x102   :  { %1407 = vmatprep.mubr.bf16.mxu0 %v7301_v2 }
 0x109   :  { %1408 = vmatmul.mubr.bf16.gmra.mrb[24].mxu0 %v7303_v7 }
 0x10a   :  { %1417 = vmatprep.mubr.bf16.mxu0 %v7304_v8  ;;  %v7658_v8 = vrot.slane %v230_v4, %v7645_v3 }
 0x111   :  { %1418 = vmatmul.mubr.bf16.gmra.mrb[28].mxu0 %v7306_v13 }
 0x112   :  { %1427 = vmatprep.mubr.bf16.mxu0 %v7307_v14 }
 0x119   :  { %1428 = vmatmul.mubr.bf16.gmra.mrb[32].mxu0 %v7309_v16 }
 0x11a   :  { %1437 = vmatprep.mubr.bf16.mxu0 %v7310_v17 }
 0x121   :  { %1438 = vmatmul.mubr.bf16.gmra.mrb[36].mxu0 %v7312_v18 }
 0x122   :  { %1447 = vmatprep.mubr.bf16.mxu0 %v7313_v19 }
 0x129   :  { %1448 = vmatmul.mubr.bf16.gmra.mrb[40].mxu0 %v7315_v20 }
 0x12a   :  { %1457 = vmatprep.mubr.bf16.mxu0 %v7316_v21 }
 0x131   :  { %1458 = vmatmul.mubr.bf16.gmra.mrb[44].mxu0 %v7318_v22 }
 0x132   :  { %1467 = vmatprep.mubr.bf16.mxu0 %v7322_v23 }
 0x139   :  { %1468 = vmatmul.mubr.bf16.gmra.mrb[48].mxu0 %v7324_v26 }
 0x13a   :  { %1477 = vmatprep.mubr.bf16.mxu0 %v7328_v27 }
 0x141   :  { %1478 = vmatmul.mubr.bf16.gmra.mrb[52].mxu0 %v7330_v28 }
 0x142   :  { %1487 = vmatprep.mubr.bf16.mxu0 %v7334_v29 }
 0x149   :  { %1488 = vmatmul.mubr.bf16.gmra.mrb[56].mxu0 %v7336_v30 }
 0x14a   :  { %1497 = vmatprep.mubr.bf16.mxu0 %v7340_v31 }
 0x14c   :  { %v7609_v48 = vpop.f32.mrb[0].mxu1 }
 0x14d   :  { %v7611_v49 = vpop.f32.mrb[1].mxu1 }
 0x14e   :  { %v7613_v50 = vpop.f32.mrb[2].mxu1 }
 0x14f   :  { %v7615_v51 = vpop.f32.mrb[3].mxu1 }
 0x151   :  { %1498 = vmatmul.mubr.bf16.gmra.mrb[60].mxu0 %v7342_v32 }
 0x152   :  { %1507 = vmatprep.mubr.bf16.mxu0 %v7346_v33 }
 0x154   :  { %v7617_v53 = vpop.f32.mrb[4].mxu1 }
 0x155   :  { %v7619_v54 = vpop.f32.mrb[5].mxu1 }
 0x156   :  { %v7621_v55 = vpop.f32.mrb[6].mxu1 }
 0x157   :  { %v7623_v56 = vpop.f32.mrb[7].mxu1 }
 0x159   :  { %1508 = vmatmul.mubr.bf16.gmra.mrb[64].mxu0 %v7349_v34 }
 0x15a   :  { %1517 = vmatprep.mubr.bf16.mxu0 %v7354_v35 }
 0x15c   :  { %v7625_v57 = vpop.f32.mrb[8].mxu1 }
 0x15d   :  { %v7627_v58 = vpop.f32.mrb[9].mxu1 }
 0x15e   :  { %v7629_v59 = vpop.f32.mrb[10].mxu1 }
 0x15f   :  { %v7631_v60 = vpop.f32.mrb[11].mxu1 }
 0x161   :  { %1518 = vmatmul.mubr.bf16.gmra.mrb[68].mxu0 %v7356_v36 }
 0x162   :  { %1527 = vmatprep.mubr.bf16.mxu0 %v7361_v37 }
 0x164   :  { %v7633_v62 = vpop.f32.mrb[12].mxu1 }
 0x165   :  { %v7635_v63 = vpop.f32.mrb[13].mxu1 }
 0x166   :  { %v7640_v1 = vpop.f32.mrb[14].mxu1 }
 0x167   :  { %v7642_v2 = vpop.f32.mrb[15].mxu1 }
 0x169   :  { %1528 = vmatmul.mubr.bf16.gmra.mrb[72].mxu0 %v7363_v38 }
 0x16a   :  { %1537 = vmatprep.mubr.bf16.mxu0 %v7368_v39 }
 0x16c   :  { %v7653_v6 = vpop.f32.mrb[16].mxu1 }
 0x16d   :  { %v7655_v7 = vpop.f32.mrb[17].mxu1 }
 0x16e   :  { %v7660_v9 = vpop.f32.mrb[18].mxu1 }
 0x16f   :  { %v7665_v11 = vpop.f32.mrb[19].mxu1 }
 0x171   :  { %1538 = vmatmul.mubr.bf16.gmra.mrb[76].mxu0 %v7371_v40 }
 0x172   :  { %1547 = vmatprep.mubr.bf16.mxu0 %v7380_v41 }
 0x174   :  { %v7670_v19 = vpop.f32.mrb[20].mxu1 }
 0x175   :  { %v7673_v21 = vpop.f32.mrb[21].mxu1 }
 0x176   :  { %v7675_v24 = vpop.f32.mrb[22].mxu1 }
 0x177   :  { %v7677_v27 = vpop.f32.mrb[23].mxu1 }
 0x179   :  { %1548 = vmatmul.mubr.bf16.gmra.mrb[80].mxu0 %v7382_v42 }
 0x17a   :  { %1557 = vmatprep.mubr.bf16.mxu0 %v7387_v43 }
 0x17c   :  { %v7682_v37 = vpop.f32.mrb[24].mxu1 }
 0x17d   :  { %v7685_v39 = vpop.f32.mrb[25].mxu1 }
 0x17e   :  { %v7687_v42 = vpop.f32.mrb[26].mxu1 }
 0x181   :  { %1558 = vmatmul.mubr.bf16.gmra.mrb[84].mxu0 %v7390_v44 }
 0x182   :  { %1567 = vmatprep.mubr.bf16.mxu0 %v7395_v45  ;;  %v7689_v45 = vpop.f32.mrb[27].mxu1 }
 0x189   :  { %1568 = vmatmul.mubr.bf16.gmra.mrb[88].mxu0 %v7397_v46 }
 0x18a   :  { %1577 = vmatprep.mubr.bf16.mxu0 %v7402_v47 }
 0x191   :  { %1578 = vmatmul.mubr.bf16.gmra.mrb[92].mxu0 %v7404_v52 }
 0x1ac   :  { %v1349_v12 = vpop.f32.mrb[0].mxu0 }
 0x1ad   :  { %v6945_v13 = vadd.f32 %v1349_v12, %v7658_v8  ;;  %v1351_v14 = vpop.f32.mrb[1].mxu0 }
 0x1ae   :  { %v6946_v15 = vadd.f32 %v1351_v14, %v7663_v10  ;;  %v1353_v16 = vpop.f32.mrb[2].mxu0 }
 0x1af   :  { %v6947_v17 = vadd.f32 %v1353_v16, %v7658_v8  ;;  %v1355_v18 = vpop.f32.mrb[3].mxu0  ;;  %v1588_v22 = vmax.f32 %v6945_v13, 0.0 }
 0x1b0   :  { %v6948_v20 = vadd.f32 %v1355_v18, %v7663_v10  ;;  %v1589_v25 = vmax.f32 %v6946_v15, 0.0 }
 0x1b1   :  { %v1590_v23 = vmax.f32 %v6947_v17, 0.0  ;;  %v7694_v17 = vpop.f32.mrb[28].mxu1 }
 0x1b2   :  { %v1591_v26 = vmax.f32 %v6948_v20, 0.0  ;;  %v7697_v20 = vpop.f32.mrb[29].mxu1 }
 0x1b3   :  { %v1684_v28 = vpack.c.bf16 %v1590_v23, %v1588_v22 }
 0x1b4   :  { %v1685_v29 = vpack.c.bf16 %v1591_v26, %v1589_v25  ;;  %v1359_v30 = vpop.f32.mrb[4].mxu0  ;;  %v7699_v25 = vpop.f32.mrb[30].mxu1 }
 0x1b5   :  { %v6949_v31 = vadd.f32 %v1359_v30, %v7658_v8  ;;  %v1361_v32 = vpop.f32.mrb[5].mxu0 }
 0x1b6   :  { %v6950_v33 = vadd.f32 %v1361_v32, %v7663_v10  ;;  %v1363_v34 = vpop.f32.mrb[6].mxu0  ;;  %1899 = vmatprep.mubr.bf16.mxu1 %v1685_v29  ;;  %v7701_v29 = vpop.f32.mrb[31].mxu1 }
 0x1b7   :  { %v6951_v35 = vadd.f32 %v1363_v34, %v7658_v8  ;;  %v1365_v36 = vpop.f32.mrb[7].mxu0  ;;  %1900 = vmatmul.mubr.bf16.vlgmr.msra.gmra.mrb[48].mxu1 %v1684_v28  ;;  %v1592_v40 = vmax.f32 %v6949_v31, 0.0 }
 0x1b8   :  { %v6952_v38 = vadd.f32 %v1365_v36, %v7663_v10  ;;  %v1593_v43 = vmax.f32 %v6950_v33, 0.0 }
 0x1b9   :  { %v1594_v41 = vmax.f32 %v6951_v35, 0.0 }
 0x1ba   :  { %v1595_v44 = vmax.f32 %v6952_v38, 0.0 }
 0x1bb   :  { %v1686_v46 = vpack.c.bf16 %v1594_v41, %v1592_v40 }
 0x1bc   :  { %v1687_v47 = vpack.c.bf16 %v1595_v44, %v1593_v43  ;;  %v1369_v52 = vpop.f32.mrb[8].mxu0 }
 0x1bd   :  { %v6953_v4 = vadd.f32 %v1369_v52, %v7658_v8  ;;  %v1371_v12 = vpop.f32.mrb[9].mxu0 }
 0x1be   :  { %v6954_v13 = vadd.f32 %v1371_v12, %v7663_v10  ;;  %v1373_v14 = vpop.f32.mrb[10].mxu0  ;;  %1907 = vmatprep.mubr.bf16.mxu1 %v1687_v47 }
 0x1bf   :  { %v6955_v15 = vadd.f32 %v1373_v14, %v7658_v8  ;;  %v1375_v16 = vpop.f32.mrb[11].mxu0  ;;  %1908 = vmatmul.mubr.bf16.gmra.mrb[52].mxu1 %v1686_v46  ;;  %v1596_v22 = vmax.f32 %v6953_v4, 0.0 }
 0x1c0   :  { %v6956_v18 = vadd.f32 %v1375_v16, %v7663_v10  ;;  %v1597_v26 = vmax.f32 %v6954_v13, 0.0 }
 0x1c1   :  { %v1598_v23 = vmax.f32 %v6955_v15, 0.0 }
 0x1c2   :  { %v1599_v28 = vmax.f32 %v6956_v18, 0.0 }
 0x1c3   :  { %v1688_v30 = vpack.c.bf16 %v1598_v23, %v1596_v22  ;;  %v7710_v23 = vpop.f32.mrb[32].mxu1 }
 0x1c4   :  { %v1689_v31 = vpack.c.bf16 %v1599_v28, %v1597_v26  ;;  %v1379_v32 = vpop.f32.mrb[12].mxu0  ;;  %v7713_v28 = vpop.f32.mrb[33].mxu1 }
 0x1c5   :  { %v6957_v33 = vadd.f32 %v1379_v32, %v7658_v8  ;;  %v1381_v34 = vpop.f32.mrb[13].mxu0  ;;  %v7715_v32 = vpop.f32.mrb[34].mxu1 }
 0x1c6   :  { %v6958_v35 = vadd.f32 %v1381_v34, %v7663_v10  ;;  %v1383_v36 = vpop.f32.mrb[14].mxu0  ;;  %1915 = vmatprep.mubr.bf16.mxu1 %v1689_v31 }
 0x1c7   :  { %v6959_v38 = vadd.f32 %v1383_v36, %v7658_v8  ;;  %v1385_v40 = vpop.f32.mrb[15].mxu0  ;;  %1916 = vmatmul.mubr.bf16.gmra.mrb[56].mxu1 %v1688_v30  ;;  %v1600_v43 = vmax.f32 %v6957_v33, 0.0 }
 0x1c8   :  { %v6960_v41 = vadd.f32 %v1385_v40, %v7663_v10  ;;  %v1601_v46 = vmax.f32 %v6958_v35, 0.0  ;;  %v7717_v35 = vpop.f32.mrb[35].mxu1 }
 0x1c9   :  { %v1602_v44 = vmax.f32 %v6959_v38, 0.0 }
 0x1ca   :  { %v1603_v47 = vmax.f32 %v6960_v41, 0.0  ;;  %v7719_v41 = vpop.f32.mrb[36].mxu1 }
 0x1cb   :  { %v1690_v52 = vpack.c.bf16 %v1602_v44, %v1600_v43 }
 0x1cc   :  { %v1691_v4 = vpack.c.bf16 %v1603_v47, %v1601_v46  ;;  %v1389_v12 = vpop.f32.mrb[16].mxu0  ;;  %v7722_v46 = vpop.f32.mrb[37].mxu1 }
 0x1cd   :  { %v6961_v13 = vadd.f32 %v1389_v12, %v7658_v8  ;;  %v1391_v14 = vpop.f32.mrb[17].mxu0 }
 0x1ce   :  { %v6962_v15 = vadd.f32 %v1391_v14, %v7663_v10  ;;  %v1393_v16 = vpop.f32.mrb[18].mxu0  ;;  %1923 = vmatprep.mubr.bf16.mxu1 %v1691_v4  ;;  %v7725_v4 = vpop.f32.mrb[38].mxu1 }
 0x1cf   :  { %v6963_v18 = vadd.f32 %v1393_v16, %v7658_v8  ;;  %v1395_v22 = vpop.f32.mrb[19].mxu0  ;;  %1924 = vmatmul.mubr.bf16.gmra.mrb[60].mxu1 %v1690_v52  ;;  %v1604_v30 = vmax.f32 %v6961_v13, 0.0  ;;  %v7728_v14 = vpop.f32.mrb[39].mxu1 }
 0x1d0   :  { %v6964_v26 = vadd.f32 %v1395_v22, %v7663_v10  ;;  %v1605_v33 = vmax.f32 %v6962_v15, 0.0 }
 0x1d1   :  { %v1606_v31 = vmax.f32 %v6963_v18, 0.0 }
 0x1d2   :  { %v1607_v34 = vmax.f32 %v6964_v26, 0.0 }
 0x1d3   :  { %v1692_v36 = vpack.c.bf16 %v1606_v31, %v1604_v30 }
 0x1d4   :  { %v1693_v38 = vpack.c.bf16 %v1607_v34, %v1605_v33  ;;  %v1399_v40 = vpop.f32.mrb[20].mxu0  ;;  %v7731_v34 = vpop.f32.mrb[40].mxu1 }
 0x1d5   :  { %v6965_v43 = vadd.f32 %v1399_v40, %v7658_v8  ;;  %v1401_v44 = vpop.f32.mrb[21].mxu0 }
 0x1d6   :  { %v6966_v47 = vadd.f32 %v1401_v44, %v7663_v10  ;;  %v1403_v52 = vpop.f32.mrb[22].mxu0  ;;  %1931 = vmatprep.mubr.bf16.mxu1 %v1693_v38  ;;  %v7734_v44 = vpop.f32.mrb[41].mxu1 }
 0x1d7   :  { %v6967_v12 = vadd.f32 %v1403_v52, %v7658_v8  ;;  %v1405_v13 = vpop.f32.mrb[23].mxu0  ;;  %1932 = vmatmul.mubr.bf16.gmra.mrb[64].mxu1 %v1692_v36  ;;  %v1608_v16 = vmax.f32 %v6965_v43, 0.0  ;;  %v7737_v61 = vpop.f32.mrb[42].mxu1 }
 0x1d8   :  { %v6968_v15 = vadd.f32 %v1405_v13, %v7663_v10  ;;  %v1609_v22 = vmax.f32 %v6966_v47, 0.0 }
 0x1d9   :  { %v1610_v18 = vmax.f32 %v6967_v12, 0.0  ;;  %v7740_v12 = vpop.f32.mrb[43].mxu1 }
 0x1da   :  { %v1611_v26 = vmax.f32 %v6968_v15, 0.0  ;;  %9385 = vst [vmem:[#allocation16_spill] sm:$0xff] %v7740_v12 }
 0x1db   :  { %v1694_v30 = vpack.c.bf16 %v1610_v18, %v1608_v16 }
 0x1dc   :  { %v1695_v31 = vpack.c.bf16 %v1611_v26, %v1609_v22  ;;  %v1409_v33 = vpop.f32.mrb[24].mxu0 }
 0x1dd   :  { %v6969_v38 = vadd.f32 %v1409_v33, %v7658_v8  ;;  %v1411_v40 = vpop.f32.mrb[25].mxu0 }
 0x1de   :  { %v6970_v36 = vadd.f32 %v1411_v40, %v7663_v10  ;;  %v1413_v52 = vpop.f32.mrb[26].mxu0  ;;  %1939 = vmatprep.mubr.bf16.mxu1 %v1695_v31  ;;  %v7743_v40 = vpop.f32.mrb[44].mxu1 }
 0x1df   :  { %v6971_v43 = vadd.f32 %v1413_v52, %v7658_v8  ;;  %v1415_v47 = vpop.f32.mrb[27].mxu0  ;;  %1940 = vmatmul.mubr.bf16.gmra.mrb[68].mxu1 %v1694_v30  ;;  %v1612_v15 = vmax.f32 %v6969_v38, 0.0  ;;  %9386 = vst [vmem:[#allocation17_spill] sm:$0xff] %v7743_v40  ;;  %v7746_v0 = vpop.f32.mrb[45].mxu1 }
 0x1e0   :  { %v6972_v13 = vadd.f32 %v1415_v47, %v7663_v10  ;;  %v1613_v18 = vmax.f32 %v6970_v36, 0.0  ;;  %9387 = vst [vmem:[#allocation18_spill] sm:$0xff] %v7746_v0  ;;  %v7749_v12 = vpop.f32.mrb[46].mxu1 }
 0x1e1   :  { %v1614_v16 = vmax.f32 %v6971_v43, 0.0  ;;  %9388 = vst [vmem:[#allocation19_spill] sm:$0xff] %v7749_v12  ;;  %v7752_v43 = vpop.f32.mrb[47].mxu1 }
 0x1e2   :  { %v1615_v22 = vmax.f32 %v6972_v13, 0.0  ;;  %9389 = vst [vmem:[#allocation20_spill] sm:$0xff] %v7752_v43 }
 0x1e3   :  { %v1696_v26 = vpack.c.bf16 %v1614_v16, %v1612_v15 }
 0x1e4   :  { %v1697_v33 = vpack.c.bf16 %v1615_v22, %v1613_v18  ;;  %v1419_v5 = vpop.f32.mrb[28].mxu0 }
 0x1e5   :  { %v6973_v31 = vadd.f32 %v1419_v5, %v7658_v8  ;;  %v1421_v3 = vpop.f32.mrb[29].mxu0 }
 0x1e6   :  { %v6974_v30 = vadd.f32 %v1421_v3, %v7663_v10  ;;  %v1423_v52 = vpop.f32.mrb[30].mxu0  ;;  %1947 = vmatprep.mubr.bf16.mxu1 %v1697_v33 }
 0x1e7   :  { %v6975_v38 = vadd.f32 %v1423_v52, %v7658_v8  ;;  %v1425_v36 = vpop.f32.mrb[31].mxu0  ;;  %1948 = vmatmul.mubr.bf16.gmra.mrb[72].mxu1 %v1696_v26  ;;  %v1616_v13 = vmax.f32 %v6973_v31, 0.0 }
 0x1e8   :  { %v6976_v47 = vadd.f32 %v1425_v36, %v7663_v10  ;;  %v1617_v5 = vmax.f32 %v6974_v30, 0.0 }
 0x1e9   :  { %v1618_v15 = vmax.f32 %v6975_v38, 0.0 }
 0x1ea   :  { %v1619_v16 = vmax.f32 %v6976_v47, 0.0 }
 0x1eb   :  { %v1698_v18 = vpack.c.bf16 %v1618_v15, %v1616_v13 }
 0x1ec   :  { %v1699_v22 = vpack.c.bf16 %v1619_v16, %v1617_v5  ;;  %v1429_v0 = vpop.f32.mrb[32].mxu0 }
 0x1ed   :  { %v6977_v3 = vadd.f32 %v1429_v0, %v7658_v8  ;;  %v1431_v33 = vpop.f32.mrb[33].mxu0 }
 0x1ee   :  { %v6978_v12 = vadd.f32 %v1431_v33, %v7663_v10  ;;  %v1433_v40 = vpop.f32.mrb[34].mxu0  ;;  %1955 = vmatprep.mubr.bf16.mxu1 %v1699_v22 }
 0x1ef   :  { %v6979_v26 = vadd.f32 %v1433_v40, %v7658_v8  ;;  %v1435_v52 = vpop.f32.mrb[35].mxu0  ;;  %1956 = vmatmul.mubr.bf16.gmra.mrb[76].mxu1 %v1698_v18  ;;  %v1620_v31 = vmax.f32 %v6977_v3, 0.0 }
 0x1f0   :  { %v6980_v36 = vadd.f32 %v1435_v52, %v7663_v10  ;;  %v1621_v30 = vmax.f32 %v6978_v12, 0.0 }
 0x1f1   :  { %v1622_v38 = vmax.f32 %v6979_v26, 0.0 }
 0x1f2   :  { %v1623_v47 = vmax.f32 %v6980_v36, 0.0 }
 0x1f3   :  { %v1700_v13 = vpack.c.bf16 %v1622_v38, %v1620_v31 }
 0x1f4   :  { %v1701_v15 = vpack.c.bf16 %v1623_v47, %v1621_v30  ;;  %v1439_v5 = vpop.f32.mrb[36].mxu0 }
 0x1f5   :  { %v6981_v0 = vadd.f32 %v1439_v5, %v7658_v8  ;;  %v1441_v16 = vpop.f32.mrb[37].mxu0 }
 0x1f6   :  { %v6982_v33 = vadd.f32 %v1441_v16, %v7663_v10  ;;  %v1443_v43 = vpop.f32.mrb[38].mxu0  ;;  %1963 = vmatprep.mubr.bf16.mxu1 %v1701_v15 }
 0x1f7   :  { %v6983_v40 = vadd.f32 %v1443_v43, %v7658_v8  ;;  %v1445_v22 = vpop.f32.mrb[39].mxu0  ;;  %1964 = vmatmul.mubr.bf16.gmra.mrb[80].mxu1 %v1700_v13  ;;  %v1624_v3 = vmax.f32 %v6981_v0, 0.0 }
 0x1f8   :  { %v6984_v18 = vadd.f32 %v1445_v22, %v7663_v10  ;;  %v1625_v12 = vmax.f32 %v6982_v33, 0.0 }
 0x1f9   :  { %v1626_v26 = vmax.f32 %v6983_v40, 0.0 }
 0x1fa   :  { %v1627_v52 = vmax.f32 %v6984_v18, 0.0 }
 0x1fb   :  { %v1702_v36 = vpack.c.bf16 %v1626_v26, %v1624_v3 }
 0x1fc   :  { %v1703_v31 = vpack.c.bf16 %v1627_v52, %v1625_v12  ;;  %v1449_v38 = vpop.f32.mrb[40].mxu0 }
 0x1fd   :  { %v6985_v30 = vadd.f32 %v1449_v38, %v7658_v8  ;;  %v1451_v47 = vpop.f32.mrb[41].mxu0 }
 0x1fe   :  { %v6986_v5 = vadd.f32 %v1451_v47, %v7663_v10  ;;  %v1453_v16 = vpop.f32.mrb[42].mxu0  ;;  %1971 = vmatprep.mubr.bf16.mxu1 %v1703_v31 }
 0x1ff   :  { %v6987_v43 = vadd.f32 %v1453_v16, %v7658_v8  ;;  %v1455_v15 = vpop.f32.mrb[43].mxu0  ;;  %1972 = vmatmul.mubr.bf16.gmra.mrb[84].mxu1 %v1702_v36  ;;  %v1628_v0 = vmax.f32 %v6985_v30, 0.0 }
 0x200   :  { %v6988_v13 = vadd.f32 %v1455_v15, %v7663_v10  ;;  %v1629_v33 = vmax.f32 %v6986_v5, 0.0  ;;  %v1197_v5 = vadd.f32 %v7609_v48, %v7658_v8 }
 0x201   :  { %v1630_v40 = vmax.f32 %v6987_v43, 0.0 }
 0x202   :  { %v1631_v22 = vmax.f32 %v6988_v13, 0.0 }
 0x203   :  { %v1704_v18 = vpack.c.bf16 %v1630_v40, %v1628_v0  ;;  %v1199_v0 = vadd.f32 %v7611_v49, %v7663_v10 }
 0x204   :  { %v1705_v3 = vpack.c.bf16 %v1631_v22, %v1629_v33  ;;  %v1459_v26 = vpop.f32.mrb[44].mxu0 }
 0x205   :  { %v6989_v12 = vadd.f32 %v1459_v26, %v7658_v8  ;;  %v1461_v52 = vpop.f32.mrb[45].mxu0 }
 0x206   :  { %v6990_v38 = vadd.f32 %v1461_v52, %v7663_v10  ;;  %v1463_v47 = vpop.f32.mrb[46].mxu0  ;;  %1979 = vmatprep.mubr.bf16.mxu1 %v1705_v3  ;;  %v1201_v3 = vadd.f32 %v7613_v50, %v7658_v8  ;;  %v1209_v50 = vadd.f32 %v7619_v54, %v7663_v10 }
 0x207   :  { %v6991_v31 = vadd.f32 %v1463_v47, %v7658_v8  ;;  %v1465_v16 = vpop.f32.mrb[47].mxu0  ;;  %1980 = vmatmul.mubr.bf16.gmra.mrb[88].mxu1 %v1704_v18  ;;  %v1632_v30 = vmax.f32 %v6989_v12, 0.0  ;;  %v1203_v12 = vadd.f32 %v7615_v51, %v7663_v10 }
 0x208   :  { %v6992_v36 = vadd.f32 %v1465_v16, %v7663_v10  ;;  %v1633_v15 = vmax.f32 %v6990_v38, 0.0 }
 0x209   :  { %v1634_v43 = vmax.f32 %v6991_v31, 0.0 }
 0x20a   :  { %v1635_v13 = vmax.f32 %v6992_v36, 0.0  ;;  %v1207_v36 = vadd.f32 %v7617_v53, %v7658_v8 }
 0x20b   :  { %v1706_v40 = vpack.c.bf16 %v1634_v43, %v1632_v30 }
 0x20c   :  { %v1707_v33 = vpack.c.bf16 %v1635_v13, %v1633_v15  ;;  %v1469_v22 = vpop.f32.mrb[48].mxu0  ;;  %v1211_v13 = vadd.f32 %v7621_v55, %v7658_v8  ;;  %v1219_v55 = vadd.f32 %v7627_v58, %v7663_v10 }
 0x20d   :  { %v1470_v26 = vadd.f32 %v1469_v22, %v1197_v5  ;;  %v1471_v18 = vpop.f32.mrb[49].mxu0 }
 0x20e   :  { %v1472_v52 = vadd.f32 %v1471_v18, %v1199_v0  ;;  %v1473_v47 = vpop.f32.mrb[50].mxu0  ;;  %1987 = vmatprep.mubr.bf16.mxu1 %v1707_v33 }
 0x20f   :  { %v1474_v48 = vadd.f32 %v1473_v47, %v1201_v3  ;;  %v1475_v38 = vpop.f32.mrb[51].mxu0  ;;  %1988 = vmatmul.mubr.bf16.gmra.mrb[92].mxu1 %v1706_v40  ;;  %v1636_v16 = vmax.f32 %v1470_v26, 0.0  ;;  %v1213_v40 = vadd.f32 %v7623_v56, %v7663_v10 }
 0x210   :  { %v1476_v31 = vadd.f32 %v1475_v38, %v1203_v12  ;;  %v1637_v30 = vmax.f32 %v1472_v52, 0.0  ;;  %v1217_v52 = vadd.f32 %v7625_v57, %v7658_v8 }
 0x211   :  { %v1638_v49 = vmax.f32 %v1474_v48, 0.0 }
 0x212   :  { %v1639_v43 = vmax.f32 %v1476_v31, 0.0 }
 0x213   :  { %v1708_v5 = vpack.c.bf16 %v1638_v49, %v1636_v16  ;;  %v1221_v16 = vadd.f32 %v7629_v59, %v7658_v8  ;;  %v1229_v59 = vadd.f32 %v7635_v63, %v7663_v10 }
 0x214   :  { %v1709_v15 = vpack.c.bf16 %v1639_v43, %v1637_v30  ;;  %v1479_v51 = vpop.f32.mrb[52].mxu0  ;;  %v1223_v30 = vadd.f32 %v7631_v60, %v7663_v10 }
 0x215   :  { %v1480_v0 = vadd.f32 %v1479_v51, %v1207_v36  ;;  %v1481_v33 = vpop.f32.mrb[53].mxu0 }
 0x216   :  { %v1482_v22 = vadd.f32 %v1481_v33, %v1209_v50  ;;  %v1483_v3 = vpop.f32.mrb[54].mxu0  ;;  %1995 = vmatprep.mubr.bf16.mxu1 %v1709_v15 }
 0x217   :  { %v1484_v53 = vadd.f32 %v1483_v3, %v1211_v13  ;;  %v1485_v26 = vpop.f32.mrb[55].mxu0  ;;  %1996 = vmatmul.mubr.bf16.gmra.mrb[96].mxu1 %v1708_v5  ;;  %v1640_v12 = vmax.f32 %v1480_v0, 0.0  ;;  %v1227_v13 = vadd.f32 %v7633_v62, %v7658_v8  ;;  %v1231_v3 = vadd.f32 %v7640_v1, %v7658_v8 }
 0x218   :  { %v1486_v18 = vadd.f32 %v1485_v26, %v1213_v40  ;;  %v1641_v47 = vmax.f32 %v1482_v22, 0.0  ;;  %v1239_v1 = vadd.f32 %v7655_v7, %v7663_v10 }
 0x219   :  { %v1642_v54 = vmax.f32 %v1484_v53, 0.0 }
 0x21a   :  { %v1643_v48 = vmax.f32 %v1486_v18, 0.0  ;;  %v1233_v18 = vadd.f32 %v7642_v2, %v7663_v10 }
 0x21b   :  { %v1710_v38 = vpack.c.bf16 %v1642_v54, %v1640_v12 }
 0x21c   :  { %v1711_v31 = vpack.c.bf16 %v1643_v48, %v1641_v47  ;;  %v1489_v56 = vpop.f32.mrb[56].mxu0 }
 0x21d   :  { %v1490_v49 = vadd.f32 %v1489_v56, %v1217_v52  ;;  %v1491_v36 = vpop.f32.mrb[57].mxu0 }
 0x21e   :  { %v1492_v43 = vadd.f32 %v1491_v36, %v1219_v55  ;;  %v1493_v50 = vpop.f32.mrb[58].mxu0  ;;  %2003 = vmatprep.mubr.bf16.mxu1 %v1711_v31  ;;  %v1237_v55 = vadd.f32 %v7653_v6, %v7658_v8 }
 0x21f   :  { %v1494_v57 = vadd.f32 %v1493_v50, %v1221_v16  ;;  %v1495_v5 = vpop.f32.mrb[59].mxu0  ;;  %2004 = vmatmul.mubr.bf16.gmra.mrb[100].mxu1 %v1710_v38  ;;  %v1644_v51 = vmax.f32 %v1490_v49, 0.0  ;;  %v1241_v49 = vadd.f32 %v7660_v9, %v7658_v8  ;;  %v1249_v9 = vadd.f32 %v7673_v21, %v7663_v10 }
 0x220   :  { %v1496_v15 = vadd.f32 %v1495_v5, %v1223_v30  ;;  %v1645_v0 = vmax.f32 %v1492_v43, 0.0  ;;  %v1243_v43 = vadd.f32 %v7665_v11, %v7663_v10 }
 0x221   :  { %v1646_v58 = vmax.f32 %v1494_v57, 0.0 }
 0x222   :  { %v1647_v33 = vmax.f32 %v1496_v15, 0.0 }
 0x223   :  { %v1712_v40 = vpack.c.bf16 %v1646_v58, %v1644_v51  ;;  %v1247_v58 = vadd.f32 %v7670_v19, %v7658_v8 }
 0x224   :  { %v1713_v22 = vpack.c.bf16 %v1647_v33, %v1645_v0  ;;  %v1499_v60 = vpop.f32.mrb[60].mxu0 }
 0x225   :  { %v1500_v53 = vadd.f32 %v1499_v60, %v1227_v13  ;;  %v1501_v26 = vpop.f32.mrb[61].mxu0 }
 0x226   :  { %v1502_v12 = vadd.f32 %v1501_v26, %v1229_v59  ;;  %v1503_v54 = vpop.f32.mrb[62].mxu0  ;;  %2011 = vmatprep.mubr.bf16.mxu1 %v1713_v22 }
 0x227   :  { %v1504_v62 = vadd.f32 %v1503_v54, %v1231_v3  ;;  %v1505_v52 = vpop.f32.mrb[63].mxu0  ;;  %2012 = vmatmul.mubr.bf16.gmra.mrb[104].mxu1 %v1712_v40  ;;  %v1648_v48 = vmax.f32 %v1500_v53, 0.0  ;;  %v1251_v40 = vadd.f32 %v7675_v24, %v7658_v8  ;;  %v1253_v3 = vadd.f32 %v7677_v27, %v7663_v10 }
 0x228   :  { %v1506_v47 = vadd.f32 %v1505_v52, %v1233_v18  ;;  %v1649_v38 = vmax.f32 %v1502_v12, 0.0  ;;  %v1259_v24 = vadd.f32 %v7685_v39, %v7663_v10 }
 0x229   :  { %v1650_v63 = vmax.f32 %v1504_v62, 0.0  ;;  %v1257_v62 = vadd.f32 %v7682_v37, %v7658_v8 }
 0x22a   :  { %v1651_v31 = vmax.f32 %v1506_v47, 0.0 }
 0x22b   :  { %v1714_v56 = vpack.c.bf16 %v1650_v63, %v1648_v48 }
 0x22c   :  { %v1715_v16 = vpack.c.bf16 %v1651_v31, %v1649_v38  ;;  %v1509_v2 = vpop.f32.mrb[64].mxu0 }
 0x22d   :  { %v1510_v36 = vadd.f32 %v1509_v2, %v1237_v55  ;;  %v1511_v30 = vpop.f32.mrb[65].mxu0  ;;  %v1261_v55 = vadd.f32 %v7687_v42, %v7658_v8  ;;  %v1269_v42 = vadd.f32 %v7697_v20, %v7663_v10 }
 0x22e   :  { %v1512_v50 = vadd.f32 %v1511_v30, %v1239_v1  ;;  %v1513_v57 = vpop.f32.mrb[66].mxu0  ;;  %2019 = vmatprep.mubr.bf16.mxu1 %v1715_v16  ;;  %v1263_v1 = vadd.f32 %v7689_v45, %v7663_v10  ;;  %v1267_v30 = vadd.f32 %v7694_v17, %v7658_v8 }
 0x22f   :  { %v1514_v6 = vadd.f32 %v1513_v57, %v1241_v49  ;;  %v1515_v5 = vpop.f32.mrb[67].mxu0  ;;  %2020 = vmatmul.mubr.bf16.gmra.mrb[108].mxu1 %v1714_v56  ;;  %v1652_v51 = vmax.f32 %v1510_v36, 0.0 }
 0x230   :  { %v1516_v15 = vadd.f32 %v1515_v5, %v1243_v43  ;;  %v1653_v13 = vmax.f32 %v1512_v50, 0.0  ;;  %v1271_v5 = vadd.f32 %v7699_v25, %v7658_v8  ;;  %v1279_v25 = vadd.f32 %v7713_v28, %v7663_v10 }
 0x231   :  { %v1654_v7 = vmax.f32 %v1514_v6, 0.0 }
 0x232   :  { %v1655_v0 = vmax.f32 %v1516_v15, 0.0 }
 0x233   :  { %v1716_v33 = vpack.c.bf16 %v1654_v7, %v1652_v51  ;;  %v1273_v7 = vadd.f32 %v7701_v29, %v7663_v10  ;;  %v1281_v29 = vadd.f32 %v7715_v32, %v7658_v8  ;;  %v1287_v32 = vadd.f32 %v7719_v41, %v7658_v8 }
 0x234   :  { %v1717_v59 = vpack.c.bf16 %v1655_v0, %v1653_v13  ;;  %v1519_v11 = vpop.f32.mrb[68].mxu0 }
 0x235   :  { %v1520_v22 = vadd.f32 %v1519_v11, %v1247_v58  ;;  %v1521_v60 = vpop.f32.mrb[69].mxu0 }
 0x236   :  { %v1522_v53 = vadd.f32 %v1521_v60, %v1249_v9  ;;  %v1523_v26 = vpop.f32.mrb[70].mxu0  ;;  %2027 = vmatprep.mubr.bf16.mxu1 %v1717_v59  ;;  %v1277_v59 = vadd.f32 %v7710_v23, %v7658_v8 }
 0x237   :  { %v1524_v19 = vadd.f32 %v1523_v26, %v1251_v40  ;;  %v1525_v18 = vpop.f32.mrb[71].mxu0  ;;  %2028 = vmatmul.mubr.bf16.gmra.mrb[112].mxu1 %v1716_v33  ;;  %v1656_v54 = vmax.f32 %v1520_v22, 0.0 }
 0x238   :  { %v1526_v12 = vadd.f32 %v1525_v18, %v1253_v3  ;;  %v1657_v52 = vmax.f32 %v1522_v53, 0.0  ;;  %v1283_v53 = vadd.f32 %v7717_v35, %v7663_v10 }
 0x239   :  { %v1658_v21 = vmax.f32 %v1524_v19, 0.0 }
 0x23a   :  { %v1659_v47 = vmax.f32 %v1526_v12, 0.0 }
 0x23b   :  { %v1718_v48 = vpack.c.bf16 %v1658_v21, %v1656_v54 }
 0x23c   :  { %v1719_v63 = vpack.c.bf16 %v1659_v47, %v1657_v52  ;;  %v1529_v27 = vpop.f32.mrb[72].mxu0 }
 0x23d   :  { %v1530_v38 = vadd.f32 %v1529_v27, %v1257_v62  ;;  %v1531_v31 = vpop.f32.mrb[73].mxu0 }
 0x23e   :  { %v1532_v56 = vadd.f32 %v1531_v31, %v1259_v24  ;;  %v1533_v16 = vpop.f32.mrb[74].mxu0  ;;  %2035 = vmatprep.mubr.bf16.mxu1 %v1719_v63  ;;  %v1289_v24 = vadd.f32 %v7722_v46, %v7663_v10 }
 0x23f   :  { %v1534_v37 = vadd.f32 %v1533_v16, %v1261_v55  ;;  %v1535_v2 = vpop.f32.mrb[75].mxu0  ;;  %2036 = vmatmul.mubr.bf16.gmra.mrb[116].mxu1 %v1718_v48  ;;  %v1660_v36 = vmax.f32 %v1530_v38, 0.0  ;;  %v1291_v48 = vadd.f32 %v7725_v4, %v7658_v8  ;;  %v1293_v55 = vadd.f32 %v7728_v14, %v7663_v10 }
 0x240   :  { %v1536_v49 = vadd.f32 %v1535_v2, %v1263_v1  ;;  %v1661_v43 = vmax.f32 %v1532_v56, 0.0  ;;  %v1297_v4 = vadd.f32 %v7731_v34, %v7658_v8 }
 0x241   :  { %v1662_v39 = vmax.f32 %v1534_v37, 0.0 }
 0x242   :  { %v1663_v50 = vmax.f32 %v1536_v49, 0.0 }
 0x243   :  { %v1720_v57 = vpack.c.bf16 %v1662_v39, %v1660_v36  ;;  %v1299_v39 = vadd.f32 %v7734_v44, %v7663_v10 }
 0x244   :  { %v1721_v6 = vpack.c.bf16 %v1663_v50, %v1661_v43  ;;  %v1539_v45 = vpop.f32.mrb[76].mxu0 }
 0x245   :  { %v1540_v15 = vadd.f32 %v1539_v45, %v1267_v30  ;;  %v1541_v51 = vpop.f32.mrb[77].mxu0  ;;  %v1301_v30 = vadd.f32 %v7737_v61, %v7658_v8 }
 0x246   :  { %v1542_v58 = vadd.f32 %v1541_v51, %v1269_v42  ;;  %v1543_v13 = vpop.f32.mrb[78].mxu0  ;;  %2043 = vmatprep.mubr.bf16.mxu1 %v1721_v6  ;;  %v9390_v42 = vld [vmem:[#allocation16_spill] sm:$0xff] }
 0x247   :  { %v1544_v17 = vadd.f32 %v1543_v13, %v1271_v5  ;;  %v1545_v0 = vpop.f32.mrb[79].mxu0  ;;  %2044 = vmatmul.mubr.bf16.gmra.mrb[120].mxu1 %v1720_v57  ;;  %v1664_v33 = vmax.f32 %v1540_v15, 0.0  ;;  %v1303_v57 = vadd.f32 %v9390_v42, %v7663_v10 }
 0x248   :  { %v1546_v9 = vadd.f32 %v1545_v0, %v1273_v7  ;;  %v1665_v11 = vmax.f32 %v1542_v58, 0.0 }
 0x249   :  { %v1666_v20 = vmax.f32 %v1544_v17, 0.0  ;;  %v9391_v17 = vld [vmem:[#allocation17_spill] sm:$0xff] }
 0x24a   :  { %v1667_v40 = vmax.f32 %v1546_v9, 0.0  ;;  %v1307_v61 = vadd.f32 %v9391_v17, %v7658_v8  ;;  %v9392_v9 = vld [vmem:[#allocation18_spill] sm:$0xff] }
 0x24b   :  { %v1722_v22 = vpack.c.bf16 %v1666_v20, %v1664_v33  ;;  %v1309_v33 = vadd.f32 %v9392_v9, %v7663_v10 }
 0x24c   :  { %v1723_v60 = vpack.c.bf16 %v1667_v40, %v1665_v11  ;;  %v1549_v3 = vpop.f32.mrb[80].mxu0 }
 0x24d   :  { %v1550_v26 = vadd.f32 %v1549_v3, %v1277_v59  ;;  %v1551_v19 = vpop.f32.mrb[81].mxu0  ;;  %v9393_v59 = vld [vmem:[#allocation19_spill] sm:$0xff] }
 0x24e   :  { %2051 = vmatprep.mubr.bf16.mxu1 %v1723_v60  ;;  %v1552_v18 = vadd.f32 %v1551_v19, %v1279_v25  ;;  %v1553_v12 = vpop.f32.mrb[82].mxu0  ;;  %v1311_v11 = vadd.f32 %v9393_v59, %v7658_v8 }
 0x24f   :  { %2052 = vmatmul.mubr.bf16.gmra.mrb[124].mxu1 %v1722_v22  ;;  %v1668_v23 = vmax.f32 %v1550_v26, 0.0  ;;  %v1554_v54 = vadd.f32 %v1553_v12, %v1281_v29  ;;  %v1555_v21 = vpop.f32.mrb[83].mxu0  ;;  %v9394_v22 = vld [vmem:[#allocation20_spill] sm:$0xff] }
 0x250   :  { %v1669_v62 = vmax.f32 %v1552_v18, 0.0  ;;  %v1556_v28 = vadd.f32 %v1555_v21, %v1283_v53  ;;  %v1313_v29 = vadd.f32 %v9394_v22, %v7663_v10  ;;  %v7870_v10 = vld [vmem:[%s9350_s4] ss:$0 sm:$0xff] }
 0x251   :  { %v1670_v52 = vmax.f32 %v1554_v54, 0.0 }
 0x252   :  { %v1671_v47 = vmax.f32 %v1556_v28, 0.0 }
 0x253   :  { %v1724_v35 = vpack.c.bf16 %v1670_v52, %v1668_v23 }
 0x254   :  { %v1725_v63 = vpack.c.bf16 %v1671_v47, %v1669_v62  ;;  %v1559_v27 = vpop.f32.mrb[84].mxu0 }
 0x255   :  { %v1560_v38 = vadd.f32 %v1559_v27, %v1287_v32  ;;  %v1561_v31 = vpop.f32.mrb[85].mxu0 }
 0x256   :  { %v1562_v1 = vadd.f32 %v1561_v31, %v1289_v24  ;;  %v1563_v56 = vpop.f32.mrb[86].mxu0  ;;  %2059 = vmatprep.mubr.bf16.mxu1 %v1725_v63 }
 0x257   :  { %v1672_v16 = vmax.f32 %v1560_v38, 0.0  ;;  %v1564_v41 = vadd.f32 %v1563_v56, %v1291_v48  ;;  %v1565_v37 = vpop.f32.mrb[87].mxu0  ;;  %2060 = vmatmul.mubr.bf16.gmra.mrb[128].mxu1 %v1724_v35  ;;  %v7876_v35 = vld [vmem:[%s9351_s5] ss:$0 sm:$0xff] }
 0x258   :  { %v1673_v2 = vmax.f32 %v1562_v1, 0.0  ;;  %v1566_v46 = vadd.f32 %v1565_v37, %v1293_v55 }
 0x259   :  { %v1674_v49 = vmax.f32 %v1564_v41, 0.0 }
 0x25a   :  { %v1675_v36 = vmax.f32 %v1566_v46, 0.0 }
 0x25b   :  { %v1726_v14 = vpack.c.bf16 %v1674_v49, %v1672_v16 }
 0x25c   :  { %v1727_v43 = vpack.c.bf16 %v1675_v36, %v1673_v2  ;;  %v1569_v50 = vpop.f32.mrb[88].mxu0 }
 0x25d   :  { %v1570_v6 = vadd.f32 %v1569_v50, %v1297_v4  ;;  %v1571_v45 = vpop.f32.mrb[89].mxu0 }
 0x25e   :  { %v1572_v5 = vadd.f32 %v1571_v45, %v1299_v39  ;;  %v1573_v15 = vpop.f32.mrb[90].mxu0  ;;  %2067 = vmatprep.mubr.bf16.mxu1 %v1727_v43 }
 0x25f   :  { %v1676_v51 = vmax.f32 %v1570_v6, 0.0  ;;  %v1574_v34 = vadd.f32 %v1573_v15, %v1301_v30  ;;  %v1575_v7 = vpop.f32.mrb[91].mxu0  ;;  %2068 = vmatmul.mubr.bf16.gmra.mrb[132].mxu1 %v1726_v14 }
 0x260   :  { %v1677_v58 = vmax.f32 %v1572_v5, 0.0  ;;  %v1576_v44 = vadd.f32 %v1575_v7, %v1303_v57 }
 0x261   :  { %v1678_v13 = vmax.f32 %v1574_v34, 0.0 }
 0x262   :  { %v1679_v0 = vmax.f32 %v1576_v44, 0.0 }
 0x263   :  { %v1728_v20 = vpack.c.bf16 %v1678_v13, %v1676_v51 }
 0x264   :  { %v1729_v40 = vpack.c.bf16 %v1679_v0, %v1677_v58  ;;  %v1579_v25 = vpop.f32.mrb[92].mxu0 }
 0x265   :  { %v1580_v60 = vadd.f32 %v1579_v25, %v1307_v61  ;;  %v1581_v3 = vpop.f32.mrb[93].mxu0 }
 0x266   :  { %v1582_v53 = vadd.f32 %v1581_v3, %v1309_v33  ;;  %v1583_v26 = vpop.f32.mrb[94].mxu0  ;;  %2075 = vmatprep.mubr.bf16.mxu1 %v1729_v40 }
 0x267   :  { %v1680_v19 = vmax.f32 %v1580_v60, 0.0  ;;  %v1584_v18 = vadd.f32 %v1583_v26, %v1311_v11  ;;  %v1585_v12 = vpop.f32.mrb[95].mxu0  ;;  %2076 = vmatmul.mubr.bf16.gmra.mrb[136].mxu1 %v1728_v20 }
 0x268   :  { %v1681_v23 = vmax.f32 %v1582_v53, 0.0  ;;  %v1586_v54 = vadd.f32 %v1585_v12, %v1313_v29 }
 0x269   :  { %v1682_v21 = vmax.f32 %v1584_v18, 0.0 }
 0x26a   :  { %v1683_v62 = vmax.f32 %v1586_v54, 0.0 }
 0x26b   :  { %v1730_v28 = vpack.c.bf16 %v1682_v21, %v1680_v19 }
 0x26c   :  { %v1731_v8 = vpack.c.bf16 %v1683_v62, %v1681_v23 }
 0x26e   :  { %2083 = vmatprep.mubr.bf16.mxu1 %v1731_v8 }
 0x26f   :  { %2084 = vmatmul.mubr.bf16.gmra.mrb[140].mxu1 %v1730_v28 }
 0x28a   :  { %v1901_v52 = vpop.f32.mrb[48].mxu1 }
 0x28b   :  { %v1902_v32 = vadd.f32 %v7870_v10, %v1901_v52  ;;  %v1903_v47 = vpop.f32.mrb[49].mxu1 }
 0x28c   :  { %v1904_v24 = vpop.f32.mrb[50].mxu1 }
 0x28d   :  { %v2092_v48 = vmax.f32 %v1902_v32, 0.0  ;;  %v1905_v63 = vadd.f32 %v7870_v10, %v1904_v24  ;;  %v1906_v27 = vpop.f32.mrb[51].mxu1 }
 0x28f   :  { %v2093_v55 = vmax.f32 %v1905_v63, 0.0  ;;  %v2147_v38 = vmul.f32 %v7876_v35, %v2092_v48 }
 0x291   :  { %2195 = vadd.xlane.f32.xlu0 %v2147_v38  ;;  %v2148_v16 = vmul.f32 %v7876_v35, %v2093_v55 }
 0x292   :  { %v1909_v31 = vpop.f32.mrb[52].mxu1 }
 0x293   :  { %v1910_v1 = vadd.f32 %v7870_v10, %v1909_v31  ;;  %v1911_v56 = vpop.f32.mrb[53].mxu1 }
 0x294   :  { %v1912_v41 = vpop.f32.mrb[54].mxu1 }
 0x295   :  { %v2094_v37 = vmax.f32 %v1910_v1, 0.0  ;;  %v1913_v2 = vadd.f32 %v7870_v10, %v1912_v41  ;;  %v1914_v46 = vpop.f32.mrb[55].mxu1  ;;  %2197 = vadd.xlane.f32.xlu0 %v2148_v16 }
 0x297   :  { %v2095_v49 = vmax.f32 %v1913_v2, 0.0  ;;  %v2149_v4 = vmul.f32 %v7876_v35, %v2094_v37 }
 0x299   :  { %2199 = vadd.xlane.f32.xlu1 %v2149_v4  ;;  %v2150_v30 = vmul.f32 %v7876_v35, %v2095_v49 }
 0x29a   :  { %v1917_v36 = vpop.f32.mrb[56].mxu1 }
 0x29b   :  { %v1918_v39 = vadd.f32 %v7870_v10, %v1917_v36  ;;  %v1919_v14 = vpop.f32.mrb[57].mxu1 }
 0x29c   :  { %v1920_v43 = vpop.f32.mrb[58].mxu1 }
 0x29d   :  { %v2096_v50 = vmax.f32 %v1918_v39, 0.0  ;;  %v1921_v42 = vadd.f32 %v7870_v10, %v1920_v43  ;;  %v1922_v57 = vpop.f32.mrb[59].mxu1  ;;  %2201 = vadd.xlane.f32.xlu1 %v2150_v30 }
 0x29f   :  { %v2097_v6 = vmax.f32 %v1921_v42, 0.0  ;;  %v2151_v45 = vmul.f32 %v7876_v35, %v2096_v50 }
 0x2a1   :  { %2203 = vadd.xlane.f32.xlu0 %v2151_v45  ;;  %v2152_v5 = vmul.f32 %v7876_v35, %v2097_v6 }
 0x2a2   :  { %v1925_v15 = vpop.f32.mrb[60].mxu1 }
 0x2a3   :  { %v1926_v51 = vadd.f32 %v7870_v10, %v1925_v15  ;;  %v1927_v34 = vpop.f32.mrb[61].mxu1  ;;  %2205 = vadd.xlane.f32.xlu1 %v2152_v5 }
 0x2a4   :  { %v1928_v7 = vpop.f32.mrb[62].mxu1 }
 0x2a5   :  { %v2098_v58 = vmax.f32 %v1926_v51, 0.0  ;;  %v1929_v44 = vadd.f32 %v7870_v10, %v1928_v7  ;;  %v1930_v13 = vpop.f32.mrb[63].mxu1 }
 0x2a7   :  { %v2099_v17 = vmax.f32 %v1929_v44, 0.0  ;;  %v2153_v61 = vmul.f32 %v7876_v35, %v2098_v58 }
 0x2a9   :  { %2207 = vadd.xlane.f32.xlu0 %v2153_v61  ;;  %v2154_v0 = vmul.f32 %v7876_v35, %v2099_v17 }
 0x2aa   :  { %v1933_v9 = vpop.f32.mrb[64].mxu1 }
 0x2ab   :  { %v1934_v33 = vadd.f32 %v7870_v10, %v1933_v9  ;;  %v1935_v20 = vpop.f32.mrb[65].mxu1  ;;  %2209 = vadd.xlane.f32.xlu1 %v2154_v0 }
 0x2ac   :  { %v1936_v59 = vpop.f32.mrb[66].mxu1 }
 0x2ad   :  { %v2100_v11 = vmax.f32 %v1934_v33, 0.0  ;;  %v1937_v40 = vadd.f32 %v7870_v10, %v1936_v59  ;;  %v1938_v25 = vpop.f32.mrb[67].mxu1 }
 0x2af   :  { %v2101_v22 = vmax.f32 %v1937_v40, 0.0  ;;  %v2155_v29 = vmul.f32 %v7876_v35, %v2100_v11 }
 0x2b1   :  { %2211 = vadd.xlane.f32.xlu0 %v2155_v29  ;;  %v2156_v60 = vmul.f32 %v7876_v35, %v2101_v22 }
 0x2b2   :  { %v1941_v3 = vpop.f32.mrb[68].mxu1 }
 0x2b3   :  { %v1942_v53 = vadd.f32 %v7870_v10, %v1941_v3  ;;  %v1943_v26 = vpop.f32.mrb[69].mxu1  ;;  %2213 = vadd.xlane.f32.xlu1 %v2156_v60 }
 0x2b4   :  { %v1944_v19 = vpop.f32.mrb[70].mxu1 }
 0x2b5   :  { %v2102_v18 = vmax.f32 %v1942_v53, 0.0  ;;  %v1945_v12 = vadd.f32 %v7870_v10, %v1944_v19  ;;  %v1946_v23 = vpop.f32.mrb[71].mxu1 }
 0x2b7   :  { %v2103_v54 = vmax.f32 %v1945_v12, 0.0  ;;  %v2157_v21 = vmul.f32 %v7876_v35, %v2102_v18 }
 0x2b9   :  { %2215 = vadd.xlane.f32.xlu0 %v2157_v21  ;;  %v2158_v62 = vmul.f32 %v7876_v35, %v2103_v54 }
 0x2ba   :  { %v1949_v28 = vpop.f32.mrb[72].mxu1 }
 0x2bb   :  { %v1950_v8 = vadd.f32 %v7870_v10, %v1949_v28  ;;  %v1951_v52 = vpop.f32.mrb[73].mxu1  ;;  %2217 = vadd.xlane.f32.xlu1 %v2158_v62 }
 0x2bc   :  { %v1952_v32 = vpop.f32.mrb[74].mxu1 }
 0x2bd   :  { %v2104_v47 = vmax.f32 %v1950_v8, 0.0  ;;  %v1953_v24 = vadd.f32 %v7870_v10, %v1952_v32  ;;  %v1954_v48 = vpop.f32.mrb[75].mxu1 }
 0x2bf   :  { %v2105_v63 = vmax.f32 %v1953_v24, 0.0  ;;  %v2159_v27 = vmul.f32 %v7876_v35, %v2104_v47 }
 0x2c1   :  { %2219 = vadd.xlane.f32.xlu0 %v2159_v27  ;;  %v2160_v55 = vmul.f32 %v7876_v35, %v2105_v63 }
 0x2c2   :  { %v1957_v38 = vpop.f32.mrb[76].mxu1 }
 0x2c3   :  { %v1958_v31 = vadd.f32 %v7870_v10, %v1957_v38  ;;  %v1959_v1 = vpop.f32.mrb[77].mxu1  ;;  %2221 = vadd.xlane.f32.xlu1 %v2160_v55 }
 0x2c4   :  { %v1960_v56 = vpop.f32.mrb[78].mxu1 }
 0x2c5   :  { %v2106_v16 = vmax.f32 %v1958_v31, 0.0  ;;  %v1961_v41 = vadd.f32 %v7870_v10, %v1960_v56  ;;  %v1962_v37 = vpop.f32.mrb[79].mxu1 }
 0x2c7   :  { %v2107_v2 = vmax.f32 %v1961_v41, 0.0  ;;  %v2161_v46 = vmul.f32 %v7876_v35, %v2106_v16 }
 0x2c9   :  { %2223 = vadd.xlane.f32.xlu0 %v2161_v46  ;;  %v2162_v49 = vmul.f32 %v7876_v35, %v2107_v2 }
 0x2ca   :  { %v1965_v4 = vpop.f32.mrb[80].mxu1 }
 0x2cb   :  { %v1966_v36 = vadd.f32 %v7870_v10, %v1965_v4  ;;  %v1967_v39 = vpop.f32.mrb[81].mxu1  ;;  %2225 = vadd.xlane.f32.xlu1 %v2162_v49 }
 0x2cc   :  { %v1968_v14 = vpop.f32.mrb[82].mxu1 }
 0x2cd   :  { %v2108_v30 = vmax.f32 %v1966_v36, 0.0  ;;  %v1969_v43 = vadd.f32 %v7870_v10, %v1968_v14  ;;  %v1970_v50 = vpop.f32.mrb[83].mxu1 }
 0x2cf   :  { %v2109_v42 = vmax.f32 %v1969_v43, 0.0  ;;  %v2163_v57 = vmul.f32 %v7876_v35, %v2108_v30 }
 0x2d1   :  { %2227 = vadd.xlane.f32.xlu0 %v2163_v57  ;;  %v2164_v6 = vmul.f32 %v7876_v35, %v2109_v42 }
 0x2d2   :  { %v1973_v45 = vpop.f32.mrb[84].mxu1 }
 0x2d3   :  { %v1974_v5 = vadd.f32 %v7870_v10, %v1973_v45  ;;  %v1975_v15 = vpop.f32.mrb[85].mxu1  ;;  %2229 = vadd.xlane.f32.xlu1 %v2164_v6 }
 0x2d4   :  { %v1976_v51 = vpop.f32.mrb[86].mxu1 }
 0x2d5   :  { %v2110_v34 = vmax.f32 %v1974_v5, 0.0  ;;  %v1977_v7 = vadd.f32 %v7870_v10, %v1976_v51  ;;  %v1978_v58 = vpop.f32.mrb[87].mxu1 }
 0x2d7   :  { %v2111_v44 = vmax.f32 %v1977_v7, 0.0  ;;  %v2165_v13 = vmul.f32 %v7876_v35, %v2110_v34 }
 0x2d9   :  { %2231 = vadd.xlane.f32.xlu0 %v2165_v13  ;;  %v2166_v17 = vmul.f32 %v7876_v35, %v2111_v44 }
 0x2da   :  { %v1981_v61 = vpop.f32.mrb[88].mxu1 }
 0x2db   :  { %v1982_v0 = vadd.f32 %v7870_v10, %v1981_v61  ;;  %v1983_v9 = vpop.f32.mrb[89].mxu1  ;;  %2233 = vadd.xlane.f32.xlu1 %v2166_v17 }
 0x2dc   :  { %v1984_v33 = vpop.f32.mrb[90].mxu1 }
 0x2dd   :  { %v2112_v20 = vmax.f32 %v1982_v0, 0.0  ;;  %v1985_v59 = vadd.f32 %v7870_v10, %v1984_v33  ;;  %v1986_v11 = vpop.f32.mrb[91].mxu1 }
 0x2df   :  { %v2113_v40 = vmax.f32 %v1985_v59, 0.0  ;;  %v2167_v25 = vmul.f32 %v7876_v35, %v2112_v20 }
 0x2e1   :  { %2235 = vadd.xlane.f32.xlu0 %v2167_v25  ;;  %v2168_v22 = vmul.f32 %v7876_v35, %v2113_v40 }
 0x2e2   :  { %v1989_v29 = vpop.f32.mrb[92].mxu1 }
 0x2e3   :  { %v1990_v60 = vadd.f32 %v7870_v10, %v1989_v29  ;;  %v1991_v3 = vpop.f32.mrb[93].mxu1  ;;  %2237 = vadd.xlane.f32.xlu1 %v2168_v22 }
 0x2e4   :  { %v1992_v53 = vpop.f32.mrb[94].mxu1 }
 0x2e5   :  { %v2114_v26 = vmax.f32 %v1990_v60, 0.0  ;;  %v1993_v19 = vadd.f32 %v7870_v10, %v1992_v53  ;;  %v1994_v18 = vpop.f32.mrb[95].mxu1 }
 0x2e7   :  { %v2115_v12 = vmax.f32 %v1993_v19, 0.0  ;;  %v2169_v23 = vmul.f32 %v7876_v35, %v2114_v26 }
 0x2e9   :  { %2239 = vadd.xlane.f32.xlu0 %v2169_v23  ;;  %v2170_v54 = vmul.f32 %v7876_v35, %v2115_v12 }
 0x2ea   :  { %v1997_v21 = vpop.f32.mrb[96].mxu1 }
 0x2eb   :  { %v1998_v62 = vadd.f32 %v7870_v10, %v1997_v21  ;;  %v1999_v28 = vpop.f32.mrb[97].mxu1  ;;  %2241 = vadd.xlane.f32.xlu1 %v2170_v54 }
 0x2ec   :  { %v2000_v8 = vpop.f32.mrb[98].mxu1 }
 0x2ed   :  { %v2116_v52 = vmax.f32 %v1998_v62, 0.0  ;;  %v2001_v32 = vadd.f32 %v7870_v10, %v2000_v8  ;;  %v2002_v47 = vpop.f32.mrb[99].mxu1 }
 0x2ef   :  { %v2117_v24 = vmax.f32 %v2001_v32, 0.0  ;;  %v2171_v48 = vmul.f32 %v7876_v35, %v2116_v52  ;;  %v7954_v32 = vstv %s9352_s6 }
 0x2f1   :  { %2243 = vadd.xlane.f32.xlu0 %v2171_v48  ;;  %v2172_v63 = vmul.f32 %v7876_v35, %v2117_v24 }
 0x2f2   :  { %v2005_v27 = vpop.f32.mrb[100].mxu1 }
 0x2f3   :  { %v2006_v55 = vadd.f32 %v7870_v10, %v2005_v27  ;;  %v2007_v38 = vpop.f32.mrb[101].mxu1  ;;  %2245 = vadd.xlane.f32.xlu1 %v2172_v63  ;;  %v7513_v27 = vmov 1966171168  }
 0x2f4   :  { %v2008_v31 = vpop.f32.mrb[102].mxu1 }
 0x2f5   :  { %v2118_v1 = vmax.f32 %v2006_v55, 0.0  ;;  %v2009_v56 = vadd.f32 %v7870_v10, %v2008_v31  ;;  %v2010_v16 = vpop.f32.mrb[103].mxu1  ;;  %v3930_v55 = vunpack.c.l.s4 %v7513_v27 }
 0x2f7   :  { %v2119_v41 = vmax.f32 %v2009_v56, 0.0  ;;  %v2173_v37 = vmul.f32 %v7876_v35, %v2118_v1  ;;  %v9395_v56 = vld [vmem:[#allocation13_spill] sm:$0xff] }
 0x2f8   :  { %v7960_v16 = vsub.s32 2, %v9395_v56 }
 0x2f9   :  { %2247 = vadd.xlane.f32.xlu0 %v2173_v37  ;;  %v2174_v2 = vmul.f32 %v7876_v35, %v2119_v41  ;;  %v7963_v41 = vsub.s32 3, %v9395_v56 }
 0x2fa   :  { %v2013_v46 = vpop.f32.mrb[104].mxu1 }
 0x2fb   :  { %v2014_v49 = vadd.f32 %v7870_v10, %v2013_v46  ;;  %v2015_v4 = vpop.f32.mrb[105].mxu1  ;;  %2249 = vadd.xlane.f32.xlu1 %v2174_v2 }
 0x2fc   :  { %v2016_v36 = vpop.f32.mrb[106].mxu1  ;;  %v7971_v4 = vsub.s32 5, %v9395_v56 }
 0x2fd   :  { %v2120_v39 = vmax.f32 %v2014_v49, 0.0  ;;  %v2017_v14 = vadd.f32 %v7870_v10, %v2016_v36  ;;  %v2018_v30 = vpop.f32.mrb[107].mxu1  ;;  %v7968_v49 = vsub.s32 4, %v9395_v56 }
 0x2fe   :  { %v3931_v30 = vunpack.c.0.s8 %v3930_v55 }
 0x2ff   :  { %v2121_v43 = vmax.f32 %v2017_v14, 0.0  ;;  %v2175_v50 = vmul.f32 %v7876_v35, %v2120_v39  ;;  %v7974_v39 = vsub.s32 6, %v9395_v56  ;;  %v7977_v14 = vsub.s32 7, %v9395_v56 }
 0x301   :  { %2251 = vadd.xlane.f32.xlu0 %v2175_v50  ;;  %v2176_v42 = vmul.f32 %v7876_v35, %v2121_v43  ;;  %v9396_v43 = vld [vmem:[#allocation14_spill] sm:$0xff] }
 0x302   :  { %v2021_v57 = vpop.f32.mrb[108].mxu1 }
 0x303   :  { %v2022_v6 = vadd.f32 %v7870_v10, %v2021_v57  ;;  %v2023_v45 = vpop.f32.mrb[109].mxu1  ;;  %2253 = vadd.xlane.f32.xlu1 %v2176_v42 }
 0x304   :  { %v2024_v5 = vpop.f32.mrb[110].mxu1 }
 0x305   :  { %v2122_v15 = vmax.f32 %v2022_v6, 0.0  ;;  %v2025_v51 = vadd.f32 %v7870_v10, %v2024_v5  ;;  %v2026_v34 = vpop.f32.mrb[111].mxu1  ;;  %v9397_v5 = vld [vmem:[#allocation15_spill] sm:$0xff] }
 0x307   :  { %v2123_v7 = vmax.f32 %v2025_v51, 0.0  ;;  %v2177_v58 = vmul.f32 %v7876_v35, %v2122_v15 }
 0x309   :  { %2255 = vadd.xlane.f32.xlu0 %v2177_v58  ;;  %v2178_v44 = vmul.f32 %v7876_v35, %v2123_v7 }
 0x30a   :  { %v2029_v13 = vpop.f32.mrb[112].mxu1 }
 0x30b   :  { %v2030_v17 = vadd.f32 %v7870_v10, %v2029_v13  ;;  %v2031_v61 = vpop.f32.mrb[113].mxu1  ;;  %2257 = vadd.xlane.f32.xlu1 %v2178_v44 }
 0x30c   :  { %v2032_v0 = vpop.f32.mrb[114].mxu1 }
 0x30d   :  { %v2124_v9 = vmax.f32 %v2030_v17, 0.0  ;;  %v2033_v33 = vadd.f32 %v7870_v10, %v2032_v0  ;;  %v2034_v20 = vpop.f32.mrb[115].mxu1 }
 0x30f   :  { %v2125_v59 = vmax.f32 %v2033_v33, 0.0  ;;  %v2179_v11 = vmul.f32 %v7876_v35, %v2124_v9 }
 0x311   :  { %2259 = vadd.xlane.f32.xlu0 %v2179_v11  ;;  %v2180_v40 = vmul.f32 %v7876_v35, %v2125_v59 }
 0x312   :  { %v2037_v25 = vpop.f32.mrb[116].mxu1 }
 0x313   :  { %v2038_v22 = vadd.f32 %v7870_v10, %v2037_v25  ;;  %v2039_v29 = vpop.f32.mrb[117].mxu1  ;;  %2261 = vadd.xlane.f32.xlu1 %v2180_v40 }
 0x314   :  { %v2040_v60 = vpop.f32.mrb[118].mxu1 }
 0x315   :  { %v2126_v3 = vmax.f32 %v2038_v22, 0.0  ;;  %v2041_v53 = vadd.f32 %v7870_v10, %v2040_v60  ;;  %v2042_v26 = vpop.f32.mrb[119].mxu1 }
 0x317   :  { %v2127_v19 = vmax.f32 %v2041_v53, 0.0  ;;  %v2181_v18 = vmul.f32 %v7876_v35, %v2126_v3 }
 0x319   :  { %2263 = vadd.xlane.f32.xlu0 %v2181_v18  ;;  %v2182_v12 = vmul.f32 %v7876_v35, %v2127_v19  ;;  %v7999_v19 = vsub.s32 %v3931_v30, %v9395_v56 }
 0x31a   :  { %v2045_v23 = vpop.f32.mrb[120].mxu1 }
 0x31b   :  { %v2046_v54 = vadd.f32 %v7870_v10, %v2045_v23  ;;  %v2047_v21 = vpop.f32.mrb[121].mxu1  ;;  %2265 = vadd.xlane.f32.xlu1 %v2182_v12 }
 0x31c   :  { %v2048_v62 = vpop.f32.mrb[122].mxu1 }
 0x31d   :  { %v2128_v28 = vmax.f32 %v2046_v54, 0.0  ;;  %v2049_v8 = vadd.f32 %v7870_v10, %v2048_v62  ;;  %v2050_v52 = vpop.f32.mrb[123].mxu1 }
 0x31e   :  { %v2196_v47 = vpop.xlane.xlu0 %2195 }
 0x31f   :  { %v2129_v24 = vmax.f32 %v2049_v8, 0.0  ;;  %v2183_v48 = vmul.f32 %v7876_v35, %v2128_v28  ;;  %v2293_v63 = vadd.f32 %v7954_v32, %v2196_v47 }
 0x321   :  { %2267 = vadd.xlane.f32.xlu0 %v2183_v48  ;;  %v2184_v38 = vmul.f32 %v7876_v35, %v2129_v24  ;;  %v2392_v50 = vrot.slane %v2293_v63, %v9396_v43  ;;  %v2396_v61 = vrot.slane %v2293_v63, %v9397_v5  ;;  %v2400_v9 = vrot.slane %v2293_v63, %v7960_v16 }
 0x322   :  { %v2053_v31 = vpop.f32.mrb[124].mxu1  ;;  %v2198_v1 = vpop.xlane.xlu0 %2197  ;;  %v2404_v33 = vrot.slane %v2293_v63, %v7963_v41  ;;  %v2408_v20 = vrot.slane %v2293_v63, %v7968_v49  ;;  %v2412_v11 = vrot.slane %v2293_v63, %v7971_v4  ;;  %v2416_v40 = vrot.slane %v2293_v63, %v7974_v39 }
 0x323   :  { %v2054_v37 = vadd.f32 %v7870_v10, %v2053_v31  ;;  %v2294_v2 = vadd.f32 %v7954_v32, %v2198_v1  ;;  %v2055_v46 = vpop.f32.mrb[125].mxu1  ;;  %2269 = vadd.xlane.f32.xlu1 %v2184_v38  ;;  %v2420_v25 = vrot.slane %v2293_v63, %v7977_v14  ;;  %v3925_v12 = vcombine.low %v2392_v50, %v2396_v61 }
 0x324   :  { %v2056_v36 = vpop.f32.mrb[126].mxu1  ;;  %v3926_v23 = vcombine.low %v2400_v9, %v2404_v33  ;;  %v3927_v54 = vcombine.low %v2408_v20, %v2412_v11 }
 0x325   :  { %v2130_v42 = vmax.f32 %v2054_v37, 0.0  ;;  %v2057_v57 = vadd.f32 %v7870_v10, %v2056_v36  ;;  %v2058_v6 = vpop.f32.mrb[127].mxu1  ;;  %v2424_v45 = vrot.slane %v2294_v2, %v9396_v43  ;;  %v2428_v15 = vrot.slane %v2294_v2, %v9397_v5 }
 0x326   :  { %v2432_v51 = vrot.slane %v2294_v2, %v7960_v16  ;;  %v2436_v34 = vrot.slane %v2294_v2, %v7963_v41  ;;  %v2440_v7 = vrot.slane %v2294_v2, %v7968_v49  ;;  %v2444_v58 = vrot.slane %v2294_v2, %v7971_v4 }
 0x327   :  { %v2131_v44 = vmax.f32 %v2057_v57, 0.0  ;;  %v2185_v13 = vmul.f32 %v7876_v35, %v2130_v42  ;;  %v2448_v17 = vrot.slane %v2294_v2, %v7974_v39  ;;  %v2452_v0 = vrot.slane %v2294_v2, %v7977_v14 }
 0x328   :  { %v3974_v22 = vcombine.low %v2424_v45, %v2428_v15  ;;  %v3975_v29 = vcombine.low %v2432_v51, %v2436_v34  ;;  %v3976_v60 = vcombine.low %v2440_v7, %v2444_v58  ;;  %v3928_v21 = vcombine.low %v2416_v40, %v2420_v25  ;;  %v2200_v58 = vpop.xlane.xlu1 %2199 }
 0x329   :  { %2271 = vadd.xlane.f32.xlu0 %v2185_v13  ;;  %v2186_v59 = vmul.f32 %v7876_v35, %v2131_v44  ;;  %v3977_v3 = vcombine.low %v2448_v17, %v2452_v0  ;;  %v3935_v24 = vrot.slane %v3925_v12, %v7999_v19  ;;  %v3942_v48 = vrot.slane %v3926_v23, %v7999_v19 }
 0x32a   :  { %v2061_v53 = vpop.f32.mrb[128].mxu1  ;;  %v3984_v28 = vrot.slane %v3974_v22, %v7999_v19  ;;  %v3991_v8 = vrot.slane %v3975_v29, %v7999_v19  ;;  %v3998_v52 = vrot.slane %v3976_v60, %v7999_v19  ;;  %v3949_v63 = vrot.slane %v3927_v54, %v7999_v19 }
 0x32b   :  { %2273 = vadd.xlane.f32.xlu1 %v2186_v59  ;;  %v2063_v26 = vpop.f32.mrb[129].mxu1  ;;  %v4005_v47 = vrot.slane %v3977_v3, %v7999_v19  ;;  %v3956_v27 = vrot.slane %v3928_v21, %v7999_v19  ;;  %v3957_v2 = vcombine.low %v3935_v24, %v3942_v48  ;;  %v2295_v9 = vadd.f32 %v7954_v32, %v2200_v58 }
 0x32c   :  { %v2064_v18 = vpop.f32.mrb[130].mxu1  ;;  %v4006_v55 = vcombine.low %v3984_v28, %v3991_v8  ;;  %v2202_v0 = vpop.xlane.xlu1 %2201  ;;  %v2062_v12 = vadd.f32 %v7870_v10, %v2061_v53 }
 0x32d   :  { %v2066_v62 = vpop.f32.mrb[131].mxu1  ;;  %v4007_v38 = vcombine.low %v3998_v52, %v4005_v47  ;;  %v3958_v46 = vcombine.low %v3949_v63, %v3956_v27  ;;  %v3965_v42 = vrot.slane %v3957_v2, %v7999_v19  ;;  %v2296_v20 = vadd.f32 %v7954_v32, %v2202_v0 }
 0x32e   :  { %v4014_v30 = vrot.slane %v4006_v55, %v7999_v19  ;;  %v2456_v59 = vrot.slane %v2295_v9, %v9396_v43  ;;  %v2460_v11 = vrot.slane %v2295_v9, %v9397_v5  ;;  %v2464_v40 = vrot.slane %v2295_v9, %v7960_v16 }
 0x32f   :  { %v4021_v50 = vrot.slane %v4007_v38, %v7999_v19  ;;  %v3972_v57 = vrot.slane %v3958_v46, %v7999_v19  ;;  %v2468_v25 = vrot.slane %v2295_v9, %v7963_v41  ;;  %v2472_v22 = vrot.slane %v2295_v9, %v7968_v49 }
 0x330   :  { %v8020_v33 = vpop.xlane.xlu1 %2205  ;;  %v2476_v29 = vrot.slane %v2295_v9, %v7971_v4  ;;  %v2480_v3 = vrot.slane %v2295_v9, %v7974_v39  ;;  %v2484_v26 = vrot.slane %v2295_v9, %v7977_v14  ;;  %v2065_v23 = vadd.f32 %v7870_v10, %v2064_v18 }
 0x331   :  { %v4022_v6 = vcombine.low %v4014_v30, %v4021_v50  ;;  %v3973_v34 = vcombine.low %v3965_v42, %v3972_v57  ;;  %v4023_v54 = vcombine.low %v2456_v59, %v2460_v11  ;;  %v4024_v21 = vcombine.low %v2464_v40, %v2468_v25 }
 0x332   :  { %v2069_v31 = vpop.f32.mrb[132].mxu1  ;;  %v4025_v62 = vcombine.low %v2472_v22, %v2476_v29  ;;  %v2488_v28 = vrot.slane %v2296_v20, %v9396_v43  ;;  %v4026_v52 = vcombine.low %v2480_v3, %v2484_v26  ;;  %v2492_v47 = vrot.slane %v2296_v20, %v9397_v5 }
 0x333   :  { %v2071_v1 = vpop.f32.mrb[133].mxu1  ;;  %v2496_v24 = vrot.slane %v2296_v20, %v7960_v16  ;;  %v2500_v48 = vrot.slane %v2296_v20, %v7963_v41  ;;  %v2504_v63 = vrot.slane %v2296_v20, %v7968_v49  ;;  %v2508_v27 = vrot.slane %v2296_v20, %v7971_v4 }
 0x334   :  { %v8009_v37 = vpop.f32.mrb[134].mxu1  ;;  %v2512_v53 = vrot.slane %v2296_v20, %v7974_v39  ;;  %v2516_v18 = vrot.slane %v2296_v20, %v7977_v14  ;;  %v2132_v55 = vmax.f32 %v2062_v12, 0.0  ;;  %v2133_v1 = vmax.f32 %v2065_v23, 0.0 }
 0x335   :  { %v2074_v36 = vpop.f32.mrb[135].mxu1  ;;  %v2070_v2 = vadd.f32 %v7870_v10, %v2069_v31  ;;  %v4033_v46 = vrot.slane %v4023_v54, %v7999_v19  ;;  %v4047_v30 = vrot.slane %v4025_v62, %v7999_v19  ;;  %v4054_v50 = vrot.slane %v4026_v52, %v7999_v19 }
 0x336   :  { %v4040_v36 = vrot.slane %v4024_v21, %v7999_v19  ;;  %v4072_v42 = vcombine.low %v2488_v28, %v2492_v47  ;;  %v4073_v57 = vcombine.low %v2496_v24, %v2500_v48  ;;  %v2188_v9 = vmul.f32 %v7876_v35, %v2133_v1 }
 0x337   :  { %v2134_v0 = vmax.f32 %v2070_v2, 0.0  ;;  %v4056_v59 = vcombine.low %v4047_v30, %v4054_v50 }
 0x338   :  { %v8029_v60 = vpop.xlane.xlu1 %2209  ;;  %v4055_v20 = vcombine.low %v4033_v46, %v4040_v36  ;;  %v4082_v40 = vrot.slane %v4072_v42, %v7999_v19 }
 0x339   :  { %v2189_v52 = vmul.f32 %v7876_v35, %v2134_v0 }
 0x33a   :  { %v2077_v45 = vpop.f32.mrb[136].mxu1  ;;  %v4063_v47 = vrot.slane %v4055_v20, %v7999_v19 }
 0x33b   :  { %v2079_v15 = vpop.f32.mrb[137].mxu1 }
 0x33c   :  { %6281 = vperm.xlu1 %7150, %v4022_v6   ;;  %v8015_v51 = vpop.f32.mrb[138].mxu1  ;;  %v4074_v6 = vcombine.low %v2504_v63, %v2508_v27  ;;  %v4075_v15 = vcombine.low %v2512_v53, %v2516_v18  ;;  %v2204_v53 = vpop.xlane.xlu0 %2203 }
 0x33d   :  { %v2082_v7 = vpop.f32.mrb[139].mxu1 }
 0x33e   :  { %v2187_v7 = vmul.f32 %v7876_v35, %v2132_v55  ;;  %v4096_v25 = vrot.slane %v4074_v6, %v7999_v19  ;;  %v4103_v22 = vrot.slane %v4075_v15, %v7999_v19 }
 0x33f   :  { %6278 = vperm.xlu0 %7149, %v3973_v34   ;;  %v2078_v34 = vadd.f32 %v7870_v10, %v2077_v45  ;;  %v4089_v45 = vrot.slane %v4073_v57, %v7999_v19 }
 0x340   :  { %v2214_v8 = vpop.xlane.xlu1 %2213  ;;  %v4105_v27 = vcombine.low %v4096_v25, %v4103_v22 }
 0x341   :  { %v2302_v38 = vadd.f32 %v7954_v32, %v2214_v8  ;;  %v2136_v29 = vmax.f32 %v2078_v34, 0.0  ;;  %v4104_v63 = vcombine.low %v4082_v40, %v4089_v45  ;;  %v8081_v34 = vadd.f32 %v7954_v32, %v2204_v53 }
 0x342   :  { %v2085_v44 = vpop.f32.mrb[140].mxu1 }
 0x343   :  { %v2087_v13 = vpop.f32.mrb[141].mxu1  ;;  %v2680_v58 = vrot.slane %v2302_v38, %v9396_v43  ;;  %v2684_v31 = vrot.slane %v2302_v38, %v9397_v5  ;;  %v2086_v3 = vadd.f32 %v7870_v10, %v2085_v44  ;;  %v2696_v26 = vrot.slane %v2302_v38, %v7968_v49 }
 0x344   :  { %v8017_v17 = vpop.f32.mrb[142].mxu1  ;;  %v2688_v13 = vrot.slane %v2302_v38, %v7960_v16  ;;  %v2700_v12 = vrot.slane %v2302_v38, %v7971_v4  ;;  %v2704_v23 = vrot.slane %v2302_v38, %v7974_v39  ;;  %v2708_v54 = vrot.slane %v2302_v38, %v7977_v14 }
 0x345   :  { %v2090_v61 = vpop.f32.mrb[143].mxu1  ;;  %v4366_v21 = vcombine.low %v2680_v58, %v2684_v31  ;;  %v4070_v44 = vrot.slane %v4056_v59, %v7999_v19  ;;  %v2138_v24 = vmax.f32 %v2086_v3, 0.0  ;;  %v2191_v48 = vmul.f32 %v7876_v35, %v2136_v29 }
 0x346   :  { %v2692_v61 = vrot.slane %v2302_v38, %v7963_v41  ;;  %v4368_v18 = vcombine.low %v2696_v26, %v2700_v12  ;;  %v4369_v55 = vcombine.low %v2704_v23, %v2708_v54  ;;  %v8089_v58 = vadd.f32 %v7870_v10, %v8009_v37 }
 0x347   :  { %v4376_v38 = vrot.slane %v4366_v21, %v7999_v19  ;;  %v4112_v0 = vrot.slane %v4104_v63, %v7999_v19 }
 0x348   :  { %v2218_v11 = vpop.xlane.xlu1 %2217  ;;  %v4367_v62 = vcombine.low %v2688_v13, %v2692_v61  ;;  %v2193_v13 = vmul.f32 %v7876_v35, %v2138_v24  ;;  %v4071_v61 = vcombine.low %v4063_v47, %v4070_v44  ;;  %v4390_v59 = vrot.slane %v4368_v18, %v7999_v19 }
 0x349   :  { %v2304_v28 = vadd.f32 %v7954_v32, %v2218_v11 }
 0x34a   :  { %v4383_v1 = vrot.slane %v4367_v62, %v7999_v19 }
 0x34b   :  { %v2744_v2 = vrot.slane %v2304_v28, %v9396_v43  ;;  %v2748_v46 = vrot.slane %v2304_v28, %v9397_v5  ;;  %v2752_v36 = vrot.slane %v2304_v28, %v7960_v16  ;;  %v2756_v30 = vrot.slane %v2304_v28, %v7963_v41 }
 0x34c   :  { %v2760_v42 = vrot.slane %v2304_v28, %v7968_v49  ;;  %v2764_v57 = vrot.slane %v2304_v28, %v7971_v4  ;;  %v2768_v6 = vrot.slane %v2304_v28, %v7974_v39  ;;  %v2772_v15 = vrot.slane %v2304_v28, %v7977_v14 }
 0x34d   :  { %v8098_v11 = vcombine.low %v4376_v38, %v4383_v1  ;;  %v4464_v10 = vcombine.low %v2744_v2, %v2748_v46  ;;  %v4465_v37 = vcombine.low %v2752_v36, %v2756_v30 }
 0x34e   :  { %v4466_v40 = vcombine.low %v2760_v42, %v2764_v57  ;;  %v4467_v45 = vcombine.low %v2768_v6, %v2772_v15 }
 0x34f   :  { %v4406_v53 = vrot.slane %v8098_v11, %v7999_v19  ;;  %v4474_v18 = vrot.slane %v4464_v10, %v7999_v19 }
 0x350   :  { %v2222_v8 = vpop.xlane.xlu1 %2221  ;;  %v4488_v38 = vrot.slane %v4466_v40, %v7999_v19  ;;  %v4495_v1 = vrot.slane %v4467_v45, %v7999_v19 }
 0x351   :  { %v2306_v31 = vadd.f32 %v7954_v32, %v2222_v8 }
 0x352   :  { %v4497_v40 = vcombine.low %v4488_v38, %v4495_v1 }
 0x353   :  { %v2808_v25 = vrot.slane %v2306_v31, %v9396_v43  ;;  %v2812_v35 = vrot.slane %v2306_v31, %v9397_v5  ;;  %v2816_v22 = vrot.slane %v2306_v31, %v7960_v16  ;;  %v2820_v29 = vrot.slane %v2306_v31, %v7963_v41 }
 0x354   :  { %v2824_v26 = vrot.slane %v2306_v31, %v7968_v49  ;;  %v2828_v12 = vrot.slane %v2306_v31, %v7971_v4  ;;  %v2832_v23 = vrot.slane %v2306_v31, %v7974_v39  ;;  %v2836_v54 = vrot.slane %v2306_v31, %v7977_v14 }
 0x355   :  { %v4562_v2 = vcombine.low %v2808_v25, %v2812_v35  ;;  %v4563_v46 = vcombine.low %v2816_v22, %v2820_v29  ;;  %v4511_v1 = vrot.slane %v4497_v40, %v7999_v19 }
 0x356   :  { %v4564_v36 = vcombine.low %v2824_v26, %v2828_v12  ;;  %v4565_v30 = vcombine.low %v2832_v23, %v2836_v54 }
 0x357   :  { %v4572_v45 = vrot.slane %v4562_v2, %v7999_v19  ;;  %v4579_v25 = vrot.slane %v4563_v46, %v7999_v19  ;;  %v8152_v2 = vpop.xlane.xlu0 %2207 }
 0x358   :  { %v2226_v50 = vpop.xlane.xlu1 %2225  ;;  %v4586_v35 = vrot.slane %v4564_v36, %v7999_v19  ;;  %v4593_v22 = vrot.slane %v4565_v30, %v7999_v19 }
 0x359   :  { %v2308_v20 = vadd.f32 %v7954_v32, %v2226_v50  ;;  %v4594_v46 = vcombine.low %v4572_v45, %v4579_v25 }
 0x35a   :  { %v4595_v36 = vcombine.low %v4586_v35, %v4593_v22 }
 0x35b   :  { %v2872_v21 = vrot.slane %v2308_v20, %v9396_v43  ;;  %v2876_v62 = vrot.slane %v2308_v20, %v9397_v5  ;;  %v2880_v28 = vrot.slane %v2308_v20, %v7960_v16  ;;  %v2884_v8 = vrot.slane %v2308_v20, %v7963_v41 }
 0x35c   :  { %v2892_v47 = vrot.slane %v2308_v20, %v7971_v4  ;;  %v2896_v44 = vrot.slane %v2308_v20, %v7974_v39  ;;  %v2900_v24 = vrot.slane %v2308_v20, %v7977_v14  ;;  %v4602_v22 = vrot.slane %v4594_v46, %v7999_v19 }
 0x35d   :  { %v4660_v42 = vcombine.low %v2872_v21, %v2876_v62  ;;  %v4661_v57 = vcombine.low %v2880_v28, %v2884_v8 }
 0x35e   :  { %2275 = vadd.xlane.f32.xlu0 %v2187_v7  ;;  %v8085_v7 = vadd.f32 %v7954_v32, %v8020_v33  ;;  %v4397_v33 = vrot.slane %v4369_v55, %v7999_v19  ;;  %v4481_v55 = vrot.slane %v4465_v37, %v7999_v19  ;;  %v4663_v15 = vcombine.low %v2896_v44, %v2900_v24 }
 0x35f   :  { %v4670_v29 = vrot.slane %v4660_v42, %v7999_v19 }
 0x360   :  { %2277 = vadd.xlane.f32.xlu1 %v2188_v9  ;;  %v4119_v9 = vrot.slane %v4105_v27, %v7999_v19  ;;  %v2230_v3 = vpop.xlane.xlu1 %2229  ;;  %v4399_v27 = vcombine.low %v4390_v59, %v4397_v33  ;;  %v4496_v37 = vcombine.low %v4474_v18, %v4481_v55  ;;  %v4691_v12 = vrot.slane %v4663_v15, %v7999_v19 }
 0x362   :  { %2279 = vadd.xlane.f32.xlu0 %v2189_v52  ;;  %v2888_v52 = vrot.slane %v2308_v20, %v7968_v49  ;;  %v4120_v63 = vcombine.low %v4112_v0, %v4119_v9  ;;  %v4504_v38 = vrot.slane %v4496_v37, %v7999_v19 }
 0x364   :  { %v4662_v6 = vcombine.low %v2888_v52, %v2892_v47  ;;  %v4512_v35 = vcombine.low %v4504_v38, %v4511_v1 }
 0x366   :  { %2283 = vadd.xlane.f32.xlu0 %v2191_v48  ;;  %v2310_v48 = vadd.f32 %v7954_v32, %v2230_v3  ;;  %v4677_v3 = vrot.slane %v4661_v57, %v7999_v19  ;;  %v4684_v26 = vrot.slane %v4662_v6, %v7999_v19 }
 0x368   :  { %v2234_v50 = vpop.xlane.xlu1 %2233  ;;  %v2936_v31 = vrot.slane %v2310_v48, %v9396_v43  ;;  %v2944_v0 = vrot.slane %v2310_v48, %v7960_v16  ;;  %v2948_v9 = vrot.slane %v2310_v48, %v7963_v41  ;;  %v2952_v20 = vrot.slane %v2310_v48, %v7968_v49 }
 0x369   :  { %v2956_v59 = vrot.slane %v2310_v48, %v7971_v4  ;;  %v2960_v33 = vrot.slane %v2310_v48, %v7974_v39  ;;  %v2964_v11 = vrot.slane %v2310_v48, %v7977_v14  ;;  %v2312_v10 = vadd.f32 %v7954_v32, %v2234_v50 }
 0x36a   :  { %2287 = vadd.xlane.f32.xlu0 %v2193_v13  ;;  %v2940_v13 = vrot.slane %v2310_v48, %v9397_v5  ;;  %v4759_v21 = vcombine.low %v2944_v0, %v2948_v9  ;;  %v4692_v30 = vcombine.low %v4670_v29, %v4677_v3  ;;  %v4693_v50 = vcombine.low %v4684_v26, %v4691_v12 }
 0x36b   :  { %v4760_v62 = vcombine.low %v2952_v20, %v2956_v59  ;;  %v4761_v28 = vcombine.low %v2960_v33, %v2964_v11  ;;  %v3000_v8 = vrot.slane %v2312_v10, %v9396_v43  ;;  %v3004_v52 = vrot.slane %v2312_v10, %v9397_v5 }
 0x36c   :  { %v4758_v54 = vcombine.low %v2936_v31, %v2940_v13  ;;  %v3008_v47 = vrot.slane %v2312_v10, %v7960_v16  ;;  %v3012_v44 = vrot.slane %v2312_v10, %v7963_v41  ;;  %v3016_v24 = vrot.slane %v2312_v10, %v7968_v49 }
 0x36d   :  { %v3020_v48 = vrot.slane %v2312_v10, %v7971_v4  ;;  %v4775_v57 = vrot.slane %v4759_v21, %v7999_v19  ;;  %v4782_v6 = vrot.slane %v4760_v62, %v7999_v19  ;;  %v4789_v15 = vrot.slane %v4761_v28, %v7999_v19 }
 0x36e   :  { %v4768_v42 = vrot.slane %v4758_v54, %v7999_v19  ;;  %v4857_v13 = vcombine.low %v3008_v47, %v3012_v44  ;;  %v4609_v29 = vrot.slane %v4595_v36, %v7999_v19  ;;  %v4700_v3 = vrot.slane %v4692_v30, %v7999_v19 }
 0x36f   :  { %v4858_v0 = vcombine.low %v3016_v24, %v3020_v48  ;;  %v4707_v26 = vrot.slane %v4693_v50, %v7999_v19 }
 0x370   :  { %v2238_v23 = vpop.xlane.xlu1 %2237  ;;  %v4790_v12 = vcombine.low %v4768_v42, %v4775_v57  ;;  %v4873_v21 = vrot.slane %v4857_v13, %v7999_v19  ;;  %v4610_v50 = vcombine.low %v4602_v22, %v4609_v29  ;;  %v2520_v57 = vrot.slane %v8081_v34, %v9396_v43 }
 0x371   :  { %6284 = vperm.xlu1 %7150, %v4071_v61   ;;  %v4413_v61 = vrot.slane %v4399_v27, %v7999_v19  ;;  %v3028_v27 = vrot.slane %v2312_v10, %v7977_v14  ;;  %v2314_v18 = vadd.f32 %v7954_v32, %v2238_v23  ;;  %v4791_v23 = vcombine.low %v4782_v6, %v4789_v15 }
 0x372   :  { %v4880_v62 = vrot.slane %v4858_v0, %v7999_v19  ;;  %v4708_v42 = vcombine.low %v4700_v3, %v4707_v26  ;;  %v4798_v15 = vrot.slane %v4790_v12, %v7999_v19 }
 0x373   :  { %v4414_v55 = vcombine.low %v4406_v53, %v4413_v61  ;;  %v4856_v53 = vcombine.low %v3000_v8, %v3004_v52  ;;  %v3064_v20 = vrot.slane %v2314_v18, %v9396_v43  ;;  %v3068_v59 = vrot.slane %v2314_v18, %v9397_v5 }
 0x374   :  { %v3072_v33 = vrot.slane %v2314_v18, %v7960_v16  ;;  %v3076_v11 = vrot.slane %v2314_v18, %v7963_v41  ;;  %v3080_v61 = vrot.slane %v2314_v18, %v7968_v49  ;;  %v3084_v37 = vrot.slane %v2314_v18, %v7971_v4 }
 0x375   :  { %6287 = vperm.xlu1 %7150, %v4120_v63   ;;  %v3024_v63 = vrot.slane %v2312_v10, %v7974_v39  ;;  %v8162_v10 = vpop.xlane.xlu0 %2211  ;;  %v3088_v40 = vrot.slane %v2314_v18, %v7974_v39  ;;  %v3092_v45 = vrot.slane %v2314_v18, %v7977_v14  ;;  %v4866_v54 = vrot.slane %v4856_v53, %v7999_v19 }
 0x376   :  { %v4954_v47 = vcombine.low %v3064_v20, %v3068_v59  ;;  %v4955_v44 = vcombine.low %v3072_v33, %v3076_v11  ;;  %v4956_v24 = vcombine.low %v3080_v61, %v3084_v37 }
 0x377   :  { %v4859_v9 = vcombine.low %v3024_v63, %v3028_v27  ;;  %v4957_v48 = vcombine.low %v3088_v40, %v3092_v45  ;;  %v4888_v53 = vcombine.low %v4866_v54, %v4873_v21  ;;  %v2524_v54 = vrot.slane %v8081_v34, %v9397_v5 }
 0x378   :  { %v2242_v31 = vpop.xlane.xlu1 %2241  ;;  %v4964_v0 = vrot.slane %v4954_v47, %v7999_v19  ;;  %v4978_v20 = vrot.slane %v4956_v24, %v7999_v19  ;;  %v2528_v21 = vrot.slane %v8081_v34, %v7960_v16 }
 0x379   :  { %v2316_v25 = vadd.f32 %v7954_v32, %v2242_v31  ;;  %v4887_v28 = vrot.slane %v4859_v9, %v7999_v19  ;;  %v8177_v8 = vpop.xlane.xlu0 %2215  ;;  %v4805_v31 = vrot.slane %v4791_v23, %v7999_v19  ;;  %v4971_v9 = vrot.slane %v4955_v44, %v7999_v19 }
 0x37a   :  { %v4985_v59 = vrot.slane %v4957_v48, %v7999_v19 }
 0x37b   :  { %v3128_v63 = vrot.slane %v2316_v25, %v9396_v43  ;;  %v3132_v27 = vrot.slane %v2316_v25, %v9397_v5  ;;  %v3136_v18 = vrot.slane %v2316_v25, %v7960_v16  ;;  %v3144_v38 = vrot.slane %v2316_v25, %v7968_v49 }
 0x37c   :  { %v3148_v1 = vrot.slane %v2316_v25, %v7971_v4  ;;  %v3152_v46 = vrot.slane %v2316_v25, %v7974_v39  ;;  %v3156_v36 = vrot.slane %v2316_v25, %v7977_v14  ;;  %v4889_v13 = vcombine.low %v4880_v62, %v4887_v28 }
 0x37d   :  { %v8190_v6 = vpop.xlane.xlu0 %2219  ;;  %v5052_v33 = vcombine.low %v3128_v63, %v3132_v27  ;;  %v4806_v23 = vcombine.low %v4798_v15, %v4805_v31  ;;  %v2532_v62 = vrot.slane %v8081_v34, %v7963_v41  ;;  %v4896_v28 = vrot.slane %v4888_v53, %v7999_v19 }
 0x37e   :  { %v5054_v61 = vcombine.low %v3144_v38, %v3148_v1  ;;  %v5055_v37 = vcombine.low %v3152_v46, %v3156_v36  ;;  %v4986_v47 = vcombine.low %v4964_v0, %v4971_v9  ;;  %v4987_v44 = vcombine.low %v4978_v20, %v4985_v59 }
 0x37f   :  { %v5062_v24 = vrot.slane %v5052_v33, %v7999_v19  ;;  %v2536_v36 = vrot.slane %v8081_v34, %v7968_v49  ;;  %v2135_v15 = vmax.f32 %v8089_v58, 0.0  ;;  %v4121_v53 = vcombine.low %v2520_v57, %v2524_v54 }
 0x380   :  { %6305 = vperm.xlu0 %7149, %v4414_v55   ;;  %v2246_v52 = vpop.xlane.xlu1 %2245  ;;  %v3140_v55 = vrot.slane %v2316_v25, %v7963_v41  ;;  %v5076_v63 = vrot.slane %v5054_v61, %v7999_v19  ;;  %v5083_v27 = vrot.slane %v5055_v37, %v7999_v19  ;;  %v5001_v0 = vrot.slane %v4987_v44, %v7999_v19  ;;  %v8264_v44 = vld [vmem:[%s9351_s5] ss:$0 sm:$0xff] }
 0x381   :  { %v2318_v30 = vadd.f32 %v7954_v32, %v2246_v52  ;;  %v8202_v22 = vpop.xlane.xlu0 %2223  ;;  %v4903_v52 = vrot.slane %v4889_v13, %v7999_v19  ;;  %v4994_v13 = vrot.slane %v4986_v47, %v7999_v19  ;;  %v4122_v58 = vcombine.low %v2528_v21, %v2532_v62 }
 0x382   :  { %v5053_v11 = vcombine.low %v3136_v18, %v3140_v55  ;;  %v5085_v20 = vcombine.low %v5076_v63, %v5083_v27  ;;  %v2552_v57 = vrot.slane %v8085_v7, %v9396_v43  ;;  %v2580_v54 = vrot.slane %v8085_v7, %v7977_v14 }
 0x383   :  { %v3192_v40 = vrot.slane %v2318_v30, %v9396_v43  ;;  %v3196_v45 = vrot.slane %v2318_v30, %v9397_v5  ;;  %v3200_v25 = vrot.slane %v2318_v30, %v7960_v16  ;;  %v3208_v29 = vrot.slane %v2318_v30, %v7968_v49 }
 0x384   :  { %6311 = vperm.xlu0 %7149, %v4512_v35   ;;  %v3204_v35 = vrot.slane %v2318_v30, %v7963_v41  ;;  %v3212_v3 = vrot.slane %v2318_v30, %v7971_v4  ;;  %v3216_v26 = vrot.slane %v2318_v30, %v7974_v39  ;;  %v3220_v12 = vrot.slane %v2318_v30, %v7977_v14 }
 0x385   :  { %v5069_v48 = vrot.slane %v5053_v11, %v7999_v19  ;;  %v8220_v18 = vpop.xlane.xlu0 %2227  ;;  %v5150_v55 = vcombine.low %v3192_v40, %v3196_v45  ;;  %v2540_v30 = vrot.slane %v8081_v34, %v7971_v4  ;;  %v4904_v31 = vcombine.low %v4896_v28, %v4903_v52 }
 0x386   :  { %v5151_v38 = vcombine.low %v3200_v25, %v3204_v35  ;;  %v5152_v1 = vcombine.low %v3208_v29, %v3212_v3  ;;  %v5153_v46 = vcombine.low %v3216_v26, %v3220_v12  ;;  %v2556_v25 = vrot.slane %v8085_v7, %v9397_v5 }
 0x387   :  { %v5084_v9 = vcombine.low %v5062_v24, %v5069_v48  ;;  %v5160_v33 = vrot.slane %v5150_v55, %v7999_v19  ;;  %v4123_v37 = vcombine.low %v2536_v36, %v2540_v30  ;;  %v2560_v35 = vrot.slane %v8085_v7, %v7960_v16 }
 0x388   :  { %6317 = vperm.xlu0 %7149, %v4610_v50   ;;  %v2544_v50 = vrot.slane %v8081_v34, %v7974_v39  ;;  %v5167_v11 = vrot.slane %v5151_v38, %v7999_v19  ;;  %v5174_v61 = vrot.slane %v5152_v1, %v7999_v19  ;;  %v8241_v45 = vpop.xlane.xlu1 %2249  ;;  %v2564_v29 = vrot.slane %v8085_v7, %v7963_v41 }
 0x389   :  { %v8233_v59 = vpop.xlane.xlu0 %2231  ;;  %v2568_v3 = vrot.slane %v8085_v7, %v7968_v49  ;;  %v5002_v26 = vcombine.low %v4994_v13, %v5001_v0  ;;  %v2572_v12 = vrot.slane %v8085_v7, %v7971_v4  ;;  %v5092_v62 = vrot.slane %v5084_v9, %v7999_v19 }
 0x38a   :  { %v5099_v28 = vrot.slane %v5085_v20, %v7999_v19  ;;  %v5182_v52 = vcombine.low %v5160_v33, %v5167_v11  ;;  %v2190_v24 = vmul.f32 %v8264_v44, %v2135_v15  ;;  %v4138_v63 = vrot.slane %v4122_v58, %v7999_v19 }
 0x38b   :  { %v4145_v27 = vrot.slane %v4123_v37, %v7999_v19  ;;  %v4170_v55 = vcombine.low %v2552_v57, %v2556_v25  ;;  %v4171_v38 = vcombine.low %v2560_v35, %v2564_v29  ;;  %v4172_v1 = vcombine.low %v2568_v3, %v2572_v12 }
 0x38c   :  { %6323 = vperm.xlu0 %7149, %v4708_v42   ;;  %v2548_v42 = vrot.slane %v8081_v34, %v7977_v14  ;;  %v5181_v34 = vrot.slane %v5153_v46, %v7999_v19  ;;  %v5100_v30 = vcombine.low %v5092_v62, %v5099_v28  ;;  %v8288_v57 = vadd.f32 %v7954_v32, %v8152_v2 }
 0x38d   :  { %v8257_v21 = vpop.xlane.xlu0 %2235  ;;  %v4187_v13 = vrot.slane %v4171_v38, %v7999_v19  ;;  %v4194_v0 = vrot.slane %v4172_v1, %v7999_v19 }
 0x38e   :  { %v4124_v40 = vcombine.low %v2544_v50, %v2548_v42  ;;  %v5183_v47 = vcombine.low %v5174_v61, %v5181_v34  ;;  %v5190_v50 = vrot.slane %v5182_v52, %v7999_v19 }
 0x390   :  { %6329 = vperm.xlu0 %7149, %v4806_v23   ;;  %v2576_v23 = vrot.slane %v8085_v7, %v7974_v39  ;;  %v8267_v48 = vpop.xlane.xlu1 %2253  ;;  %v4131_v7 = vrot.slane %v4121_v53, %v7999_v19  ;;  %v5197_v42 = vrot.slane %v5183_v47, %v7999_v19  ;;  %v4152_v15 = vrot.slane %v4124_v40, %v7999_v19 }
 0x391   :  { %v8272_v36 = vpop.xlane.xlu0 %2239  ;;  %v4180_v53 = vrot.slane %v4170_v55, %v7999_v19 }
 0x392   :  { %v4173_v46 = vcombine.low %v2576_v23, %v2580_v54  ;;  %v5198_v33 = vcombine.low %v5190_v50, %v5197_v42  ;;  %v4153_v11 = vcombine.low %v4131_v7, %v4138_v63  ;;  %v4154_v61 = vcombine.low %v4145_v27, %v4152_v15 }
 0x393   :  { %v4202_v37 = vcombine.low %v4180_v53, %v4187_v13  ;;  %v9399_v15 = vlaneseq }
 0x394   :  { %6335 = vperm.xlu0 %7149, %v4904_v31   ;;  %v4201_v9 = vrot.slane %v4173_v46, %v7999_v19  ;;  %v4161_v35 = vrot.slane %v4153_v11, %v7999_v19  ;;  %v4168_v29 = vrot.slane %v4154_v61, %v7999_v19 }
 0x395   :  { %v8283_v20 = vpop.xlane.xlu0 %2243  ;;  %v4210_v52 = vrot.slane %v4202_v37, %v7999_v19  ;;  %v8311_v53 = vand.u32 127, %v9399_v15  ;;  %v2596_v37 = vrot.slane %v8288_v57, %v7963_v41 }
 0x396   :  { %v4203_v40 = vcombine.low %v4194_v0, %v4201_v9 }
 0x397   :  { %9400 = vst [vmem:[#allocation17_spill] sm:$0xff] %v8311_v53 }
 0x398   :  { %6341 = vperm.xlu0 %7149, %v5002_v26   ;;  %v8277_v31 = vpop.xlane.xlu1 %2257  ;;  %v4217_v47 = vrot.slane %v4203_v40, %v7999_v19 }
 0x399   :  { %2281 = vadd.xlane.f32.xlu1 %v2190_v24  ;;  %9398 = vst [vmem:[#allocation16_spill] sm:$0xff] %v8277_v31  ;;  %v8290_v25 = vpop.xlane.xlu0 %2247 }
 0x39a   :  { %v4218_v0 = vcombine.low %v4210_v52, %v4217_v47  ;;  %v2600_v52 = vrot.slane %v8288_v57, %v7968_v49 }
 0x39c   :  { %6347 = vperm.xlu0 %7149, %v5100_v30   ;;  %v4169_v30 = vcombine.low %v4161_v35, %v4168_v29 }
 0x39d   :  { %v8304_v63 = vpop.xlane.xlu0 %2251 }
 0x3a0   :  { %v2262_v34 = vpop.xlane.xlu1 %2261  ;;  %6353 = vperm.xlu0 %7149, %v5198_v33   ;;  %v2584_v33 = vrot.slane %v8288_v57, %v9396_v43 }
 0x3a1   :  { %v2326_v58 = vadd.f32 %v7954_v32, %v2262_v34  ;;  %v8316_v11 = vpop.xlane.xlu0 %2255  ;;  %v2588_v34 = vrot.slane %v8288_v57, %v9397_v5 }
 0x3a3   :  { %v3448_v3 = vrot.slane %v2326_v58, %v9396_v43  ;;  %v3452_v26 = vrot.slane %v2326_v58, %v9397_v5  ;;  %v3456_v12 = vrot.slane %v2326_v58, %v7960_v16  ;;  %v3460_v23 = vrot.slane %v2326_v58, %v7963_v41 }
 0x3a4   :  { %v3464_v54 = vrot.slane %v2326_v58, %v7968_v49  ;;  %v3468_v62 = vrot.slane %v2326_v58, %v7971_v4  ;;  %v3472_v2 = vrot.slane %v2326_v58, %v7974_v39  ;;  %v3476_v28 = vrot.slane %v2326_v58, %v7977_v14 }
 0x3a5   :  { %v5542_v24 = vcombine.low %v3448_v3, %v3452_v26  ;;  %v5543_v7 = vcombine.low %v3456_v12, %v3460_v23  ;;  %v2592_v58 = vrot.slane %v8288_v57, %v7960_v16  ;;  %v8336_v47 = vpop.xlane.xlu0 %2259 }
 0x3a6   :  { %v5544_v27 = vcombine.low %v3464_v54, %v3468_v62  ;;  %v5545_v55 = vcombine.low %v3472_v2, %v3476_v28 }
 0x3a7   :  { %v5552_v38 = vrot.slane %v5542_v24, %v7999_v19  ;;  %v5559_v1 = vrot.slane %v5543_v7, %v7999_v19 }
 0x3a8   :  { %v2266_v46 = vpop.xlane.xlu1 %2265  ;;  %v5566_v50 = vrot.slane %v5544_v27, %v7999_v19  ;;  %v5573_v42 = vrot.slane %v5545_v55, %v7999_v19  ;;  %v2604_v55 = vrot.slane %v8288_v57, %v7971_v4 }
 0x3a9   :  { %v2328_v13 = vadd.f32 %v7954_v32, %v2266_v46  ;;  %v5574_v9 = vcombine.low %v5552_v38, %v5559_v1  ;;  %v8342_v38 = vadd.f32 %v7954_v32, %v8029_v60 }
 0x3aa   :  { %6290 = vperm.xlu1 %7150, %v4169_v30   ;;  %v5575_v61 = vcombine.low %v5566_v50, %v5573_v42 }
 0x3ab   :  { %v5582_v40 = vrot.slane %v5574_v9, %v7999_v19  ;;  %v3512_v35 = vrot.slane %v2328_v13, %v9396_v43  ;;  %v3516_v29 = vrot.slane %v2328_v13, %v9397_v5  ;;  %v3520_v3 = vrot.slane %v2328_v13, %v7960_v16 }
 0x3ac   :  { %v5589_v26 = vrot.slane %v5575_v61, %v7999_v19  ;;  %v3524_v12 = vrot.slane %v2328_v13, %v7963_v41  ;;  %v3528_v23 = vrot.slane %v2328_v13, %v7968_v49  ;;  %v3532_v54 = vrot.slane %v2328_v13, %v7971_v4 }
 0x3ad   :  { %v3536_v62 = vrot.slane %v2328_v13, %v7974_v39  ;;  %v3540_v2 = vrot.slane %v2328_v13, %v7977_v14  ;;  %v5640_v28 = vcombine.low %v3512_v35, %v3516_v29  ;;  %v6427_v13 = vadd.s32 4294967288, %v8311_v53  ;;  %v8358_v35 = vpop.xlane.xlu0 %2263 }
 0x3ae   :  { %6293 = vperm.xlu1 %7150, %v4218_v0   ;;  %v5590_v24 = vcombine.low %v5582_v40, %v5589_v26  ;;  %v5641_v7 = vcombine.low %v3520_v3, %v3524_v12  ;;  %v5642_v27 = vcombine.low %v3528_v23, %v3532_v54  ;;  %v8350_v0 = vsub.s32 %v8311_v53, %v9395_v56 }
 0x3af   :  { %v5643_v1 = vcombine.low %v3536_v62, %v3540_v2  ;;  %v5650_v46 = vrot.slane %v5640_v28, %v7999_v19  ;;  %v2608_v61 = vrot.slane %v8288_v57, %v7974_v39  ;;  %v2612_v40 = vrot.slane %v8288_v57, %v7977_v14  ;;  %9402 = vst [vmem:[#allocation19_spill] sm:$0xff] %v8358_v35 }
 0x3b0   :  { %6377 = vperm.xlu0 %7149, %v5590_v24   ;;  %v2270_v30 = vpop.xlane.xlu1 %2269  ;;  %v5657_v50 = vrot.slane %v5641_v7, %v7999_v19  ;;  %v5664_v42 = vrot.slane %v5642_v27, %v7999_v19  ;;  %9401 = vst [vmem:[#allocation18_spill] sm:$0xff] %v8350_v0  ;;  %v8360_v3 = vcombine.low %v2584_v33, %v2588_v34 }
 0x3b1   :  { %v2330_v9 = vadd.f32 %v7954_v32, %v2270_v30  ;;  %v5671_v60 = vrot.slane %v5643_v1, %v7999_v19  ;;  %v8362_v26 = vcombine.low %v2592_v58, %v2596_v37  ;;  %v8364_v12 = vcombine.low %v2600_v52, %v2604_v55  ;;  %v8376_v7 = vpop.xlane.xlu0 %2267 }
 0x3b2   :  { %v5672_v29 = vcombine.low %v5650_v46, %v5657_v50  ;;  %9403 = vst [vmem:[#allocation20_spill] sm:$0xff] %v8376_v7  ;;  %v4222_v1 = vcombine.low %v2608_v61, %v2612_v40  ;;  %v8379_v30 = vsub.s32 %v6427_v13, %v9395_v56 }
 0x3b3   :  { %v5673_v23 = vcombine.low %v5664_v42, %v5671_v60  ;;  %v3576_v54 = vrot.slane %v2330_v9, %v9396_v43  ;;  %v3580_v62 = vrot.slane %v2330_v9, %v9397_v5  ;;  %v3584_v2 = vrot.slane %v2330_v9, %v7960_v16 }
 0x3b4   :  { %v5680_v28 = vrot.slane %v5672_v29, %v7999_v19  ;;  %v3588_v57 = vrot.slane %v2330_v9, %v7963_v41  ;;  %v3592_v24 = vrot.slane %v2330_v9, %v7968_v49  ;;  %v3596_v33 = vrot.slane %v2330_v9, %v7971_v4  ;;  %9404 = vst [vmem:[#allocation14_spill] sm:$0xff] %v8379_v30 }
 0x3b5   :  { %v5687_v34 = vrot.slane %v5673_v23, %v7999_v19  ;;  %v3600_v58 = vrot.slane %v2330_v9, %v7974_v39  ;;  %v3604_v37 = vrot.slane %v2330_v9, %v7977_v14  ;;  %v5738_v52 = vcombine.low %v3576_v54, %v3580_v62 }
 0x3b6   :  { %v5739_v27 = vcombine.low %v3584_v2, %v3588_v57  ;;  %v5740_v55 = vcombine.low %v3592_v24, %v3596_v33  ;;  %v4229_v9 = vrot.slane %v8360_v3, %v7999_v19  ;;  %v2616_v54 = vrot.slane %v8342_v38, %v9396_v43  ;;  %v8394_v2 = vpop.xlane.xlu0 %2271 }
 0x3b7   :  { %v5688_v46 = vcombine.low %v5680_v28, %v5687_v34  ;;  %v5741_v50 = vcombine.low %v3600_v58, %v3604_v37  ;;  %v5748_v42 = vrot.slane %v5738_v52, %v7999_v19  ;;  %v4236_v40 = vrot.slane %v8362_v26, %v7999_v19  ;;  %9405 = vst [vmem:[#allocation15_spill] sm:$0xff] %v8394_v2 }
 0x3b8   :  { %v2274_v60 = vpop.xlane.xlu1 %2273  ;;  %v5755_v29 = vrot.slane %v5739_v27, %v7999_v19  ;;  %v5762_v23 = vrot.slane %v5740_v55, %v7999_v19  ;;  %v4243_v62 = vrot.slane %v8364_v12, %v7999_v19  ;;  %v4250_v57 = vrot.slane %v4222_v1, %v7999_v19 }
 0x3b9   :  { %6383 = vperm.xlu0 %7149, %v5688_v46   ;;  %v2332_v61 = vadd.f32 %v7954_v32, %v2274_v60  ;;  %v5769_v13 = vrot.slane %v5741_v50, %v7999_v19  ;;  %v2620_v3 = vrot.slane %v8342_v38, %v9397_v5  ;;  %v2624_v24 = vrot.slane %v8342_v38, %v7960_v16 }
 0x3ba   :  { %v5770_v28 = vcombine.low %v5748_v42, %v5755_v29  ;;  %v2628_v42 = vrot.slane %v8342_v38, %v7963_v41 }
 0x3bb   :  { %v5771_v33 = vcombine.low %v5762_v23, %v5769_v13  ;;  %v3640_v34 = vrot.slane %v2332_v61, %v9396_v43  ;;  %v3644_v58 = vrot.slane %v2332_v61, %v9397_v5  ;;  %v3648_v26 = vrot.slane %v2332_v61, %v7960_v16 }
 0x3bc   :  { %v6282_v37 = vpop.permute.xlu1 %6281  ;;  %v5778_v12 = vrot.slane %v5770_v28, %v7999_v19  ;;  %v3652_v52 = vrot.slane %v2332_v61, %v7963_v41  ;;  %v3656_v27 = vrot.slane %v2332_v61, %v7968_v49  ;;  %v3660_v55 = vrot.slane %v2332_v61, %v7971_v4 }
 0x3bd   :  { %v5785_v1 = vrot.slane %v5771_v33, %v7999_v19  ;;  %v3664_v46 = vrot.slane %v2332_v61, %v7974_v39  ;;  %v3668_v50 = vrot.slane %v2332_v61, %v7977_v14  ;;  %v5836_v29 = vcombine.low %v3640_v34, %v3644_v58 }
 0x3be   :  { %v6279_v60 = vpop.permute.xlu0 %6278  ;;  %v5837_v23 = vcombine.low %v3648_v26, %v3652_v52  ;;  %v5838_v13 = vcombine.low %v3656_v27, %v3660_v55  ;;  %v2632_v28 = vrot.slane %v8342_v38, %v7968_v49  ;;  %v6431_v15 = vrot.slane %v6282_v37, %v8379_v30 }
 0x3bf   :  { %v6426_v31 = vrot.slane %v6279_v60, %v8350_v0  ;;  %v5786_v2 = vcombine.low %v5778_v12, %v5785_v1  ;;  %v5839_v33 = vcombine.low %v3664_v46, %v3668_v50  ;;  %v5846_v7 = vrot.slane %v5836_v29, %v7999_v19  ;;  %v7408_v46 = vld [vmem:[%s9350_s4] ss:$0 sm:$0xff]  ;;  %s7514_s4 = smov [#allocation9]  }
 0x3c0   :  { %v5853_v61 = vrot.slane %v5837_v23, %v7999_v19  ;;  %v5860_v35 = vrot.slane %v5838_v13, %v7999_v19  ;;  %v2636_v34 = vrot.slane %v8342_v38, %v7971_v4  ;;  %v2640_v37 = vrot.slane %v8342_v38, %v7974_v39  ;;  %s6725_s25 = sshll.u32 %s7514_s4, 4  ;;  %s6726_s25 = int_to_ptr.vmem [resolvable:$true] %s6725_s25 }
 0x3c1   :  { %v8423_v58 = vsel %vm6432_vm0, %v6431_v15, %v6426_v31  ;;  %6389 = vperm.xlu0 %7149, %v5786_v2   ;;  %v5867_v26 = vrot.slane %v5839_v33, %v7999_v19  ;;  %v2644_v12 = vrot.slane %v8342_v38, %v7977_v14  ;;  %v4268_v27 = vcombine.low %v2616_v54, %v2620_v3  ;;  %s7475_s26 = scalar_lea.vmem %s6726_s25, 48  ;;  %s7479_s27 = scalar_lea.vmem %s6726_s25, 64 }
 0x3c2   :  { %9406 = vst [vmem:[#allocation21_spill] sm:$0xff] %v8423_v58  ;;  %v5868_v52 = vcombine.low %v5846_v7, %v5853_v61  ;;  %v4269_v55 = vcombine.low %v2624_v24, %v2628_v42  ;;  %v2081_v31 = vadd.f32 %v7408_v46, %v8015_v51  ;;  %v4251_v2 = vcombine.low %v4229_v9, %v4236_v40  ;;  %p7476_p10 = scmp.ne.s32.totalorder %s6726_s25, %s7475_s26  ;;  %p7480_p11 = scmp.lt.s32.totalorder %s6726_s25, %s6726_s25 }
 0x3c3   :  { %v5869_v1 = vcombine.low %v5860_v35, %v5867_v26  ;;  %v4252_v60 = vcombine.low %v4243_v62, %v4250_v57  ;;  %v4270_v29 = vcombine.low %v2632_v28, %v2636_v34  ;;  %v4271_v23 = vcombine.low %v2640_v37, %v2644_v12  ;;  %p7481_p12 = scmp.lt.s32.totalorder %s7479_s27, %s7475_s26 }
 0x3c4   :  { %v5876_v15 = vrot.slane %v5868_v52, %v7999_v19  ;;  %v4278_v38 = vrot.slane %v4268_v27, %v7999_v19  ;;  %v4285_v7 = vrot.slane %v4269_v55, %v7999_v19  ;;  %v8439_v35 = vadd.f32 %v7408_v46, %v8017_v17 }
 0x3c5   :  { %v5883_v50 = vrot.slane %v5869_v1, %v7999_v19  ;;  %v2137_v3 = vmax.f32 %v2081_v31, 0.0  ;;  %v4259_v51 = vrot.slane %v4251_v2, %v7999_v19  ;;  %v4266_v24 = vrot.slane %v4252_v60, %v7999_v19  ;;  %p7482_p13 = por %p7481_p12, %p7480_p11 }
 0x3c6   :  { %v4292_v9 = vrot.slane %v4270_v29, %v7999_v19  ;;  %v4299_v40 = vrot.slane %v4271_v23, %v7999_v19  ;;  %v2301_v62 = vadd.f32 %v7954_v32, %v8162_v10  ;;  %v2303_v57 = vadd.f32 %v7954_v32, %v8177_v8 }
 0x3c7   :  { %v5884_v54 = vcombine.low %v5876_v15, %v5883_v50  ;;  %v8449_v42 = vcombine.low %v4278_v38, %v4285_v7  ;;  %v2305_v17 = vadd.f32 %v7954_v32, %v8190_v6  ;;  %v8455_v13 = vadd.f32 %v7954_v32, %v8202_v22  ;;  %p7483_p0 = pnand %p7482_p13, %p7476_p10 }
 0x3c8   :  { %v8460_v33 = vadd.f32 %v7954_v32, %v8220_v18  ;;  %v8464_v10 = vadd.f32 %v7954_v32, %v8233_v59  ;;  %v8468_v8 = vadd.f32 %v7954_v32, %v8257_v21  ;;  %v8472_v6 = vadd.f32 %v7954_v32, %v8272_v36 }
 0x3c9   :  { %6395 = vperm.xlu0 %7149, %v5884_v54   ;;  %v2192_v22 = vmul.f32 %v8264_v44, %v2137_v3  ;;  %v8477_v61 = vadd.f32 %v7954_v32, %v8283_v20  ;;  %v8479_v18 = vcombine.low %v4259_v51, %v4266_v24  ;;  %v8481_v34 = vcombine.low %v4292_v9, %v4299_v40 }
 0x3ca   :  { %9407 = vst [vmem:[#allocation22_spill] sm:$0xff] %v8468_v8  ;;  %9408 = vst [vmem:[#allocation23_spill] sm:$0xff] %v8472_v6  ;;  %v6434_v59 = vadd.s32 4294967280, %v8311_v53  ;;  %v8486_v21 = vadd.f32 %v7954_v32, %v8290_v25  ;;  %v2648_v26 = vrot.slane %v2301_v62, %v9396_v43  ;;  %v2652_v37 = vrot.slane %v2301_v62, %v9397_v5 }
 0x3cb   :  { %9409 = vst [vmem:[#allocation24_spill] sm:$0xff] %v8477_v61  ;;  %v2656_v20 = vrot.slane %v2301_v62, %v7960_v16  ;;  %v2660_v12 = vrot.slane %v2301_v62, %v7963_v41  ;;  %v2664_v52 = vrot.slane %v2301_v62, %v7968_v49  ;;  %v2668_v27 = vrot.slane %v2301_v62, %v7971_v4 }
 0x3cc   :  { %9410 = vst [vmem:[#allocation25_spill] sm:$0xff] %v8486_v21  ;;  %v2672_v55 = vrot.slane %v2301_v62, %v7974_v39  ;;  %v2676_v25 = vrot.slane %v2301_v62, %v7977_v14  ;;  %v2712_v1 = vrot.slane %v2303_v57, %v9396_v43  ;;  %v2716_v46 = vrot.slane %v2303_v57, %v9397_v5 }
 0x3cd   :  { %v2720_v31 = vrot.slane %v2303_v57, %v7960_v16  ;;  %v2724_v15 = vrot.slane %v2303_v57, %v7963_v41  ;;  %v2728_v2 = vrot.slane %v2303_v57, %v7968_v49  ;;  %v2732_v50 = vrot.slane %v2303_v57, %v7971_v4 }
 0x3ce   :  { %v2736_v60 = vrot.slane %v2303_v57, %v7974_v39  ;;  %v2740_v29 = vrot.slane %v2303_v57, %v7977_v14  ;;  %v2776_v23 = vrot.slane %v2305_v17, %v9396_v43  ;;  %v2780_v38 = vrot.slane %v2305_v17, %v9397_v5 }
 0x3cf   :  { %v2784_v7 = vrot.slane %v2305_v17, %v7960_v16  ;;  %v2788_v54 = vrot.slane %v2305_v17, %v7963_v41  ;;  %v2792_v3 = vrot.slane %v2305_v17, %v7968_v49  ;;  %v2796_v51 = vrot.slane %v2305_v17, %v7971_v4 }
 0x3d0   :  { %v8515_v9 = vsub.s32 %v6434_v59, %v9395_v56  ;;  %v2800_v40 = vrot.slane %v2305_v17, %v7974_v39  ;;  %v2804_v62 = vrot.slane %v2305_v17, %v7977_v14  ;;  %v4317_v57 = vcombine.low %v2648_v26, %v2652_v37 }
 0x3d1   :  { %v4319_v28 = vcombine.low %v2664_v52, %v2668_v27  ;;  %v4320_v36 = vcombine.low %v2672_v55, %v2676_v25  ;;  %v4415_v30 = vcombine.low %v2712_v1, %v2716_v46  ;;  %v4416_v0 = vcombine.low %v2720_v31, %v2724_v15 }
 0x3d2   :  { %2285 = vadd.xlane.f32.xlu1 %v2192_v22  ;;  %9411 = vst [vmem:[#allocation26_spill] sm:$0xff] %v8515_v9  ;;  %v4318_v22 = vcombine.low %v2656_v20, %v2660_v12  ;;  %v4417_v21 = vcombine.low %v2728_v2, %v2732_v50  ;;  %v4418_v61 = vcombine.low %v2736_v60, %v2740_v29 }
 0x3d3   :  { %v4513_v6 = vcombine.low %v2776_v23, %v2780_v38  ;;  %v4514_v8 = vcombine.low %v2784_v7, %v2788_v54  ;;  %v4515_v58 = vcombine.low %v2792_v3, %v2796_v51  ;;  %v2840_v24 = vrot.slane %v8455_v13, %v9396_v43 }
 0x3d4   :  { %v4516_v59 = vcombine.low %v2800_v40, %v2804_v62  ;;  %v2844_v9 = vrot.slane %v8455_v13, %v9397_v5  ;;  %v2848_v17 = vrot.slane %v8455_v13, %v7960_v16  ;;  %v2852_v26 = vrot.slane %v8455_v13, %v7963_v41 }
 0x3d5   :  { %v2856_v37 = vrot.slane %v8455_v13, %v7968_v49  ;;  %v2860_v20 = vrot.slane %v8455_v13, %v7971_v4  ;;  %v2864_v12 = vrot.slane %v8455_v13, %v7974_v39  ;;  %v2868_v52 = vrot.slane %v8455_v13, %v7977_v14 }
 0x3d6   :  { %v4327_v27 = vrot.slane %v4317_v57, %v7999_v19  ;;  %v4334_v55 = vrot.slane %v4318_v22, %v7999_v19  ;;  %v4341_v25 = vrot.slane %v4319_v28, %v7999_v19  ;;  %v4348_v1 = vrot.slane %v4320_v36, %v7999_v19 }
 0x3d7   :  { %v4425_v46 = vrot.slane %v4415_v30, %v7999_v19  ;;  %v4432_v31 = vrot.slane %v4416_v0, %v7999_v19  ;;  %v4439_v15 = vrot.slane %v4417_v21, %v7999_v19  ;;  %v4446_v2 = vrot.slane %v4418_v61, %v7999_v19 }
 0x3d8   :  { %v4523_v50 = vrot.slane %v4513_v6, %v7999_v19  ;;  %v4530_v13 = vrot.slane %v4514_v8, %v7999_v19  ;;  %v4537_v60 = vrot.slane %v4515_v58, %v7999_v19  ;;  %v4544_v29 = vrot.slane %v4516_v59, %v7999_v19 }
 0x3d9   :  { %v4611_v23 = vcombine.low %v2840_v24, %v2844_v9  ;;  %v4612_v28 = vcombine.low %v2848_v17, %v2852_v26  ;;  %v4613_v38 = vcombine.low %v2856_v37, %v2860_v20  ;;  %v4614_v36 = vcombine.low %v2864_v12, %v2868_v52 }
 0x3da   :  { %v2904_v30 = vrot.slane %v8460_v33, %v9396_v43  ;;  %v2908_v0 = vrot.slane %v8460_v33, %v9397_v5  ;;  %v2912_v61 = vrot.slane %v8460_v33, %v7960_v16  ;;  %v2916_v8 = vrot.slane %v8460_v33, %v7963_v41 }
 0x3db   :  { %v2920_v58 = vrot.slane %v8460_v33, %v7968_v49  ;;  %v2924_v6 = vrot.slane %v8460_v33, %v7971_v4  ;;  %v2928_v21 = vrot.slane %v8460_v33, %v7974_v39  ;;  %v2932_v7 = vrot.slane %v8460_v33, %v7977_v14 }
 0x3dc   :  { %v8565_v54 = vadd.f32 %v7954_v32, %v8241_v45  ;;  %v6441_v3 = vadd.s32 4294967272, %v8311_v53  ;;  %v4349_v51 = vcombine.low %v4327_v27, %v4334_v55  ;;  %v4350_v24 = vcombine.low %v4341_v25, %v4348_v1 }
 0x3dd   :  { %v4447_v9 = vcombine.low %v4425_v46, %v4432_v31  ;;  %v4448_v40 = vcombine.low %v4439_v15, %v4446_v2  ;;  %v4545_v62 = vcombine.low %v4523_v50, %v4530_v13  ;;  %v4546_v57 = vcombine.low %v4537_v60, %v4544_v29 }
 0x3de   :  { %v4621_v22 = vrot.slane %v4611_v23, %v7999_v19  ;;  %v4628_v59 = vrot.slane %v4612_v28, %v7999_v19  ;;  %v4635_v17 = vrot.slane %v4613_v38, %v7999_v19  ;;  %v4642_v33 = vrot.slane %v4614_v36, %v7999_v19 }
 0x3df   :  { %v4709_v45 = vcombine.low %v2904_v30, %v2908_v0  ;;  %v4710_v26 = vcombine.low %v2912_v61, %v2916_v8  ;;  %v4711_v37 = vcombine.low %v2920_v58, %v2924_v6  ;;  %v4712_v20 = vcombine.low %v2928_v21, %v2932_v7 }
 0x3e0   :  { %v9412_v12 = vrot.slane %v8481_v34, %v7999_v19  ;;  %v9413_v52 = vrot.slane %v8449_v42, %v7999_v19  ;;  %v8580_v55 = vsub.s32 %v6441_v3, %v9395_v56  ;;  %v9415_v25 = vmax.f32 %v8439_v35, 0.0 }
 0x3e1   :  { %v4357_v46 = vrot.slane %v4349_v51, %v7999_v19  ;;  %v4364_v31 = vrot.slane %v4350_v24, %v7999_v19  ;;  %v4455_v34 = vrot.slane %v4447_v9, %v7999_v19  ;;  %v4462_v15 = vrot.slane %v4448_v40, %v7999_v19 }
 0x3e2   :  { %v4316_v27 = vcombine.low %v9413_v52, %v9412_v12  ;;  %9414 = vst [vmem:[#allocation27_spill] sm:$0xff] %v8580_v55  ;;  %v8585_v1 = vmul.f32 %v8264_v44, %v9415_v25  ;;  %v4553_v42 = vrot.slane %v4545_v62, %v7999_v19  ;;  %v4560_v2 = vrot.slane %v4546_v57, %v7999_v19 }
 0x3e3   :  { %6296 = vperm.xlu1 %7150, %v8479_v18   ;;  %v6455_v18 = vadd.s32 4294967256, %v8311_v53  ;;  %v8594_v50 = vcombine.low %v4621_v22, %v4628_v59  ;;  %v8596_v35 = vcombine.low %v4635_v17, %v4642_v33  ;;  %v4719_v44 = vrot.slane %v4709_v45, %v7999_v19 }
 0x3e4   :  { %v4726_v13 = vrot.slane %v4710_v26, %v7999_v19  ;;  %v4733_v60 = vrot.slane %v4711_v37, %v7999_v19  ;;  %v4740_v29 = vrot.slane %v4712_v20, %v7999_v19  ;;  %v8604_v23 = vadd.f32 %v7954_v32, %v8304_v63 }
 0x3e5   :  { %v8608_v28 = vadd.f32 %v7954_v32, %v8267_v48  ;;  %v8612_v38 = vadd.f32 %v7954_v32, %v8316_v11  ;;  %v8615_v36 = vsub.s32 %v6455_v18, %v9395_v56  ;;  %v8617_v30 = vcombine.low %v4357_v46, %v4364_v31  ;;  %v9419_v11 = vld [vmem:[#allocation19_spill] sm:$0xff] }
 0x3e6   :  { %v8619_v0 = vcombine.low %v4455_v34, %v4462_v15  ;;  %v2968_v63 = vrot.slane %v8464_v10, %v9396_v43  ;;  %v2972_v61 = vrot.slane %v8464_v10, %v9397_v5  ;;  %v8627_v48 = vadd.f32 %v7954_v32, %v8336_v47 }
 0x3e7   :  { %6299 = vperm.xlu1 %7150, %v4316_v27   ;;  %9416 = vst [vmem:[#allocation28_spill] sm:$0xff] %v8612_v38  ;;  %9417 = vst [vmem:[#allocation29_spill] sm:$0xff] %v8615_v36  ;;  %v8631_v8 = vadd.f32 %v7954_v32, %v9419_v11  ;;  %v8633_v58 = vcombine.low %v4553_v42, %v4560_v2  ;;  %v8636_v6 = vadd.s32 4294967264, %v8311_v53 }
 0x3e8   :  { %9418 = vst [vmem:[#allocation30_spill] sm:$0xff] %v8627_v48  ;;  %v8642_v51 = vcombine.low %v4719_v44, %v4726_v13  ;;  %v8644_v47 = vcombine.low %v4733_v60, %v4740_v29  ;;  %v2976_v9 = vrot.slane %v8464_v10, %v7960_v16  ;;  %v2980_v40 = vrot.slane %v8464_v10, %v7963_v41  ;;  %v9421_v29 = vld [vmem:[#allocation26_spill] sm:$0xff] }
 0x3e9   :  { %9420 = vst [vmem:[#allocation19_spill] sm:$0xff] %v8631_v8  ;;  %v2984_v62 = vrot.slane %v8464_v10, %v7968_v49  ;;  %v2988_v22 = vrot.slane %v8464_v10, %v7971_v4  ;;  %v2996_v17 = vrot.slane %v8464_v10, %v7977_v14  ;;  %v8659_v33 = vcombine.low %v2968_v63, %v2972_v61 }
 0x3ea   :  { %v8671_v34 = vcombine.low %v2976_v9, %v2980_v40 }
 0x3eb   :  { %v2276_v21 = vpop.xlane.xlu0 %2275  ;;  %v4809_v3 = vcombine.low %v2984_v62, %v2988_v22 }
 0x3ec   :  { %v2333_v24 = vadd.f32 %v7954_v32, %v2276_v21 }
 0x3ed   :  { %v2278_v57 = vpop.xlane.xlu1 %2277 }
 0x3ee   :  { %v2334_v45 = vadd.f32 %v7954_v32, %v2278_v57  ;;  %v3672_v26 = vrot.slane %v2333_v24, %v9396_v43  ;;  %v3676_v37 = vrot.slane %v2333_v24, %v9397_v5  ;;  %v3680_v20 = vrot.slane %v2333_v24, %v7960_v16 }
 0x3ef   :  { %v3684_v12 = vrot.slane %v2333_v24, %v7963_v41  ;;  %v3688_v52 = vrot.slane %v2333_v24, %v7968_v49  ;;  %v3692_v27 = vrot.slane %v2333_v24, %v7971_v4  ;;  %v3696_v25 = vrot.slane %v2333_v24, %v7974_v39  ;;  %v2280_v15 = vpop.xlane.xlu0 %2279 }
 0x3f0   :  { %v3700_v18 = vrot.slane %v2333_v24, %v7977_v14  ;;  %v5885_v46 = vcombine.low %v3672_v26, %v3676_v37  ;;  %v3704_v31 = vrot.slane %v2334_v45, %v9396_v43  ;;  %v3708_v13 = vrot.slane %v2334_v45, %v9397_v5  ;;  %v9422_v37 = vld [vmem:[#allocation21_spill] sm:$0xff] }
 0x3f1   :  { %v6285_v42 = vpop.permute.xlu1 %6284  ;;  %v5886_v2 = vcombine.low %v3680_v20, %v3684_v12  ;;  %v5887_v44 = vcombine.low %v3688_v52, %v3692_v27  ;;  %v3712_v60 = vrot.slane %v2334_v45, %v7960_v16  ;;  %v3716_v21 = vrot.slane %v2334_v45, %v7963_v41 }
 0x3f2   :  { %v6438_v63 = vrot.slane %v6285_v42, %v9421_v29  ;;  %v5888_v61 = vcombine.low %v3696_v25, %v3700_v18  ;;  %v5895_v11 = vrot.slane %v5885_v46, %v7999_v19  ;;  %v3720_v40 = vrot.slane %v2334_v45, %v7968_v49 }
 0x3f3   :  { %v5902_v24 = vrot.slane %v5886_v2, %v7999_v19  ;;  %v5909_v9 = vrot.slane %v5887_v44, %v7999_v19  ;;  %v3724_v57 = vrot.slane %v2334_v45, %v7971_v4  ;;  %v2335_v26 = vadd.f32 %v7954_v32, %v2280_v15 }
 0x3f4   :  { %v6440_v20 = vsel %vm6439_vm1, %v6438_v63, %v9422_v37  ;;  %v5916_v12 = vrot.slane %v5888_v61, %v7999_v19  ;;  %v3728_v52 = vrot.slane %v2334_v45, %v7974_v39  ;;  %v3732_v18 = vrot.slane %v2334_v45, %v7977_v14 }
 0x3f5   :  { %v6288_v27 = vpop.permute.xlu1 %6287  ;;  %v5917_v25 = vcombine.low %v5895_v11, %v5902_v24  ;;  %v5934_v46 = vcombine.low %v3704_v31, %v3708_v13  ;;  %v5935_v42 = vcombine.low %v3712_v60, %v3716_v21  ;;  %v5936_v7 = vcombine.low %v3720_v40, %v3724_v57 }
 0x3f6   :  { %v6445_v2 = vrot.slane %v6288_v27, %v8580_v55  ;;  %v5918_v44 = vcombine.low %v5909_v9, %v5916_v12  ;;  %v5937_v59 = vcombine.low %v3728_v52, %v3732_v18  ;;  %v3736_v31 = vrot.slane %v2335_v26, %v9396_v43 }
 0x3f7   :  { %v5925_v15 = vrot.slane %v5917_v25, %v7999_v19  ;;  %v5944_v63 = vrot.slane %v5934_v46, %v7999_v19  ;;  %v5951_v61 = vrot.slane %v5935_v42, %v7999_v19  ;;  %v5958_v45 = vrot.slane %v5936_v7, %v7999_v19 }
 0x3f8   :  { %v8693_v37 = vsel %vm6446_vm2, %v6445_v2, %v6440_v20  ;;  %v5932_v11 = vrot.slane %v5918_v44, %v7999_v19  ;;  %v5965_v13 = vrot.slane %v5937_v59, %v7999_v19  ;;  %v3740_v62 = vrot.slane %v2335_v26, %v9397_v5 }
 0x3f9   :  { %9423 = vst [vmem:[#allocation21_spill] sm:$0xff] %v8693_v37  ;;  %v5966_v60 = vcombine.low %v5944_v63, %v5951_v61  ;;  %v3744_v22 = vrot.slane %v2335_v26, %v7960_v16  ;;  %v3748_v24 = vrot.slane %v2335_v26, %v7963_v41  ;;  %v3752_v9 = vrot.slane %v2335_v26, %v7968_v49  ;;  %v9425_v61 = vld [vmem:[#allocation22_spill] sm:$0xff] }
 0x3fa   :  { %v5933_v21 = vcombine.low %v5925_v15, %v5932_v11  ;;  %v3756_v40 = vrot.slane %v2335_v26, %v7971_v4  ;;  %v5967_v57 = vcombine.low %v5958_v45, %v5965_v13  ;;  %v3760_v7 = vrot.slane %v2335_v26, %v7974_v39 }
 0x3fb   :  { %v5974_v20 = vrot.slane %v5966_v60, %v7999_v19  ;;  %v3764_v12 = vrot.slane %v2335_v26, %v7977_v14  ;;  %v5983_v59 = vcombine.low %v3736_v31, %v3740_v62  ;;  %v5984_v52 = vcombine.low %v3744_v22, %v3748_v24 }
 0x3fc   :  { %6398 = vperm.xlu0 %7149, %v5933_v21   ;;  %v5985_v27 = vcombine.low %v3752_v9, %v3756_v40  ;;  %v9424_v25 = vrot.slane %v8464_v10, %v7974_v39  ;;  %v5981_v46 = vrot.slane %v5967_v57, %v7999_v19  ;;  %v4817_v2 = vrot.slane %v8659_v33, %v7999_v19 }
 0x3fd   :  { %v5986_v42 = vcombine.low %v3760_v7, %v3764_v12  ;;  %v4824_v26 = vrot.slane %v8671_v34, %v7999_v19  ;;  %v5993_v44 = vrot.slane %v5983_v59, %v7999_v19  ;;  %v6000_v15 = vrot.slane %v5984_v52, %v7999_v19 }
 0x3fe   :  { %v4810_v18 = vcombine.low %v9424_v25, %v2996_v17  ;;  %v6007_v63 = vrot.slane %v5985_v27, %v7999_v19  ;;  %v3032_v11 = vrot.slane %v9425_v61, %v9396_v43  ;;  %v5982_v10 = vcombine.low %v5974_v20, %v5981_v46  ;;  %v9427_v20 = vld [vmem:[#allocation20_spill] sm:$0xff] }
 0x3ff   :  { %v6014_v17 = vrot.slane %v5986_v42, %v7999_v19  ;;  %v3036_v45 = vrot.slane %v9425_v61, %v9397_v5  ;;  %v3040_v33 = vrot.slane %v9425_v61, %v7960_v16  ;;  %v6015_v31 = vcombine.low %v5993_v44, %v6000_v15  ;;  %v9431_v42 = vld [vmem:[#allocation23_spill] sm:$0xff] }
 0x400   :  { %v4831_v34 = vrot.slane %v4809_v3, %v7999_v19  ;;  %v3044_v13 = vrot.slane %v9425_v61, %v7963_v41  ;;  %v3048_v60 = vrot.slane %v9425_v61, %v7968_v49  ;;  %6401 = vperm.xlu0 %7149, %v5982_v10   ;;  %v4838_v22 = vrot.slane %v4810_v18, %v7999_v19 }
 0x401   :  { %v6016_v62 = vcombine.low %v6007_v63, %v6014_v17  ;;  %v8734_v21 = vcombine.low %v4817_v2, %v4824_v26  ;;  %v3052_v24 = vrot.slane %v9425_v61, %v7971_v4  ;;  %v6023_v9 = vrot.slane %v6015_v31, %v7999_v19  ;;  %v9432_v31 = vld [vmem:[#allocation24_spill] sm:$0xff] }
 0x402   :  { %v8741_v3 = vsub.s32 %v8636_v6, %v9395_v56  ;;  %v3056_v40 = vrot.slane %v9425_v61, %v7974_v39  ;;  %v3060_v57 = vrot.slane %v9425_v61, %v7977_v14  ;;  %v8749_v7 = vadd.f32 %v7954_v32, %v9427_v20 }
 0x403   :  { %v6030_v12 = vrot.slane %v6016_v62, %v7999_v19  ;;  %v9429_v59 = vrot.slane %v8596_v35, %v7999_v19  ;;  %v9430_v52 = vrot.slane %v8594_v50, %v7999_v19  ;;  %v4905_v18 = vcombine.low %v3032_v11, %v3036_v45 }
 0x404   :  { %9426 = vst [vmem:[#allocation22_spill] sm:$0xff] %v8741_v3  ;;  %9428 = vst [vmem:[#allocation20_spill] sm:$0xff] %v8749_v7  ;;  %v4906_v46 = vcombine.low %v3040_v33, %v3044_v13  ;;  %v3096_v2 = vrot.slane %v9431_v42, %v9396_v43  ;;  %v8766_v44 = vcombine.low %v4831_v34, %v4838_v22 }
 0x405   :  { %v8758_v6 = vcombine.low %v9430_v52, %v9429_v59  ;;  %v6031_v26 = vcombine.low %v6023_v9, %v6030_v12  ;;  %v8770_v50 = vcombine.low %v3048_v60, %v3052_v24  ;;  %v8772_v15 = vcombine.low %v3056_v40, %v3060_v57  ;;  %v9433_v57 = vld [vmem:[#allocation25_spill] sm:$0xff] }
 0x406   :  { %v3100_v63 = vrot.slane %v9431_v42, %v9397_v5  ;;  %v3104_v61 = vrot.slane %v9431_v42, %v7960_v16  ;;  %v3108_v11 = vrot.slane %v9431_v42, %v7963_v41  ;;  %v3112_v10 = vrot.slane %v9431_v42, %v7968_v49 }
 0x407   :  { %6404 = vperm.xlu0 %7149, %v6031_v26   ;;  %v3116_v17 = vrot.slane %v9431_v42, %v7971_v4  ;;  %v3120_v45 = vrot.slane %v9431_v42, %v7974_v39  ;;  %v3124_v33 = vrot.slane %v9431_v42, %v7977_v14  ;;  %v3160_v34 = vrot.slane %v9432_v31, %v9396_v43 }
 0x408   :  { %v3164_v13 = vrot.slane %v9432_v31, %v9397_v5  ;;  %v3168_v60 = vrot.slane %v9432_v31, %v7960_v16  ;;  %v3172_v62 = vrot.slane %v9432_v31, %v7963_v41  ;;  %v3176_v22 = vrot.slane %v9432_v31, %v7968_v49 }
 0x409   :  { %v3180_v24 = vrot.slane %v9432_v31, %v7971_v4  ;;  %v3184_v9 = vrot.slane %v9432_v31, %v7974_v39  ;;  %v3188_v40 = vrot.slane %v9432_v31, %v7977_v14  ;;  %v3224_v20 = vrot.slane %v9433_v57, %v9396_v43 }
 0x40a   :  { %v3228_v12 = vrot.slane %v9433_v57, %v9397_v5  ;;  %v3232_v59 = vrot.slane %v9433_v57, %v7960_v16  ;;  %v3236_v52 = vrot.slane %v9433_v57, %v7963_v41  ;;  %v3240_v42 = vrot.slane %v9433_v57, %v7968_v49 }
 0x40b   :  { %2289 = vadd.xlane.f32.xlu1 %v8585_v1  ;;  %v3244_v26 = vrot.slane %v9433_v57, %v7971_v4  ;;  %v3248_v31 = vrot.slane %v9433_v57, %v7974_v39  ;;  %v3252_v35 = vrot.slane %v9433_v57, %v7977_v14  ;;  %v4915_v27 = vrot.slane %v4905_v18, %v7999_v19 }
 0x40c   :  { %v4922_v25 = vrot.slane %v4906_v46, %v7999_v19  ;;  %v5003_v55 = vcombine.low %v3096_v2, %v3100_v63  ;;  %v5004_v29 = vcombine.low %v3104_v61, %v3108_v11  ;;  %v5005_v56 = vcombine.low %v3112_v10, %v3116_v17 }
 0x40d   :  { %v5006_v1 = vcombine.low %v3120_v45, %v3124_v33  ;;  %v5101_v53 = vcombine.low %v3160_v34, %v3164_v13  ;;  %v5102_v7 = vcombine.low %v3168_v60, %v3172_v62  ;;  %v4854_v8 = vrot.slane %v8766_v44, %v7999_v19 }
 0x40e   :  { %v4929_v48 = vrot.slane %v8770_v50, %v7999_v19  ;;  %v5103_v36 = vcombine.low %v3176_v22, %v3180_v24  ;;  %v5104_v38 = vcombine.low %v3184_v9, %v3188_v40  ;;  %v5199_v37 = vcombine.low %v3224_v20, %v3228_v12  ;;  %v2284_v12 = vpop.xlane.xlu0 %2283 }
 0x40f   :  { %v5200_v57 = vcombine.low %v3232_v59, %v3236_v52  ;;  %v5201_v3 = vcombine.low %v3240_v42, %v3244_v26  ;;  %v5202_v18 = vcombine.low %v3248_v31, %v3252_v35  ;;  %v4936_v46 = vrot.slane %v8772_v15, %v7999_v19 }
 0x410   :  { %v8829_v2 = vcombine.low %v4915_v27, %v4922_v25  ;;  %v5013_v63 = vrot.slane %v5003_v55, %v7999_v19  ;;  %v5020_v61 = vrot.slane %v5004_v29, %v7999_v19  ;;  %v5027_v44 = vrot.slane %v5005_v56, %v7999_v19 }
 0x411   :  { %v5034_v11 = vrot.slane %v5006_v1, %v7999_v19  ;;  %v5111_v50 = vrot.slane %v5101_v53, %v7999_v19  ;;  %v5118_v10 = vrot.slane %v5102_v7, %v7999_v19  ;;  %v5125_v17 = vrot.slane %v5103_v36, %v7999_v19 }
 0x412   :  { %v5132_v35 = vrot.slane %v5104_v38, %v7999_v19  ;;  %v3256_v27 = vrot.slane %v8565_v54, %v9396_v43  ;;  %v3260_v55 = vrot.slane %v8565_v54, %v9397_v5  ;;  %v5209_v29 = vrot.slane %v5199_v37, %v7999_v19 }
 0x413   :  { %v5216_v56 = vrot.slane %v5200_v57, %v7999_v19  ;;  %v5223_v25 = vrot.slane %v5201_v3, %v7999_v19  ;;  %v5230_v53 = vrot.slane %v5202_v18, %v7999_v19  ;;  %v3264_v7 = vrot.slane %v8565_v54, %v7960_v16 }
 0x414   :  { %v3268_v38 = vrot.slane %v8565_v54, %v7963_v41  ;;  %v3272_v36 = vrot.slane %v8565_v54, %v7968_v49  ;;  %v3276_v15 = vrot.slane %v8565_v54, %v7971_v4  ;;  %v9434_v37 = vrot.slane %v8644_v47, %v7999_v19 }
 0x415   :  { %v9435_v3 = vrot.slane %v8642_v51, %v7999_v19  ;;  %v9436_v33 = vrot.slane %v8734_v21, %v7999_v19  ;;  %v3280_v13 = vrot.slane %v8565_v54, %v7974_v39  ;;  %v3284_v60 = vrot.slane %v8565_v54, %v7977_v14 }
 0x416   :  { %v4938_v62 = vcombine.low %v4929_v48, %v4936_v46  ;;  %v4945_v47 = vrot.slane %v8829_v2, %v7999_v19  ;;  %v5035_v22 = vcombine.low %v5013_v63, %v5020_v61  ;;  %v5036_v24 = vcombine.low %v5027_v44, %v5034_v11 }
 0x417   :  { %v8861_v45 = vcombine.low %v9435_v3, %v9434_v37  ;;  %v8866_v34 = vcombine.low %v9436_v33, %v4854_v8  ;;  %v5133_v51 = vcombine.low %v5111_v50, %v5118_v10  ;;  %v5134_v9 = vcombine.low %v5125_v17, %v5132_v35 }
 0x418   :  { %v5231_v40 = vcombine.low %v5209_v29, %v5216_v56  ;;  %v5232_v20 = vcombine.low %v5223_v25, %v5230_v53  ;;  %v5248_v21 = vcombine.low %v3256_v27, %v3260_v55  ;;  %v5249_v8 = vcombine.low %v3264_v7, %v3268_v38 }
 0x419   :  { %v5250_v59 = vcombine.low %v3272_v36, %v3276_v15  ;;  %v3288_v52 = vrot.slane %v8604_v23, %v9396_v43  ;;  %v5251_v42 = vcombine.low %v3280_v13, %v3284_v60  ;;  %v3292_v54 = vrot.slane %v8604_v23, %v9397_v5 }
 0x41a   :  { %v3296_v48 = vrot.slane %v8604_v23, %v7960_v16  ;;  %v3300_v26 = vrot.slane %v8604_v23, %v7963_v41  ;;  %v3304_v31 = vrot.slane %v8604_v23, %v7968_v49  ;;  %v3308_v1 = vrot.slane %v8604_v23, %v7971_v4 }
 0x41b   :  { %v3312_v57 = vrot.slane %v8604_v23, %v7974_v39  ;;  %v3316_v18 = vrot.slane %v8604_v23, %v7977_v14  ;;  %v2337_v46 = vadd.f32 %v7954_v32, %v2284_v12  ;;  %v4952_v2 = vrot.slane %v4938_v62, %v7999_v19 }
 0x41c   :  { %v5043_v63 = vrot.slane %v5035_v22, %v7999_v19  ;;  %v5050_v61 = vrot.slane %v5036_v24, %v7999_v19  ;;  %6302 = vperm.xlu1 %7150, %v8617_v30   ;;  %v5141_v44 = vrot.slane %v5133_v51, %v7999_v19  ;;  %v5148_v11 = vrot.slane %v5134_v9, %v7999_v19 }
 0x41d   :  { %v5239_v50 = vrot.slane %v5231_v40, %v7999_v19  ;;  %v5246_v10 = vrot.slane %v5232_v20, %v7999_v19  ;;  %v5258_v23 = vrot.slane %v5248_v21, %v7999_v19  ;;  %v5265_v17 = vrot.slane %v5249_v8, %v7999_v19 }
 0x41e   :  { %v5272_v35 = vrot.slane %v5250_v59, %v7999_v19  ;;  %v5279_v27 = vrot.slane %v5251_v42, %v7999_v19  ;;  %v5297_v55 = vcombine.low %v3288_v52, %v3292_v54  ;;  %v5298_v29 = vcombine.low %v3296_v48, %v3300_v26 }
 0x41f   :  { %v5299_v56 = vcombine.low %v3304_v31, %v3308_v1  ;;  %v5300_v30 = vcombine.low %v3312_v57, %v3316_v18  ;;  %v3800_v25 = vrot.slane %v2337_v46, %v9396_v43  ;;  %v3804_v53 = vrot.slane %v2337_v46, %v9397_v5 }
 0x420   :  { %v3808_v7 = vrot.slane %v2337_v46, %v7960_v16  ;;  %v3812_v38 = vrot.slane %v2337_v46, %v7963_v41  ;;  %6308 = vperm.xlu1 %7150, %v8619_v0   ;;  %v3816_v36 = vrot.slane %v2337_v46, %v7968_v49  ;;  %v3820_v15 = vrot.slane %v2337_v46, %v7971_v4 }
 0x421   :  { %v3824_v37 = vrot.slane %v2337_v46, %v7974_v39  ;;  %v3828_v3 = vrot.slane %v2337_v46, %v7977_v14  ;;  %v8912_v33 = vcombine.low %v4945_v47, %v4952_v2  ;;  %v8914_v13 = vcombine.low %v5043_v63, %v5050_v61 }
 0x422   :  { %v8916_v60 = vcombine.low %v5258_v23, %v5265_v17  ;;  %v8918_v62 = vcombine.low %v5272_v35, %v5279_v27  ;;  %v8920_v22 = vcombine.low %v5141_v44, %v5148_v11  ;;  %v8922_v0 = vcombine.low %v5239_v50, %v5246_v10 }
 0x423   :  { %v5307_v24 = vrot.slane %v5297_v55, %v7999_v19  ;;  %v5314_v51 = vrot.slane %v5298_v29, %v7999_v19  ;;  %v5321_v9 = vrot.slane %v5299_v56, %v7999_v19  ;;  %v5328_v47 = vrot.slane %v5300_v30, %v7999_v19  ;;  %v9437_v56 = vld [vmem:[#allocation22_spill] sm:$0xff] }
 0x424   :  { %v3320_v40 = vrot.slane %v8608_v28, %v9396_v43  ;;  %v3324_v20 = vrot.slane %v8608_v28, %v9397_v5  ;;  %6314 = vperm.xlu1 %7150, %v8633_v58   ;;  %v6081_v12 = vcombine.low %v3800_v25, %v3804_v53  ;;  %v6082_v21 = vcombine.low %v3808_v7, %v3812_v38 }
 0x425   :  { %v6083_v8 = vcombine.low %v3816_v36, %v3820_v15  ;;  %v6084_v59 = vcombine.low %v3824_v37, %v3828_v3  ;;  %v5288_v52 = vrot.slane %v8916_v60, %v7999_v19  ;;  %v5295_v42 = vrot.slane %v8918_v62, %v7999_v19  ;;  %v9438_v3 = vld [vmem:[#allocation21_spill] sm:$0xff] }
 0x426   :  { %v3328_v54 = vrot.slane %v8608_v28, %v7960_v16  ;;  %v3332_v48 = vrot.slane %v8608_v28, %v7963_v41  ;;  %v2282_v26 = vpop.xlane.xlu1 %2281  ;;  %v8941_v31 = vcombine.low %v5307_v24, %v5314_v51  ;;  %v3336_v58 = vrot.slane %v8608_v28, %v7968_v49 }
 0x427   :  { %v3340_v1 = vrot.slane %v8608_v28, %v7971_v4  ;;  %v3344_v57 = vrot.slane %v8608_v28, %v7974_v39  ;;  %v2336_v18 = vadd.f32 %v7954_v32, %v2282_v26  ;;  %v8950_v46 = vcombine.low %v5321_v9, %v5328_v47  ;;  %v9439_v47 = vld [vmem:[#allocation28_spill] sm:$0xff] }
 0x428   :  { %v3348_v2 = vrot.slane %v8608_v28, %v7977_v14  ;;  %v8954_v63 = vcombine.low %v3320_v40, %v3324_v20  ;;  %6320 = vperm.xlu1 %7150, %v8758_v6   ;;  %v6091_v61 = vrot.slane %v6081_v12, %v7999_v19  ;;  %v6098_v44 = vrot.slane %v6082_v21, %v7999_v19 }
 0x429   :  { %v6105_v11 = vrot.slane %v6083_v8, %v7999_v19  ;;  %v6112_v50 = vrot.slane %v6084_v59, %v7999_v19  ;;  %v3768_v10 = vrot.slane %v2336_v18, %v9396_v43  ;;  %v3772_v23 = vrot.slane %v2336_v18, %v9397_v5  ;;  %v9440_v59 = vld [vmem:[#allocation29_spill] sm:$0xff] }
 0x42a   :  { %v3776_v17 = vrot.slane %v2336_v18, %v7960_v16  ;;  %v3780_v28 = vrot.slane %v2336_v18, %v7963_v41  ;;  %v6291_v35 = vpop.permute.xlu1 %6290  ;;  %v3784_v27 = vrot.slane %v2336_v18, %v7968_v49  ;;  %v3788_v6 = vrot.slane %v2336_v18, %v7971_v4 }
 0x42b   :  { %v3792_v55 = vrot.slane %v2336_v18, %v7974_v39  ;;  %v3796_v29 = vrot.slane %v2336_v18, %v7977_v14  ;;  %v6452_v30 = vrot.slane %v6291_v35, %v9437_v56  ;;  %v6032_v25 = vcombine.low %v3768_v10, %v3772_v23 }
 0x42c   :  { %v6033_v53 = vcombine.low %v3776_v17, %v3780_v28  ;;  %v8970_v7 = vcombine.low %v3328_v54, %v3332_v48  ;;  %6326 = vperm.xlu1 %7150, %v8861_v45   ;;  %v6034_v38 = vcombine.low %v3784_v27, %v3788_v6  ;;  %v8973_v15 = vcombine.low %v3336_v58, %v3340_v1  ;;  %v9441_v17 = vld [vmem:[#allocation30_spill] sm:$0xff] }
 0x42d   :  { %v6035_v36 = vcombine.low %v3792_v55, %v3796_v29  ;;  %v8975_v37 = vcombine.low %v3344_v57, %v3348_v2  ;;  %v6454_v24 = vsel %vm6453_vm3, %v6452_v30, %v9438_v3  ;;  %v6042_v51 = vrot.slane %v6032_v25, %v7999_v19 }
 0x42e   :  { %v6049_v9 = vrot.slane %v6033_v53, %v7999_v19  ;;  %v3352_v40 = vrot.slane %v9439_v47, %v9396_v43  ;;  %v6294_v20 = vpop.permute.xlu1 %6293  ;;  %v6056_v12 = vrot.slane %v6034_v38, %v7999_v19  ;;  %v6113_v21 = vcombine.low %v6091_v61, %v6098_v44 }
 0x42f   :  { %v6063_v45 = vrot.slane %v6035_v36, %v7999_v19  ;;  %v6114_v8 = vcombine.low %v6105_v11, %v6112_v50  ;;  %v6459_v54 = vrot.slane %v6294_v20, %v9440_v59  ;;  %v3356_v26 = vrot.slane %v9439_v47, %v9397_v5 }
 0x430   :  { %v6064_v48 = vcombine.low %v6042_v51, %v6049_v9  ;;  %v3360_v58 = vrot.slane %v9439_v47, %v7960_v16  ;;  %6332 = vperm.xlu1 %7150, %v8866_v34   ;;  %v3364_v57 = vrot.slane %v9439_v47, %v7963_v41  ;;  %v3368_v18 = vrot.slane %v9439_v47, %v7968_v49 }
 0x431   :  { %v6065_v1 = vcombine.low %v6056_v12, %v6063_v45  ;;  %v3372_v2 = vrot.slane %v9439_v47, %v7971_v4  ;;  %v8998_v61 = vsel %vm6460_vm4, %v6459_v54, %v6454_v24  ;;  %v3376_v11 = vrot.slane %v9439_v47, %v7974_v39 }
 0x432   :  { %v6072_v44 = vrot.slane %v6064_v48, %v7999_v19  ;;  %v3380_v34 = vrot.slane %v9439_v47, %v7977_v14  ;;  %v6121_v10 = vrot.slane %v6113_v21, %v7999_v19  ;;  %v6128_v23 = vrot.slane %v6114_v8, %v7999_v19  ;;  %v9442_v21 = vld [vmem:[#allocation19_spill] sm:$0xff] }
 0x433   :  { %v6079_v50 = vrot.slane %v6065_v1, %v7999_v19  ;;  %v3416_v28 = vrot.slane %v9441_v17, %v9396_v43  ;;  %v3420_v35 = vrot.slane %v9441_v17, %v9397_v5  ;;  %v3424_v27 = vrot.slane %v9441_v17, %v7960_v16 }
 0x434   :  { %v3428_v6 = vrot.slane %v9441_v17, %v7963_v41  ;;  %v3432_v55 = vrot.slane %v9441_v17, %v7968_v49  ;;  %6338 = vperm.xlu1 %7150, %v8912_v33   ;;  %v3436_v30 = vrot.slane %v9441_v17, %v7971_v4  ;;  %v3440_v25 = vrot.slane %v9441_v17, %v7974_v39 }
 0x435   :  { %v6080_v29 = vcombine.low %v6072_v44, %v6079_v50  ;;  %v3444_v53 = vrot.slane %v9441_v17, %v7977_v14  ;;  %v9031_v38 = vcombine.low %v5288_v52, %v5295_v42  ;;  %v5337_v33 = vrot.slane %v8941_v31, %v7999_v19 }
 0x436   :  { %v5344_v36 = vrot.slane %v8950_v46, %v7999_v19  ;;  %v5356_v3 = vrot.slane %v8954_v63, %v7999_v19  ;;  %v5363_v24 = vrot.slane %v8970_v7, %v7999_v19  ;;  %v5370_v62 = vrot.slane %v8973_v15, %v7999_v19 }
 0x437   :  { %6407 = vperm.xlu0 %7149, %v6080_v29   ;;  %v5377_v60 = vrot.slane %v8975_v37, %v7999_v19  ;;  %v5395_v52 = vcombine.low %v3352_v40, %v3356_v26  ;;  %v6129_v42 = vcombine.low %v6121_v10, %v6128_v23  ;;  %v5396_v51 = vcombine.low %v3360_v58, %v3364_v57 }
 0x438   :  { %v5397_v9 = vcombine.low %v3368_v18, %v3372_v2  ;;  %v5398_v47 = vcombine.low %v3376_v11, %v3380_v34  ;;  %6344 = vperm.xlu1 %7150, %v8914_v13   ;;  %v5493_v20 = vcombine.low %v3416_v28, %v3420_v35  ;;  %v5494_v12 = vcombine.low %v3424_v27, %v3428_v6  ;;  %v9443_v35 = vld [vmem:[#allocation20_spill] sm:$0xff] }
 0x439   :  { %v5495_v63 = vcombine.low %v3432_v55, %v3436_v30  ;;  %v5496_v45 = vcombine.low %v3440_v25, %v3444_v53  ;;  %v3480_v7 = vrot.slane %v9442_v21, %v9396_v43  ;;  %v3484_v15 = vrot.slane %v9442_v21, %v9397_v5 }
 0x43a   :  { %v3488_v37 = vrot.slane %v9442_v21, %v7960_v16  ;;  %v3492_v40 = vrot.slane %v9442_v21, %v7963_v41  ;;  %v3496_v13 = vrot.slane %v9442_v21, %v7968_v49  ;;  %v3500_v8 = vrot.slane %v9442_v21, %v7971_v4 }
 0x43b   :  { %6410 = vperm.xlu0 %7149, %v6129_v42   ;;  %v3504_v54 = vrot.slane %v9442_v21, %v7974_v39  ;;  %v3508_v48 = vrot.slane %v9442_v21, %v7977_v14  ;;  %v5378_v26 = vcombine.low %v5356_v3, %v5363_v24  ;;  %v5379_v58 = vcombine.low %v5370_v62, %v5377_v60 }
 0x43c   :  { %v5405_v1 = vrot.slane %v5395_v52, %v7999_v19  ;;  %v5412_v57 = vrot.slane %v5396_v51, %v7999_v19  ;;  %6350 = vperm.xlu1 %7150, %v8920_v22   ;;  %v5419_v18 = vrot.slane %v5397_v9, %v7999_v19  ;;  %v5426_v2 = vrot.slane %v5398_v47, %v7999_v19 }
 0x43d   :  { %v5503_v44 = vrot.slane %v5493_v20, %v7999_v19  ;;  %v5510_v11 = vrot.slane %v5494_v12, %v7999_v19  ;;  %v5517_v34 = vrot.slane %v5495_v63, %v7999_v19  ;;  %v5524_v50 = vrot.slane %v5496_v45, %v7999_v19  ;;  %v9444_v20 = vld [vmem:[#allocation15_spill] sm:$0xff] }
 0x43e   :  { %v5591_v10 = vcombine.low %v3480_v7, %v3484_v15  ;;  %v5592_v23 = vcombine.low %v3488_v37, %v3492_v40  ;;  %v5593_v17 = vcombine.low %v3496_v13, %v3500_v8  ;;  %v5594_v28 = vcombine.low %v3504_v54, %v3508_v48  ;;  %v9445_v7 = vld [vmem:[#allocation16_spill] sm:$0xff] }
 0x43f   :  { %v3544_v27 = vrot.slane %v9443_v35, %v9396_v43  ;;  %v3548_v22 = vrot.slane %v9443_v35, %v9397_v5  ;;  %v3552_v6 = vrot.slane %v9443_v35, %v7960_v16  ;;  %v3556_v55 = vrot.slane %v9443_v35, %v7963_v41 }
 0x440   :  { %v3560_v29 = vrot.slane %v9443_v35, %v7968_v49  ;;  %v3564_v30 = vrot.slane %v9443_v35, %v7971_v4  ;;  %6356 = vperm.xlu1 %7150, %v8922_v0   ;;  %v5386_v25 = vrot.slane %v5378_v26, %v7999_v19  ;;  %v5393_v53 = vrot.slane %v5379_v58, %v7999_v19 }
 0x441   :  { %v3568_v3 = vrot.slane %v9443_v35, %v7974_v39  ;;  %v3572_v24 = vrot.slane %v9443_v35, %v7977_v14  ;;  %v5427_v62 = vcombine.low %v5405_v1, %v5412_v57  ;;  %v5428_v60 = vcombine.low %v5419_v18, %v5426_v2 }
 0x442   :  { %v5525_v52 = vcombine.low %v5503_v44, %v5510_v11  ;;  %v5526_v42 = vcombine.low %v5517_v34, %v5524_v50  ;;  %v5601_v51 = vrot.slane %v5591_v10, %v7999_v19  ;;  %v5608_v9 = vrot.slane %v5592_v23, %v7999_v19  ;;  %v2288_v44 = vpop.xlane.xlu0 %2287 }
 0x443   :  { %v5615_v0 = vrot.slane %v5593_v17, %v7999_v19  ;;  %v5622_v47 = vrot.slane %v5594_v28, %v7999_v19  ;;  %v2331_v12 = vadd.f32 %v7954_v32, %v9444_v20  ;;  %v5689_v63 = vcombine.low %v3544_v27, %v3548_v22 }
 0x444   :  { %v5690_v45 = vcombine.low %v3552_v6, %v3556_v55  ;;  %v5691_v21 = vcombine.low %v3560_v29, %v3564_v30  ;;  %v2324_v15 = vadd.f32 %v7954_v32, %v9445_v7  ;;  %6359 = vperm.xlu1 %7150, %v9031_v38   ;;  %v5692_v37 = vcombine.low %v3568_v3, %v3572_v24 }
 0x445   :  { %v5345_v40 = vcombine.low %v5337_v33, %v5344_v36  ;;  %v5394_v13 = vcombine.low %v5386_v25, %v5393_v53  ;;  %v5435_v8 = vrot.slane %v5427_v62, %v7999_v19  ;;  %v5442_v54 = vrot.slane %v5428_v60, %v7999_v19 }
 0x446   :  { %v5533_v48 = vrot.slane %v5525_v52, %v7999_v19  ;;  %v5540_v26 = vrot.slane %v5526_v42, %v7999_v19  ;;  %v5623_v58 = vcombine.low %v5601_v51, %v5608_v9  ;;  %v5624_v1 = vcombine.low %v5615_v0, %v5622_v47 }
 0x447   :  { %v5699_v38 = vrot.slane %v5689_v63, %v7999_v19  ;;  %v5706_v57 = vrot.slane %v5690_v45, %v7999_v19  ;;  %v5713_v46 = vrot.slane %v5691_v21, %v7999_v19  ;;  %v3608_v31 = vrot.slane %v2331_v12, %v9396_v43 }
 0x448   :  { %6362 = vperm.xlu1 %7150, %v5345_v40   ;;  %v5720_v33 = vrot.slane %v5692_v37, %v7999_v19  ;;  %v3612_v36 = vrot.slane %v2331_v12, %v9397_v5  ;;  %v3616_v18 = vrot.slane %v2331_v12, %v7960_v16  ;;  %v3620_v2 = vrot.slane %v2331_v12, %v7963_v41 }
 0x449   :  { %v3624_v11 = vrot.slane %v2331_v12, %v7968_v49  ;;  %v3628_v34 = vrot.slane %v2331_v12, %v7971_v4  ;;  %v3632_v50 = vrot.slane %v2331_v12, %v7974_v39  ;;  %v3636_v10 = vrot.slane %v2331_v12, %v7977_v14 }
 0x44a   :  { %v3384_v23 = vrot.slane %v2324_v15, %v9396_v43  ;;  %v3388_v17 = vrot.slane %v2324_v15, %v9397_v5  ;;  %v3392_v28 = vrot.slane %v2324_v15, %v7960_v16  ;;  %v3396_v35 = vrot.slane %v2324_v15, %v7963_v41 }
 0x44b   :  { %v3400_v27 = vrot.slane %v2324_v15, %v7968_v49  ;;  %v3404_v22 = vrot.slane %v2324_v15, %v7971_v4  ;;  %v3408_v6 = vrot.slane %v2324_v15, %v7974_v39  ;;  %v3412_v55 = vrot.slane %v2324_v15, %v7977_v14 }
 0x44c   :  { %v2339_v29 = vadd.f32 %v7954_v32, %v2288_v44  ;;  %6365 = vperm.xlu1 %7150, %v5394_v13   ;;  %v5443_v30 = vcombine.low %v5435_v8, %v5442_v54  ;;  %v5541_v25 = vcombine.low %v5533_v48, %v5540_v26  ;;  %v5631_v53 = vrot.slane %v5623_v58, %v7999_v19 }
 0x44d   :  { %v5638_v3 = vrot.slane %v5624_v1, %v7999_v19  ;;  %v5721_v24 = vcombine.low %v5699_v38, %v5706_v57  ;;  %v5722_v62 = vcombine.low %v5713_v46, %v5720_v33  ;;  %v5787_v60 = vcombine.low %v3608_v31, %v3612_v36 }
 0x44e   :  { %v5788_v52 = vcombine.low %v3616_v18, %v3620_v2  ;;  %v5789_v42 = vcombine.low %v3624_v11, %v3628_v34  ;;  %v5790_v51 = vcombine.low %v3632_v50, %v3636_v10  ;;  %v5444_v9 = vcombine.low %v3384_v23, %v3388_v17 }
 0x44f   :  { %v5445_v0 = vcombine.low %v3392_v28, %v3396_v35  ;;  %v5446_v47 = vcombine.low %v3400_v27, %v3404_v22  ;;  %v5447_v20 = vcombine.low %v3408_v6, %v3412_v55  ;;  %v3864_v12 = vrot.slane %v2339_v29, %v9396_v43  ;;  %v9446_v6 = vld [vmem:[#allocation17_spill] sm:$0xff] }
 0x450   :  { %6368 = vperm.xlu1 %7150, %v5443_v30   ;;  %v3868_v63 = vrot.slane %v2339_v29, %v9397_v5  ;;  %v3872_v45 = vrot.slane %v2339_v29, %v7960_v16  ;;  %v3876_v21 = vrot.slane %v2339_v29, %v7963_v41  ;;  %v3880_v7 = vrot.slane %v2339_v29, %v7968_v49 }
 0x451   :  { %v3884_v15 = vrot.slane %v2339_v29, %v7971_v4  ;;  %v3888_v37 = vrot.slane %v2339_v29, %v7974_v39  ;;  %v3892_v40 = vrot.slane %v2339_v29, %v7977_v14  ;;  %v5797_v13 = vrot.slane %v5787_v60, %v7999_v19 }
 0x452   :  { %v5804_v8 = vrot.slane %v5788_v52, %v7999_v19  ;;  %v5811_v54 = vrot.slane %v5789_v42, %v7999_v19  ;;  %v5818_v48 = vrot.slane %v5790_v51, %v7999_v19  ;;  %v5639_v26 = vcombine.low %v5631_v53, %v5638_v3  ;;  %v9447_v52 = vld [vmem:[#allocation13_spill] sm:$0xff] }
 0x453   :  { %v5454_v58 = vrot.slane %v5444_v9, %v7999_v19  ;;  %v5461_v1 = vrot.slane %v5445_v0, %v7999_v19  ;;  %v5468_v38 = vrot.slane %v5446_v47, %v7999_v19  ;;  %v5475_v57 = vrot.slane %v5447_v20, %v7999_v19 }
 0x454   :  { %6374 = vperm.xlu1 %7150, %v5541_v25   ;;  %v6179_v46 = vcombine.low %v3864_v12, %v3868_v63  ;;  %v6180_v31 = vcombine.low %v3872_v45, %v3876_v21  ;;  %v6181_v33 = vcombine.low %v3880_v7, %v3884_v15  ;;  %v6182_v36 = vcombine.low %v3888_v37, %v3892_v40 }
 0x455   :  { %v5729_v18 = vrot.slane %v5721_v24, %v7999_v19  ;;  %v5736_v2 = vrot.slane %v5722_v62, %v7999_v19  ;;  %v5819_v44 = vcombine.low %v5797_v13, %v5804_v8  ;;  %v5820_v11 = vcombine.low %v5811_v54, %v5818_v48 }
 0x456   :  { %v5476_v34 = vcombine.low %v5454_v58, %v5461_v1  ;;  %v5477_v50 = vcombine.low %v5468_v38, %v5475_v57  ;;  %v6189_v10 = vrot.slane %v6179_v46, %v7999_v19  ;;  %v6196_v23 = vrot.slane %v6180_v31, %v7999_v19 }
 0x457   :  { %v6203_v17 = vrot.slane %v6181_v33, %v7999_v19  ;;  %v6210_v28 = vrot.slane %v6182_v36, %v7999_v19  ;;  %v5737_v35 = vcombine.low %v5729_v18, %v5736_v2  ;;  %v5827_v27 = vrot.slane %v5819_v44, %v7999_v19 }
 0x458   :  { %6380 = vperm.xlu1 %7150, %v5639_v26   ;;  %v5834_v22 = vrot.slane %v5820_v11, %v7999_v19  ;;  %v6462_v55 = vadd.s32 4294967248, %v9446_v6  ;;  %v5484_v29 = vrot.slane %v5476_v34, %v7999_v19  ;;  %v5491_v30 = vrot.slane %v5477_v50, %v7999_v19 }
 0x459   :  { %v6211_v25 = vcombine.low %v6189_v10, %v6196_v23  ;;  %v6212_v53 = vcombine.low %v6203_v17, %v6210_v28  ;;  %v6469_v62 = vadd.s32 4294967240, %v9446_v6  ;;  %v6483_v50 = vadd.s32 4294967224, %v9446_v6  ;;  %v6306_v23 = vpop.permute.xlu0 %6305 }
 0x45a   :  { %v5835_v3 = vcombine.low %v5827_v27, %v5834_v22  ;;  %v9162_v42 = vsub.s32 %v6462_v55, %v9447_v52  ;;  %v5492_v51 = vcombine.low %v5484_v29, %v5491_v30  ;;  %v6476_v10 = vadd.s32 4294967232, %v9446_v6 }
 0x45b   :  { %v6219_v9 = vrot.slane %v6211_v25, %v7999_v19  ;;  %v6226_v0 = vrot.slane %v6212_v53, %v7999_v19  ;;  %v9176_v54 = vsub.s32 %v6469_v62, %v9447_v52  ;;  %v9191_v28 = vsub.s32 %v6483_v50, %v9447_v52 }
 0x45c   :  { %6386 = vperm.xlu1 %7150, %v5737_v35   ;;  %v6497_v35 = vadd.s32 4294967208, %v9446_v6  ;;  %v6511_v27 = vadd.s32 4294967192, %v9446_v6  ;;  %v9197_v55 = vsub.s32 %v6476_v10, %v9447_v52  ;;  %v6490_v29 = vadd.s32 4294967216, %v9446_v6 }
 0x45d   :  { %v6227_v1 = vcombine.low %v6219_v9, %v6226_v0  ;;  %v6312_v9 = vpop.permute.xlu0 %6311 }
 0x45f   :  { %v2286_v24 = vpop.xlane.xlu1 %2285 }
 0x460   :  { %v2338_v60 = vadd.f32 %v7954_v32, %v2286_v24  ;;  %6392 = vperm.xlu1 %7150, %v5835_v3  }
 0x462   :  { %v3832_v47 = vrot.slane %v2338_v60, %v9396_v43  ;;  %v3836_v20 = vrot.slane %v2338_v60, %v9397_v5  ;;  %v3840_v12 = vrot.slane %v2338_v60, %v7960_v16  ;;  %v3844_v63 = vrot.slane %v2338_v60, %v7963_v41 }
 0x463   :  { %v6297_v45 = vpop.permute.xlu1 %6296  ;;  %v3848_v21 = vrot.slane %v2338_v60, %v7968_v49  ;;  %v3852_v7 = vrot.slane %v2338_v60, %v7971_v4  ;;  %v3856_v15 = vrot.slane %v2338_v60, %v7974_v39  ;;  %v3860_v37 = vrot.slane %v2338_v60, %v7977_v14 }
 0x464   :  { %v6466_v40 = vrot.slane %v6297_v45, %v9162_v42  ;;  %6371 = vperm.xlu1 %7150, %v5492_v51   ;;  %v6130_v13 = vcombine.low %v3832_v47, %v3836_v20  ;;  %v6131_v8 = vcombine.low %v3840_v12, %v3844_v63 }
 0x465   :  { %v6132_v48 = vcombine.low %v3848_v21, %v3852_v7  ;;  %v6133_v26 = vcombine.low %v3856_v15, %v3860_v37 }
 0x466   :  { %v6468_v58 = vsel %vm6467_vm5, %v6466_v40, %v8998_v61  ;;  %v6140_v38 = vrot.slane %v6130_v13, %v7999_v19  ;;  %v6147_v57 = vrot.slane %v6131_v8, %v7999_v19  ;;  %v9229_v8 = vsub.s32 %v6511_v27, %v9447_v52 }
 0x467   :  { %v6300_v46 = vpop.permute.xlu1 %6299  ;;  %v6154_v31 = vrot.slane %v6132_v48, %v7999_v19  ;;  %v6161_v33 = vrot.slane %v6133_v26, %v7999_v19  ;;  %v6318_v26 = vpop.permute.xlu0 %6317 }
 0x468   :  { %v6473_v36 = vrot.slane %v6300_v46, %v9176_v54  ;;  %6416 = vperm.xlu1 %7150, %v6227_v1   ;;  %v6162_v18 = vcombine.low %v6140_v38, %v6147_v57 }
 0x469   :  { %v6163_v2 = vcombine.low %v6154_v31, %v6161_v33  ;;  %v6515_v33 = vrot.slane %v6318_v26, %v9229_v8 }
 0x46a   :  { %v6475_v44 = vsel %vm6474_vm6, %v6473_v36, %v6468_v58  ;;  %v6170_v61 = vrot.slane %v6162_v18, %v7999_v19 }
 0x46b   :  { %v6177_v11 = vrot.slane %v6163_v2, %v7999_v19  ;;  %v9243_v10 = vpop.permute.xlu0 %6323 }
 0x46d   :  { %v6178_v34 = vcombine.low %v6170_v61, %v6177_v11 }
 0x46f   :  { %6413 = vperm.xlu0 %7149, %v6178_v34  }
 0x498   :  { %v2290_v17 = vpop.xlane.xlu1 %2289 }
 0x499   :  { %v2340_v22 = vadd.f32 %v7954_v32, %v2290_v17  ;;  %v6330_v17 = vpop.permute.xlu0 %6329 }
 0x49b   :  { %v3896_v30 = vrot.slane %v2340_v22, %v9396_v43  ;;  %v3900_v25 = vrot.slane %v2340_v22, %v9397_v5  ;;  %v3904_v53 = vrot.slane %v2340_v22, %v7960_v16  ;;  %v3908_v3 = vrot.slane %v2340_v22, %v7963_v41 }
 0x49c   :  { %v6303_v24 = vpop.permute.xlu1 %6302  ;;  %v3912_v62 = vrot.slane %v2340_v22, %v7968_v49  ;;  %v3916_v32 = vrot.slane %v2340_v22, %v7971_v4  ;;  %v3920_v60 = vrot.slane %v2340_v22, %v7974_v39  ;;  %v3924_v51 = vrot.slane %v2340_v22, %v7977_v14 }
 0x49d   :  { %v6480_v0 = vrot.slane %v6303_v24, %v9197_v55  ;;  %v6504_v43 = vadd.s32 4294967200, %v9446_v6  ;;  %v6228_v47 = vcombine.low %v3896_v30, %v3900_v25  ;;  %v6229_v5 = vcombine.low %v3904_v53, %v3908_v3  ;;  %v6336_v27 = vpop.permute.xlu0 %6335 }
 0x49e   :  { %v6487_v16 = vrot.slane %v6306_v23, %v9191_v28  ;;  %v9212_v41 = vsub.s32 %v6497_v35, %v9447_v52  ;;  %v6230_v20 = vcombine.low %v3912_v62, %v3916_v32  ;;  %v6231_v49 = vcombine.low %v3920_v60, %v3924_v51 }
 0x49f   :  { %v9215_v4 = vsub.s32 %v6490_v29, %v9447_v52  ;;  %v6482_v39 = vsel %vm6481_vm7, %v6480_v0, %v6475_v44  ;;  %v6238_v14 = vrot.slane %v6228_v47, %v7999_v19  ;;  %v6245_v12 = vrot.slane %v6229_v5, %v7999_v19  ;;  %v9448_v47 = vld [vmem:[#allocation18_spill] sm:$0xff] }
 0x4a0   :  { %v6309_v63 = vpop.permute.xlu1 %6308  ;;  %v6489_v45 = vsel %vm6488_vm8, %v6487_v16, %v6482_v39  ;;  %v6252_v21 = vrot.slane %v6230_v20, %v7999_v19  ;;  %v6259_v7 = vrot.slane %v6231_v49, %v7999_v19  ;;  %v9225_v37 = vsub.s32 %v6504_v43, %v9447_v52  ;;  %v9449_v20 = vld [vmem:[#allocation26_spill] sm:$0xff] }
 0x4a1   :  { %v6494_v15 = vrot.slane %v6309_v63, %v9215_v4  ;;  %v6260_v40 = vcombine.low %v6238_v14, %v6245_v12  ;;  %v6501_v13 = vrot.slane %v6312_v9, %v9212_v41  ;;  %v6342_v29 = vpop.permute.xlu0 %6341  ;;  %v9450_v39 = vld [vmem:[#allocation14_spill] sm:$0xff] }
 0x4a2   :  { %v6261_v48 = vcombine.low %v6252_v21, %v6259_v7 }
 0x4a3   :  { %v6496_v58 = vsel %vm6495_vm9, %v6494_v15, %v6489_v45  ;;  %v6268_v1 = vrot.slane %v6260_v40, %v7999_v19  ;;  %v6539_v40 = vrot.slane %v6330_v17, %v9450_v39 }
 0x4a4   :  { %v6315_v38 = vpop.permute.xlu1 %6314  ;;  %v6503_v57 = vsel %vm6502_vm10, %v6501_v13, %v6496_v58  ;;  %v6275_v46 = vrot.slane %v6261_v48, %v7999_v19  ;;  %v9451_v13 = vld [vmem:[#allocation27_spill] sm:$0xff] }
 0x4a5   :  { %v6508_v31 = vrot.slane %v6315_v38, %v9225_v37  ;;  %v6348_v25 = vpop.permute.xlu0 %6347 }
 0x4a6   :  { %v6276_v36 = vcombine.low %v6268_v1, %v6275_v46 }
 0x4a7   :  { %v6510_v18 = vsel %vm6509_vm11, %v6508_v31, %v6503_v57 }
 0x4a8   :  { %6419 = vperm.xlu0 %7149, %v6276_v36   ;;  %v9239_v2 = vsel %vm6516_vm12, %v6515_v33, %v6510_v18  ;;  %v9241_v44 = vpop.permute.xlu1 %6320  ;;  %v6549_v33 = vrot.slane %v6336_v27, %v9451_v13 }
 0x4a9   :  { %v9255_v3 = vpop.permute.xlu0 %6353 }
 0x4ac   :  { %v6327_v61 = vpop.permute.xlu1 %6326 }
 0x4ad   :  { %v6378_v62 = vpop.permute.xlu0 %6377  ;;  %v6535_v12 = vrot.slane %v6327_v61, %v9448_v47 }
 0x4ae   :  { %v6618_v14 = vrot.slane %v6378_v62, %v9450_v39 }
 0x4af   :  { %v6540_v58 = vsel %vm6432_vm0, %v6539_v40, %v6535_v12 }
 0x4b0   :  { %v6333_v11 = vpop.permute.xlu1 %6332 }
 0x4b1   :  { %v6384_v32 = vpop.permute.xlu0 %6383  ;;  %v6544_v21 = vrot.slane %v6333_v11, %v9449_v20 }
 0x4b2   :  { %v6628_v48 = vrot.slane %v6384_v32, %v9451_v13 }
 0x4b3   :  { %v6545_v38 = vsel %vm6439_vm1, %v6544_v21, %v6540_v58 }
 0x4b4   :  { %v6339_v34 = vpop.permute.xlu1 %6338  ;;  %v6550_v61 = vsel %vm6446_vm2, %v6549_v33, %v6545_v38 }
 0x4b5   :  { %v6390_v51 = vpop.permute.xlu0 %6389  ;;  %v6554_v57 = vrot.slane %v6339_v34, %v9437_v56 }
 0x4b6   :  { %v6638_v36 = vrot.slane %v6390_v51, %v9440_v59 }
 0x4b7   :  { %v6555_v17 = vsel %vm6453_vm3, %v6554_v57, %v6550_v61 }
 0x4b8   :  { %v6345_v50 = vpop.permute.xlu1 %6344 }
 0x4b9   :  { %v6396_v0 = vpop.permute.xlu0 %6395  ;;  %v6564_v62 = vrot.slane %v6345_v50, %v9162_v42  ;;  %v6569_v50 = vrot.slane %v6348_v25, %v9176_v54 }
 0x4ba   :  { %v6648_v34 = vrot.slane %v6396_v0, %v9176_v54 }
 0x4bc   :  { %v9245_v23 = vpop.permute.xlu1 %6350 }
 0x4bd   :  { %v6399_v43 = vpop.permute.xlu0 %6398 }
 0x4c0   :  { %v9247_v35 = vpop.permute.xlu1 %6356 }
 0x4c1   :  { %v6402_v45 = vpop.permute.xlu0 %6401  ;;  %v6584_v39 = vrot.slane %v9247_v35, %v9215_v4 }
 0x4c2   :  { %v6658_v0 = vrot.slane %v6402_v45, %v9191_v28 }
 0x4c4   :  { %v9249_v22 = vpop.permute.xlu1 %6359 }
 0x4c5   :  { %v6405_v18 = vpop.permute.xlu0 %6404  ;;  %v6589_v54 = vrot.slane %v9249_v22, %v9212_v41 }
 0x4c8   :  { %v9251_v30 = vpop.permute.xlu1 %6362 }
 0x4c9   :  { %v6594_v25 = vrot.slane %v9251_v30, %v9225_v37 }
 0x4cc   :  { %v9253_v53 = vpop.permute.xlu1 %6365 }
 0x4cd   :  { %v6599_v35 = vrot.slane %v9253_v53, %v9229_v8 }
 0x4d0   :  { %v9257_v24 = vpop.permute.xlu1 %6368 }
 0x4d4   :  { %v6375_v60 = vpop.permute.xlu1 %6374 }
 0x4d5   :  { %v6614_v5 = vrot.slane %v6375_v60, %v9448_v47  ;;  %v6408_v60 = vpop.permute.xlu0 %6407  ;;  %v6518_v47 = vadd.s32 4294967184, %v9446_v6 }
 0x4d6   :  { %v6668_v30 = vrot.slane %v6408_v60, %v9212_v41 }
 0x4d7   :  { %v6619_v63 = vsel %vm6432_vm0, %v6618_v14, %v6614_v5 }
 0x4d8   :  { %v6381_v9 = vpop.permute.xlu1 %6380 }
 0x4d9   :  { %v6623_v49 = vrot.slane %v6381_v9, %v9449_v20  ;;  %v6653_v9 = vrot.slane %v6399_v43, %v9197_v55  ;;  %v6521_v20 = vsub.s32 %v6518_v47, %v9447_v52  ;;  %v6411_v43 = vpop.permute.xlu0 %6410 }
 0x4da   :  { %v6673_v40 = vrot.slane %v6411_v43, %v9225_v37 }
 0x4db   :  { %v6624_v7 = vsel %vm6439_vm1, %v6623_v49, %v6619_v63  ;;  %v6604_v22 = vrot.slane %v9257_v24, %v6521_v20 }
 0x4dc   :  { %v6387_v16 = vpop.permute.xlu1 %6386  ;;  %v6629_v1 = vsel %vm6446_vm2, %v6628_v48, %v6624_v7 }
 0x4dd   :  { %v6633_v15 = vrot.slane %v6387_v16, %v9437_v56  ;;  %v6559_v56 = vrot.slane %v6342_v29, %v9440_v59  ;;  %v6525_v29 = vadd.s32 4294967176, %v9446_v6 }
 0x4df   :  { %v6634_v46 = vsel %vm6453_vm3, %v6633_v15, %v6629_v1  ;;  %v6560_v27 = vsel %vm6460_vm4, %v6559_v56, %v6555_v17  ;;  %v6528_v12 = vsub.s32 %v6525_v29, %v9447_v52 }
 0x4e0   :  { %v6393_v26 = vpop.permute.xlu1 %6392  ;;  %v6639_v11 = vsel %vm6460_vm4, %v6638_v36, %v6634_v46  ;;  %v6565_v5 = vsel %vm6467_vm5, %v6564_v62, %v6560_v27 }
 0x4e1   :  { %v6643_v31 = vrot.slane %v6393_v26, %v9162_v42  ;;  %v6574_v42 = vrot.slane %v9245_v23, %v9197_v55  ;;  %v6570_v16 = vsel %vm6474_vm6, %v6569_v50, %v6565_v5  ;;  %v6579_v55 = vrot.slane %v9255_v3, %v9191_v28 }
 0x4e2   :  { %v6663_v23 = vrot.slane %v6405_v18, %v9215_v4  ;;  %v6522_v28 = vrot.slane %v9241_v44, %v6521_v20  ;;  %v6529_v41 = vrot.slane %v9243_v10, %v6528_v12  ;;  %v9452_v18 = vlaneseq }
 0x4e3   :  { %v6644_v32 = vsel %vm6467_vm5, %v6643_v31, %v6639_v11  ;;  %v6575_v49 = vsel %vm6481_vm7, %v6574_v42, %v6570_v16 }
 0x4e4   :  { %v6649_v51 = vsel %vm6474_vm6, %v6648_v34, %v6644_v32  ;;  %v6372_v14 = vpop.permute.xlu1 %6371  ;;  %v6580_v63 = vsel %vm6488_vm8, %v6579_v55, %v6575_v49  ;;  %v6524_v24 = vsel %vm6523_vm13, %v6522_v28, %v9239_v2  ;;  %vm6716_vm15 = vcmp.lt.s32.totalorder %v9452_v18, 384 }
 0x4e5   :  { %v6654_v59 = vsel %vm6481_vm7, %v6653_v9, %v6649_v51  ;;  %v6585_v3 = vsel %vm6495_vm9, %v6584_v39, %v6580_v63  ;;  %v6609_v52 = vrot.slane %v6372_v14, %v6528_v12  ;;  %v6531_v1 = vsel %vm6530_vm14, %v6529_v41, %v6524_v24 }
 0x4e6   :  { %v6659_v6 = vsel %vm6488_vm8, %v6658_v0, %v6654_v59  ;;  %v6590_v21 = vsel %vm6502_vm10, %v6589_v54, %v6585_v3 }
 0x4e7   :  { %v6664_v45 = vsel %vm6495_vm9, %v6663_v23, %v6659_v6  ;;  %v6595_v7 = vsel %vm6509_vm11, %v6594_v25, %v6590_v21 }
 0x4e8   :  { %v6600_v15 = vsel %vm6516_vm12, %v6599_v35, %v6595_v7  ;;  %v6669_v53 = vsel %vm6502_vm10, %v6668_v30, %v6664_v45  ;;  %v6417_v26 = vpop.permute.xlu1 %6416 }
 0x4e9   :  { %v6605_v13 = vsel %vm6523_vm13, %v6604_v22, %v6600_v15  ;;  %v6674_v58 = vsel %vm6509_vm11, %v6673_v40, %v6669_v53  ;;  %v6683_v46 = vrot.slane %v6417_v26, %v6521_v20 }
 0x4ea   :  { %v6610_v48 = vsel %vm6530_vm14, %v6609_v52, %v6605_v13 }
 0x4eb   :  { %v6690_v57 = vcombine.low %v6531_v1, %v6610_v48 }
 0x4ed   :  { %v6697_v37 = vrot.slane %v6690_v57, %v7999_v19 }
 0x4ee   :  { %v6414_v4 = vpop.permute.xlu0 %6413 }
 0x4ef   :  { %v6678_v44 = vrot.slane %v6414_v4, %v9229_v8 }
 0x4f1   :  { %v6679_v38 = vsel %vm6516_vm12, %v6678_v44, %v6674_v58 }
 0x4f2   :  { %v6684_v2 = vsel %vm6523_vm13, %v6683_v46, %v6679_v38 }
 0x527   :  { %v6420_v8 = vpop.permute.xlu0 %6419 }
 0x528   :  { %v6688_v31 = vrot.slane %v6420_v8, %v6528_v12 }
 0x52a   :  { %v6689_v33 = vsel %vm6530_vm14, %v6688_v31, %v6684_v2 }
 0x52b   :  { %v6704_v36 = vrot.slane %v6689_v33, %v7999_v19 }
 0x52d   :  { %v6705_v10 = vcombine.low %v6697_v37, %v6704_v36 }
 0x52f   :  { %v6712_v61 = vrot.slane %v6705_v10, %v7999_v19 }
 0x531   :  { %6718 = vst.msk [vmem:[#allocation9] sm:$0x7] %vm6716_vm15, %v6712_v61 }
 0x532   :  { %7486 = shalt.err (!%p7483_p0)
}
 0x533   :  { %s7487_s30 = scalar_lea.hbm %s9353_s7, 48 }
 0x534   :  { %p7488_p1 = scmp.ne.s32.totalorder %s9353_s7, %s7487_s30  ;;  %p7491_p2 = scmp.lt.u32.totalorder %s7487_s30, %s9353_s7 }
 0x536   :  { %p7493_p3 = pnand %p7491_p2, %p7488_p1 }
 0x538   :  { %7496 = shalt.err (!%p7493_p3)
}
 0x539   :  { %6728 = dma.vmem_to_hbm [thread:$0]  %s6726_s25, 48, %s9353_s7, [#allocation5]  }
 0x53a   :  { %7501 = dma.done.wait [#allocation5], 48  }
 0x53b   :  { %7502 = vsyncadd [#allocation5], 4294967248 }
 0x53c   :  { %6732 = vsyncpa [#allocation4], 1 }
 0x53d   :  { %6733 = vsyncpa [#allocation7], 1 }
 0x53e   :  { %6734 = vsyncpa [#allocation5], 1 }

</bundles_post_ra>
